<compile_context>
chip_gen: v5e
topology: v5e:2x2
jax: 0.10.0
libtpu: 0.0.40
codegen_flags: <defaults>
</compile_context>

<pallas_src>
import functools

import jax
import jax.numpy as jnp
from jax.experimental import pallas as pl
from jax.experimental.pallas import tpu as pltpu


def _round_up(x, m):
    return ((x + m - 1) // m) * m


# ----------------------------------------------------------------------------
# Kernel 1: conv1 as fused (bf16 matmul -> f32 bias add -> ReLU).
# BN1 scale is folded into the weights; only a per-channel bias is added.
# ----------------------------------------------------------------------------
def _conv1_kernel(x_ref, w_ref, b_ref, o_ref):
    acc = jnp.dot(x_ref[...], w_ref[...], preferred_element_type=jnp.float32)
    o_ref[...] = jnp.maximum(acc + b_ref[...], 0.0).astype(o_ref.dtype)


def _conv1_call(p1_bf16, w_bf16, bias_f32, *, tm):
    M, K = p1_bf16.shape
    Kw, N = w_bf16.shape
    assert K == Kw and M % tm == 0
    flops = 2 * M * K * N
    bytes_accessed = (M * K + K * N + M * N) * 2 + N * 4
    return pl.pallas_call(
        _conv1_kernel,
        out_shape=jax.ShapeDtypeStruct((M, N), jnp.bfloat16),
        grid=(M // tm,),
        in_specs=[
            pl.BlockSpec((tm, K), lambda i: (i, 0)),
            pl.BlockSpec((K, N), lambda i: (0, 0)),
            pl.BlockSpec((1, N), lambda i: (0, 0)),
        ],
        out_specs=pl.BlockSpec((tm, N), lambda i: (i, 0)),
        compiler_params=pltpu.CompilerParams(
            dimension_semantics=("parallel",)),
        cost_estimate=pl.CostEstimate(flops=flops, transcendentals=0,
                                      bytes_accessed=bytes_accessed),
    )(p1_bf16, w_bf16, bias_f32)


# ----------------------------------------------------------------------------
# Kernel 2: conv2 + bn2 + ReLU + conv3 + bn3 + ReLU + fc1 + ReLU + head.
#
# Layouts (all built so every in-kernel slice is a contiguous row slab):
#   p2s   : (8*B, 5*19*32)   rows (h, b),  cols (kh, x, ci)   -- conv2 lhs
#   w2t   : (3040, 512)      width-Toeplitz conv2 weight -> cols (w, c)
#   a2_sc : (8*B, 512)       rows (h, b),  cols (w, c)        -- VMEM scratch
#   w3t   : (5, 512, 256)    per-kh width-Toeplitz conv3 weight -> (ow, c)
#   a3_sc : (4*B, 256)       rows (oh, b), cols (ow, c)       -- VMEM scratch
#   w1p   : (4, 256, 512)    fc1 weight permuted to (oh, (ow, c), f)
# ----------------------------------------------------------------------------
def _tail_kernel(p2s_ref, w2t_ref, b2t_ref, w3t_ref, b3t_ref,
                 w1p_ref, b1_ref, wh_ref, bh_ref, o_ref,
                 a2_sc, a3_sc, *, batch):
    # conv2 (BN folded, Toeplitz along width) + ReLU; a2 kept in VMEM scratch.
    a2 = jnp.dot(p2s_ref[...], w2t_ref[...], preferred_element_type=jnp.float32)
    a2_sc[...] = jnp.maximum(a2 + b2t_ref[...], 0.0).astype(jnp.bfloat16)

    # conv3: 5 contiguous row-slab slice-dots (one per kernel row kh) against
    # banded weights; output rows are (oh, b), columns (ow, c).
    acc3 = jnp.zeros((4 * batch, 256), jnp.float32)
    for kh in range(5):
        acc3 = acc3 + jnp.dot(a2_sc[kh * batch:(kh + 4) * batch, :],
                              w3t_ref[kh],
                              preferred_element_type=jnp.float32)
    a3_sc[...] = jnp.maximum(acc3 + b3t_ref[...], 0.0).astype(jnp.bfloat16)

    # fc1: 4 dots (one per conv3 output row oh), K=256 each; weight rows were
    # pre-permuted so PyTorch's NCHW flatten (c*16 + oh*4 + ow) is reproduced.
    acc = jnp.zeros((batch, w1p_ref.shape[2]), jnp.float32)
    for oh in range(4):
        acc = acc + jnp.dot(a3_sc[oh * batch:(oh + 1) * batch, :],
                            w1p_ref[oh],
                            preferred_element_type=jnp.float32)
    h = jnp.maximum(acc + b1_ref[...], 0.0).astype(jnp.bfloat16)

    # head epilogue (N padded to 128 lanes at prep; sliced off outside).
    o_ref[...] = (jnp.dot(h, wh_ref[...], preferred_element_type=jnp.float32)
                  + bh_ref[...])


def _tail_call(p2s, w2t, b2t, w3t, b3t, w1p, b1f, whp, bhp, *, batch):
    M2, K2 = p2s.shape                 # (8B, 3040)
    N2 = w2t.shape[1]                  # 512  = (w=8, c=64)
    N3 = w3t.shape[2]                  # 256  = (ow=4, c=64)
    NF = w1p.shape[2]                  # 512
    NH = whp.shape[1]                  # 128  (num_action padded)
    flops = 2 * (M2 * K2 * N2 + 5 * (4 * batch) * N2 * N3
                 + 4 * batch * N3 * NF + batch * NF * NH)
    bytes_accessed = ((M2 * K2 + K2 * N2 + 5 * N2 * N3 + 4 * N3 * NF + NF * NH) * 2
                      + (N2 + N3 + NF + NH + batch * NH) * 4)
    kernel = functools.partial(_tail_kernel, batch=batch)
    return pl.pallas_call(
        kernel,
        out_shape=jax.ShapeDtypeStruct((batch, NH), jnp.float32),
        grid=(1,),
        in_specs=[
            pl.BlockSpec((M2, K2), lambda i: (0, 0)),
            pl.BlockSpec((K2, N2), lambda i: (0, 0)),
            pl.BlockSpec((1, N2), lambda i: (0, 0)),
            pl.BlockSpec((5, N2, N3), lambda i: (0, 0, 0)),
            pl.BlockSpec((1, N3), lambda i: (0, 0)),
            pl.BlockSpec((4, N3, NF), lambda i: (0, 0, 0)),
            pl.BlockSpec((1, NF), lambda i: (0, 0)),
            pl.BlockSpec((NF, NH), lambda i: (0, 0)),
            pl.BlockSpec((1, NH), lambda i: (0, 0)),
        ],
        out_specs=pl.BlockSpec((batch, NH), lambda i: (0, 0)),
        scratch_shapes=[pltpu.VMEM((M2, N2), jnp.bfloat16),
                        pltpu.VMEM((4 * batch, N3), jnp.bfloat16)],
        compiler_params=pltpu.CompilerParams(
            dimension_semantics=("arbitrary",),
            vmem_limit_bytes=32 * 1024 * 1024),
        cost_estimate=pl.CostEstimate(flops=flops, transcendentals=0,
                                      bytes_accessed=bytes_accessed),
    )(p2s, w2t, b2t, w3t, b3t, w1p, b1f, whp, bhp)


# ----------------------------------------------------------------------------
# XLA glue: im2col patch extraction for conv1 only (small strided gathers).
# ----------------------------------------------------------------------------
def _im2col(x_nhwc, k, s):
    B, H, W, C = x_nhwc.shape
    OH = (H - k) // s + 1
    OW = (W - k) // s + 1
    cols = []
    for i in range(k):
        for j in range(k):
            cols.append(x_nhwc[:, i:i + s * OH:s, j:j + s * OW:s, :])
    patches = jnp.stack(cols, axis=3)          # (B, OH, OW, k*k, C)
    return patches, OH, OW


# ----------------------------------------------------------------------------
# Parameters (PyTorch-shaped) and one-time weight preparation.
# ----------------------------------------------------------------------------
def init_params(num_action, key):
    ks = jax.random.split(key, 10)

    def w(k, shape, scale=0.05):
        return (scale * jax.random.normal(k, shape)).astype(jnp.float32)

    def bn(cout):
        # gamma=1, beta=0, running_mean=0, running_var=1 (PyTorch defaults).
        return (jnp.ones((cout,), jnp.float32),
                jnp.zeros((cout,), jnp.float32),
                jnp.zeros((cout,), jnp.float32),
                jnp.ones((cout,), jnp.float32))

    return {
        "conv1": (w(ks[0], (32, 1, 8, 8)), w(ks[1], (32,)), *bn(32)),
        "conv2": (w(ks[2], (64, 32, 5, 5)), w(ks[3], (64,)), *bn(64)),
        "conv3": (w(ks[4], (64, 64, 5, 5)), w(ks[5], (64,)), *bn(64)),
        "fc1": (w(ks[6], (512, 64 * 4 * 4)), w(ks[7], (512,))),
        "head": (w(ks[8], (num_action, 512)), w(ks[9], (num_action,))),
    }


def prepare_params(params, num_action, eps=1e-5):
    """Fold eval-mode BN, build Toeplitz/permuted weights, cast once."""
    def fold(w_oihw, conv_b, gamma, beta, mean, var):
        scale = gamma / jnp.sqrt(var + eps)
        w = jnp.transpose(w_oihw, (2, 3, 1, 0)) * scale   # (kh, kw, cin, cout)
        bias = (conv_b - mean) * scale + beta
        return w, bias

    # conv1: plain im2col-matmul weight (64, 32), bias (1, 32). No channel pad.
    w1, b1 = fold(*params["conv1"])
    w1m = w1.reshape(8 * 8 * 1, 32).astype(jnp.bfloat16)
    b1m = b1.astype(jnp.float32)[None, :]

    # conv2: width-Toeplitz weight  [(kh, x, ci) -> (w, c)],  x = 2*w + kw.
    w2, b2 = fold(*params["conv2"])                        # (5, 5, 32, 64)
    W2T = jnp.zeros((5, 19, 32, 8, 64), jnp.float32)
    for w_out in range(8):
        for kw in range(5):
            W2T = W2T.at[:, 2 * w_out + kw, :, w_out, :].set(w2[:, kw, :, :])
    W2T = W2T.reshape(5 * 19 * 32, 8 * 64).astype(jnp.bfloat16)
    b2t = jnp.tile(b2, 8).astype(jnp.float32)[None, :]     # (1, 512), (w, c)

    # conv3: per-kh width-Toeplitz weights [(w, ci) -> (ow, c)], w = ow + kw.
    w3, b3 = fold(*params["conv3"])                        # (5, 5, 64, 64)
    W3T = jnp.zeros((5, 8, 64, 4, 64), jnp.float32)
    for ow in range(4):
        for kw in range(5):
            W3T = W3T.at[:, ow + kw, :, ow, :].set(w3[:, kw, :, :])
    W3T = W3T.reshape(5, 8 * 64, 4 * 64).astype(jnp.bfloat16)
    b3t = jnp.tile(b3, 4).astype(jnp.float32)[None, :]     # (1, 256), (ow, c)

    # fc1: permute rows to (oh, (ow, c)) to match the in-kernel a3 layout;
    # PyTorch NCHW flatten index = c*16 + oh*4 + ow.
    w_fc1, b_fc1 = params["fc1"]                           # (512, 1024)
    nf = w_fc1.shape[0]
    w1p = jnp.transpose(w_fc1.reshape(nf, 64, 4, 4), (2, 3, 1, 0))  # (oh,ow,c,f)
    w1p = w1p.reshape(4, 4 * 64, nf).astype(jnp.bfloat16)
    b1f = b_fc1.astype(jnp.float32)[None, :]

    # head: transpose + pad N to 128 lanes (sliced off outside).
    wh, bh = params["head"]
    assert num_action <= 128
    whp = jnp.pad(wh.T, ((0, 0), (0, 128 - num_action))).astype(jnp.bfloat16)
    bhp = jnp.pad(bh, (0, 128 - num_action)).astype(jnp.float32)[None, :]

    return {"conv1": (w1m, b1m), "conv2": (W2T, b2t), "conv3": (W3T, b3t),
            "fc1": (w1p, b1f), "head": (whp, bhp)}


# ----------------------------------------------------------------------------
# Full forward pass (eval-mode BN semantics).
# ----------------------------------------------------------------------------
def qnetwork_forward(x_nchw, prepped, num_action):
    B = x_nchw.shape[0]
    x = jnp.transpose(x_nchw.astype(jnp.float32), (0, 2, 3, 1))      # NHWC

    # conv1 + bn1 + relu: 2 balanced parallel M-tiles (v7x megacore friendly).
    p1, oh1, ow1 = _im2col(x, 8, 4)                                  # (B,19,19,64,1)
    m1 = B * oh1 * ow1
    p1 = p1.reshape(m1, 8 * 8 * 1).astype(jnp.bfloat16)
    m1p = _round_up(m1, 32)
    tm = m1p // 2
    if m1p != m1:
        p1 = jnp.pad(p1, ((0, m1p - m1), (0, 0)))
    w1m, b1m = prepped["conv1"]
    a1 = _conv1_call(p1, w1m, b1m, tm=tm)                            # (m1p, 32) bf16
    a1 = a1[:m1].reshape(B, oh1, ow1, 32)

    # conv2 row-slab gather: p2s rows (h, b), cols (kh, x, ci).  This is the
    # only XLA glue between the two kernels.
    slabs = jnp.stack([a1[:, kh:kh + 15:2, :, :] for kh in range(5)], axis=2)
    p2s = jnp.transpose(slabs, (1, 0, 2, 3, 4))                      # (8,B,5,19,32)
    p2s = p2s.reshape(8 * B, 5 * 19 * 32).astype(jnp.bfloat16)

    # conv2+bn2+relu + conv3+bn3+relu + fc1+relu + head, fused in one kernel.
    w2t, b2t = prepped["conv2"]
    w3t, b3t = prepped["conv3"]
    w1p, b1f = prepped["fc1"]
    whp, bhp = prepped["head"]
    q = _tail_call(p2s, w2t, b2t, w3t, b3t, w1p, b1f, whp, bhp, batch=B)
    return q[:, :num_action]


# ----------------------------------------------------------------------------
# Pure-JAX reference (f32) for a correctness check.
# ----------------------------------------------------------------------------
def reference_forward(x_nchw, params, eps=1e-5):
    def conv_bn_relu(x, p, stride):
        w, b, gamma, beta, mean, var = p
        y = jax.lax.conv_general_dilated(
            x, w, window_strides=(stride, stride), padding="VALID",
            dimension_numbers=("NCHW", "OIHW", "NCHW"))
        y = y + b[None, :, None, None]
        y = (y - mean[None, :, None, None]) / jnp.sqrt(
            var[None, :, None, None] + eps)
        y = y * gamma[None, :, None, None] + beta[None, :, None, None]
        return jnp.maximum(y, 0.0)

    x = conv_bn_relu(x_nchw, params["conv1"], 4)
    x = conv_bn_relu(x, params["conv2"], 2)
    x = conv_bn_relu(x, params["conv3"], 1)
    x = x.reshape(x.shape[0], -1)
    w1, b1 = params["fc1"]
    wh, bh = params["head"]
    x = jnp.maximum(x @ w1.T + b1, 0.0)
    return x @ wh.T + bh


if __name__ == "__main__":
    num_action = 6
    key = jax.random.PRNGKey(0)
    k_params, k_input = jax.random.split(key)

    params = init_params(num_action, k_params)
    prepped = prepare_params(params, num_action)

    # fc1 expects 64*4*4 features -> input spatial must be 80x80, 1 channel.
    x = jax.random.normal(k_input, (2, 1, 80, 80), dtype=jnp.float32)

    fwd = jax.jit(functools.partial(qnetwork_forward, num_action=num_action))
    q = fwd(x, prepped)
    q = jax.block_until_ready(q)
    assert q.shape == (2, num_action), q.shape
    assert bool(jnp.all(jnp.isfinite(q)))

    q_ref = jax.jit(reference_forward)(x, params)
    err = float(jnp.max(jnp.abs(q - q_ref)))
    assert err < 1e-1, f"max abs error vs reference: {err}"

    print("KERNEL_OK")
</pallas_src>

<mosaic_0001>
module attributes {stable_mosaic.version = 11 : i64} {
  func.func @_conv1_kernel(%arg0: i32, %arg1: memref<368x64xbf16, #tpu.memory_space<vmem>>, %arg2: memref<64x32xbf16, #tpu.memory_space<vmem>>, %arg3: memref<1x32xf32, #tpu.memory_space<vmem>>, %arg4: memref<368x32xbf16, #tpu.memory_space<vmem>>) attributes {dimension_semantics = [#tpu.dimension_semantics<parallel>], iteration_bounds = array<i64: 2>, scalar_prefetch = 0 : i64, scratch_operands = 0 : i64, tpu.core_type = #tpu.core_type<tc>, window_params = [{transform_indices = @transform_0, window_bounds = array<i64: 368, 64>}, {pipeline_mode = #tpu.pipeline_mode<synchronous>, transform_indices = @transform_1, window_bounds = array<i64: 64, 32>}, {pipeline_mode = #tpu.pipeline_mode<synchronous>, transform_indices = @transform_2, window_bounds = array<i64: 1, 32>}, {transform_indices = @transform_3, window_bounds = array<i64: 368, 32>}]} {
    %c0 = arith.constant 0 : index
    %c0_0 = arith.constant 0 : index
    %0 = vector.load %arg1[%c0, %c0_0] : memref<368x64xbf16, #tpu.memory_space<vmem>>, vector<368x64xbf16>
    %c0_1 = arith.constant 0 : index
    %c0_2 = arith.constant 0 : index
    %1 = vector.load %arg2[%c0_1, %c0_2] : memref<64x32xbf16, #tpu.memory_space<vmem>>, vector<64x32xbf16>
    %cst = arith.constant dense<0.000000e+00> : vector<368x32xf32>
    %2 = tpu.matmul %0, %1, %cst {dimension_numbers = #tpu.dot_dimension_numbers<[1], [0], [0], [1], [0, 0, 1, 1], [], []>} : vector<368x64xbf16>, vector<64x32xbf16>, vector<368x32xf32> -> vector<368x32xf32>
    %c0_3 = arith.constant 0 : index
    %c0_4 = arith.constant 0 : index
    %3 = vector.load %arg3[%c0_3, %c0_4] : memref<1x32xf32, #tpu.memory_space<vmem>>, vector<1x32xf32>
    %4 = vector.broadcast %3 : vector<1x32xf32> to vector<368x32xf32>
    %5 = arith.addf %2, %4 : vector<368x32xf32>
    %cst_5 = arith.constant 0.000000e+00 : f32
    %6 = vector.broadcast %cst_5 : f32 to vector<368x32xf32>
    %7 = arith.maximumf %5, %6 : vector<368x32xf32>
    %8 = arith.truncf %7 : vector<368x32xf32> to vector<368x32xbf16>
    %c0_6 = arith.constant 0 : index
    %c0_7 = arith.constant 0 : index
    %9 = vector.load %arg4[%c0_6, %c0_7] : memref<368x32xbf16, #tpu.memory_space<vmem>>, vector<368x32xbf16>
    tpu.vector_store %arg4[%c0_6, %c0_7], %8 {strides = array<i32>} : memref<368x32xbf16, #tpu.memory_space<vmem>>, vector<368x32xbf16>,
    return
  }
  func.func @transform_0(%arg0: i32) -> (i32, i32) {
    %c0_i32 = arith.constant 0 : i32
    %c0_i32_0 = arith.constant 0 : i32
    return %arg0, %c0_i32 : i32, i32
  }
  func.func @transform_1(%arg0: i32) -> (i32, i32) {
    %c0_i32 = arith.constant 0 : i32
    %c0_i32_0 = arith.constant 0 : i32
    %c0_i32_1 = arith.constant 0 : i32
    return %c0_i32, %c0_i32_0 : i32, i32
  }
  func.func @transform_2(%arg0: i32) -> (i32, i32) {
    %c0_i32 = arith.constant 0 : i32
    %c0_i32_0 = arith.constant 0 : i32
    %c0_i32_1 = arith.constant 0 : i32
    return %c0_i32, %c0_i32_0 : i32, i32
  }
  func.func @transform_3(%arg0: i32) -> (i32, i32) {
    %c0_i32 = arith.constant 0 : i32
    %c0_i32_0 = arith.constant 0 : i32
    return %arg0, %c0_i32 : i32, i32
  }
}

module attributes {stable_mosaic.version = 11 : i64} {
  func.func @_tail_kernel(%arg0: i32, %arg1: memref<16x3040xbf16, #tpu.memory_space<vmem>>, %arg2: memref<3040x512xbf16, #tpu.memory_space<vmem>>, %arg3: memref<1x512xf32, #tpu.memory_space<vmem>>, %arg4: memref<5x512x256xbf16, #tpu.memory_space<vmem>>, %arg5: memref<1x256xf32, #tpu.memory_space<vmem>>, %arg6: memref<4x256x512xbf16, #tpu.memory_space<vmem>>, %arg7: memref<1x512xf32, #tpu.memory_space<vmem>>, %arg8: memref<512x128xbf16, #tpu.memory_space<vmem>>, %arg9: memref<1x128xf32, #tpu.memory_space<vmem>>, %arg10: memref<2x128xf32, #tpu.memory_space<vmem>>, %arg11: memref<16x512xbf16, #tpu.memory_space<vmem>>, %arg12: memref<8x256xbf16, #tpu.memory_space<vmem>>) attributes {dimension_semantics = [#tpu.dimension_semantics<arbitrary>], iteration_bounds = array<i64: 1>, scalar_prefetch = 0 : i64, scratch_operands = 2 : i64, tpu.core_type = #tpu.core_type<tc>, window_params = [{pipeline_mode = #tpu.pipeline_mode<synchronous>, transform_indices = @transform_0, window_bounds = array<i64: 16, 3040>}, {pipeline_mode = #tpu.pipeline_mode<synchronous>, transform_indices = @transform_1, window_bounds = array<i64: 3040, 512>}, {pipeline_mode = #tpu.pipeline_mode<synchronous>, transform_indices = @transform_2, window_bounds = array<i64: 1, 512>}, {pipeline_mode = #tpu.pipeline_mode<synchronous>, transform_indices = @transform_3, window_bounds = array<i64: 5, 512, 256>}, {pipeline_mode = #tpu.pipeline_mode<synchronous>, transform_indices = @transform_4, window_bounds = array<i64: 1, 256>}, {pipeline_mode = #tpu.pipeline_mode<synchronous>, transform_indices = @transform_5, window_bounds = array<i64: 4, 256, 512>}, {pipeline_mode = #tpu.pipeline_mode<synchronous>, transform_indices = @transform_6, window_bounds = array<i64: 1, 512>}, {pipeline_mode = #tpu.pipeline_mode<synchronous>, transform_indices = @transform_7, window_bounds = array<i64: 512, 128>}, {pipeline_mode = #tpu.pipeline_mode<synchronous>, transform_indices = @transform_8, window_bounds = array<i64: 1, 128>}, {pipeline_mode = #tpu.pipeline_mode<synchronous>, transform_indices = @transform_9, window_bounds = array<i64: 2, 128>}]} {
    %c0 = arith.constant 0 : index
    %c0_0 = arith.constant 0 : index
    %0 = vector.load %arg1[%c0, %c0_0] : memref<16x3040xbf16, #tpu.memory_space<vmem>>, vector<16x3040xbf16>
    %c0_1 = arith.constant 0 : index
    %c0_2 = arith.constant 0 : index
    %1 = vector.load %arg2[%c0_1, %c0_2] : memref<3040x512xbf16, #tpu.memory_space<vmem>>, vector<3040x512xbf16>
    %cst = arith.constant dense<0.000000e+00> : vector<16x512xf32>
    %2 = tpu.matmul %0, %1, %cst {dimension_numbers = #tpu.dot_dimension_numbers<[1], [0], [0], [1], [0, 0, 1, 1], [], []>} : vector<16x3040xbf16>, vector<3040x512xbf16>, vector<16x512xf32> -> vector<16x512xf32>
    %c0_3 = arith.constant 0 : index
    %c0_4 = arith.constant 0 : index
    %3 = vector.load %arg3[%c0_3, %c0_4] : memref<1x512xf32, #tpu.memory_space<vmem>>, vector<1x512xf32>
    %4 = vector.broadcast %3 : vector<1x512xf32> to vector<16x512xf32>
    %5 = arith.addf %2, %4 : vector<16x512xf32>
    %cst_5 = arith.constant 0.000000e+00 : f32
    %6 = vector.broadcast %cst_5 : f32 to vector<16x512xf32>
    %7 = arith.maximumf %5, %6 : vector<16x512xf32>
    %8 = arith.truncf %7 : vector<16x512xf32> to vector<16x512xbf16>
    %c0_6 = arith.constant 0 : index
    %c0_7 = arith.constant 0 : index
    %9 = vector.load %arg11[%c0_6, %c0_7] : memref<16x512xbf16, #tpu.memory_space<vmem>>, vector<16x512xbf16>
    tpu.vector_store %arg11[%c0_6, %c0_7], %8 {strides = array<i32>} : memref<16x512xbf16, #tpu.memory_space<vmem>>, vector<16x512xbf16>,
    %cst_8 = arith.constant 0.000000e+00 : f32
    %10 = vector.broadcast %cst_8 : f32 to vector<8x256xf32>
    %c0_9 = arith.constant 0 : index
    %c0_10 = arith.constant 0 : index
    %11 = vector.load %arg11[%c0_9, %c0_10] : memref<16x512xbf16, #tpu.memory_space<vmem>>, vector<8x512xbf16>
    %c0_11 = arith.constant 0 : index
    %c0_12 = arith.constant 0 : index
    %c0_13 = arith.constant 0 : index
    %12 = vector.load %arg4[%c0_11, %c0_12, %c0_13] : memref<5x512x256xbf16, #tpu.memory_space<vmem>>, vector<1x512x256xbf16>
    %13 = vector.shape_cast %12 : vector<1x512x256xbf16> to vector<512x256xbf16>
    %cst_14 = arith.constant dense<0.000000e+00> : vector<8x256xf32>
    %14 = tpu.matmul %11, %13, %cst_14 {dimension_numbers = #tpu.dot_dimension_numbers<[1], [0], [0], [1], [0, 0, 1, 1], [], []>} : vector<8x512xbf16>, vector<512x256xbf16>, vector<8x256xf32> -> vector<8x256xf32>
    %15 = arith.addf %10, %14 : vector<8x256xf32>
    %c2 = arith.constant 2 : index
    %c0_15 = arith.constant 0 : index
    %16 = vector.load %arg11[%c2, %c0_15] : memref<16x512xbf16, #tpu.memory_space<vmem>>, vector<8x512xbf16>
    %c1 = arith.constant 1 : index
    %c0_16 = arith.constant 0 : index
    %c0_17 = arith.constant 0 : index
    %17 = vector.load %arg4[%c1, %c0_16, %c0_17] : memref<5x512x256xbf16, #tpu.memory_space<vmem>>, vector<1x512x256xbf16>
    %18 = vector.shape_cast %17 : vector<1x512x256xbf16> to vector<512x256xbf16>
    %cst_18 = arith.constant dense<0.000000e+00> : vector<8x256xf32>
    %19 = tpu.matmul %16, %18, %cst_18 {dimension_numbers = #tpu.dot_dimension_numbers<[1], [0], [0], [1], [0, 0, 1, 1], [], []>} : vector<8x512xbf16>, vector<512x256xbf16>, vector<8x256xf32> -> vector<8x256xf32>
    %20 = arith.addf %15, %19 : vector<8x256xf32>
    %c4 = arith.constant 4 : index
    %c0_19 = arith.constant 0 : index
    %21 = vector.load %arg11[%c4, %c0_19] : memref<16x512xbf16, #tpu.memory_space<vmem>>, vector<8x512xbf16>
    %c2_20 = arith.constant 2 : index
    %c0_21 = arith.constant 0 : index
    %c0_22 = arith.constant 0 : index
    %22 = vector.load %arg4[%c2_20, %c0_21, %c0_22] : memref<5x512x256xbf16, #tpu.memory_space<vmem>>, vector<1x512x256xbf16>
    %23 = vector.shape_cast %22 : vector<1x512x256xbf16> to vector<512x256xbf16>
    %cst_23 = arith.constant dense<0.000000e+00> : vector<8x256xf32>
    %24 = tpu.matmul %21, %23, %cst_23 {dimension_numbers = #tpu.dot_dimension_numbers<[1], [0], [0], [1], [0, 0, 1, 1], [], []>} : vector<8x512xbf16>, vector<512x256xbf16>, vector<8x256xf32> -> vector<8x256xf32>
    %25 = arith.addf %20, %24 : vector<8x256xf32>
    %c6 = arith.constant 6 : index
    %c0_24 = arith.constant 0 : index
    %26 = vector.load %arg11[%c6, %c0_24] : memref<16x512xbf16, #tpu.memory_space<vmem>>, vector<8x512xbf16>
    %c3 = arith.constant 3 : index
    %c0_25 = arith.constant 0 : index
    %c0_26 = arith.constant 0 : index
    %27 = vector.load %arg4[%c3, %c0_25, %c0_26] : memref<5x512x256xbf16, #tpu.memory_space<vmem>>, vector<1x512x256xbf16>
    %28 = vector.shape_cast %27 : vector<1x512x256xbf16> to vector<512x256xbf16>
    %cst_27 = arith.constant dense<0.000000e+00> : vector<8x256xf32>
    %29 = tpu.matmul %26, %28, %cst_27 {dimension_numbers = #tpu.dot_dimension_numbers<[1], [0], [0], [1], [0, 0, 1, 1], [], []>} : vector<8x512xbf16>, vector<512x256xbf16>, vector<8x256xf32> -> vector<8x256xf32>
    %30 = arith.addf %25, %29 : vector<8x256xf32>
    %c8 = arith.constant 8 : index
    %c0_28 = arith.constant 0 : index
    %31 = vector.load %arg11[%c8, %c0_28] : memref<16x512xbf16, #tpu.memory_space<vmem>>, vector<8x512xbf16>
    %c4_29 = arith.constant 4 : index
    %c0_30 = arith.constant 0 : index
    %c0_31 = arith.constant 0 : index
    %32 = vector.load %arg4[%c4_29, %c0_30, %c0_31] : memref<5x512x256xbf16, #tpu.memory_space<vmem>>, vector<1x512x256xbf16>
    %33 = vector.shape_cast %32 : vector<1x512x256xbf16> to vector<512x256xbf16>
    %cst_32 = arith.constant dense<0.000000e+00> : vector<8x256xf32>
    %34 = tpu.matmul %31, %33, %cst_32 {dimension_numbers = #tpu.dot_dimension_numbers<[1], [0], [0], [1], [0, 0, 1, 1], [], []>} : vector<8x512xbf16>, vector<512x256xbf16>, vector<8x256xf32> -> vector<8x256xf32>
    %35 = arith.addf %30, %34 : vector<8x256xf32>
    %c0_33 = arith.constant 0 : index
    %c0_34 = arith.constant 0 : index
    %36 = vector.load %arg5[%c0_33, %c0_34] : memref<1x256xf32, #tpu.memory_space<vmem>>, vector<1x256xf32>
    %37 = vector.broadcast %36 : vector<1x256xf32> to vector<8x256xf32>
    %38 = arith.addf %35, %37 : vector<8x256xf32>
    %cst_35 = arith.constant 0.000000e+00 : f32
    %39 = vector.broadcast %cst_35 : f32 to vector<8x256xf32>
    %40 = arith.maximumf %38, %39 : vector<8x256xf32>
    %41 = arith.truncf %40 : vector<8x256xf32> to vector<8x256xbf16>
    %c0_36 = arith.constant 0 : index
    %c0_37 = arith.constant 0 : index
    %42 = vector.load %arg12[%c0_36, %c0_37] : memref<8x256xbf16, #tpu.memory_space<vmem>>, vector<8x256xbf16>
    tpu.vector_store %arg12[%c0_36, %c0_37], %41 {strides = array<i32>} : memref<8x256xbf16, #tpu.memory_space<vmem>>, vector<8x256xbf16>,
    %cst_38 = arith.constant 0.000000e+00 : f32
    %43 = vector.broadcast %cst_38 : f32 to vector<2x512xf32>
    %c0_39 = arith.constant 0 : index
    %c0_40 = arith.constant 0 : index
    %44 = vector.load %arg12[%c0_39, %c0_40] : memref<8x256xbf16, #tpu.memory_space<vmem>>, vector<2x256xbf16>
    %c0_41 = arith.constant 0 : index
    %c0_42 = arith.constant 0 : index
    %c0_43 = arith.constant 0 : index
    %45 = vector.load %arg6[%c0_41, %c0_42, %c0_43] : memref<4x256x512xbf16, #tpu.memory_space<vmem>>, vector<1x256x512xbf16>
    %46 = vector.shape_cast %45 : vector<1x256x512xbf16> to vector<256x512xbf16>
    %cst_44 = arith.constant dense<0.000000e+00> : vector<2x512xf32>
    %47 = tpu.matmul %44, %46, %cst_44 {dimension_numbers = #tpu.dot_dimension_numbers<[1], [0], [0], [1], [0, 0, 1, 1], [], []>} : vector<2x256xbf16>, vector<256x512xbf16>, vector<2x512xf32> -> vector<2x512xf32>
    %48 = arith.addf %43, %47 : vector<2x512xf32>
    %c2_45 = arith.constant 2 : index
    %c0_46 = arith.constant 0 : index
    %49 = vector.load %arg12[%c2_45, %c0_46] : memref<8x256xbf16, #tpu.memory_space<vmem>>, vector<2x256xbf16>
    %c1_47 = arith.constant 1 : index
    %c0_48 = arith.constant 0 : index
    %c0_49 = arith.constant 0 : index
    %50 = vector.load %arg6[%c1_47, %c0_48, %c0_49] : memref<4x256x512xbf16, #tpu.memory_space<vmem>>, vector<1x256x512xbf16>
    %51 = vector.shape_cast %50 : vector<1x256x512xbf16> to vector<256x512xbf16>
    %cst_50 = arith.constant dense<0.000000e+00> : vector<2x512xf32>
    %52 = tpu.matmul %49, %51, %cst_50 {dimension_numbers = #tpu.dot_dimension_numbers<[1], [0], [0], [1], [0, 0, 1, 1], [], []>} : vector<2x256xbf16>, vector<256x512xbf16>, vector<2x512xf32> -> vector<2x512xf32>
    %53 = arith.addf %48, %52 : vector<2x512xf32>
    %c4_51 = arith.constant 4 : index
    %c0_52 = arith.constant 0 : index
    %54 = vector.load %arg12[%c4_51, %c0_52] : memref<8x256xbf16, #tpu.memory_space<vmem>>, vector<2x256xbf16>
    %c2_53 = arith.constant 2 : index
    %c0_54 = arith.constant 0 : index
    %c0_55 = arith.constant 0 : index
    %55 = vector.load %arg6[%c2_53, %c0_54, %c0_55] : memref<4x256x512xbf16, #tpu.memory_space<vmem>>, vector<1x256x512xbf16>
    %56 = vector.shape_cast %55 : vector<1x256x512xbf16> to vector<256x512xbf16>
    %cst_56 = arith.constant dense<0.000000e+00> : vector<2x512xf32>
    %57 = tpu.matmul %54, %56, %cst_56 {dimension_numbers = #tpu.dot_dimension_numbers<[1], [0], [0], [1], [0, 0, 1, 1], [], []>} : vector<2x256xbf16>, vector<256x512xbf16>, vector<2x512xf32> -> vector<2x512xf32>
    %58 = arith.addf %53, %57 : vector<2x512xf32>
    %c6_57 = arith.constant 6 : index
    %c0_58 = arith.constant 0 : index
    %59 = vector.load %arg12[%c6_57, %c0_58] : memref<8x256xbf16, #tpu.memory_space<vmem>>, vector<2x256xbf16>
    %c3_59 = arith.constant 3 : index
    %c0_60 = arith.constant 0 : index
    %c0_61 = arith.constant 0 : index
    %60 = vector.load %arg6[%c3_59, %c0_60, %c0_61] : memref<4x256x512xbf16, #tpu.memory_space<vmem>>, vector<1x256x512xbf16>
    %61 = vector.shape_cast %60 : vector<1x256x512xbf16> to vector<256x512xbf16>
    %cst_62 = arith.constant dense<0.000000e+00> : vector<2x512xf32>
    %62 = tpu.matmul %59, %61, %cst_62 {dimension_numbers = #tpu.dot_dimension_numbers<[1], [0], [0], [1], [0, 0, 1, 1], [], []>} : vector<2x256xbf16>, vector<256x512xbf16>, vector<2x512xf32> -> vector<2x512xf32>
    %63 = arith.addf %58, %62 : vector<2x512xf32>
    %c0_63 = arith.constant 0 : index
    %c0_64 = arith.constant 0 : index
    %64 = vector.load %arg7[%c0_63, %c0_64] : memref<1x512xf32, #tpu.memory_space<vmem>>, vector<1x512xf32>
    %65 = vector.broadcast %64 : vector<1x512xf32> to vector<2x512xf32>
    %66 = arith.addf %63, %65 : vector<2x512xf32>
    %cst_65 = arith.constant 0.000000e+00 : f32
    %67 = vector.broadcast %cst_65 : f32 to vector<2x512xf32>
    %68 = arith.maximumf %66, %67 : vector<2x512xf32>
    %69 = arith.truncf %68 : vector<2x512xf32> to vector<2x512xbf16>
    %c0_66 = arith.constant 0 : index
    %c0_67 = arith.constant 0 : index
    %70 = vector.load %arg8[%c0_66, %c0_67] : memref<512x128xbf16, #tpu.memory_space<vmem>>, vector<512x128xbf16>
    %cst_68 = arith.constant dense<0.000000e+00> : vector<2x128xf32>
    %71 = tpu.matmul %69, %70, %cst_68 {dimension_numbers = #tpu.dot_dimension_numbers<[1], [0], [0], [1], [0, 0, 1, 1], [], []>} : vector<2x512xbf16>, vector<512x128xbf16>, vector<2x128xf32> -> vector<2x128xf32>
    %c0_69 = arith.constant 0 : index
    %c0_70 = arith.constant 0 : index
    %72 = vector.load %arg9[%c0_69, %c0_70] : memref<1x128xf32, #tpu.memory_space<vmem>>, vector<1x128xf32>
    %73 = vector.broadcast %72 : vector<1x128xf32> to vector<2x128xf32>
    %74 = arith.addf %71, %73 : vector<2x128xf32>
    %c0_71 = arith.constant 0 : index
    %c0_72 = arith.constant 0 : index
    %75 = vector.load %arg10[%c0_71, %c0_72] : memref<2x128xf32, #tpu.memory_space<vmem>>, vector<2x128xf32>
    tpu.vector_store %arg10[%c0_71, %c0_72], %74 {strides = array<i32>} : memref<2x128xf32, #tpu.memory_space<vmem>>, vector<2x128xf32>,
    return
  }
  func.func @transform_0(%arg0: i32) -> (i32, i32) {
    %c0_i32 = arith.constant 0 : i32
    %c0_i32_0 = arith.constant 0 : i32
    %c0_i32_1 = arith.constant 0 : i32
    return %c0_i32, %c0_i32_0 : i32, i32
  }
  func.func @transform_1(%arg0: i32) -> (i32, i32) {
    %c0_i32 = arith.constant 0 : i32
    %c0_i32_0 = arith.constant 0 : i32
    %c0_i32_1 = arith.constant 0 : i32
    return %c0_i32, %c0_i32_0 : i32, i32
  }
  func.func @transform_2(%arg0: i32) -> (i32, i32) {
    %c0_i32 = arith.constant 0 : i32
    %c0_i32_0 = arith.constant 0 : i32
    %c0_i32_1 = arith.constant 0 : i32
    return %c0_i32, %c0_i32_0 : i32, i32
  }
  func.func @transform_3(%arg0: i32) -> (i32, i32, i32) {
    %c0_i32 = arith.constant 0 : i32
    %c0_i32_0 = arith.constant 0 : i32
    %c0_i32_1 = arith.constant 0 : i32
    %c0_i32_2 = arith.constant 0 : i32
    return %c0_i32, %c0_i32_0, %c0_i32_1 : i32, i32, i32
  }
  func.func @transform_4(%arg0: i32) -> (i32, i32) {
    %c0_i32 = arith.constant 0 : i32
    %c0_i32_0 = arith.constant 0 : i32
    %c0_i32_1 = arith.constant 0 : i32
    return %c0_i32, %c0_i32_0 : i32, i32
  }
  func.func @transform_5(%arg0: i32) -> (i32, i32, i32) {
    %c0_i32 = arith.constant 0 : i32
    %c0_i32_0 = arith.constant 0 : i32
    %c0_i32_1 = arith.constant 0 : i32
    %c0_i32_2 = arith.constant 0 : i32
    return %c0_i32, %c0_i32_0, %c0_i32_1 : i32, i32, i32
  }
  func.func @transform_6(%arg0: i32) -> (i32, i32) {
    %c0_i32 = arith.constant 0 : i32
    %c0_i32_0 = arith.constant 0 : i32
    %c0_i32_1 = arith.constant 0 : i32
    return %c0_i32, %c0_i32_0 : i32, i32
  }
  func.func @transform_7(%arg0: i32) -> (i32, i32) {
    %c0_i32 = arith.constant 0 : i32
    %c0_i32_0 = arith.constant 0 : i32
    %c0_i32_1 = arith.constant 0 : i32
    return %c0_i32, %c0_i32_0 : i32, i32
  }
  func.func @transform_8(%arg0: i32) -> (i32, i32) {
    %c0_i32 = arith.constant 0 : i32
    %c0_i32_0 = arith.constant 0 : i32
    %c0_i32_1 = arith.constant 0 : i32
    return %c0_i32, %c0_i32_0 : i32, i32
  }
  func.func @transform_9(%arg0: i32) -> (i32, i32) {
    %c0_i32 = arith.constant 0 : i32
    %c0_i32_0 = arith.constant 0 : i32
    %c0_i32_1 = arith.constant 0 : i32
    return %c0_i32, %c0_i32_0 : i32, i32
  }
}

</mosaic_0001>

<bundles_post_ra>
// kernel: qnetwork_forward.2
= control target key start
LH: loop header
LB: loop body
LE: loop exit
PB: predicated region body
PF: predicated region fallthrough
CT: control target
= control target key end

     0   :  { %s977_s12 = smov 0   ;;  %s1206_s0 = inlined_call_operand.vmem [shape: bf16[736,64], index: 0, kind: input, shape index: {}]   ;;  %s1207_s1 = inlined_call_operand.vmem [shape: bf16[64,32], index: 1, kind: input, shape index: {}]   ;;  %s1208_s2 = inlined_call_operand.vmem [shape: f32[1,32], index: 2, kind: input, shape index: {}]   ;;  %s1209_s3 = inlined_call_operand.vmem [shape: bf16[736,32], index: 3, kind: output, shape index: {}]  }
   0x1 LB: > { %s761_s13 = sadd.s32 4294967295, %s955_s12   ;;  %p765_p0 = scmp.ge.s32.totalorder %s955_s12, 1  ;;  %s955_s12 = sphi %s977_s12, %s13_s12  }
   0x2   : > { %p138_p1 = scmp.lt.s32.totalorder %s955_s12, 3 }
   0x4   : > { %p139_p2 = pnand %p765_p0, %p138_p1 }
   0x5   : > { %s162_s16 = smul.u32 (!%p139_p2), 46, %s761_s13 }
   0x6   : > { %142 = sbr.rel (%p139_p2) target bundleno = 255 (0xff), region = 32 }
   0x7   : > { %p163_p3 = scmp.lt.s32.totalorder (!%p139_p2), %s162_s16, 91 }
   0xb   : > { %v927_v0 = vld [vmem:[%s1207_s1 + $0x18] sm:$0xff]  ;;  %v926_v1 = vld [vmem:[%s1207_s1 + $0x10] sm:$0xff]  ;;  %s1211_s16 = smov (!%p163_p3, %s162_s16), 91  ;;  %v925_v2 = vld [vmem:[%s1207_s1 + $0x8] sm:$0xff]  ;;  %vm372_vm0 = vcmask 523264   ;;  %vm658_vm1 = vcmask 257024  }
   0xc   : > { %446 = vmatpush.bf16.msra.mxu0 %v927_v0  ;;  %928 = vmatpush.bf16.msra.mxu1 %v927_v0  ;;  %s766_s21 = sshll.u32 %s1211_s16, 2  ;;  %v924_v3 = vld [vmem:[%s1207_s1] sm:$0xff] }
   0xd   : > { %929 = vmatpush.bf16.msra.mxu2 %v927_v0  ;;  %930 = vmatpush.bf16.msra.mxu3 %v927_v0  ;;  %s1005_s26 = scalar_lea.vmem %s1206_s0, %s766_s21  ;;  %v1056_v27 = vld [vmem:[%s1208_s2] ss:$0 sm:$0xff]  ;;  %s1065_s4 = scalar_lea.vmem %s1209_s3, %s766_s21 }
   0xe   : > { %v901_v4 = vld [vmem:[%s1005_s26] sm:$0xff]  ;;  %v907_v5 = vld [vmem:[%s1005_s26 + $0x30] sm:$0xff]  ;;  %v902_v8 = vld [vmem:[%s1005_s26 + $0x8] sm:$0xff] }
   0xf   : > { %v913_v6 = vld [vmem:[%s1005_s26 + $0x60] sm:$0xff]  ;;  %v919_v7 = vld [vmem:[%s1005_s26 + $0x90] sm:$0xff]  ;;  %v908_v9 = vld [vmem:[%s1005_s26 + $0x38] sm:$0xff] }
  0x10   : > { %447 = vmatpush.bf16.msra.mxu0 %v926_v1  ;;  %931 = vmatpush.bf16.msra.mxu1 %v926_v1  ;;  %v914_v10 = vld [vmem:[%s1005_s26 + $0x68] sm:$0xff]  ;;  %v920_v11 = vld [vmem:[%s1005_s26 + $0x98] sm:$0xff]  ;;  %v903_v12 = vld [vmem:[%s1005_s26 + $0x10] sm:$0xff] }
  0x11   : > { %932 = vmatpush.bf16.msra.mxu2 %v926_v1  ;;  %933 = vmatpush.bf16.msra.mxu3 %v926_v1  ;;  %v909_v13 = vld [vmem:[%s1005_s26 + $0x40] sm:$0xff]  ;;  %v915_v14 = vld [vmem:[%s1005_s26 + $0x70] sm:$0xff]  ;;  %v904_v16 = vld [vmem:[%s1005_s26 + $0x18] sm:$0xff] }
  0x12   : > { %v921_v15 = vld [vmem:[%s1005_s26 + $0xa0] sm:$0xff]  ;;  %v910_v17 = vld [vmem:[%s1005_s26 + $0x48] sm:$0xff]  ;;  %v916_v18 = vld [vmem:[%s1005_s26 + $0x78] sm:$0xff] }
  0x13   : > { %v922_v19 = vld [vmem:[%s1005_s26 + $0xa8] sm:$0xff]  ;;  %v905_v20 = vld [vmem:[%s1005_s26 + $0x20] sm:$0xff]  ;;  %v911_v21 = vld [vmem:[%s1005_s26 + $0x50] sm:$0xff] }
  0x14   : > { %448 = vmatpush.bf16.msra.mxu0 %v925_v2  ;;  %934 = vmatpush.bf16.msra.mxu1 %v925_v2  ;;  %v917_v22 = vld [vmem:[%s1005_s26 + $0x80] sm:$0xff]  ;;  %v923_v23 = vld [vmem:[%s1005_s26 + $0xb0] sm:$0xff]  ;;  %v906_v24 = vld [vmem:[%s1005_s26 + $0x28] sm:$0xff] }
  0x15   : > { %935 = vmatpush.bf16.msra.mxu2 %v925_v2  ;;  %936 = vmatpush.bf16.msra.mxu3 %v925_v2  ;;  %v912_v25 = vld [vmem:[%s1005_s26 + $0x58] sm:$0xff]  ;;  %v918_v26 = vld [vmem:[%s1005_s26 + $0x88] sm:$0xff] }
  0x18   : > { %449 = vmatpush.bf16.msra.mxu0 %v924_v3  ;;  %937 = vmatpush.bf16.msra.mxu1 %v924_v3 }
  0x19   : > { %938 = vmatpush.bf16.msra.mxu2 %v924_v3  ;;  %939 = vmatpush.bf16.msra.mxu3 %v924_v3 }
  0x1b   : > { %876 = vmatmul.msk.bf16.vlgmr.msra.gmra.mxu0 %vm372_vm0, %v901_v4  ;;  %882 = vmatmul.msk.bf16.vlgmr.msra.gmra.mxu1 %vm372_vm0, %v907_v5 }
  0x1c   : > { %888 = vmatmul.msk.bf16.vlgmr.msra.gmra.mxu2 %vm372_vm0, %v913_v6  ;;  %894 = vmatmul.msk.bf16.vlgmr.msra.gmra.mxu3 %vm372_vm0, %v919_v7 }
  0x2b   : > { %877 = vmatmul.msk.bf16.gmra.mxu0 %vm372_vm0, %v902_v8  ;;  %883 = vmatmul.msk.bf16.gmra.mxu1 %vm372_vm0, %v908_v9 }
  0x2c   : > { %889 = vmatmul.msk.bf16.gmra.mxu2 %vm372_vm0, %v914_v10  ;;  %895 = vmatmul.msk.bf16.gmra.mxu3 %vm372_vm0, %v920_v11 }
  0x3b   : > { %878 = vmatmul.msk.bf16.gmra.mxu0 %vm372_vm0, %v903_v12  ;;  %884 = vmatmul.msk.bf16.gmra.mxu1 %vm372_vm0, %v909_v13 }
  0x3c   : > { %890 = vmatmul.msk.bf16.gmra.mxu2 %vm372_vm0, %v915_v14  ;;  %896 = vmatmul.msk.bf16.gmra.mxu3 %vm372_vm0, %v921_v15 }
  0x4b   : > { %879 = vmatmul.msk.bf16.gmra.mxu0 %vm372_vm0, %v904_v16  ;;  %885 = vmatmul.msk.bf16.gmra.mxu1 %vm372_vm0, %v910_v17 }
  0x4c   : > { %891 = vmatmul.msk.bf16.gmra.mxu2 %vm372_vm0, %v916_v18  ;;  %897 = vmatmul.msk.bf16.gmra.mxu3 %vm372_vm0, %v922_v19 }
  0x5b   : > { %880 = vmatmul.msk.bf16.gmra.mxu0 %vm372_vm0, %v905_v20  ;;  %886 = vmatmul.msk.bf16.gmra.mxu1 %vm372_vm0, %v911_v21 }
  0x5c   : > { %892 = vmatmul.msk.bf16.gmra.mxu2 %vm372_vm0, %v917_v22  ;;  %898 = vmatmul.msk.bf16.gmra.mxu3 %vm372_vm0, %v923_v23 }
  0x6b   : > { %881 = vmatmul.msk.bf16.gmra.mxu0 %vm372_vm0, %v906_v24  ;;  %887 = vmatmul.msk.bf16.gmra.mxu1 %vm372_vm0, %v912_v25 }
  0x6c   : > { %893 = vmatmul.msk.bf16.gmra.mxu2 %vm372_vm0, %v918_v26 }
  0x98   : > { %v451_v28 = vpop.f32.mrf.mxu0  ;;  %v481_v29 = vpop.f32.mrf.mxu1 }
  0x99   : > { %v452_v30 = vadd.f32 %v1056_v27, %v451_v28  ;;  %v482_v31 = vadd.f32 %v1056_v27, %v481_v29 }
  0x9b   : > { %v566_v32 = vmax.f32 %v452_v30, 0.0  ;;  %v578_v33 = vmax.f32 %v482_v31, 0.0 }
  0x9d   : > { %v612_v34 = vpack.c.bf16 %v566_v32, %v566_v32  ;;  %v624_v35 = vpack.c.bf16 %v578_v33, %v578_v33 }
  0x9f   : > { %659 = vst.msk [vmem:[%s1065_s4] sm:$0xf] %vm658_vm1, %v612_v34  ;;  %v511_v36 = vpop.f32.mrf.mxu2  ;;  %v541_v37 = vpop.f32.mrf.mxu3 }
  0xa0   : > { %671 = vst.msk [vmem:[%s1065_s4 + $0x30] sm:$0xf] %vm658_vm1, %v624_v35  ;;  %v512_v38 = vadd.f32 %v1056_v27, %v511_v36  ;;  %v453_v39 = vpop.f32.mrf.mxu0  ;;  %v483_v40 = vpop.f32.mrf.mxu1  ;;  %v542_v41 = vadd.f32 %v1056_v27, %v541_v37 }
  0xa1   : > { %v454_v42 = vadd.f32 %v1056_v27, %v453_v39  ;;  %v484_v43 = vadd.f32 %v1056_v27, %v483_v40 }
  0xa2   : > { %v590_v44 = vmax.f32 %v512_v38, 0.0  ;;  %v602_v45 = vmax.f32 %v542_v41, 0.0 }
  0xa3   : > { %v567_v46 = vmax.f32 %v454_v42, 0.0  ;;  %v579_v47 = vmax.f32 %v484_v43, 0.0 }
  0xa4   : > { %v636_v48 = vpack.c.bf16 %v590_v44, %v590_v44  ;;  %v648_v51 = vpack.c.bf16 %v602_v45, %v602_v45 }
  0xa5   : > { %v613_v49 = vpack.c.bf16 %v567_v46, %v567_v46  ;;  %v625_v50 = vpack.c.bf16 %v579_v47, %v579_v47 }
  0xa6   : > { %683 = vst.msk [vmem:[%s1065_s4 + $0x60] sm:$0xf] %vm658_vm1, %v636_v48 }
  0xa7   : > { %660 = vst.msk [vmem:[%s1065_s4 + $0x4] sm:$0xf] %vm658_vm1, %v613_v49  ;;  %v513_v52 = vpop.f32.mrf.mxu2  ;;  %v543_v53 = vpop.f32.mrf.mxu3 }
  0xa8   : > { %672 = vst.msk [vmem:[%s1065_s4 + $0x34] sm:$0xf] %vm658_vm1, %v625_v50  ;;  %v514_v54 = vadd.f32 %v1056_v27, %v513_v52  ;;  %v456_v55 = vpop.f32.mrf.mxu0  ;;  %v486_v56 = vpop.f32.mrf.mxu1  ;;  %v544_v57 = vadd.f32 %v1056_v27, %v543_v53 }
  0xa9   : > { %695 = vst.msk [vmem:[%s1065_s4 + $0x90] sm:$0xf] %vm658_vm1, %v648_v51  ;;  %v457_v58 = vadd.f32 %v1056_v27, %v456_v55  ;;  %v487_v59 = vadd.f32 %v1056_v27, %v486_v56 }
  0xaa   : > { %v591_v60 = vmax.f32 %v514_v54, 0.0  ;;  %v603_v61 = vmax.f32 %v544_v57, 0.0 }
  0xab   : > { %v568_v62 = vmax.f32 %v457_v58, 0.0  ;;  %v580_v63 = vmax.f32 %v487_v59, 0.0 }
  0xac   : > { %v637_v0 = vpack.c.bf16 %v591_v60, %v591_v60  ;;  %v649_v3 = vpack.c.bf16 %v603_v61, %v603_v61 }
  0xad   : > { %v614_v1 = vpack.c.bf16 %v568_v62, %v568_v62  ;;  %v626_v2 = vpack.c.bf16 %v580_v63, %v580_v63 }
  0xae   : > { %684 = vst.msk [vmem:[%s1065_s4 + $0x64] sm:$0xf] %vm658_vm1, %v637_v0 }
  0xaf   : > { %661 = vst.msk [vmem:[%s1065_s4 + $0x8] sm:$0xf] %vm658_vm1, %v614_v1  ;;  %v516_v4 = vpop.f32.mrf.mxu2  ;;  %v546_v5 = vpop.f32.mrf.mxu3 }
  0xb0   : > { %673 = vst.msk [vmem:[%s1065_s4 + $0x38] sm:$0xf] %vm658_vm1, %v626_v2  ;;  %v517_v6 = vadd.f32 %v1056_v27, %v516_v4  ;;  %v458_v7 = vpop.f32.mrf.mxu0  ;;  %v488_v8 = vpop.f32.mrf.mxu1  ;;  %v547_v9 = vadd.f32 %v1056_v27, %v546_v5 }
  0xb1   : > { %696 = vst.msk [vmem:[%s1065_s4 + $0x94] sm:$0xf] %vm658_vm1, %v649_v3  ;;  %v459_v10 = vadd.f32 %v1056_v27, %v458_v7  ;;  %v489_v11 = vadd.f32 %v1056_v27, %v488_v8 }
  0xb2   : > { %v592_v12 = vmax.f32 %v517_v6, 0.0  ;;  %v604_v13 = vmax.f32 %v547_v9, 0.0 }
  0xb3   : > { %v569_v14 = vmax.f32 %v459_v10, 0.0  ;;  %v581_v15 = vmax.f32 %v489_v11, 0.0 }
  0xb4   : > { %v638_v16 = vpack.c.bf16 %v592_v12, %v592_v12  ;;  %v650_v19 = vpack.c.bf16 %v604_v13, %v604_v13 }
  0xb5   : > { %v615_v17 = vpack.c.bf16 %v569_v14, %v569_v14  ;;  %v627_v18 = vpack.c.bf16 %v581_v15, %v581_v15 }
  0xb6   : > { %685 = vst.msk [vmem:[%s1065_s4 + $0x68] sm:$0xf] %vm658_vm1, %v638_v16 }
  0xb7   : > { %662 = vst.msk [vmem:[%s1065_s4 + $0xc] sm:$0xf] %vm658_vm1, %v615_v17  ;;  %v518_v20 = vpop.f32.mrf.mxu2  ;;  %v548_v21 = vpop.f32.mrf.mxu3 }
  0xb8   : > { %674 = vst.msk [vmem:[%s1065_s4 + $0x3c] sm:$0xf] %vm658_vm1, %v627_v18  ;;  %v519_v22 = vadd.f32 %v1056_v27, %v518_v20  ;;  %v461_v23 = vpop.f32.mrf.mxu0  ;;  %v491_v24 = vpop.f32.mrf.mxu1  ;;  %v549_v25 = vadd.f32 %v1056_v27, %v548_v21 }
  0xb9   : > { %697 = vst.msk [vmem:[%s1065_s4 + $0x98] sm:$0xf] %vm658_vm1, %v650_v19  ;;  %v462_v26 = vadd.f32 %v1056_v27, %v461_v23  ;;  %v492_v28 = vadd.f32 %v1056_v27, %v491_v24 }
  0xba   : > { %v593_v29 = vmax.f32 %v519_v22, 0.0  ;;  %v605_v30 = vmax.f32 %v549_v25, 0.0 }
  0xbb   : > { %v570_v31 = vmax.f32 %v462_v26, 0.0  ;;  %v582_v32 = vmax.f32 %v492_v28, 0.0 }
  0xbc   : > { %v639_v33 = vpack.c.bf16 %v593_v29, %v593_v29  ;;  %v651_v36 = vpack.c.bf16 %v605_v30, %v605_v30 }
  0xbd   : > { %v616_v34 = vpack.c.bf16 %v570_v31, %v570_v31  ;;  %v628_v35 = vpack.c.bf16 %v582_v32, %v582_v32 }
  0xbe   : > { %686 = vst.msk [vmem:[%s1065_s4 + $0x6c] sm:$0xf] %vm658_vm1, %v639_v33 }
  0xbf   : > { %663 = vst.msk [vmem:[%s1065_s4 + $0x10] sm:$0xf] %vm658_vm1, %v616_v34  ;;  %v521_v37 = vpop.f32.mrf.mxu2  ;;  %v551_v38 = vpop.f32.mrf.mxu3 }
  0xc0   : > { %675 = vst.msk [vmem:[%s1065_s4 + $0x40] sm:$0xf] %vm658_vm1, %v628_v35  ;;  %v522_v39 = vadd.f32 %v1056_v27, %v521_v37  ;;  %v463_v40 = vpop.f32.mrf.mxu0  ;;  %v493_v41 = vpop.f32.mrf.mxu1  ;;  %v552_v42 = vadd.f32 %v1056_v27, %v551_v38 }
  0xc1   : > { %698 = vst.msk [vmem:[%s1065_s4 + $0x9c] sm:$0xf] %vm658_vm1, %v651_v36  ;;  %v464_v43 = vadd.f32 %v1056_v27, %v463_v40  ;;  %v494_v44 = vadd.f32 %v1056_v27, %v493_v41 }
  0xc2   : > { %v594_v45 = vmax.f32 %v522_v39, 0.0  ;;  %v606_v46 = vmax.f32 %v552_v42, 0.0 }
  0xc3   : > { %v571_v47 = vmax.f32 %v464_v43, 0.0  ;;  %v583_v48 = vmax.f32 %v494_v44, 0.0 }
  0xc4   : > { %v640_v49 = vpack.c.bf16 %v594_v45, %v594_v45  ;;  %v652_v52 = vpack.c.bf16 %v606_v46, %v606_v46 }
  0xc5   : > { %v617_v50 = vpack.c.bf16 %v571_v47, %v571_v47  ;;  %v629_v51 = vpack.c.bf16 %v583_v48, %v583_v48 }
  0xc6   : > { %687 = vst.msk [vmem:[%s1065_s4 + $0x70] sm:$0xf] %vm658_vm1, %v640_v49 }
  0xc7   : > { %664 = vst.msk [vmem:[%s1065_s4 + $0x14] sm:$0xf] %vm658_vm1, %v617_v50  ;;  %v523_v53 = vpop.f32.mrf.mxu2  ;;  %v553_v54 = vpop.f32.mrf.mxu3 }
  0xc8   : > { %676 = vst.msk [vmem:[%s1065_s4 + $0x44] sm:$0xf] %vm658_vm1, %v629_v51  ;;  %v524_v55 = vadd.f32 %v1056_v27, %v523_v53  ;;  %v466_v56 = vpop.f32.mrf.mxu0  ;;  %v496_v57 = vpop.f32.mrf.mxu1  ;;  %v554_v58 = vadd.f32 %v1056_v27, %v553_v54 }
  0xc9   : > { %699 = vst.msk [vmem:[%s1065_s4 + $0xa0] sm:$0xf] %vm658_vm1, %v652_v52  ;;  %v467_v59 = vadd.f32 %v1056_v27, %v466_v56  ;;  %v497_v60 = vadd.f32 %v1056_v27, %v496_v57 }
  0xca   : > { %v595_v61 = vmax.f32 %v524_v55, 0.0  ;;  %v607_v62 = vmax.f32 %v554_v58, 0.0 }
  0xcb   : > { %v572_v63 = vmax.f32 %v467_v59, 0.0  ;;  %v584_v0 = vmax.f32 %v497_v60, 0.0 }
  0xcc   : > { %v641_v1 = vpack.c.bf16 %v595_v61, %v595_v61  ;;  %v653_v4 = vpack.c.bf16 %v607_v62, %v607_v62 }
  0xcd   : > { %v618_v2 = vpack.c.bf16 %v572_v63, %v572_v63  ;;  %v630_v3 = vpack.c.bf16 %v584_v0, %v584_v0 }
  0xce   : > { %688 = vst.msk [vmem:[%s1065_s4 + $0x74] sm:$0xf] %vm658_vm1, %v641_v1 }
  0xcf   : > { %665 = vst.msk [vmem:[%s1065_s4 + $0x18] sm:$0xf] %vm658_vm1, %v618_v2  ;;  %v526_v5 = vpop.f32.mrf.mxu2  ;;  %v556_v6 = vpop.f32.mrf.mxu3 }
  0xd0   : > { %677 = vst.msk [vmem:[%s1065_s4 + $0x48] sm:$0xf] %vm658_vm1, %v630_v3  ;;  %v527_v7 = vadd.f32 %v1056_v27, %v526_v5  ;;  %v468_v8 = vpop.f32.mrf.mxu0  ;;  %v498_v9 = vpop.f32.mrf.mxu1  ;;  %v557_v10 = vadd.f32 %v1056_v27, %v556_v6 }
  0xd1   : > { %700 = vst.msk [vmem:[%s1065_s4 + $0xa4] sm:$0xf] %vm658_vm1, %v653_v4  ;;  %v469_v11 = vadd.f32 %v1056_v27, %v468_v8  ;;  %v499_v12 = vadd.f32 %v1056_v27, %v498_v9 }
  0xd2   : > { %v596_v13 = vmax.f32 %v527_v7, 0.0  ;;  %v608_v14 = vmax.f32 %v557_v10, 0.0 }
  0xd3   : > { %v573_v15 = vmax.f32 %v469_v11, 0.0  ;;  %v585_v16 = vmax.f32 %v499_v12, 0.0 }
  0xd4   : > { %v642_v17 = vpack.c.bf16 %v596_v13, %v596_v13  ;;  %v654_v20 = vpack.c.bf16 %v608_v14, %v608_v14 }
  0xd5   : > { %v619_v18 = vpack.c.bf16 %v573_v15, %v573_v15  ;;  %v631_v19 = vpack.c.bf16 %v585_v16, %v585_v16 }
  0xd6   : > { %689 = vst.msk [vmem:[%s1065_s4 + $0x78] sm:$0xf] %vm658_vm1, %v642_v17 }
  0xd7   : > { %666 = vst.msk [vmem:[%s1065_s4 + $0x1c] sm:$0xf] %vm658_vm1, %v619_v18  ;;  %v528_v21 = vpop.f32.mrf.mxu2  ;;  %v558_v22 = vpop.f32.mrf.mxu3 }
  0xd8   : > { %678 = vst.msk [vmem:[%s1065_s4 + $0x4c] sm:$0xf] %vm658_vm1, %v631_v19  ;;  %v529_v23 = vadd.f32 %v1056_v27, %v528_v21  ;;  %v471_v24 = vpop.f32.mrf.mxu0  ;;  %v501_v25 = vpop.f32.mrf.mxu1  ;;  %v559_v26 = vadd.f32 %v1056_v27, %v558_v22 }
  0xd9   : > { %701 = vst.msk [vmem:[%s1065_s4 + $0xa8] sm:$0xf] %vm658_vm1, %v654_v20  ;;  %v472_v28 = vadd.f32 %v1056_v27, %v471_v24  ;;  %v502_v29 = vadd.f32 %v1056_v27, %v501_v25 }
  0xda   : > { %v597_v30 = vmax.f32 %v529_v23, 0.0  ;;  %v609_v31 = vmax.f32 %v559_v26, 0.0 }
  0xdb   : > { %v574_v32 = vmax.f32 %v472_v28, 0.0  ;;  %v586_v33 = vmax.f32 %v502_v29, 0.0 }
  0xdc   : > { %v643_v34 = vpack.c.bf16 %v597_v30, %v597_v30  ;;  %v655_v37 = vpack.c.bf16 %v609_v31, %v609_v31 }
  0xdd   : > { %v620_v35 = vpack.c.bf16 %v574_v32, %v574_v32  ;;  %v632_v36 = vpack.c.bf16 %v586_v33, %v586_v33 }
  0xde   : > { %690 = vst.msk [vmem:[%s1065_s4 + $0x7c] sm:$0xf] %vm658_vm1, %v643_v34 }
  0xdf   : > { %667 = vst.msk [vmem:[%s1065_s4 + $0x20] sm:$0xf] %vm658_vm1, %v620_v35  ;;  %v531_v38 = vpop.f32.mrf.mxu2  ;;  %v561_v39 = vpop.f32.mrf.mxu3 }
  0xe0   : > { %679 = vst.msk [vmem:[%s1065_s4 + $0x50] sm:$0xf] %vm658_vm1, %v632_v36  ;;  %v532_v40 = vadd.f32 %v1056_v27, %v531_v38  ;;  %v473_v41 = vpop.f32.mrf.mxu0  ;;  %v503_v42 = vpop.f32.mrf.mxu1  ;;  %v562_v43 = vadd.f32 %v1056_v27, %v561_v39 }
  0xe1   : > { %702 = vst.msk [vmem:[%s1065_s4 + $0xac] sm:$0xf] %vm658_vm1, %v655_v37  ;;  %v474_v44 = vadd.f32 %v1056_v27, %v473_v41  ;;  %v504_v45 = vadd.f32 %v1056_v27, %v503_v42 }
  0xe2   : > { %v598_v46 = vmax.f32 %v532_v40, 0.0  ;;  %v610_v47 = vmax.f32 %v562_v43, 0.0 }
  0xe3   : > { %v575_v48 = vmax.f32 %v474_v44, 0.0  ;;  %v587_v49 = vmax.f32 %v504_v45, 0.0 }
  0xe4   : > { %v644_v50 = vpack.c.bf16 %v598_v46, %v598_v46  ;;  %v656_v53 = vpack.c.bf16 %v610_v47, %v610_v47 }
  0xe5   : > { %v621_v51 = vpack.c.bf16 %v575_v48, %v575_v48  ;;  %v633_v52 = vpack.c.bf16 %v587_v49, %v587_v49 }
  0xe6   : > { %691 = vst.msk [vmem:[%s1065_s4 + $0x80] sm:$0xf] %vm658_vm1, %v644_v50 }
  0xe7   : > { %668 = vst.msk [vmem:[%s1065_s4 + $0x24] sm:$0xf] %vm658_vm1, %v621_v51  ;;  %v533_v54 = vpop.f32.mrf.mxu2  ;;  %v563_v55 = vpop.f32.mrf.mxu3 }
  0xe8   : > { %680 = vst.msk [vmem:[%s1065_s4 + $0x54] sm:$0xf] %vm658_vm1, %v633_v52  ;;  %v534_v56 = vadd.f32 %v1056_v27, %v533_v54  ;;  %v476_v57 = vpop.f32.mrf.mxu0  ;;  %v506_v58 = vpop.f32.mrf.mxu1  ;;  %v564_v59 = vadd.f32 %v1056_v27, %v563_v55 }
  0xe9   : > { %703 = vst.msk [vmem:[%s1065_s4 + $0xb0] sm:$0xf] %vm658_vm1, %v656_v53  ;;  %v477_v60 = vadd.f32 %v1056_v27, %v476_v57  ;;  %v507_v61 = vadd.f32 %v1056_v27, %v506_v58 }
  0xea   : > { %v599_v62 = vmax.f32 %v534_v56, 0.0  ;;  %v611_v63 = vmax.f32 %v564_v59, 0.0 }
  0xeb   : > { %v576_v0 = vmax.f32 %v477_v60, 0.0  ;;  %v588_v1 = vmax.f32 %v507_v61, 0.0 }
  0xec   : > { %v645_v2 = vpack.c.bf16 %v599_v62, %v599_v62  ;;  %v657_v5 = vpack.c.bf16 %v611_v63, %v611_v63 }
  0xed   : > { %v622_v3 = vpack.c.bf16 %v576_v0, %v576_v0  ;;  %v634_v4 = vpack.c.bf16 %v588_v1, %v588_v1 }
  0xee   : > { %692 = vst.msk [vmem:[%s1065_s4 + $0x84] sm:$0xf] %vm658_vm1, %v645_v2 }
  0xef   : > { %669 = vst.msk [vmem:[%s1065_s4 + $0x28] sm:$0xf] %vm658_vm1, %v622_v3  ;;  %v536_v6 = vpop.f32.mrf.mxu2 }
  0xf0   : > { %681 = vst.msk [vmem:[%s1065_s4 + $0x58] sm:$0xf] %vm658_vm1, %v634_v4  ;;  %v537_v7 = vadd.f32 %v1056_v27, %v536_v6  ;;  %v478_v8 = vpop.f32.mrf.mxu0  ;;  %v508_v9 = vpop.f32.mrf.mxu1 }
  0xf1   : > { %704 = vst.msk [vmem:[%s1065_s4 + $0xb4] sm:$0xf] %vm658_vm1, %v657_v5  ;;  %v479_v10 = vadd.f32 %v1056_v27, %v478_v8  ;;  %v509_v11 = vadd.f32 %v1056_v27, %v508_v9 }
  0xf2   : > { %v600_v12 = vmax.f32 %v537_v7, 0.0 }
  0xf3   : > { %v577_v13 = vmax.f32 %v479_v10, 0.0  ;;  %v589_v14 = vmax.f32 %v509_v11, 0.0 }
  0xf4   : > { %v646_v15 = vpack.c.bf16 %v600_v12, %v600_v12 }
  0xf5   : > { %v623_v16 = vpack.c.bf16 %v577_v13, %v577_v13  ;;  %v635_v17 = vpack.c.bf16 %v589_v14, %v589_v14 }
  0xf6   : > { %693 = vst.msk [vmem:[%s1065_s4 + $0x88] sm:$0xf] %vm658_vm1, %v646_v15 }
  0xf7   : > { %670 = vst.msk [vmem:[%s1065_s4 + $0x2c] sm:$0xf] %vm658_vm1, %v623_v16  ;;  %v538_v18 = vpop.f32.mrf.mxu2 }
  0xf8   : > { %682 = vst.msk [vmem:[%s1065_s4 + $0x5c] sm:$0xf] %vm658_vm1, %v635_v17  ;;  %v539_v19 = vadd.f32 %v1056_v27, %v538_v18 }
  0xfa   : > { %v601_v20 = vmax.f32 %v539_v19, 0.0 }
  0xfc   : > { %v647_v21 = vpack.c.bf16 %v601_v20, %v601_v20 }
  0xfe   : > { %694 = vst.msk [vmem:[%s1065_s4 + $0x8c] sm:$0xf] %vm658_vm1, %v647_v21 }
  0xff PF: > { %s13_s12 = sadd.s32 1, %s955_s12  }
 0x100   : > { %p10_p4 = scmp.ge.s32.totalorder %s13_s12, 4  }
 0x102   :  { %12 = sbr.rel (!%p10_p4) target bundleno = 1 (0x1), region = 62 }

// kernel: qnetwork_forward.3
= control target key start
LH: loop header
LB: loop body
LE: loop exit
PB: predicated region body
PF: predicated region fallthrough
CT: control target
= control target key end

     0   :  { %s27685_s0 = inlined_call_operand.vmem [shape: bf16[16,3040], index: 0, kind: input, shape index: {}]   ;;  %s27686_s1 = inlined_call_operand.vmem [shape: bf16[3040,512], index: 1, kind: input, shape index: {}]   ;;  %s27687_s2 = inlined_call_operand.vmem [shape: f32[1,512], index: 2, kind: input, shape index: {}]   ;;  %s27688_s3 = inlined_call_operand.vmem [shape: bf16[5,512,256], index: 3, kind: input, shape index: {}]   ;;  %s27689_s4 = inlined_call_operand.vmem [shape: f32[1,256], index: 4, kind: input, shape index: {}]   ;;  %s27690_s5 = inlined_call_operand.vmem [shape: bf16[4,256,512], index: 5, kind: input, shape index: {}]   ;;  %s27691_s6 = inlined_call_operand.vmem [shape: f32[1,512], index: 6, kind: input, shape index: {}]   ;;  %s27692_s7 = inlined_call_operand.vmem [shape: bf16[512,128], index: 7, kind: input, shape index: {}]   ;;  %s27693_s8 = inlined_call_operand.vmem [shape: f32[1,128], index: 8, kind: input, shape index: {}]   ;;  %s27694_s9 = inlined_call_operand.hbm [shape: f32[2,128], index: 9, kind: output, shape index: {}]  }
   0x1   :  { %v11251_v0 = vld [vmem:[%s27686_s1 + $0xe0] sm:$0xf]  ;;  %v17163_v1 = vld [vmem:[%s27686_s1 + $0xec] sm:$0xf0] }
   0x2   :  { %v11379_v2 = vld [vmem:[%s27686_s1 + $0x1e0] sm:$0xf]  ;;  %v11252_v3 = vor.u32 %v17163_v1, %v11251_v0  ;;  %v17195_v4 = vld [vmem:[%s27686_s1 + $0x1ec] sm:$0xf0] }
   0x3   :  { %v11507_v5 = vld [vmem:[%s27686_s1 + $0x2e0] sm:$0xf]  ;;  %v17227_v6 = vld [vmem:[%s27686_s1 + $0x2ec] sm:$0xf0]  ;;  %v11380_v7 = vor.u32 %v17195_v4, %v11379_v2 }
   0x4   :  { %v11508_v8 = vor.u32 %v17227_v6, %v11507_v5  ;;  %v11635_v9 = vld [vmem:[%s27686_s1 + $0x3e0] sm:$0xf]  ;;  %v17259_v10 = vld [vmem:[%s27686_s1 + $0x3ec] sm:$0xf0]  ;;  %4751 = vmatpush.bf16.msra.mxu0 %v11252_v3 }
   0x5   :  { %v11235_v11 = vld [vmem:[%s27686_s1 + $0xc0] sm:$0xf]  ;;  %v11636_v12 = vor.u32 %v17259_v10, %v11635_v9  ;;  %v17159_v13 = vld [vmem:[%s27686_s1 + $0xcc] sm:$0xf0]  ;;  %4765 = vmatpush.bf16.msra.mxu1 %v11380_v7 }
   0x6   :  { %v11363_v14 = vld [vmem:[%s27686_s1 + $0x1c0] sm:$0xf]  ;;  %v17191_v15 = vld [vmem:[%s27686_s1 + $0x1cc] sm:$0xf0]  ;;  %4779 = vmatpush.bf16.msra.mxu2 %v11508_v8  ;;  %v11236_v16 = vor.u32 %v17159_v13, %v11235_v11 }
   0x7   :  { %v11364_v17 = vor.u32 %v17191_v15, %v11363_v14  ;;  %v11491_v18 = vld [vmem:[%s27686_s1 + $0x2c0] sm:$0xf]  ;;  %v17223_v19 = vld [vmem:[%s27686_s1 + $0x2cc] sm:$0xf0]  ;;  %4793 = vmatpush.bf16.msra.mxu3 %v11636_v12 }
   0x8   :  { %v11619_v20 = vld [vmem:[%s27686_s1 + $0x3c0] sm:$0xf]  ;;  %v11492_v21 = vor.u32 %v17223_v19, %v11491_v18  ;;  %v17255_v22 = vld [vmem:[%s27686_s1 + $0x3cc] sm:$0xf0]  ;;  %4752 = vmatpush.bf16.msra.mxu0 %v11236_v16 }
   0x9   :  { %v11219_v23 = vld [vmem:[%s27686_s1 + $0xa0] sm:$0xf]  ;;  %v17155_v24 = vld [vmem:[%s27686_s1 + $0xac] sm:$0xf0]  ;;  %v11620_v25 = vor.u32 %v17255_v22, %v11619_v20  ;;  %4766 = vmatpush.bf16.msra.mxu1 %v11364_v17 }
   0xa   :  { %v11347_v26 = vld [vmem:[%s27686_s1 + $0x1a0] sm:$0xf]  ;;  %v17187_v27 = vld [vmem:[%s27686_s1 + $0x1ac] sm:$0xf0]  ;;  %v11220_v29 = vor.u32 %v17155_v24, %v11219_v23  ;;  %4780 = vmatpush.bf16.msra.mxu2 %v11492_v21 }
   0xb   :  { %v11475_v28 = vld [vmem:[%s27686_s1 + $0x2a0] sm:$0xf]  ;;  %v17219_v30 = vld [vmem:[%s27686_s1 + $0x2ac] sm:$0xf0]  ;;  %v11348_v33 = vor.u32 %v17187_v27, %v11347_v26  ;;  %4794 = vmatpush.bf16.msra.mxu3 %v11620_v25 }
   0xc   :  { %v11603_v31 = vld [vmem:[%s27686_s1 + $0x3a0] sm:$0xf]  ;;  %v17251_v32 = vld [vmem:[%s27686_s1 + $0x3ac] sm:$0xf0]  ;;  %v11476_v34 = vor.u32 %v17219_v30, %v11475_v28  ;;  %4753 = vmatpush.bf16.msra.mxu0 %v11220_v29 }
   0xd   :  { %v11203_v35 = vld [vmem:[%s27686_s1 + $0x80] sm:$0xf]  ;;  %v17151_v36 = vld [vmem:[%s27686_s1 + $0x8c] sm:$0xf0]  ;;  %v11604_v38 = vor.u32 %v17251_v32, %v11603_v31  ;;  %4767 = vmatpush.bf16.msra.mxu1 %v11348_v33 }
   0xe   :  { %v11331_v37 = vld [vmem:[%s27686_s1 + $0x180] sm:$0xf]  ;;  %v17183_v39 = vld [vmem:[%s27686_s1 + $0x18c] sm:$0xf0]  ;;  %v11204_v44 = vor.u32 %v17151_v36, %v11203_v35  ;;  %4781 = vmatpush.bf16.msra.mxu2 %v11476_v34 }
   0xf   :  { %v11459_v40 = vld [vmem:[%s27686_s1 + $0x280] sm:$0xf]  ;;  %v17215_v41 = vld [vmem:[%s27686_s1 + $0x28c] sm:$0xf0]  ;;  %v11332_v45 = vor.u32 %v17183_v39, %v11331_v37  ;;  %4795 = vmatpush.bf16.msra.mxu3 %v11604_v38 }
  0x10   :  { %v11587_v42 = vld [vmem:[%s27686_s1 + $0x380] sm:$0xf]  ;;  %v17247_v43 = vld [vmem:[%s27686_s1 + $0x38c] sm:$0xf0]  ;;  %v11460_v46 = vor.u32 %v17215_v41, %v11459_v40  ;;  %4754 = vmatpush.bf16.msra.mxu0 %v11204_v44 }
  0x11   :  { %v11187_v47 = vld [vmem:[%s27686_s1 + $0x60] sm:$0xf]  ;;  %v17147_v48 = vld [vmem:[%s27686_s1 + $0x6c] sm:$0xf0]  ;;  %v11588_v50 = vor.u32 %v17247_v43, %v11587_v42  ;;  %4768 = vmatpush.bf16.msra.mxu1 %v11332_v45 }
  0x12   :  { %v11315_v49 = vld [vmem:[%s27686_s1 + $0x160] sm:$0xf]  ;;  %v17179_v51 = vld [vmem:[%s27686_s1 + $0x16c] sm:$0xf0]  ;;  %v11188_v56 = vor.u32 %v17147_v48, %v11187_v47  ;;  %4782 = vmatpush.bf16.msra.mxu2 %v11460_v46 }
  0x13   :  { %v11443_v52 = vld [vmem:[%s27686_s1 + $0x260] sm:$0xf]  ;;  %v17211_v53 = vld [vmem:[%s27686_s1 + $0x26c] sm:$0xf0]  ;;  %v11316_v57 = vor.u32 %v17179_v51, %v11315_v49  ;;  %4796 = vmatpush.bf16.msra.mxu3 %v11588_v50 }
  0x14   :  { %v11571_v54 = vld [vmem:[%s27686_s1 + $0x360] sm:$0xf]  ;;  %v17243_v55 = vld [vmem:[%s27686_s1 + $0x36c] sm:$0xf0]  ;;  %v11444_v58 = vor.u32 %v17211_v53, %v11443_v52  ;;  %4755 = vmatpush.bf16.msra.mxu0 %v11188_v56 }
  0x15   :  { %v11171_v59 = vld [vmem:[%s27686_s1 + $0x40] sm:$0xf]  ;;  %v17143_v60 = vld [vmem:[%s27686_s1 + $0x4c] sm:$0xf0]  ;;  %v11572_v62 = vor.u32 %v17243_v55, %v11571_v54  ;;  %4769 = vmatpush.bf16.msra.mxu1 %v11316_v57  ;;  %v11051_v54 = vld [vmem:[%s27685_s0 + $0x8] sm:$0xf] }
  0x16   :  { %v11299_v61 = vld [vmem:[%s27686_s1 + $0x140] sm:$0xf]  ;;  %v17175_v63 = vld [vmem:[%s27686_s1 + $0x14c] sm:$0xf0]  ;;  %v11172_v4 = vor.u32 %v17143_v60, %v11171_v59  ;;  %4783 = vmatpush.bf16.msra.mxu2 %v11444_v58  ;;  %v17122_v59 = vld [vmem:[%s27685_s0 + $0x64] sm:$0xf0] }
  0x17   :  { %v11427_v0 = vld [vmem:[%s27686_s1 + $0x240] sm:$0xf]  ;;  %v17207_v1 = vld [vmem:[%s27686_s1 + $0x24c] sm:$0xf0]  ;;  %v11300_v5 = vor.u32 %v17175_v63, %v11299_v61  ;;  %4797 = vmatpush.bf16.msra.mxu3 %v11572_v62 }
  0x18   :  { %v11555_v2 = vld [vmem:[%s27686_s1 + $0x340] sm:$0xf]  ;;  %v17239_v3 = vld [vmem:[%s27686_s1 + $0x34c] sm:$0xf0]  ;;  %v11428_v6 = vor.u32 %v17207_v1, %v11427_v0  ;;  %4756 = vmatpush.bf16.msra.mxu0 %v11172_v4  ;;  %v18864_v1 = vor.u32 %v17122_v59, %v11051_v54 }
  0x19   :  { %v11155_v7 = vld [vmem:[%s27686_s1 + $0x20] sm:$0xf]  ;;  %v17139_v8 = vld [vmem:[%s27686_s1 + $0x2c] sm:$0xf0]  ;;  %v11556_v10 = vor.u32 %v17239_v3, %v11555_v2  ;;  %4770 = vmatpush.bf16.msra.mxu1 %v11300_v5 }
  0x1a   :  { %v11283_v9 = vld [vmem:[%s27686_s1 + $0x120] sm:$0xf]  ;;  %v17171_v11 = vld [vmem:[%s27686_s1 + $0x12c] sm:$0xf0]  ;;  %v11156_v16 = vor.u32 %v17139_v8, %v11155_v7  ;;  %4784 = vmatpush.bf16.msra.mxu2 %v11428_v6  ;;  %27721 = vst [vmem:[#allocation8_spill] sm:$0xff] %v18864_v1 }
  0x1b   :  { %v11411_v12 = vld [vmem:[%s27686_s1 + $0x220] sm:$0xf]  ;;  %v17203_v13 = vld [vmem:[%s27686_s1 + $0x22c] sm:$0xf0]  ;;  %v11284_v19 = vor.u32 %v17171_v11, %v11283_v9  ;;  %4798 = vmatpush.bf16.msra.mxu3 %v11556_v10  ;;  %v17109_v6 = vld [vmem:[%s27685_s0 + $0x4] sm:$0xf] }
  0x1c   :  { %v11539_v14 = vld [vmem:[%s27686_s1 + $0x320] sm:$0xf]  ;;  %v17235_v15 = vld [vmem:[%s27686_s1 + $0x32c] sm:$0xf0]  ;;  %v11412_v20 = vor.u32 %v17203_v13, %v11411_v12  ;;  %4757 = vmatpush.bf16.msra.mxu0 %v11156_v16  ;;  %v11045_v7 = vld [vmem:[%s27685_s0 + $0x60] sm:$0xf0] }
  0x1d   :  { %v11139_v17 = vld [vmem:[%s27686_s1] sm:$0xf]  ;;  %v17135_v18 = vld [vmem:[%s27686_s1 + $0xc] sm:$0xf0]  ;;  %v11540_v24 = vor.u32 %v17235_v15, %v11539_v14  ;;  %4771 = vmatpush.bf16.msra.mxu1 %v11284_v19  ;;  %v17110_v8 = vld [vmem:[%s27685_s0 + $0xc] sm:$0xf]  ;;  %v18886_v10 = vor.u32 %v17109_v6, %v11045_v7 }
  0x1e   :  { %v11267_v21 = vld [vmem:[%s27686_s1 + $0x100] sm:$0xf]  ;;  %v17167_v22 = vld [vmem:[%s27686_s1 + $0x10c] sm:$0xf0]  ;;  %v11140_v31 = vor.u32 %v17135_v18, %v11139_v17  ;;  %4785 = vmatpush.bf16.msra.mxu2 %v11412_v20  ;;  %v11053_v11 = vld [vmem:[%s27685_s0 + $0x68] sm:$0xf0] }
  0x1f   :  { %v11395_v23 = vld [vmem:[%s27686_s1 + $0x200] sm:$0xf]  ;;  %v17199_v25 = vld [vmem:[%s27686_s1 + $0x20c] sm:$0xf0]  ;;  %v11268_v35 = vor.u32 %v17167_v22, %v11267_v21  ;;  %4799 = vmatpush.bf16.msra.mxu3 %v11540_v24  ;;  %27722 = vst [vmem:[#allocation9_spill] sm:$0xff] %v18886_v10  ;;  %v18900_v17 = vor.u32 %v17110_v8, %v11053_v11 }
  0x20   :  { %v11523_v26 = vld [vmem:[%s27686_s1 + $0x300] sm:$0xf]  ;;  %v17231_v27 = vld [vmem:[%s27686_s1 + $0x30c] sm:$0xf0]  ;;  %v11396_v36 = vor.u32 %v17199_v25, %v11395_v23  ;;  %4758 = vmatpush.bf16.msra.mxu0 %v11140_v31 }
  0x21   :  { %v11763_v28 = vld [vmem:[%s27686_s1 + $0x4e0] sm:$0xf]  ;;  %v17291_v29 = vld [vmem:[%s27686_s1 + $0x4ec] sm:$0xf0]  ;;  %v11524_v39 = vor.u32 %v17231_v27, %v11523_v26  ;;  %4772 = vmatpush.bf16.msra.mxu1 %v11268_v35  ;;  %27723 = vst [vmem:[#allocation10_spill] sm:$0xff] %v18900_v17 }
  0x22   :  { %v11891_v30 = vld [vmem:[%s27686_s1 + $0x5e0] sm:$0xf]  ;;  %v17323_v32 = vld [vmem:[%s27686_s1 + $0x5ec] sm:$0xf0]  ;;  %v11764_v40 = vor.u32 %v17291_v29, %v11763_v28  ;;  %4786 = vmatpush.bf16.msra.mxu2 %v11396_v36 }
  0x23   :  { %v12019_v33 = vld [vmem:[%s27686_s1 + $0x6e0] sm:$0xf]  ;;  %v17355_v34 = vld [vmem:[%s27686_s1 + $0x6ec] sm:$0xf0]  ;;  %v11892_v43 = vor.u32 %v17323_v32, %v11891_v30  ;;  %4800 = vmatpush.bf16.msra.mxu3 %v11524_v39 }
  0x24   :  { %v12147_v37 = vld [vmem:[%s27686_s1 + $0x7e0] sm:$0xf]  ;;  %v17387_v38 = vld [vmem:[%s27686_s1 + $0x7ec] sm:$0xf0]  ;;  %v12020_v44 = vor.u32 %v17355_v34, %v12019_v33  ;;  %4807 = vmatpush.bf16.msrb.mxu0 %v11764_v40  ;;  %4773 = vmatmul.bf16.vlgmr.msra.gmra.mxu1 %v18886_v10 }
  0x25   :  { %v11747_v41 = vld [vmem:[%s27686_s1 + $0x4c0] sm:$0xf]  ;;  %v17287_v42 = vld [vmem:[%s27686_s1 + $0x4cc] sm:$0xf0]  ;;  %v12148_v48 = vor.u32 %v17387_v38, %v12147_v37  ;;  %4821 = vmatpush.bf16.msrb.mxu1 %v11892_v43  ;;  %4787 = vmatmul.bf16.vlgmr.msra.gmra.mxu2 %v18864_v1 }
  0x26   :  { %v11875_v45 = vld [vmem:[%s27686_s1 + $0x5c0] sm:$0xf]  ;;  %v17319_v46 = vld [vmem:[%s27686_s1 + $0x5cc] sm:$0xf0]  ;;  %v11748_v55 = vor.u32 %v17287_v42, %v11747_v41  ;;  %4835 = vmatpush.bf16.msrb.mxu2 %v12020_v44  ;;  %4801 = vmatmul.bf16.vlgmr.msra.gmra.mxu3 %v18900_v17 }
  0x27   :  { %v12003_v47 = vld [vmem:[%s27686_s1 + $0x6c0] sm:$0xf]  ;;  %v17351_v49 = vld [vmem:[%s27686_s1 + $0x6cc] sm:$0xf0]  ;;  %v11876_v60 = vor.u32 %v17319_v46, %v11875_v45  ;;  %4849 = vmatpush.bf16.msrb.mxu3 %v12148_v48 }
  0x28   :  { %v12131_v50 = vld [vmem:[%s27686_s1 + $0x7c0] sm:$0xf]  ;;  %v17383_v51 = vld [vmem:[%s27686_s1 + $0x7cc] sm:$0xf0]  ;;  %v12004_v61 = vor.u32 %v17351_v49, %v12003_v47  ;;  %4808 = vmatpush.bf16.msrb.mxu0 %v11748_v55 }
  0x29   :  { %v11043_v52 = vld [vmem:[%s27685_s0] sm:$0xf]  ;;  %v17283_v57 = vld [vmem:[%s27686_s1 + $0x4ac] sm:$0xf0]  ;;  %v12132_v2 = vor.u32 %v17383_v51, %v12131_v50  ;;  %4822 = vmatpush.bf16.msrb.mxu1 %v11876_v60 }
  0x2a   :  { %v17121_v53 = vld [vmem:[%s27685_s0 + $0x5c] sm:$0xf0]  ;;  %v17315_v63 = vld [vmem:[%s27686_s1 + $0x5ac] sm:$0xf0]  ;;  %4836 = vmatpush.bf16.msrb.mxu2 %v12004_v61 }
  0x2b   :  { %v11731_v56 = vld [vmem:[%s27686_s1 + $0x4a0] sm:$0xf]  ;;  %v18850_v58 = vor.u32 %v17121_v53, %v11043_v52  ;;  %v17347_v3 = vld [vmem:[%s27686_s1 + $0x6ac] sm:$0xf0]  ;;  %4850 = vmatpush.bf16.msrb.mxu3 %v12132_v2 }
  0x2c   :  { %v11859_v62 = vld [vmem:[%s27686_s1 + $0x5a0] sm:$0xf]  ;;  %v17379_v5 = vld [vmem:[%s27686_s1 + $0x7ac] sm:$0xf0]  ;;  %v11732_v9 = vor.u32 %v17283_v57, %v11731_v56 }
  0x2d   :  { %27720 = vst [vmem:[#allocation7_spill] sm:$0xff] %v18850_v58  ;;  %v11987_v0 = vld [vmem:[%s27686_s1 + $0x6a0] sm:$0xf]  ;;  %4759 = vmatmul.bf16.vlgmr.msra.gmra.mxu0 %v18850_v58  ;;  %v11860_v12 = vor.u32 %v17315_v63, %v11859_v62  ;;  %v17279_v15 = vld [vmem:[%s27686_s1 + $0x48c] sm:$0xf0] }
  0x2e   :  { %v12115_v4 = vld [vmem:[%s27686_s1 + $0x7a0] sm:$0xf]  ;;  %v11988_v13 = vor.u32 %v17347_v3, %v11987_v0  ;;  %v17311_v19 = vld [vmem:[%s27686_s1 + $0x58c] sm:$0xf0]  ;;  %4809 = vmatpush.bf16.msrb.mxu0 %v11732_v9 }
  0x2f   :  { %v11715_v14 = vld [vmem:[%s27686_s1 + $0x480] sm:$0xf]  ;;  %v12116_v18 = vor.u32 %v17379_v5, %v12115_v4  ;;  %v17343_v21 = vld [vmem:[%s27686_s1 + $0x68c] sm:$0xf0]  ;;  %4823 = vmatpush.bf16.msrb.mxu1 %v11860_v12 }
  0x30   :  { %v11843_v16 = vld [vmem:[%s27686_s1 + $0x580] sm:$0xf]  ;;  %v17375_v23 = vld [vmem:[%s27686_s1 + $0x78c] sm:$0xf0]  ;;  %v11716_v24 = vor.u32 %v17279_v15, %v11715_v14  ;;  %4837 = vmatpush.bf16.msrb.mxu2 %v11988_v13 }
  0x31   :  { %v11971_v20 = vld [vmem:[%s27686_s1 + $0x680] sm:$0xf]  ;;  %v11844_v25 = vor.u32 %v17311_v19, %v11843_v16  ;;  %v17275_v28 = vld [vmem:[%s27686_s1 + $0x46c] sm:$0xf0]  ;;  %4851 = vmatpush.bf16.msrb.mxu3 %v12116_v18 }
  0x32   :  { %v12099_v22 = vld [vmem:[%s27686_s1 + $0x780] sm:$0xf]  ;;  %v11972_v26 = vor.u32 %v17343_v21, %v11971_v20  ;;  %v17307_v31 = vld [vmem:[%s27686_s1 + $0x56c] sm:$0xf0]  ;;  %4810 = vmatpush.bf16.msrb.mxu0 %v11716_v24 }
  0x33   :  { %v11699_v27 = vld [vmem:[%s27686_s1 + $0x460] sm:$0xf]  ;;  %v12100_v30 = vor.u32 %v17375_v23, %v12099_v22  ;;  %v17339_v33 = vld [vmem:[%s27686_s1 + $0x66c] sm:$0xf0]  ;;  %4824 = vmatpush.bf16.msrb.mxu1 %v11844_v25  ;;  %v11067_v25 = vld [vmem:[%s27685_s0 + $0x18] sm:$0xf] }
  0x34   :  { %v11827_v29 = vld [vmem:[%s27686_s1 + $0x560] sm:$0xf]  ;;  %v17371_v35 = vld [vmem:[%s27686_s1 + $0x76c] sm:$0xf0]  ;;  %v11700_v36 = vor.u32 %v17275_v28, %v11699_v27  ;;  %4838 = vmatpush.bf16.msrb.mxu2 %v11972_v26  ;;  %v17124_v26 = vld [vmem:[%s27685_s0 + $0x74] sm:$0xf0] }
  0x35   :  { %v11955_v32 = vld [vmem:[%s27686_s1 + $0x660] sm:$0xf]  ;;  %v11828_v37 = vor.u32 %v17307_v31, %v11827_v29  ;;  %v17271_v40 = vld [vmem:[%s27686_s1 + $0x44c] sm:$0xf0]  ;;  %4852 = vmatpush.bf16.msrb.mxu3 %v12100_v30  ;;  %v17111_v27 = vld [vmem:[%s27685_s0 + $0x14] sm:$0xf] }
  0x36   :  { %v12083_v34 = vld [vmem:[%s27686_s1 + $0x760] sm:$0xf]  ;;  %v11956_v38 = vor.u32 %v17339_v33, %v11955_v32  ;;  %v17303_v43 = vld [vmem:[%s27686_s1 + $0x54c] sm:$0xf0]  ;;  %4811 = vmatpush.bf16.msrb.mxu0 %v11700_v36  ;;  %v11061_v30 = vld [vmem:[%s27685_s0 + $0x70] sm:$0xf0] }
  0x37   :  { %v11683_v39 = vld [vmem:[%s27686_s1 + $0x440] sm:$0xf]  ;;  %v12084_v42 = vor.u32 %v17371_v35, %v12083_v34  ;;  %v17335_v45 = vld [vmem:[%s27686_s1 + $0x64c] sm:$0xf0]  ;;  %4825 = vmatpush.bf16.msrb.mxu1 %v11828_v37  ;;  %v17112_v31 = vld [vmem:[%s27685_s0 + $0x1c] sm:$0xf] }
  0x38   :  { %v11811_v41 = vld [vmem:[%s27686_s1 + $0x540] sm:$0xf]  ;;  %v17367_v47 = vld [vmem:[%s27686_s1 + $0x74c] sm:$0xf0]  ;;  %v11684_v48 = vor.u32 %v17271_v40, %v11683_v39  ;;  %4839 = vmatpush.bf16.msrb.mxu2 %v11956_v38  ;;  %v11069_v32 = vld [vmem:[%s27685_s0 + $0x78] sm:$0xf0] }
  0x39   :  { %v11939_v44 = vld [vmem:[%s27686_s1 + $0x640] sm:$0xf]  ;;  %v11812_v50 = vor.u32 %v17303_v43, %v11811_v41  ;;  %v17267_v52 = vld [vmem:[%s27686_s1 + $0x42c] sm:$0xf0]  ;;  %4853 = vmatpush.bf16.msrb.mxu3 %v12084_v42  ;;  %v19083_v43 = vor.u32 %v17124_v26, %v11067_v25 }
  0x3a   :  { %v12067_v46 = vld [vmem:[%s27686_s1 + $0x740] sm:$0xf]  ;;  %v11940_v51 = vor.u32 %v17335_v45, %v11939_v44  ;;  %v17299_v54 = vld [vmem:[%s27686_s1 + $0x52c] sm:$0xf0]  ;;  %4812 = vmatpush.bf16.msrb.mxu0 %v11684_v48  ;;  %v19085_v44 = vor.u32 %v17111_v27, %v11061_v30 }
  0x3b   :  { %v11667_v49 = vld [vmem:[%s27686_s1 + $0x420] sm:$0xf]  ;;  %v12068_v55 = vor.u32 %v17367_v47, %v12067_v46  ;;  %v17331_v57 = vld [vmem:[%s27686_s1 + $0x62c] sm:$0xf0]  ;;  %4826 = vmatpush.bf16.msrb.mxu1 %v11812_v50  ;;  %27725 = vst [vmem:[#allocation12_spill] sm:$0xff] %v19083_v43  ;;  %v19093_v47 = vor.u32 %v17112_v31, %v11069_v32 }
  0x3c   :  { %v11795_v53 = vld [vmem:[%s27686_s1 + $0x520] sm:$0xf]  ;;  %v17363_v60 = vld [vmem:[%s27686_s1 + $0x72c] sm:$0xf0]  ;;  %v11668_v63 = vor.u32 %v17267_v52, %v11667_v49  ;;  %4840 = vmatpush.bf16.msrb.mxu2 %v11940_v51  ;;  %27726 = vst [vmem:[#allocation13_spill] sm:$0xff] %v19085_v44 }
  0x3d   :  { %v11923_v56 = vld [vmem:[%s27686_s1 + $0x620] sm:$0xf]  ;;  %v17263_v62 = vld [vmem:[%s27686_s1 + $0x40c] sm:$0xf0]  ;;  %v11796_v5 = vor.u32 %v17299_v54, %v11795_v53  ;;  %4854 = vmatpush.bf16.msrb.mxu3 %v12068_v55  ;;  %27727 = vst [vmem:[#allocation14_spill] sm:$0xff] %v19093_v47 }
  0x3e   :  { %v12051_v59 = vld [vmem:[%s27686_s1 + $0x720] sm:$0xf]  ;;  %v17295_v2 = vld [vmem:[%s27686_s1 + $0x50c] sm:$0xf0]  ;;  %v11924_v6 = vor.u32 %v17331_v57, %v11923_v56  ;;  %4813 = vmatpush.bf16.msrb.mxu0 %v11668_v63 }
  0x3f   :  { %v11651_v61 = vld [vmem:[%s27686_s1 + $0x400] sm:$0xf]  ;;  %v17327_v4 = vld [vmem:[%s27686_s1 + $0x60c] sm:$0xf0]  ;;  %v12052_v11 = vor.u32 %v17363_v60, %v12051_v59  ;;  %4827 = vmatpush.bf16.msrb.mxu1 %v11796_v5 }
  0x40   :  { %v11779_v0 = vld [vmem:[%s27686_s1 + $0x500] sm:$0xf]  ;;  %v17359_v8 = vld [vmem:[%s27686_s1 + $0x70c] sm:$0xf0]  ;;  %v11652_v19 = vor.u32 %v17263_v62, %v11651_v61  ;;  %4841 = vmatpush.bf16.msrb.mxu2 %v11924_v6 }
  0x41   :  { %v11907_v3 = vld [vmem:[%s27686_s1 + $0x600] sm:$0xf]  ;;  %v17419_v12 = vld [vmem:[%s27686_s1 + $0x8ec] sm:$0xf0]  ;;  %v11780_v23 = vor.u32 %v17295_v2, %v11779_v0  ;;  %4855 = vmatpush.bf16.msrb.mxu3 %v12052_v11 }
  0x42   :  { %v12035_v7 = vld [vmem:[%s27686_s1 + $0x700] sm:$0xf]  ;;  %v17451_v14 = vld [vmem:[%s27686_s1 + $0x9ec] sm:$0xf0]  ;;  %v11908_v24 = vor.u32 %v17327_v4, %v11907_v3  ;;  %4814 = vmatpush.bf16.msrb.mxu0 %v11652_v19 }
  0x43   :  { %v12275_v9 = vld [vmem:[%s27686_s1 + $0x8e0] sm:$0xf]  ;;  %v17483_v16 = vld [vmem:[%s27686_s1 + $0xaec] sm:$0xf0]  ;;  %v12036_v28 = vor.u32 %v17359_v8, %v12035_v7  ;;  %4828 = vmatpush.bf16.msrb.mxu1 %v11780_v23 }
  0x44   :  { %v12403_v13 = vld [vmem:[%s27686_s1 + $0x9e0] sm:$0xf]  ;;  %v17515_v20 = vld [vmem:[%s27686_s1 + $0xbec] sm:$0xf0]  ;;  %v12276_v29 = vor.u32 %v17419_v12, %v12275_v9  ;;  %4842 = vmatpush.bf16.msrb.mxu2 %v11908_v24 }
  0x45   :  { %v12531_v15 = vld [vmem:[%s27686_s1 + $0xae0] sm:$0xf]  ;;  %v11059_v21 = vld [vmem:[%s27685_s0 + $0x10] sm:$0xf]  ;;  %v12404_v33 = vor.u32 %v17451_v14, %v12403_v13  ;;  %4856 = vmatpush.bf16.msrb.mxu3 %v12036_v28 }
  0x46   :  { %v12659_v18 = vld [vmem:[%s27686_s1 + $0xbe0] sm:$0xf]  ;;  %v17123_v22 = vld [vmem:[%s27685_s0 + $0x6c] sm:$0xf0]  ;;  %v12532_v34 = vor.u32 %v17483_v16, %v12531_v15  ;;  %4863 = vmatpush.bf16.msra.mxu0 %v12276_v29  ;;  %4829 = vmatmul.bf16.vlgmr.msrb.gmra.mxu1 %v19085_v44 }
  0x47   :  { %v12259_v35 = vld [vmem:[%s27686_s1 + $0x8c0] sm:$0xf]  ;;  %v17415_v36 = vld [vmem:[%s27686_s1 + $0x8cc] sm:$0xf0]  ;;  %v12660_v38 = vor.u32 %v17515_v20, %v12659_v18  ;;  %v19072_v39 = vor.u32 %v17123_v22, %v11059_v21  ;;  %4877 = vmatpush.bf16.msra.mxu1 %v12404_v33  ;;  %4843 = vmatmul.bf16.vlgmr.msrb.gmra.mxu2 %v19083_v43 }
  0x48   :  { %v12387_v37 = vld [vmem:[%s27686_s1 + $0x9c0] sm:$0xf]  ;;  %v17447_v40 = vld [vmem:[%s27686_s1 + $0x9cc] sm:$0xf0]  ;;  %v12260_v48 = vor.u32 %v17415_v36, %v12259_v35  ;;  %4891 = vmatpush.bf16.msra.mxu2 %v12532_v34  ;;  %4857 = vmatmul.bf16.vlgmr.msrb.gmra.mxu3 %v19093_v47 }
  0x49   :  { %27724 = vst [vmem:[#allocation11_spill] sm:$0xff] %v19072_v39  ;;  %v12515_v41 = vld [vmem:[%s27686_s1 + $0xac0] sm:$0xf]  ;;  %v17479_v42 = vld [vmem:[%s27686_s1 + $0xacc] sm:$0xf0]  ;;  %v12388_v49 = vor.u32 %v17447_v40, %v12387_v37  ;;  %4905 = vmatpush.bf16.msra.mxu3 %v12660_v38  ;;  %4815 = vmatmul.bf16.vlgmr.msrb.gmra.mxu0 %v19072_v39 }
  0x4a   :  { %v12643_v45 = vld [vmem:[%s27686_s1 + $0xbc0] sm:$0xf]  ;;  %v17511_v46 = vld [vmem:[%s27686_s1 + $0xbcc] sm:$0xf0]  ;;  %v12516_v50 = vor.u32 %v17479_v42, %v12515_v41  ;;  %4864 = vmatpush.bf16.msra.mxu0 %v12260_v48 }
  0x4b   :  { %v12243_v51 = vld [vmem:[%s27686_s1 + $0x8a0] sm:$0xf]  ;;  %v17411_v52 = vld [vmem:[%s27686_s1 + $0x8ac] sm:$0xf0]  ;;  %v12644_v54 = vor.u32 %v17511_v46, %v12643_v45  ;;  %4878 = vmatpush.bf16.msra.mxu1 %v12388_v49 }
  0x4c   :  { %v12371_v53 = vld [vmem:[%s27686_s1 + $0x9a0] sm:$0xf]  ;;  %v17443_v55 = vld [vmem:[%s27686_s1 + $0x9ac] sm:$0xf0]  ;;  %v12244_v61 = vor.u32 %v17411_v52, %v12243_v51  ;;  %4892 = vmatpush.bf16.msra.mxu2 %v12516_v50 }
  0x4d   :  { %v12499_v56 = vld [vmem:[%s27686_s1 + $0xaa0] sm:$0xf]  ;;  %v17475_v57 = vld [vmem:[%s27686_s1 + $0xaac] sm:$0xf0]  ;;  %v12372_v62 = vor.u32 %v17443_v55, %v12371_v53  ;;  %4906 = vmatpush.bf16.msra.mxu3 %v12644_v54 }
  0x4e   :  { %v12627_v59 = vld [vmem:[%s27686_s1 + $0xba0] sm:$0xf]  ;;  %v17507_v60 = vld [vmem:[%s27686_s1 + $0xbac] sm:$0xf0]  ;;  %v12500_v63 = vor.u32 %v17475_v57, %v12499_v56  ;;  %4865 = vmatpush.bf16.msra.mxu0 %v12244_v61 }
  0x4f   :  { %v12227_v0 = vld [vmem:[%s27686_s1 + $0x880] sm:$0xf]  ;;  %v17407_v2 = vld [vmem:[%s27686_s1 + $0x88c] sm:$0xf0]  ;;  %v12628_v4 = vor.u32 %v17507_v60, %v12627_v59  ;;  %4879 = vmatpush.bf16.msra.mxu1 %v12372_v62 }
  0x50   :  { %v12355_v3 = vld [vmem:[%s27686_s1 + $0x980] sm:$0xf]  ;;  %v17439_v5 = vld [vmem:[%s27686_s1 + $0x98c] sm:$0xf0]  ;;  %v12228_v11 = vor.u32 %v17407_v2, %v12227_v0  ;;  %4893 = vmatpush.bf16.msra.mxu2 %v12500_v63 }
  0x51   :  { %v12483_v6 = vld [vmem:[%s27686_s1 + $0xa80] sm:$0xf]  ;;  %v17471_v7 = vld [vmem:[%s27686_s1 + $0xa8c] sm:$0xf0]  ;;  %v12356_v12 = vor.u32 %v17439_v5, %v12355_v3  ;;  %4907 = vmatpush.bf16.msra.mxu3 %v12628_v4 }
  0x52   :  { %v12611_v8 = vld [vmem:[%s27686_s1 + $0xb80] sm:$0xf]  ;;  %v17503_v9 = vld [vmem:[%s27686_s1 + $0xb8c] sm:$0xf0]  ;;  %v12484_v13 = vor.u32 %v17471_v7, %v12483_v6  ;;  %4866 = vmatpush.bf16.msra.mxu0 %v12228_v11 }
  0x53   :  { %v12211_v14 = vld [vmem:[%s27686_s1 + $0x860] sm:$0xf]  ;;  %v17403_v15 = vld [vmem:[%s27686_s1 + $0x86c] sm:$0xf0]  ;;  %v12612_v18 = vor.u32 %v17503_v9, %v12611_v8  ;;  %4880 = vmatpush.bf16.msra.mxu1 %v12356_v12 }
  0x54   :  { %v12339_v16 = vld [vmem:[%s27686_s1 + $0x960] sm:$0xf]  ;;  %v17435_v19 = vld [vmem:[%s27686_s1 + $0x96c] sm:$0xf0]  ;;  %v12212_v24 = vor.u32 %v17403_v15, %v12211_v14  ;;  %4894 = vmatpush.bf16.msra.mxu2 %v12484_v13 }
  0x55   :  { %v12467_v20 = vld [vmem:[%s27686_s1 + $0xa60] sm:$0xf]  ;;  %v17467_v21 = vld [vmem:[%s27686_s1 + $0xa6c] sm:$0xf0]  ;;  %v12340_v25 = vor.u32 %v17435_v19, %v12339_v16  ;;  %4908 = vmatpush.bf16.msra.mxu3 %v12612_v18  ;;  %v11083_v16 = vld [vmem:[%s27685_s0 + $0x28] sm:$0xf] }
  0x56   :  { %v12595_v22 = vld [vmem:[%s27686_s1 + $0xb60] sm:$0xf]  ;;  %v17499_v23 = vld [vmem:[%s27686_s1 + $0xb6c] sm:$0xf0]  ;;  %v12468_v26 = vor.u32 %v17467_v21, %v12467_v20  ;;  %4867 = vmatpush.bf16.msra.mxu0 %v12212_v24  ;;  %v17126_v18 = vld [vmem:[%s27685_s0 + $0x84] sm:$0xf0] }
  0x57   :  { %v12195_v27 = vld [vmem:[%s27686_s1 + $0x840] sm:$0xf]  ;;  %v17399_v28 = vld [vmem:[%s27686_s1 + $0x84c] sm:$0xf0]  ;;  %v12596_v30 = vor.u32 %v17499_v23, %v12595_v22  ;;  %4881 = vmatpush.bf16.msra.mxu1 %v12340_v25  ;;  %v17113_v19 = vld [vmem:[%s27685_s0 + $0x24] sm:$0xf] }
  0x58   :  { %v12323_v29 = vld [vmem:[%s27686_s1 + $0x940] sm:$0xf]  ;;  %v17431_v31 = vld [vmem:[%s27686_s1 + $0x94c] sm:$0xf0]  ;;  %v12196_v36 = vor.u32 %v17399_v28, %v12195_v27  ;;  %4895 = vmatpush.bf16.msra.mxu2 %v12468_v26  ;;  %v11077_v22 = vld [vmem:[%s27685_s0 + $0x80] sm:$0xf0] }
  0x59   :  { %v12451_v32 = vld [vmem:[%s27686_s1 + $0xa40] sm:$0xf]  ;;  %v17463_v33 = vld [vmem:[%s27686_s1 + $0xa4c] sm:$0xf0]  ;;  %v12324_v38 = vor.u32 %v17431_v31, %v12323_v29  ;;  %4909 = vmatpush.bf16.msra.mxu3 %v12596_v30  ;;  %v17114_v23 = vld [vmem:[%s27685_s0 + $0x2c] sm:$0xf] }
  0x5a   :  { %v12579_v34 = vld [vmem:[%s27686_s1 + $0xb40] sm:$0xf]  ;;  %v17495_v35 = vld [vmem:[%s27686_s1 + $0xb4c] sm:$0xf0]  ;;  %v12452_v40 = vor.u32 %v17463_v33, %v12451_v32  ;;  %4868 = vmatpush.bf16.msra.mxu0 %v12196_v36  ;;  %v11085_v24 = vld [vmem:[%s27685_s0 + $0x88] sm:$0xf0]  ;;  %v19313_v36 = vor.u32 %v17113_v19, %v11077_v22 }
  0x5b   :  { %v12179_v37 = vld [vmem:[%s27686_s1 + $0x820] sm:$0xf]  ;;  %v17395_v41 = vld [vmem:[%s27686_s1 + $0x82c] sm:$0xf0]  ;;  %v12580_v46 = vor.u32 %v17495_v35, %v12579_v34  ;;  %4882 = vmatpush.bf16.msra.mxu1 %v12324_v38  ;;  %v19311_v35 = vor.u32 %v17126_v18, %v11083_v16 }
  0x5c   :  { %v12307_v42 = vld [vmem:[%s27686_s1 + $0x920] sm:$0xf]  ;;  %v17427_v45 = vld [vmem:[%s27686_s1 + $0x92c] sm:$0xf0]  ;;  %v12180_v54 = vor.u32 %v17395_v41, %v12179_v37  ;;  %4896 = vmatpush.bf16.msra.mxu2 %v12452_v40  ;;  %v19321_v40 = vor.u32 %v17114_v23, %v11085_v24 }
  0x5d   :  { %v12435_v48 = vld [vmem:[%s27686_s1 + $0xa20] sm:$0xf]  ;;  %v17459_v49 = vld [vmem:[%s27686_s1 + $0xa2c] sm:$0xf0]  ;;  %v12308_v60 = vor.u32 %v17427_v45, %v12307_v42  ;;  %4910 = vmatpush.bf16.msra.mxu3 %v12580_v46 }
  0x5e   :  { %v12563_v50 = vld [vmem:[%s27686_s1 + $0xb20] sm:$0xf]  ;;  %v17491_v51 = vld [vmem:[%s27686_s1 + $0xb2c] sm:$0xf0]  ;;  %v12436_v61 = vor.u32 %v17459_v49, %v12435_v48  ;;  %4869 = vmatpush.bf16.msra.mxu0 %v12180_v54 }
  0x5f   :  { %v12163_v52 = vld [vmem:[%s27686_s1 + $0x800] sm:$0xf]  ;;  %v17391_v53 = vld [vmem:[%s27686_s1 + $0x80c] sm:$0xf0]  ;;  %v12564_v2 = vor.u32 %v17491_v51, %v12563_v50  ;;  %4883 = vmatpush.bf16.msra.mxu1 %v12308_v60 }
  0x60   :  { %v12291_v55 = vld [vmem:[%s27686_s1 + $0x900] sm:$0xf]  ;;  %v17423_v56 = vld [vmem:[%s27686_s1 + $0x90c] sm:$0xf0]  ;;  %v12164_v9 = vor.u32 %v17391_v53, %v12163_v52  ;;  %4897 = vmatpush.bf16.msra.mxu2 %v12436_v61 }
  0x61   :  { %v12419_v57 = vld [vmem:[%s27686_s1 + $0xa00] sm:$0xf]  ;;  %v17455_v59 = vld [vmem:[%s27686_s1 + $0xa0c] sm:$0xf0]  ;;  %v12292_v14 = vor.u32 %v17423_v56, %v12291_v55  ;;  %4911 = vmatpush.bf16.msra.mxu3 %v12564_v2 }
  0x62   :  { %v12547_v62 = vld [vmem:[%s27686_s1 + $0xb00] sm:$0xf]  ;;  %v17487_v63 = vld [vmem:[%s27686_s1 + $0xb0c] sm:$0xf0]  ;;  %v12420_v15 = vor.u32 %v17455_v59, %v12419_v57  ;;  %4870 = vmatpush.bf16.msra.mxu0 %v12164_v9 }
  0x63   :  { %v12787_v0 = vld [vmem:[%s27686_s1 + $0xce0] sm:$0xf]  ;;  %v17547_v3 = vld [vmem:[%s27686_s1 + $0xcec] sm:$0xf0]  ;;  %v12548_v20 = vor.u32 %v17487_v63, %v12547_v62  ;;  %4884 = vmatpush.bf16.msra.mxu1 %v12292_v14 }
  0x64   :  { %v12915_v4 = vld [vmem:[%s27686_s1 + $0xde0] sm:$0xf]  ;;  %v17579_v5 = vld [vmem:[%s27686_s1 + $0xdec] sm:$0xf0]  ;;  %v12788_v21 = vor.u32 %v17547_v3, %v12787_v0  ;;  %4898 = vmatpush.bf16.msra.mxu2 %v12420_v15 }
  0x65   :  { %v13043_v6 = vld [vmem:[%s27686_s1 + $0xee0] sm:$0xf]  ;;  %v17611_v7 = vld [vmem:[%s27686_s1 + $0xeec] sm:$0xf0]  ;;  %v12916_v25 = vor.u32 %v17579_v5, %v12915_v4  ;;  %4912 = vmatpush.bf16.msra.mxu3 %v12548_v20 }
  0x66   :  { %v13171_v8 = vld [vmem:[%s27686_s1 + $0xfe0] sm:$0xf]  ;;  %v17643_v11 = vld [vmem:[%s27686_s1 + $0xfec] sm:$0xf0]  ;;  %v13044_v26 = vor.u32 %v17611_v7, %v13043_v6  ;;  %4919 = vmatpush.bf16.msrb.mxu0 %v12788_v21  ;;  %4885 = vmatmul.bf16.vlgmr.msra.gmra.mxu1 %v19313_v36 }
  0x67   :  { %v11075_v12 = vld [vmem:[%s27685_s0 + $0x20] sm:$0xf]  ;;  %v17543_v28 = vld [vmem:[%s27686_s1 + $0xccc] sm:$0xf0]  ;;  %v13172_v30 = vor.u32 %v17643_v11, %v13171_v8  ;;  %4933 = vmatpush.bf16.msrb.mxu1 %v12916_v25  ;;  %4899 = vmatmul.bf16.vlgmr.msra.gmra.mxu2 %v19311_v35 }
  0x68   :  { %v17125_v13 = vld [vmem:[%s27685_s0 + $0x7c] sm:$0xf0]  ;;  %v17575_v32 = vld [vmem:[%s27686_s1 + $0xdcc] sm:$0xf0]  ;;  %4947 = vmatpush.bf16.msrb.mxu2 %v13044_v26  ;;  %4913 = vmatmul.bf16.vlgmr.msra.gmra.mxu3 %v19321_v40 }
  0x69   :  { %v12771_v27 = vld [vmem:[%s27686_s1 + $0xcc0] sm:$0xf]  ;;  %v19300_v31 = vor.u32 %v17125_v13, %v11075_v12  ;;  %v17607_v34 = vld [vmem:[%s27686_s1 + $0xecc] sm:$0xf0]  ;;  %4961 = vmatpush.bf16.msrb.mxu3 %v13172_v30 }
  0x6a   :  { %v12899_v29 = vld [vmem:[%s27686_s1 + $0xdc0] sm:$0xf]  ;;  %v17639_v38 = vld [vmem:[%s27686_s1 + $0xfcc] sm:$0xf0]  ;;  %v12772_v41 = vor.u32 %v17543_v28, %v12771_v27 }
  0x6b   :  { %v13027_v33 = vld [vmem:[%s27686_s1 + $0xec0] sm:$0xf]  ;;  %v12900_v42 = vor.u32 %v17575_v32, %v12899_v29  ;;  %v17539_v48 = vld [vmem:[%s27686_s1 + $0xcac] sm:$0xf0]  ;;  %4871 = vmatmul.bf16.vlgmr.msra.gmra.mxu0 %v19300_v31 }
  0x6c   :  { %v13155_v37 = vld [vmem:[%s27686_s1 + $0xfc0] sm:$0xf]  ;;  %v13028_v45 = vor.u32 %v17607_v34, %v13027_v33  ;;  %v17571_v51 = vld [vmem:[%s27686_s1 + $0xdac] sm:$0xf0]  ;;  %4920 = vmatpush.bf16.msrb.mxu0 %v12772_v41 }
  0x6d   :  { %v12755_v46 = vld [vmem:[%s27686_s1 + $0xca0] sm:$0xf]  ;;  %v13156_v50 = vor.u32 %v17639_v38, %v13155_v37  ;;  %v17603_v53 = vld [vmem:[%s27686_s1 + $0xeac] sm:$0xf0]  ;;  %4934 = vmatpush.bf16.msrb.mxu1 %v12900_v42 }
  0x6e   :  { %v12883_v49 = vld [vmem:[%s27686_s1 + $0xda0] sm:$0xf]  ;;  %v17635_v55 = vld [vmem:[%s27686_s1 + $0xfac] sm:$0xf0]  ;;  %v12756_v56 = vor.u32 %v17539_v48, %v12755_v46  ;;  %4948 = vmatpush.bf16.msrb.mxu2 %v13028_v45 }
  0x6f   :  { %v13011_v52 = vld [vmem:[%s27686_s1 + $0xea0] sm:$0xf]  ;;  %v12884_v57 = vor.u32 %v17571_v51, %v12883_v49  ;;  %v17535_v61 = vld [vmem:[%s27686_s1 + $0xc8c] sm:$0xf0]  ;;  %4962 = vmatpush.bf16.msrb.mxu3 %v13156_v50 }
  0x70   :  { %v13139_v54 = vld [vmem:[%s27686_s1 + $0xfa0] sm:$0xf]  ;;  %v13012_v59 = vor.u32 %v17603_v53, %v13011_v52  ;;  %v17567_v0 = vld [vmem:[%s27686_s1 + $0xd8c] sm:$0xf0]  ;;  %4921 = vmatpush.bf16.msrb.mxu0 %v12756_v56 }
  0x71   :  { %v12739_v60 = vld [vmem:[%s27686_s1 + $0xc80] sm:$0xf]  ;;  %v13140_v63 = vor.u32 %v17635_v55, %v13139_v54  ;;  %v17599_v3 = vld [vmem:[%s27686_s1 + $0xe8c] sm:$0xf0]  ;;  %4935 = vmatpush.bf16.msrb.mxu1 %v12884_v57 }
  0x72   :  { %v12867_v62 = vld [vmem:[%s27686_s1 + $0xd80] sm:$0xf]  ;;  %v17631_v5 = vld [vmem:[%s27686_s1 + $0xf8c] sm:$0xf0]  ;;  %v12740_v6 = vor.u32 %v17535_v61, %v12739_v60  ;;  %4949 = vmatpush.bf16.msrb.mxu2 %v13012_v59 }
  0x73   :  { %v12995_v2 = vld [vmem:[%s27686_s1 + $0xe80] sm:$0xf]  ;;  %v12868_v7 = vor.u32 %v17567_v0, %v12867_v62  ;;  %v17531_v11 = vld [vmem:[%s27686_s1 + $0xc6c] sm:$0xf0]  ;;  %4963 = vmatpush.bf16.msrb.mxu3 %v13140_v63 }
  0x74   :  { %v13123_v4 = vld [vmem:[%s27686_s1 + $0xf80] sm:$0xf]  ;;  %v12996_v8 = vor.u32 %v17599_v3, %v12995_v2  ;;  %v17563_v14 = vld [vmem:[%s27686_s1 + $0xd6c] sm:$0xf0]  ;;  %4922 = vmatpush.bf16.msrb.mxu0 %v12740_v6 }
  0x75   :  { %v12723_v9 = vld [vmem:[%s27686_s1 + $0xc60] sm:$0xf]  ;;  %v13124_v13 = vor.u32 %v17631_v5, %v13123_v4  ;;  %v17595_v16 = vld [vmem:[%s27686_s1 + $0xe6c] sm:$0xf0]  ;;  %4936 = vmatpush.bf16.msrb.mxu1 %v12868_v7 }
  0x76   :  { %v12851_v12 = vld [vmem:[%s27686_s1 + $0xd60] sm:$0xf]  ;;  %v17627_v19 = vld [vmem:[%s27686_s1 + $0xf6c] sm:$0xf0]  ;;  %v12724_v20 = vor.u32 %v17531_v11, %v12723_v9  ;;  %4950 = vmatpush.bf16.msrb.mxu2 %v12996_v8 }
  0x77   :  { %v12979_v15 = vld [vmem:[%s27686_s1 + $0xe60] sm:$0xf]  ;;  %v12852_v21 = vor.u32 %v17563_v14, %v12851_v12  ;;  %v17527_v24 = vld [vmem:[%s27686_s1 + $0xc4c] sm:$0xf0]  ;;  %4964 = vmatpush.bf16.msrb.mxu3 %v13124_v13 }
  0x78   :  { %v13107_v18 = vld [vmem:[%s27686_s1 + $0xf60] sm:$0xf]  ;;  %v12980_v22 = vor.u32 %v17595_v16, %v12979_v15  ;;  %v17559_v27 = vld [vmem:[%s27686_s1 + $0xd4c] sm:$0xf0]  ;;  %4923 = vmatpush.bf16.msrb.mxu0 %v12724_v20 }
  0x79   :  { %v12707_v23 = vld [vmem:[%s27686_s1 + $0xc40] sm:$0xf]  ;;  %v13108_v26 = vor.u32 %v17627_v19, %v13107_v18  ;;  %v17591_v29 = vld [vmem:[%s27686_s1 + $0xe4c] sm:$0xf0]  ;;  %4937 = vmatpush.bf16.msrb.mxu1 %v12852_v21 }
  0x7a   :  { %v12835_v25 = vld [vmem:[%s27686_s1 + $0xd40] sm:$0xf]  ;;  %v17623_v32 = vld [vmem:[%s27686_s1 + $0xf4c] sm:$0xf0]  ;;  %v12708_v33 = vor.u32 %v17527_v24, %v12707_v23  ;;  %4951 = vmatpush.bf16.msrb.mxu2 %v12980_v22 }
  0x7b   :  { %v12963_v28 = vld [vmem:[%s27686_s1 + $0xe40] sm:$0xf]  ;;  %v17523_v37 = vld [vmem:[%s27686_s1 + $0xc2c] sm:$0xf0]  ;;  %v12836_v38 = vor.u32 %v17559_v27, %v12835_v25  ;;  %4965 = vmatpush.bf16.msrb.mxu3 %v13108_v26 }
  0x7c   :  { %v13091_v30 = vld [vmem:[%s27686_s1 + $0xf40] sm:$0xf]  ;;  %v12964_v41 = vor.u32 %v17591_v29, %v12963_v28  ;;  %v17555_v45 = vld [vmem:[%s27686_s1 + $0xd2c] sm:$0xf0] }
  0x7d   :  { %v12691_v34 = vld [vmem:[%s27686_s1 + $0xc20] sm:$0xf]  ;;  %v13092_v48 = vor.u32 %v17623_v32, %v13091_v30  ;;  %v17587_v49 = vld [vmem:[%s27686_s1 + $0xe2c] sm:$0xf0] }
  0x7e   :  { %v12819_v42 = vld [vmem:[%s27686_s1 + $0xd20] sm:$0xf]  ;;  %v17619_v51 = vld [vmem:[%s27686_s1 + $0xf2c] sm:$0xf0] }
  0x7f   :  { %v12947_v46 = vld [vmem:[%s27686_s1 + $0xe20] sm:$0xf]  ;;  %v17519_v53 = vld [vmem:[%s27686_s1 + $0xc0c] sm:$0xf0] }
  0x80   :  { %v13075_v50 = vld [vmem:[%s27686_s1 + $0xf20] sm:$0xf] }
  0x81   :  { %v12675_v52 = vld [vmem:[%s27686_s1 + $0xc00] sm:$0xf] }
  0x82   :  { %14 = vsyncpa [#allocation5], 0  ;;  %4924 = vmatpush.bf16.msrb.mxu0 %v12708_v33  ;;  %v12692_v54 = vor.u32 %v17523_v37, %v12691_v34  ;;  %v12803_v55 = vld [vmem:[%s27686_s1 + $0xd00] sm:$0xf]  ;;  %v17551_v56 = vld [vmem:[%s27686_s1 + $0xd0c] sm:$0xf0]  ;;  %4938 = vmatpush.bf16.msrb.mxu1 %v12836_v38  ;;  %v12820_v60 = vor.u32 %v17555_v45, %v12819_v42  ;;  %v12948_v61 = vor.u32 %v17587_v49, %v12947_v46 }
  0x83   :  { %v12931_v57 = vld [vmem:[%s27686_s1 + $0xe00] sm:$0xf]  ;;  %v17583_v59 = vld [vmem:[%s27686_s1 + $0xe0c] sm:$0xf0]  ;;  %4952 = vmatpush.bf16.msrb.mxu2 %v12964_v41  ;;  %4966 = vmatpush.bf16.msrb.mxu3 %v13092_v48  ;;  %v13076_v2 = vor.u32 %v17619_v51, %v13075_v50  ;;  %v12676_v9 = vor.u32 %v17519_v53, %v12675_v52  ;;  %v12804_v14 = vor.u32 %v17551_v56, %v12803_v55  ;;  %v11099_v16 = vld [vmem:[%s27685_s0 + $0x38] sm:$0xf] }
  0x84   :  { %v13059_v62 = vld [vmem:[%s27686_s1 + $0xf00] sm:$0xf]  ;;  %v17615_v63 = vld [vmem:[%s27686_s1 + $0xf0c] sm:$0xf0]  ;;  %v12932_v15 = vor.u32 %v17583_v59, %v12931_v57  ;;  %v17128_v18 = vld [vmem:[%s27685_s0 + $0x94] sm:$0xf0] }
  0x85   :  { %v13299_v0 = vld [vmem:[%s27686_s1 + $0x10e0] sm:$0xf]  ;;  %v17675_v3 = vld [vmem:[%s27686_s1 + $0x10ec] sm:$0xf0]  ;;  %v17115_v19 = vld [vmem:[%s27685_s0 + $0x34] sm:$0xf]  ;;  %v13060_v20 = vor.u32 %v17615_v63, %v13059_v62  ;;  %v19539_v38 = vor.u32 %v17128_v18, %v11099_v16 }
  0x86   :  { %v13427_v4 = vld [vmem:[%s27686_s1 + $0x11e0] sm:$0xf]  ;;  %v17707_v5 = vld [vmem:[%s27686_s1 + $0x11ec] sm:$0xf0]  ;;  %4925 = vmatpush.bf16.msrb.mxu0 %v12692_v54  ;;  %4939 = vmatpush.bf16.msrb.mxu1 %v12820_v60  ;;  %v13300_v21 = vor.u32 %v17675_v3, %v13299_v0  ;;  %v11093_v22 = vld [vmem:[%s27685_s0 + $0x90] sm:$0xf0] }
  0x87   :  { %v13555_v6 = vld [vmem:[%s27686_s1 + $0x12e0] sm:$0xf]  ;;  %v17739_v7 = vld [vmem:[%s27686_s1 + $0x12ec] sm:$0xf0]  ;;  %4953 = vmatpush.bf16.msrb.mxu2 %v12948_v61  ;;  %4967 = vmatpush.bf16.msrb.mxu3 %v13076_v2  ;;  %v17116_v23 = vld [vmem:[%s27685_s0 + $0x3c] sm:$0xf]  ;;  %v13428_v25 = vor.u32 %v17707_v5, %v13427_v4  ;;  %v19541_v41 = vor.u32 %v17115_v19, %v11093_v22 }
  0x88   :  { %v13683_v8 = vld [vmem:[%s27686_s1 + $0x13e0] sm:$0xf]  ;;  %v17771_v11 = vld [vmem:[%s27686_s1 + $0x13ec] sm:$0xf0]  ;;  %v11101_v24 = vld [vmem:[%s27685_s0 + $0x98] sm:$0xf0]  ;;  %v13556_v26 = vor.u32 %v17739_v7, %v13555_v6 }
  0x89   :  { %v11091_v12 = vld [vmem:[%s27685_s0 + $0x30] sm:$0xf]  ;;  %v13283_v27 = vld [vmem:[%s27686_s1 + $0x10c0] sm:$0xf]  ;;  %v13684_v30 = vor.u32 %v17771_v11, %v13683_v8  ;;  %v19549_v46 = vor.u32 %v17116_v23, %v11101_v24  ;;  %vm4747_vm0 = vcmask 785408   ;;  %s18544_s22 = smov [#allocation4]  }
  0x8a   :  { %v17127_v13 = vld [vmem:[%s27685_s0 + $0x8c] sm:$0xf0]  ;;  %v13411_v29 = vld [vmem:[%s27686_s1 + $0x11c0] sm:$0xf]  ;;  %4926 = vmatpush.bf16.msrb.mxu0 %v12676_v9  ;;  %4940 = vmatpush.bf16.msrb.mxu1 %v12804_v14  ;;  %s11032_s24 = sshll.u32 %s27694_s9, 4  ;;  %s11033_s24 = int_to_ptr.hbm [resolvable:$true] %s11032_s24 }
  0x8b   :  { %v17671_v28 = vld [vmem:[%s27686_s1 + $0x10cc] sm:$0xf0]  ;;  %v19528_v32 = vor.u32 %v17127_v13, %v11091_v12  ;;  %v13539_v34 = vld [vmem:[%s27686_s1 + $0x12c0] sm:$0xf]  ;;  %4954 = vmatpush.bf16.msrb.mxu2 %v12932_v15  ;;  %4968 = vmatpush.bf16.msrb.mxu3 %v13060_v20 }
  0x8c   :  { %v17703_v33 = vld [vmem:[%s27686_s1 + $0x11cc] sm:$0xf0]  ;;  %v13667_v42 = vld [vmem:[%s27686_s1 + $0x13c0] sm:$0xf]  ;;  %v13284_v48 = vor.u32 %v17671_v28, %v13283_v27 }
  0x8d   :  { %v17735_v37 = vld [vmem:[%s27686_s1 + $0x12cc] sm:$0xf0]  ;;  %v13412_v49 = vor.u32 %v17703_v33, %v13411_v29  ;;  %v13267_v51 = vld [vmem:[%s27686_s1 + $0x10a0] sm:$0xf]  ;;  %4927 = vmatmul.bf16.vlgmr.msrb.gmra.mxu0 %v19528_v32  ;;  %4941 = vmatmul.bf16.vlgmr.msrb.gmra.mxu1 %v19541_v41 }
  0x8e   :  { %v17767_v45 = vld [vmem:[%s27686_s1 + $0x13cc] sm:$0xf0]  ;;  %4975 = vmatpush.bf16.msra.mxu0 %v13300_v21  ;;  %4989 = vmatpush.bf16.msra.mxu1 %v13428_v25  ;;  %v13540_v50 = vor.u32 %v17735_v37, %v13539_v34  ;;  %v13395_v53 = vld [vmem:[%s27686_s1 + $0x11a0] sm:$0xf] }
  0x8f   :  { %5003 = vmatpush.bf16.msra.mxu2 %v13556_v26  ;;  %v17667_v52 = vld [vmem:[%s27686_s1 + $0x10ac] sm:$0xf0]  ;;  %5017 = vmatpush.bf16.msra.mxu3 %v13684_v30  ;;  %v13668_v54 = vor.u32 %v17767_v45, %v13667_v42  ;;  %v13523_v56 = vld [vmem:[%s27686_s1 + $0x12a0] sm:$0xf] }
  0x90   :  { %v17699_v55 = vld [vmem:[%s27686_s1 + $0x11ac] sm:$0xf0]  ;;  %4955 = vmatmul.bf16.vlgmr.msrb.gmra.mxu2 %v19539_v38  ;;  %v13651_v59 = vld [vmem:[%s27686_s1 + $0x13a0] sm:$0xf]  ;;  %4969 = vmatmul.bf16.vlgmr.msrb.gmra.mxu3 %v19549_v46  ;;  %v13268_v61 = vor.u32 %v17667_v52, %v13267_v51 }
  0x91   :  { %v17731_v57 = vld [vmem:[%s27686_s1 + $0x12ac] sm:$0xf0]  ;;  %v13396_v62 = vor.u32 %v17699_v55, %v13395_v53  ;;  %v13251_v0 = vld [vmem:[%s27686_s1 + $0x1080] sm:$0xf] }
  0x92   :  { %v17763_v60 = vld [vmem:[%s27686_s1 + $0x13ac] sm:$0xf0]  ;;  %4976 = vmatpush.bf16.msra.mxu0 %v13284_v48  ;;  %4990 = vmatpush.bf16.msra.mxu1 %v13412_v49  ;;  %v13524_v63 = vor.u32 %v17731_v57, %v13523_v56  ;;  %v13379_v3 = vld [vmem:[%s27686_s1 + $0x1180] sm:$0xf] }
  0x93   :  { %5004 = vmatpush.bf16.msra.mxu2 %v13540_v50  ;;  %v17663_v2 = vld [vmem:[%s27686_s1 + $0x108c] sm:$0xf0]  ;;  %5018 = vmatpush.bf16.msra.mxu3 %v13668_v54  ;;  %v13652_v4 = vor.u32 %v17763_v60, %v13651_v59  ;;  %v13507_v6 = vld [vmem:[%s27686_s1 + $0x1280] sm:$0xf] }
  0x94   :  { %v17695_v5 = vld [vmem:[%s27686_s1 + $0x118c] sm:$0xf0]  ;;  %v13635_v8 = vld [vmem:[%s27686_s1 + $0x1380] sm:$0xf]  ;;  %v13252_v11 = vor.u32 %v17663_v2, %v13251_v0 }
  0x95   :  { %v17727_v7 = vld [vmem:[%s27686_s1 + $0x128c] sm:$0xf0]  ;;  %v13380_v12 = vor.u32 %v17695_v5, %v13379_v3  ;;  %v13235_v14 = vld [vmem:[%s27686_s1 + $0x1060] sm:$0xf] }
  0x96   :  { %v17759_v9 = vld [vmem:[%s27686_s1 + $0x138c] sm:$0xf0]  ;;  %4977 = vmatpush.bf16.msra.mxu0 %v13268_v61  ;;  %4991 = vmatpush.bf16.msra.mxu1 %v13396_v62  ;;  %v13508_v13 = vor.u32 %v17727_v7, %v13507_v6  ;;  %v13363_v16 = vld [vmem:[%s27686_s1 + $0x1160] sm:$0xf] }
  0x97   :  { %5005 = vmatpush.bf16.msra.mxu2 %v13524_v63  ;;  %v17659_v15 = vld [vmem:[%s27686_s1 + $0x106c] sm:$0xf0]  ;;  %5019 = vmatpush.bf16.msra.mxu3 %v13652_v4  ;;  %v13636_v18 = vor.u32 %v17759_v9, %v13635_v8  ;;  %v13491_v20 = vld [vmem:[%s27686_s1 + $0x1260] sm:$0xf] }
  0x98   :  { %v17691_v19 = vld [vmem:[%s27686_s1 + $0x116c] sm:$0xf0]  ;;  %v13619_v22 = vld [vmem:[%s27686_s1 + $0x1360] sm:$0xf]  ;;  %v13236_v24 = vor.u32 %v17659_v15, %v13235_v14 }
  0x99   :  { %v17723_v21 = vld [vmem:[%s27686_s1 + $0x126c] sm:$0xf0]  ;;  %v13364_v25 = vor.u32 %v17691_v19, %v13363_v16  ;;  %v13219_v27 = vld [vmem:[%s27686_s1 + $0x1040] sm:$0xf] }
  0x9a   :  { %v17755_v23 = vld [vmem:[%s27686_s1 + $0x136c] sm:$0xf0]  ;;  %4978 = vmatpush.bf16.msra.mxu0 %v13252_v11  ;;  %4992 = vmatpush.bf16.msra.mxu1 %v13380_v12  ;;  %v13492_v26 = vor.u32 %v17723_v21, %v13491_v20  ;;  %v13347_v29 = vld [vmem:[%s27686_s1 + $0x1140] sm:$0xf] }
  0x9b   :  { %5006 = vmatpush.bf16.msra.mxu2 %v13508_v13  ;;  %v17655_v28 = vld [vmem:[%s27686_s1 + $0x104c] sm:$0xf0]  ;;  %5020 = vmatpush.bf16.msra.mxu3 %v13636_v18  ;;  %v13620_v30 = vor.u32 %v17755_v23, %v13619_v22  ;;  %v13475_v34 = vld [vmem:[%s27686_s1 + $0x1240] sm:$0xf] }
  0x9c   :  { %v17687_v33 = vld [vmem:[%s27686_s1 + $0x114c] sm:$0xf0]  ;;  %v13603_v42 = vld [vmem:[%s27686_s1 + $0x1340] sm:$0xf]  ;;  %v13220_v48 = vor.u32 %v17655_v28, %v13219_v27  ;;  %v17117_v27 = vld [vmem:[%s27685_s0 + $0x44] sm:$0xf] }
  0x9d   :  { %v17719_v37 = vld [vmem:[%s27686_s1 + $0x124c] sm:$0xf0]  ;;  %v13203_v49 = vld [vmem:[%s27686_s1 + $0x1020] sm:$0xf]  ;;  %v13348_v50 = vor.u32 %v17687_v33, %v13347_v29  ;;  %v17118_v33 = vld [vmem:[%s27685_s0 + $0x4c] sm:$0xf] }
  0x9e   :  { %v17751_v45 = vld [vmem:[%s27686_s1 + $0x134c] sm:$0xf0]  ;;  %4979 = vmatpush.bf16.msra.mxu0 %v13236_v24  ;;  %4993 = vmatpush.bf16.msra.mxu1 %v13364_v25  ;;  %v13476_v51 = vor.u32 %v17719_v37, %v13475_v34  ;;  %v13331_v53 = vld [vmem:[%s27686_s1 + $0x1120] sm:$0xf]  ;;  %v11115_v25 = vld [vmem:[%s27685_s0 + $0x48] sm:$0xf] }
  0x9f   :  { %5007 = vmatpush.bf16.msra.mxu2 %v13492_v26  ;;  %v17651_v52 = vld [vmem:[%s27686_s1 + $0x102c] sm:$0xf0]  ;;  %5021 = vmatpush.bf16.msra.mxu3 %v13620_v30  ;;  %v13604_v55 = vor.u32 %v17751_v45, %v13603_v42  ;;  %v13459_v56 = vld [vmem:[%s27686_s1 + $0x1220] sm:$0xf]  ;;  %v17130_v26 = vld [vmem:[%s27685_s0 + $0xa4] sm:$0xf0] }
  0xa0   :  { %v17683_v54 = vld [vmem:[%s27686_s1 + $0x112c] sm:$0xf0]  ;;  %v13587_v59 = vld [vmem:[%s27686_s1 + $0x1320] sm:$0xf]  ;;  %v13204_v63 = vor.u32 %v17651_v52, %v13203_v49  ;;  %v11109_v30 = vld [vmem:[%s27685_s0 + $0xa0] sm:$0xf0] }
  0xa1   :  { %v17715_v57 = vld [vmem:[%s27686_s1 + $0x122c] sm:$0xf0]  ;;  %v13187_v61 = vld [vmem:[%s27686_s1 + $0x1000] sm:$0xf]  ;;  %v13332_v5 = vor.u32 %v17683_v54, %v13331_v53  ;;  %v11117_v34 = vld [vmem:[%s27685_s0 + $0xa8] sm:$0xf0] }
  0xa2   :  { %v17747_v60 = vld [vmem:[%s27686_s1 + $0x132c] sm:$0xf0]  ;;  %4980 = vmatpush.bf16.msra.mxu0 %v13220_v48  ;;  %v13315_v0 = vld [vmem:[%s27686_s1 + $0x1100] sm:$0xf]  ;;  %4994 = vmatpush.bf16.msra.mxu1 %v13348_v50  ;;  %v13460_v6 = vor.u32 %v17715_v57, %v13459_v56  ;;  %v19769_v56 = vor.u32 %v17117_v27, %v11109_v30 }
  0xa3   :  { %v17647_v62 = vld [vmem:[%s27686_s1 + $0x100c] sm:$0xf0]  ;;  %v13443_v3 = vld [vmem:[%s27686_s1 + $0x1200] sm:$0xf]  ;;  %5008 = vmatpush.bf16.msra.mxu2 %v13476_v51  ;;  %5022 = vmatpush.bf16.msra.mxu3 %v13604_v55  ;;  %v13588_v11 = vor.u32 %v17747_v60, %v13587_v59  ;;  %v19767_v55 = vor.u32 %v17130_v26, %v11115_v25  ;;  %v19777_v60 = vor.u32 %v17118_v33, %v11117_v34 }
  0xa4   :  { %v17679_v2 = vld [vmem:[%s27686_s1 + $0x110c] sm:$0xf0]  ;;  %v13571_v7 = vld [vmem:[%s27686_s1 + $0x1300] sm:$0xf]  ;;  %v13188_v19 = vor.u32 %v17647_v62, %v13187_v61  ;;  %27730 = vst [vmem:[#allocation17_spill] sm:$0xff] %v19769_v56 }
  0xa5   :  { %v17711_v4 = vld [vmem:[%s27686_s1 + $0x120c] sm:$0xf0]  ;;  %v13811_v9 = vld [vmem:[%s27686_s1 + $0x14e0] sm:$0xf]  ;;  %v13316_v23 = vor.u32 %v17679_v2, %v13315_v0  ;;  %27729 = vst [vmem:[#allocation16_spill] sm:$0xff] %v19767_v55 }
  0xa6   :  { %v17743_v8 = vld [vmem:[%s27686_s1 + $0x130c] sm:$0xf0]  ;;  %v13939_v13 = vld [vmem:[%s27686_s1 + $0x15e0] sm:$0xf]  ;;  %4981 = vmatpush.bf16.msra.mxu0 %v13204_v63  ;;  %4995 = vmatpush.bf16.msra.mxu1 %v13332_v5  ;;  %v13444_v24 = vor.u32 %v17711_v4, %v13443_v3  ;;  %27731 = vst [vmem:[#allocation18_spill] sm:$0xff] %v19777_v60 }
  0xa7   :  { %v17803_v12 = vld [vmem:[%s27686_s1 + $0x14ec] sm:$0xf0]  ;;  %v14067_v15 = vld [vmem:[%s27686_s1 + $0x16e0] sm:$0xf]  ;;  %5009 = vmatpush.bf16.msra.mxu2 %v13460_v6  ;;  %5023 = vmatpush.bf16.msra.mxu3 %v13588_v11  ;;  %v13572_v28 = vor.u32 %v17743_v8, %v13571_v7 }
  0xa8   :  { %v17835_v14 = vld [vmem:[%s27686_s1 + $0x15ec] sm:$0xf0]  ;;  %v14163_v18 = vld [vmem:[%s27686_s1 + $0x17a0] sm:$0xf]  ;;  %v13812_v29 = vor.u32 %v17803_v12, %v13811_v9 }
  0xa9   :  { %v17867_v16 = vld [vmem:[%s27686_s1 + $0x16ec] sm:$0xf0]  ;;  %v11107_v21 = vld [vmem:[%s27685_s0 + $0x40] sm:$0xf]  ;;  %v13940_v37 = vor.u32 %v17835_v14, %v13939_v13 }
  0xaa   :  { %v17891_v20 = vld [vmem:[%s27686_s1 + $0x17ac] sm:$0xf0]  ;;  %v17129_v22 = vld [vmem:[%s27685_s0 + $0x9c] sm:$0xf0]  ;;  %v14068_v42 = vor.u32 %v17867_v16, %v14067_v15  ;;  %4982 = vmatpush.bf16.msra.mxu0 %v13188_v19  ;;  %4996 = vmatpush.bf16.msra.mxu1 %v13316_v23  ;;  %v4760_v26 = vpop.f32.mrf.mxu0 }
  0xab   :  { %v13795_v45 = vld [vmem:[%s27686_s1 + $0x14c0] sm:$0xf]  ;;  %v17799_v48 = vld [vmem:[%s27686_s1 + $0x14cc] sm:$0xf0]  ;;  %v14164_v50 = vor.u32 %v17891_v20, %v14163_v18  ;;  %v19756_v51 = vor.u32 %v17129_v22, %v11107_v21  ;;  %5010 = vmatpush.bf16.msra.mxu2 %v13444_v24  ;;  %5024 = vmatpush.bf16.msra.mxu3 %v13572_v28 }
  0xac   :  { %v13923_v49 = vld [vmem:[%s27686_s1 + $0x15c0] sm:$0xf]  ;;  %v17831_v52 = vld [vmem:[%s27686_s1 + $0x15cc] sm:$0xf0]  ;;  %v13796_v61 = vor.u32 %v17799_v48, %v13795_v45 }
  0xad   :  { %27728 = vst [vmem:[#allocation15_spill] sm:$0xff] %v19756_v51  ;;  %v14051_v53 = vld [vmem:[%s27686_s1 + $0x16c0] sm:$0xf]  ;;  %v17863_v54 = vld [vmem:[%s27686_s1 + $0x16cc] sm:$0xf0]  ;;  %v13924_v63 = vor.u32 %v17831_v52, %v13923_v49  ;;  %4983 = vmatmul.bf16.vlgmr.msra.gmra.mxu0 %v19756_v51  ;;  %4997 = vmatmul.bf16.vlgmr.msra.gmra.mxu1 %v19769_v56 }
  0xae   :  { %v14147_v57 = vld [vmem:[%s27686_s1 + $0x1780] sm:$0xf]  ;;  %v17887_v59 = vld [vmem:[%s27686_s1 + $0x178c] sm:$0xf0]  ;;  %5031 = vmatpush.bf16.msrb.mxu0 %v13812_v29  ;;  %5045 = vmatpush.bf16.msrb.mxu1 %v13940_v37  ;;  %v14052_v0 = vor.u32 %v17863_v54, %v14051_v53  ;;  %v4774_v53 = vpop.f32.mrf.mxu1 }
  0xaf   :  { %v13779_v62 = vld [vmem:[%s27686_s1 + $0x14a0] sm:$0xf]  ;;  %5059 = vmatpush.bf16.msrb.mxu2 %v14068_v42  ;;  %v17795_v2 = vld [vmem:[%s27686_s1 + $0x14ac] sm:$0xf0]  ;;  %5075 = vmatpush.bf16.msrb.mxu3 %v14164_v50  ;;  %v14148_v5 = vor.u32 %v17887_v59, %v14147_v57 }
  0xb0   :  { %v13907_v3 = vld [vmem:[%s27686_s1 + $0x15a0] sm:$0xf]  ;;  %v17827_v6 = vld [vmem:[%s27686_s1 + $0x15ac] sm:$0xf0]  ;;  %5011 = vmatmul.bf16.vlgmr.msra.gmra.mxu2 %v19767_v55  ;;  %5025 = vmatmul.bf16.vlgmr.msra.gmra.mxu3 %v19777_v60  ;;  %v13780_v12 = vor.u32 %v17795_v2, %v13779_v62 }
  0xb1   :  { %v19791_v4 = vld [vmem:[%s27687_s2] sm:$0xf]  ;;  %v17859_v8 = vld [vmem:[%s27686_s1 + $0x16ac] sm:$0xf0]  ;;  %v13908_v14 = vor.u32 %v17827_v6, %v13907_v3 }
  0xb2   :  { %v14035_v7 = vld [vmem:[%s27686_s1 + $0x16a0] sm:$0xf]  ;;  %v17883_v11 = vld [vmem:[%s27686_s1 + $0x176c] sm:$0xf0]  ;;  %5032 = vmatpush.bf16.msrb.mxu0 %v13796_v61  ;;  %v27695_v13 = vperm.slane %v19791_v4, 0  ;;  %5046 = vmatpush.bf16.msrb.mxu1 %v13924_v63 }
  0xb3   :  { %v14131_v9 = vld [vmem:[%s27686_s1 + $0x1760] sm:$0xf]  ;;  %5060 = vmatpush.bf16.msrb.mxu2 %v14052_v0  ;;  %v14036_v15 = vor.u32 %v17859_v8, %v14035_v7  ;;  %v17791_v18 = vld [vmem:[%s27686_s1 + $0x148c] sm:$0xf0]  ;;  %5076 = vmatpush.bf16.msrb.mxu3 %v14148_v5  ;;  %v4788_v7 = vpop.f32.mrf.mxu2 }
  0xb4   :  { %v13763_v16 = vld [vmem:[%s27686_s1 + $0x1480] sm:$0xf]  ;;  %v14132_v20 = vor.u32 %v17883_v11, %v14131_v9  ;;  %v17823_v21 = vld [vmem:[%s27686_s1 + $0x158c] sm:$0xf0]  ;;  %v4761_v28 = vadd.f32 %v4760_v26, %v27695_v13  ;;  %v17157_v26 = vld [vmem:[%s27686_s1 + $0xc4] sm:$0xf] }
  0xb5   :  { %v13891_v19 = vld [vmem:[%s27686_s1 + $0x1580] sm:$0xf]  ;;  %v17855_v23 = vld [vmem:[%s27686_s1 + $0x168c] sm:$0xf0]  ;;  %v13764_v27 = vor.u32 %v17791_v18, %v13763_v16  ;;  %v12821_v13 = vld [vmem:[%s27686_s1 + $0xd30] sm:$0xf0] }
  0xb6   :  { %v14019_v22 = vld [vmem:[%s27686_s1 + $0x1680] sm:$0xf]  ;;  %v17879_v25 = vld [vmem:[%s27686_s1 + $0x174c] sm:$0xf0]  ;;  %5033 = vmatpush.bf16.msrb.mxu0 %v13780_v12  ;;  %5047 = vmatpush.bf16.msrb.mxu1 %v13908_v14  ;;  %v13892_v29 = vor.u32 %v17823_v21, %v13891_v19  ;;  %v4775_v57 = vadd.f32 %v4774_v53, %v4761_v28  ;;  %v17161_v14 = vld [vmem:[%s27686_s1 + $0xe4] sm:$0xf] }
  0xb7   :  { %v14115_v24 = vld [vmem:[%s27686_s1 + $0x1740] sm:$0xf]  ;;  %5061 = vmatpush.bf16.msrb.mxu2 %v14036_v15  ;;  %v14020_v30 = vor.u32 %v17855_v23, %v14019_v22  ;;  %v17787_v34 = vld [vmem:[%s27686_s1 + $0x146c] sm:$0xf0]  ;;  %5077 = vmatpush.bf16.msrb.mxu3 %v14132_v20  ;;  %v11253_v15 = vld [vmem:[%s27686_s1 + $0xf0] sm:$0xf0] }
  0xb8   :  { %v13747_v33 = vld [vmem:[%s27686_s1 + $0x1460] sm:$0xf]  ;;  %v14116_v42 = vor.u32 %v17879_v25, %v14115_v24  ;;  %v17819_v45 = vld [vmem:[%s27686_s1 + $0x156c] sm:$0xf0]  ;;  %v4789_v11 = vadd.f32 %v4788_v7, %v4775_v57  ;;  %v11256_v28 = vor.u32 %v17161_v14, %v11253_v15  ;;  %v17153_v57 = vld [vmem:[%s27686_s1 + $0xa4] sm:$0xf] }
  0xb9   :  { %v13875_v37 = vld [vmem:[%s27686_s1 + $0x1560] sm:$0xf]  ;;  %v17851_v49 = vld [vmem:[%s27686_s1 + $0x166c] sm:$0xf0]  ;;  %v13748_v54 = vor.u32 %v17787_v34, %v13747_v33  ;;  %v17120_v33 = vld [vmem:[%s27685_s0 + $0x5c] sm:$0xf] }
  0xba   :  { %v14003_v48 = vld [vmem:[%s27686_s1 + $0x1660] sm:$0xf]  ;;  %v17875_v52 = vld [vmem:[%s27686_s1 + $0x172c] sm:$0xf0]  ;;  %5034 = vmatpush.bf16.msrb.mxu0 %v13764_v27  ;;  %5048 = vmatpush.bf16.msrb.mxu1 %v13892_v29  ;;  %v13876_v59 = vor.u32 %v17819_v45, %v13875_v37  ;;  %v4802_v27 = vpop.f32.mrf.mxu3  ;;  %v11237_v29 = vld [vmem:[%s27686_s1 + $0xd0] sm:$0xf0] }
  0xbb   :  { %v14099_v50 = vld [vmem:[%s27686_s1 + $0x1720] sm:$0xf]  ;;  %5062 = vmatpush.bf16.msrb.mxu2 %v14020_v30  ;;  %v14004_v61 = vor.u32 %v17851_v49, %v14003_v48  ;;  %v17783_v63 = vld [vmem:[%s27686_s1 + $0x144c] sm:$0xf0]  ;;  %5078 = vmatpush.bf16.msrb.mxu3 %v14116_v42  ;;  %v19917_v30 = vadd.f32 %v4802_v27, %v4789_v11  ;;  %v11133_v34 = vld [vmem:[%s27685_s0 + $0xb8] sm:$0xf0] }
  0xbc   :  { %v13731_v62 = vld [vmem:[%s27686_s1 + $0x1440] sm:$0xf]  ;;  %v14100_v2 = vor.u32 %v17875_v52, %v14099_v50  ;;  %v17815_v3 = vld [vmem:[%s27686_s1 + $0x154c] sm:$0xf0]  ;;  %v11637_v7 = vld [vmem:[%s27686_s1 + $0x3f0] sm:$0xf0] }
  0xbd   :  { %v13859_v0 = vld [vmem:[%s27686_s1 + $0x1540] sm:$0xf]  ;;  %v17847_v6 = vld [vmem:[%s27686_s1 + $0x164c] sm:$0xf0]  ;;  %v13732_v12 = vor.u32 %v17783_v63, %v13731_v62  ;;  %v11381_v62 = vld [vmem:[%s27686_s1 + $0x1f0] sm:$0xf0] }
  0xbe   :  { %v13987_v5 = vld [vmem:[%s27686_s1 + $0x1640] sm:$0xf]  ;;  %v17871_v9 = vld [vmem:[%s27686_s1 + $0x170c] sm:$0xf0]  ;;  %5035 = vmatpush.bf16.msrb.mxu0 %v13748_v54  ;;  %5049 = vmatpush.bf16.msrb.mxu1 %v13876_v59  ;;  %v13860_v18 = vor.u32 %v17815_v3, %v13859_v0  ;;  %v11221_v59 = vld [vmem:[%s27686_s1 + $0xb0] sm:$0xf0]  ;;  %v19958_v0 = vor.u32 %v17120_v33, %v11133_v34 }
  0xbf   :  { %v14083_v8 = vld [vmem:[%s27686_s1 + $0x1700] sm:$0xf]  ;;  %5063 = vmatpush.bf16.msrb.mxu2 %v14004_v61  ;;  %v13988_v19 = vor.u32 %v17847_v6, %v13987_v5  ;;  %v17779_v20 = vld [vmem:[%s27686_s1 + $0x142c] sm:$0xf0]  ;;  %5079 = vmatpush.bf16.msrb.mxu3 %v14100_v2  ;;  %v17193_v61 = vld [vmem:[%s27686_s1 + $0x1e4] sm:$0xf]  ;;  %v11240_v2 = vor.u32 %v17157_v26, %v11237_v29 }
  0xc0   :  { %v13715_v16 = vld [vmem:[%s27686_s1 + $0x1420] sm:$0xf]  ;;  %v17811_v22 = vld [vmem:[%s27686_s1 + $0x152c] sm:$0xf0]  ;;  %v14084_v23 = vor.u32 %v17871_v9, %v14083_v8  ;;  %v17225_v63 = vld [vmem:[%s27686_s1 + $0x2e4] sm:$0xf] }
  0xc1   :  { %v13843_v21 = vld [vmem:[%s27686_s1 + $0x1520] sm:$0xf]  ;;  %v17843_v25 = vld [vmem:[%s27686_s1 + $0x162c] sm:$0xf0]  ;;  %v13716_v37 = vor.u32 %v17779_v20, %v13715_v16  ;;  %27732 = vst [vmem:[#allocation19_spill] sm:$0xff] %v19958_v0 }
  0xc2   :  { %v13971_v24 = vld [vmem:[%s27686_s1 + $0x1620] sm:$0xf]  ;;  %5036 = vmatpush.bf16.msrb.mxu0 %v13732_v12  ;;  %v17775_v45 = vld [vmem:[%s27686_s1 + $0x140c] sm:$0xf0]  ;;  %5050 = vmatpush.bf16.msrb.mxu1 %v13860_v18  ;;  %v13844_v49 = vor.u32 %v17811_v22, %v13843_v21  ;;  %v11509_v3 = vld [vmem:[%s27686_s1 + $0x2f0] sm:$0xf0]  ;;  %v11384_v18 = vor.u32 %v17193_v61, %v11381_v62 }
  0xc3   :  { %v13699_v42 = vld [vmem:[%s27686_s1 + $0x1400] sm:$0xf]  ;;  %5064 = vmatpush.bf16.msrb.mxu2 %v13988_v19  ;;  %v13972_v50 = vor.u32 %v17843_v25, %v13971_v24  ;;  %v17807_v52 = vld [vmem:[%s27686_s1 + $0x150c] sm:$0xf0]  ;;  %5080 = vmatpush.bf16.msrb.mxu3 %v14084_v23  ;;  %v17257_v5 = vld [vmem:[%s27686_s1 + $0x3e4] sm:$0xf]  ;;  %v11512_v19 = vor.u32 %v17225_v63, %v11509_v3  ;;  %v11224_v23 = vor.u32 %v17153_v57, %v11221_v59  ;;  %v19995_v25 = vpop.f32.mrf.mxu0 }
  0xc4   :  { %v13827_v48 = vld [vmem:[%s27686_s1 + $0x1500] sm:$0xf]  ;;  %v17839_v54 = vld [vmem:[%s27686_s1 + $0x160c] sm:$0xf0]  ;;  %v13700_v6 = vor.u32 %v17775_v45, %v13699_v42  ;;  %v11131_v14 = vld [vmem:[%s27685_s0 + $0x58] sm:$0xf]  ;;  %v11640_v24 = vor.u32 %v17257_v5, %v11637_v7  ;;  %v20050_v7 = vpop.f32.mrf.mxu2 }
  0xc5   :  { %v13955_v53 = vld [vmem:[%s27686_s1 + $0x1600] sm:$0xf]  ;;  %v11123_v8 = vld [vmem:[%s27685_s0 + $0x50] sm:$0xf]  ;;  %v13828_v11 = vor.u32 %v17807_v52, %v13827_v48  ;;  %v17132_v15 = vld [vmem:[%s27685_s0 + $0xb4] sm:$0xf0]  ;;  %v20021_v48 = vpop.f32.mrf.mxu1 }
  0xc6   :  { %5037 = vmatpush.bf16.msrb.mxu0 %v13716_v37  ;;  %v17131_v9 = vld [vmem:[%s27685_s0 + $0xac] sm:$0xf0]  ;;  %5051 = vmatpush.bf16.msrb.mxu1 %v13844_v49  ;;  %v13956_v12 = vor.u32 %v17839_v54, %v13955_v53  ;;  %v17119_v16 = vld [vmem:[%s27685_s0 + $0x54] sm:$0xf]  ;;  %v17149_v21 = vld [vmem:[%s27686_s1 + $0x84] sm:$0xf]  ;;  %v20008_v33 = vor.u32 %v17132_v15, %v11131_v14 }
  0xc7   :  { %5087 = vmatpush.bf16.msra.mxu3 %v11256_v28  ;;  %5065 = vmatpush.bf16.msrb.mxu2 %v13972_v50  ;;  %v11125_v20 = vld [vmem:[%s27685_s0 + $0xb0] sm:$0xf0]  ;;  %v17189_v22 = vld [vmem:[%s27686_s1 + $0x1c4] sm:$0xf]  ;;  %v20006_v29 = vor.u32 %v17131_v9, %v11123_v8 }
  0xc8   :  { %14177 = vmatmul.msk.bf16.vlgmr.msrb.gmra.mxu3 %vm4747_vm0, %v19958_v0  ;;  %v11365_v26 = vld [vmem:[%s27686_s1 + $0x1d0] sm:$0xf0]  ;;  %v17221_v27 = vld [vmem:[%s27686_s1 + $0x2c4] sm:$0xf]  ;;  %27734 = vst [vmem:[#allocation21_spill] sm:$0xff] %v20008_v33  ;;  %v20019_v45 = vor.u32 %v17119_v16, %v11125_v20 }
  0xc9   :  { %v11493_v28 = vld [vmem:[%s27686_s1 + $0x2d0] sm:$0xf0]  ;;  %27733 = vst [vmem:[#allocation20_spill] sm:$0xff] %v20006_v29  ;;  %v17253_v37 = vld [vmem:[%s27686_s1 + $0x3c4] sm:$0xf]  ;;  %v11368_v49 = vor.u32 %v17189_v22, %v11365_v26 }
  0xca   :  { %5038 = vmatpush.bf16.msrb.mxu0 %v13700_v6  ;;  %v11205_v34 = vld [vmem:[%s27686_s1 + $0x90] sm:$0xf0]  ;;  %5052 = vmatpush.bf16.msrb.mxu1 %v13828_v11  ;;  %27735 = vst [vmem:[#allocation22_spill] sm:$0xff] %v20019_v45  ;;  %v11496_v50 = vor.u32 %v17221_v27, %v11493_v28  ;;  %v17145_v52 = vld [vmem:[%s27686_s1 + $0x64] sm:$0xf] }
  0xcb   :  { %5088 = vmatpush.bf16.msra.mxu3 %v11240_v2  ;;  %v11621_v42 = vld [vmem:[%s27686_s1 + $0x3d0] sm:$0xf0]  ;;  %5066 = vmatpush.bf16.msrb.mxu2 %v13956_v12  ;;  %v17185_v53 = vld [vmem:[%s27686_s1 + $0x1a4] sm:$0xf]  ;;  %v11208_v54 = vor.u32 %v17149_v21, %v11205_v34  ;;  %v4816_v22 = vpop.f32.mrf.mxu0 }
  0xcc   :  { %v11624_v57 = vor.u32 %v17253_v37, %v11621_v42  ;;  %v11349_v59 = vld [vmem:[%s27686_s1 + $0x1b0] sm:$0xf0]  ;;  %v17217_v61 = vld [vmem:[%s27686_s1 + $0x2a4] sm:$0xf] }
  0xcd   :  { %v11477_v62 = vld [vmem:[%s27686_s1 + $0x2b0] sm:$0xf0]  ;;  %5039 = vmatmul.bf16.vlgmr.msrb.gmra.mxu0 %v20006_v29  ;;  %v17249_v2 = vld [vmem:[%s27686_s1 + $0x3a4] sm:$0xf]  ;;  %5053 = vmatmul.bf16.vlgmr.msrb.gmra.mxu1 %v20019_v45  ;;  %v11352_v5 = vor.u32 %v17185_v53, %v11349_v59  ;;  %v4830_v42 = vpop.f32.mrf.mxu1 }
  0xce   :  { %5101 = vmatpush.bf16.msra.mxu0 %v11384_v18  ;;  %5115 = vmatpush.bf16.msra.mxu1 %v11512_v19  ;;  %v11189_v63 = vld [vmem:[%s27686_s1 + $0x70] sm:$0xf0]  ;;  %v11480_v6 = vor.u32 %v17217_v61, %v11477_v62  ;;  %v17141_v8 = vld [vmem:[%s27686_s1 + $0x44] sm:$0xf]  ;;  %v20067_v18 = vpop.f32.mrf.mxu3 }
  0xcf   :  { %5089 = vmatpush.bf16.msra.mxu3 %v11224_v23  ;;  %5129 = vmatpush.bf16.msra.mxu2 %v11640_v24  ;;  %v11605_v3 = vld [vmem:[%s27686_s1 + $0x3b0] sm:$0xf0]  ;;  %v17181_v9 = vld [vmem:[%s27686_s1 + $0x184] sm:$0xf]  ;;  %v11192_v11 = vor.u32 %v17145_v52, %v11189_v63  ;;  %v4817_v23 = vadd.f32 %v4816_v22, %v19917_v30 }
  0xd0   :  { %5067 = vmatmul.bf16.vlgmr.msrb.gmra.mxu2 %v20008_v33  ;;  %v11608_v12 = vor.u32 %v17249_v2, %v11605_v3  ;;  %v11333_v14 = vld [vmem:[%s27686_s1 + $0x190] sm:$0xf0]  ;;  %v17213_v15 = vld [vmem:[%s27686_s1 + $0x284] sm:$0xf] }
  0xd1   :  { %v11461_v16 = vld [vmem:[%s27686_s1 + $0x290] sm:$0xf0]  ;;  %v17245_v20 = vld [vmem:[%s27686_s1 + $0x384] sm:$0xf]  ;;  %v11336_v24 = vor.u32 %v17181_v9, %v11333_v14  ;;  %v4831_v52 = vadd.f32 %v4830_v42, %v4817_v23  ;;  %v4844_v9 = vpop.f32.mrf.mxu2 }
  0xd2   :  { %5102 = vmatpush.bf16.msra.mxu0 %v11368_v49  ;;  %5116 = vmatpush.bf16.msra.mxu1 %v11496_v50  ;;  %v11173_v19 = vld [vmem:[%s27686_s1 + $0x50] sm:$0xf0]  ;;  %v11464_v26 = vor.u32 %v17213_v15, %v11461_v16  ;;  %v17137_v27 = vld [vmem:[%s27686_s1 + $0x24] sm:$0xf] }
  0xd3   :  { %5090 = vmatpush.bf16.msra.mxu3 %v11208_v54  ;;  %5130 = vmatpush.bf16.msra.mxu2 %v11624_v57  ;;  %v11589_v21 = vld [vmem:[%s27686_s1 + $0x390] sm:$0xf0]  ;;  %v17177_v28 = vld [vmem:[%s27686_s1 + $0x164] sm:$0xf]  ;;  %v11176_v34 = vor.u32 %v17141_v8, %v11173_v19  ;;  %v4845_v15 = vadd.f32 %v4844_v9, %v4831_v52 }
  0xd4   :  { %v11592_v37 = vor.u32 %v17245_v20, %v11589_v21  ;;  %v11317_v49 = vld [vmem:[%s27686_s1 + $0x170] sm:$0xf0]  ;;  %v17209_v30 = vld [vmem:[%s27686_s1 + $0x264] sm:$0xf] }
  0xd5   :  { %v11445_v50 = vld [vmem:[%s27686_s1 + $0x270] sm:$0xf0]  ;;  %v17241_v54 = vld [vmem:[%s27686_s1 + $0x364] sm:$0xf]  ;;  %v11320_v59 = vor.u32 %v17177_v28, %v11317_v49 }
  0xd6   :  { %5103 = vmatpush.bf16.msra.mxu0 %v11352_v5  ;;  %5117 = vmatpush.bf16.msra.mxu1 %v11480_v6  ;;  %v11157_v53 = vld [vmem:[%s27686_s1 + $0x30] sm:$0xf0]  ;;  %v11448_v61 = vor.u32 %v17209_v30, %v11445_v50  ;;  %v17133_v62 = vld [vmem:[%s27686_s1 + $0x4] sm:$0xf]  ;;  %v4858_v20 = vpop.f32.mrf.mxu3 }
  0xd7   :  { %5091 = vmatpush.bf16.msra.mxu3 %v11192_v11  ;;  %5131 = vmatpush.bf16.msra.mxu2 %v11608_v12  ;;  %v11573_v57 = vld [vmem:[%s27686_s1 + $0x370] sm:$0xf0]  ;;  %v17173_v63 = vld [vmem:[%s27686_s1 + $0x144] sm:$0xf]  ;;  %v11160_v2 = vor.u32 %v17137_v27, %v11157_v53 }
  0xd8   :  { %v11576_v3 = vor.u32 %v17241_v54, %v11573_v57  ;;  %v11301_v5 = vld [vmem:[%s27686_s1 + $0x150] sm:$0xf0]  ;;  %v17205_v6 = vld [vmem:[%s27686_s1 + $0x244] sm:$0xf] }
  0xd9   :  { %v11429_v8 = vld [vmem:[%s27686_s1 + $0x250] sm:$0xf0]  ;;  %v17237_v12 = vld [vmem:[%s27686_s1 + $0x344] sm:$0xf]  ;;  %v11304_v21 = vor.u32 %v17173_v63, %v11301_v5 }
  0xda   :  { %5104 = vmatpush.bf16.msra.mxu0 %v11336_v24  ;;  %5118 = vmatpush.bf16.msra.mxu1 %v11464_v26  ;;  %v11141_v11 = vld [vmem:[%s27686_s1 + $0x10] sm:$0xf0]  ;;  %v17289_v16 = vld [vmem:[%s27686_s1 + $0x4e4] sm:$0xf]  ;;  %v11432_v22 = vor.u32 %v17205_v6, %v11429_v8  ;;  %v20136_v24 = vadd.f32 %v4858_v20, %v4845_v15 }
  0xdb   :  { %5092 = vmatpush.bf16.msra.mxu3 %v11176_v34  ;;  %5132 = vmatpush.bf16.msra.mxu2 %v11592_v37  ;;  %v11557_v14 = vld [vmem:[%s27686_s1 + $0x350] sm:$0xf0]  ;;  %v17169_v23 = vld [vmem:[%s27686_s1 + $0x124] sm:$0xf]  ;;  %v11144_v26 = vor.u32 %v17133_v62, %v11141_v11 }
  0xdc   :  { %v11765_v19 = vld [vmem:[%s27686_s1 + $0x4f0] sm:$0xf0]  ;;  %v11560_v27 = vor.u32 %v17237_v12, %v11557_v14  ;;  %v17201_v34 = vld [vmem:[%s27686_s1 + $0x224] sm:$0xf] }
  0xdd   :  { %v11285_v28 = vld [vmem:[%s27686_s1 + $0x130] sm:$0xf0]  ;;  %v11768_v42 = vor.u32 %v17289_v16, %v11765_v19  ;;  %v17233_v49 = vld [vmem:[%s27686_s1 + $0x324] sm:$0xf] }
  0xde   :  { %5105 = vmatpush.bf16.msra.mxu0 %v11320_v59  ;;  %5119 = vmatpush.bf16.msra.mxu1 %v11448_v61  ;;  %v11413_v37 = vld [vmem:[%s27686_s1 + $0x230] sm:$0xf0]  ;;  %v17285_v50 = vld [vmem:[%s27686_s1 + $0x4c4] sm:$0xf]  ;;  %v11288_v53 = vor.u32 %v17169_v23, %v11285_v28 }
  0xdf   :  { %5093 = vmatpush.bf16.msra.mxu3 %v11160_v2  ;;  %5133 = vmatpush.bf16.msra.mxu2 %v11576_v3  ;;  %v11541_v30 = vld [vmem:[%s27686_s1 + $0x330] sm:$0xf0]  ;;  %v11416_v54 = vor.u32 %v17201_v34, %v11413_v37  ;;  %v17165_v57 = vld [vmem:[%s27686_s1 + $0x104] sm:$0xf] }
  0xe0   :  { %v11749_v52 = vld [vmem:[%s27686_s1 + $0x4d0] sm:$0xf0]  ;;  %v17197_v61 = vld [vmem:[%s27686_s1 + $0x204] sm:$0xf]  ;;  %v11544_v62 = vor.u32 %v17233_v49, %v11541_v30 }
  0xe1   :  { %v11269_v59 = vld [vmem:[%s27686_s1 + $0x110] sm:$0xf0]  ;;  %v17229_v2 = vld [vmem:[%s27686_s1 + $0x304] sm:$0xf]  ;;  %v11752_v5 = vor.u32 %v17285_v50, %v11749_v52 }
  0xe2   :  { %5106 = vmatpush.bf16.msra.mxu0 %v11304_v21  ;;  %5120 = vmatpush.bf16.msra.mxu1 %v11432_v22  ;;  %v11397_v63 = vld [vmem:[%s27686_s1 + $0x210] sm:$0xf0]  ;;  %v17281_v6 = vld [vmem:[%s27686_s1 + $0x4a4] sm:$0xf]  ;;  %v11272_v15 = vor.u32 %v17165_v57, %v11269_v59  ;;  %v20228_v57 = vpop.f32.mrf.mxu1 }
  0xe3   :  { %5094 = vmatpush.bf16.msra.mxu3 %v11144_v26  ;;  %5134 = vmatpush.bf16.msra.mxu2 %v11560_v27  ;;  %v11525_v3 = vld [vmem:[%s27686_s1 + $0x310] sm:$0xf0]  ;;  %v17321_v8 = vld [vmem:[%s27686_s1 + $0x5e4] sm:$0xf]  ;;  %v11400_v16 = vor.u32 %v17197_v61, %v11397_v63 }
  0xe4   :  { %v11893_v9 = vld [vmem:[%s27686_s1 + $0x5f0] sm:$0xf0]  ;;  %v17353_v12 = vld [vmem:[%s27686_s1 + $0x6e4] sm:$0xf]  ;;  %v11528_v21 = vor.u32 %v17229_v2, %v11525_v3 }
  0xe5   :  { %v11733_v11 = vld [vmem:[%s27686_s1 + $0x4b0] sm:$0xf0]  ;;  %v17385_v19 = vld [vmem:[%s27686_s1 + $0x7e4] sm:$0xf]  ;;  %v11896_v22 = vor.u32 %v17321_v8, %v11893_v9 }
  0xe6   :  { %v12021_v14 = vld [vmem:[%s27686_s1 + $0x6f0] sm:$0xf0]  ;;  %5107 = vmatpush.bf16.msra.mxu0 %v11288_v53  ;;  %5121 = vmatpush.bf16.msra.mxu1 %v11416_v54  ;;  %v11736_v23 = vor.u32 %v17281_v6, %v11733_v11  ;;  %v17277_v27 = vld [vmem:[%s27686_s1 + $0x484] sm:$0xf]  ;;  %v20226_v53 = vpop.f32.mrf.mxu0 }
  0xe7   :  { %5143 = vmatpush.bf16.msrb.mxu3 %v11768_v42  ;;  %v12149_v20 = vld [vmem:[%s27686_s1 + $0x7f0] sm:$0xf0]  ;;  %5135 = vmatpush.bf16.msra.mxu2 %v11544_v62  ;;  %v12024_v26 = vor.u32 %v17353_v12, %v12021_v14  ;;  %v17317_v28 = vld [vmem:[%s27686_s1 + $0x5c4] sm:$0xf] }
  0xe8   :  { %5095 = vmatmul.bf16.vlgmr.msra.gmra.mxu3 %v18850_v58  ;;  %v11877_v34 = vld [vmem:[%s27686_s1 + $0x5d0] sm:$0xf0]  ;;  %v12152_v37 = vor.u32 %v17385_v19, %v12149_v20  ;;  %v17349_v49 = vld [vmem:[%s27686_s1 + $0x6c4] sm:$0xf] }
  0xe9   :  { %v11717_v42 = vld [vmem:[%s27686_s1 + $0x490] sm:$0xf0]  ;;  %v17381_v50 = vld [vmem:[%s27686_s1 + $0x7c4] sm:$0xf]  ;;  %v11880_v54 = vor.u32 %v17317_v28, %v11877_v34 }
  0xea   :  { %v12005_v30 = vld [vmem:[%s27686_s1 + $0x6d0] sm:$0xf0]  ;;  %5108 = vmatpush.bf16.msra.mxu0 %v11272_v15  ;;  %5122 = vmatpush.bf16.msra.mxu1 %v11400_v16  ;;  %v11720_v59 = vor.u32 %v17277_v27, %v11717_v42  ;;  %v17273_v62 = vld [vmem:[%s27686_s1 + $0x464] sm:$0xf]  ;;  %v20275_v27 = vpop.f32.mrf.mxu2 }
  0xeb   :  { %5144 = vmatpush.bf16.msrb.mxu3 %v11752_v5  ;;  %v12133_v52 = vld [vmem:[%s27686_s1 + $0x7d0] sm:$0xf0]  ;;  %5136 = vmatpush.bf16.msra.mxu2 %v11528_v21  ;;  %v12008_v61 = vor.u32 %v17349_v49, %v12005_v30  ;;  %v17313_v63 = vld [vmem:[%s27686_s1 + $0x5a4] sm:$0xf] }
  0xec   :  { %v11861_v2 = vld [vmem:[%s27686_s1 + $0x5b0] sm:$0xf0]  ;;  %v12136_v3 = vor.u32 %v17381_v50, %v12133_v52  ;;  %v17345_v6 = vld [vmem:[%s27686_s1 + $0x6a4] sm:$0xf] }
  0xed   :  { %v11701_v5 = vld [vmem:[%s27686_s1 + $0x470] sm:$0xf0]  ;;  %5109 = vmatmul.bf16.vlgmr.msra.gmra.mxu0 %v18886_v10  ;;  %v17377_v9 = vld [vmem:[%s27686_s1 + $0x7a4] sm:$0xf]  ;;  %5123 = vmatmul.bf16.vlgmr.msra.gmra.mxu1 %v18864_v1  ;;  %v11864_v12 = vor.u32 %v17313_v63, %v11861_v2 }
  0xee   :  { %5157 = vmatpush.bf16.msrb.mxu0 %v11896_v22  ;;  %5171 = vmatpush.bf16.msrb.mxu1 %v12024_v26  ;;  %v11989_v8 = vld [vmem:[%s27686_s1 + $0x6b0] sm:$0xf0]  ;;  %v11704_v14 = vor.u32 %v17273_v62, %v11701_v5  ;;  %v17269_v16 = vld [vmem:[%s27686_s1 + $0x444] sm:$0xf]  ;;  %v4872_v42 = vpop.f32.mrf.mxu0 }
  0xef   :  { %5145 = vmatpush.bf16.msrb.mxu3 %v11736_v23  ;;  %5185 = vmatpush.bf16.msrb.mxu2 %v12152_v37  ;;  %v12117_v11 = vld [vmem:[%s27686_s1 + $0x7b0] sm:$0xf0]  ;;  %v11992_v15 = vor.u32 %v17345_v6, %v11989_v8  ;;  %v17309_v19 = vld [vmem:[%s27686_s1 + $0x584] sm:$0xf]  ;;  %v20283_v37 = vpop.f32.mrf.mxu3  ;;  %v4873_v30 = vadd.f32 %v4872_v42, %v20136_v24 }
  0xf0   :  { %5137 = vmatmul.bf16.vlgmr.msra.gmra.mxu2 %v18900_v17  ;;  %v11845_v20 = vld [vmem:[%s27686_s1 + $0x590] sm:$0xf0]  ;;  %v12120_v21 = vor.u32 %v17377_v9, %v12117_v11  ;;  %v17341_v23 = vld [vmem:[%s27686_s1 + $0x684] sm:$0xf] }
  0xf1   :  { %v11685_v22 = vld [vmem:[%s27686_s1 + $0x450] sm:$0xf0]  ;;  %v17373_v28 = vld [vmem:[%s27686_s1 + $0x784] sm:$0xf]  ;;  %v11848_v49 = vor.u32 %v17309_v19, %v11845_v20 }
  0xf2   :  { %5158 = vmatpush.bf16.msrb.mxu0 %v11880_v54  ;;  %5172 = vmatpush.bf16.msrb.mxu1 %v12008_v61  ;;  %v11973_v26 = vld [vmem:[%s27686_s1 + $0x690] sm:$0xf0]  ;;  %v11688_v50 = vor.u32 %v17269_v16, %v11685_v22  ;;  %v4886_v54 = vpop.f32.mrf.mxu1  ;;  %v17305_v61 = vld [vmem:[%s27686_s1 + $0x564] sm:$0xf] }
  0xf3   :  { %5146 = vmatpush.bf16.msrb.mxu3 %v11720_v59  ;;  %5186 = vmatpush.bf16.msrb.mxu2 %v12136_v3  ;;  %v12101_v34 = vld [vmem:[%s27686_s1 + $0x790] sm:$0xf0]  ;;  %v11976_v52 = vor.u32 %v17341_v23, %v11973_v26  ;;  %v17265_v59 = vld [vmem:[%s27686_s1 + $0x424] sm:$0xf]  ;;  %v4887_v5 = vadd.f32 %v4886_v54, %v4873_v30  ;;  %v4900_v26 = vpop.f32.mrf.mxu2 }
  0xf4   :  { %v11829_v62 = vld [vmem:[%s27686_s1 + $0x570] sm:$0xf0]  ;;  %v12104_v63 = vor.u32 %v17373_v28, %v12101_v34  ;;  %v17337_v2 = vld [vmem:[%s27686_s1 + $0x664] sm:$0xf] }
  0xf5   :  { %v11669_v24 = vld [vmem:[%s27686_s1 + $0x430] sm:$0xf0]  ;;  %v17369_v6 = vld [vmem:[%s27686_s1 + $0x764] sm:$0xf]  ;;  %v11832_v9 = vor.u32 %v17305_v61, %v11829_v62 }
  0xf6   :  { %5159 = vmatpush.bf16.msrb.mxu0 %v11864_v12  ;;  %5173 = vmatpush.bf16.msrb.mxu1 %v11992_v15  ;;  %v11957_v3 = vld [vmem:[%s27686_s1 + $0x670] sm:$0xf0]  ;;  %v17261_v11 = vld [vmem:[%s27686_s1 + $0x404] sm:$0xf]  ;;  %v11672_v12 = vor.u32 %v17265_v59, %v11669_v24 }
  0xf7   :  { %5147 = vmatpush.bf16.msrb.mxu3 %v11704_v14  ;;  %5187 = vmatpush.bf16.msrb.mxu2 %v12120_v21  ;;  %v12085_v8 = vld [vmem:[%s27686_s1 + $0x770] sm:$0xf0]  ;;  %v11960_v14 = vor.u32 %v17337_v2, %v11957_v3  ;;  %v17301_v16 = vld [vmem:[%s27686_s1 + $0x544] sm:$0xf]  ;;  %v4914_v30 = vpop.f32.mrf.mxu3 }
  0xf8   :  { %v11653_v15 = vld [vmem:[%s27686_s1 + $0x410] sm:$0xf0]  ;;  %v12088_v20 = vor.u32 %v17369_v6, %v12085_v8  ;;  %v17333_v21 = vld [vmem:[%s27686_s1 + $0x644] sm:$0xf] }
  0xf9   :  { %v11813_v19 = vld [vmem:[%s27686_s1 + $0x550] sm:$0xf0]  ;;  %v17365_v23 = vld [vmem:[%s27686_s1 + $0x744] sm:$0xf] }
  0xfa   :  { %5160 = vmatpush.bf16.msrb.mxu0 %v11848_v49  ;;  %5174 = vmatpush.bf16.msrb.mxu1 %v11976_v52  ;;  %v11941_v22 = vld [vmem:[%s27686_s1 + $0x650] sm:$0xf0]  ;;  %v17417_v34 = vld [vmem:[%s27686_s1 + $0x8e4] sm:$0xf]  ;;  %v4901_v49 = vadd.f32 %v4900_v26, %v4887_v5  ;;  %v11656_v52 = vor.u32 %v17261_v11, %v11653_v15 }
  0xfb   :  { %5148 = vmatpush.bf16.msrb.mxu3 %v11688_v50  ;;  %5188 = vmatpush.bf16.msrb.mxu2 %v12104_v63  ;;  %v12069_v28 = vld [vmem:[%s27686_s1 + $0x750] sm:$0xf0]  ;;  %v11816_v50 = vor.u32 %v17301_v16, %v11813_v19  ;;  %v11944_v54 = vor.u32 %v17333_v21, %v11941_v22  ;;  %v17297_v59 = vld [vmem:[%s27686_s1 + $0x524] sm:$0xf] }
  0xfc   :  { %v12277_v42 = vld [vmem:[%s27686_s1 + $0x8f0] sm:$0xf0]  ;;  %v20346_v62 = vadd.f32 %v4914_v30, %v4901_v49  ;;  %v12072_v63 = vor.u32 %v17365_v23, %v12069_v28  ;;  %v17329_v2 = vld [vmem:[%s27686_s1 + $0x624] sm:$0xf] }
  0xfd   :  { %v11797_v61 = vld [vmem:[%s27686_s1 + $0x530] sm:$0xf0]  ;;  %v12280_v24 = vor.u32 %v17417_v34, %v12277_v42  ;;  %v17361_v5 = vld [vmem:[%s27686_s1 + $0x724] sm:$0xf] }
  0xfe   :  { %5161 = vmatpush.bf16.msrb.mxu0 %v11832_v9  ;;  %5175 = vmatpush.bf16.msrb.mxu1 %v11960_v14  ;;  %v11925_v3 = vld [vmem:[%s27686_s1 + $0x630] sm:$0xf0]  ;;  %v17413_v8 = vld [vmem:[%s27686_s1 + $0x8c4] sm:$0xf]  ;;  %v11800_v11 = vor.u32 %v17297_v59, %v11797_v61 }
  0xff   :  { %5149 = vmatpush.bf16.msrb.mxu3 %v11672_v12  ;;  %5189 = vmatpush.bf16.msrb.mxu2 %v12088_v20  ;;  %v12053_v6 = vld [vmem:[%s27686_s1 + $0x730] sm:$0xf0]  ;;  %v17293_v12 = vld [vmem:[%s27686_s1 + $0x504] sm:$0xf]  ;;  %v11928_v15 = vor.u32 %v17329_v2, %v11925_v3 }
 0x100   :  { %v12261_v9 = vld [vmem:[%s27686_s1 + $0x8d0] sm:$0xf0]  ;;  %v17325_v16 = vld [vmem:[%s27686_s1 + $0x604] sm:$0xf]  ;;  %v12056_v21 = vor.u32 %v17361_v5, %v12053_v6 }
 0x101   :  { %v11781_v14 = vld [vmem:[%s27686_s1 + $0x510] sm:$0xf0]  ;;  %v17357_v20 = vld [vmem:[%s27686_s1 + $0x704] sm:$0xf]  ;;  %v12264_v22 = vor.u32 %v17413_v8, %v12261_v9 }
 0x102   :  { %5162 = vmatpush.bf16.msrb.mxu0 %v11816_v50  ;;  %5176 = vmatpush.bf16.msrb.mxu1 %v11944_v54  ;;  %v11909_v19 = vld [vmem:[%s27686_s1 + $0x610] sm:$0xf0]  ;;  %v17449_v26 = vld [vmem:[%s27686_s1 + $0x9e4] sm:$0xf]  ;;  %v11784_v30 = vor.u32 %v17293_v12, %v11781_v14 }
 0x103   :  { %5150 = vmatpush.bf16.msrb.mxu3 %v11656_v52  ;;  %5190 = vmatpush.bf16.msrb.mxu2 %v12072_v63  ;;  %v12037_v23 = vld [vmem:[%s27686_s1 + $0x710] sm:$0xf0]  ;;  %v17409_v34 = vld [vmem:[%s27686_s1 + $0x8a4] sm:$0xf]  ;;  %v11912_v59 = vor.u32 %v17325_v16, %v11909_v19  ;;  %v20433_v19 = vpop.f32.mrf.mxu0 }
 0x104   :  { %v12405_v28 = vld [vmem:[%s27686_s1 + $0x9f0] sm:$0xf0]  ;;  %v17481_v49 = vld [vmem:[%s27686_s1 + $0xae4] sm:$0xf]  ;;  %v12040_v63 = vor.u32 %v17357_v20, %v12037_v23  ;;  %v20441_v23 = vpop.f32.mrf.mxu1 }
 0x105   :  { %v12245_v42 = vld [vmem:[%s27686_s1 + $0x8b0] sm:$0xf0]  ;;  %v17513_v52 = vld [vmem:[%s27686_s1 + $0xbe4] sm:$0xf]  ;;  %v12408_v61 = vor.u32 %v17449_v26, %v12405_v28 }
 0x106   :  { %5151 = vmatmul.bf16.vlgmr.msrb.gmra.mxu3 %v19072_v39  ;;  %5163 = vmatpush.bf16.msrb.mxu0 %v11800_v11  ;;  %v12533_v50 = vld [vmem:[%s27686_s1 + $0xaf0] sm:$0xf0]  ;;  %v17445_v2 = vld [vmem:[%s27686_s1 + $0x9c4] sm:$0xf] }
 0x107   :  { %5199 = vmatpush.bf16.msra.mxu3 %v12280_v24  ;;  %v12661_v54 = vld [vmem:[%s27686_s1 + $0xbf0] sm:$0xf0]  ;;  %5177 = vmatpush.bf16.msrb.mxu1 %v11928_v15  ;;  %v12248_v24 = vor.u32 %v17409_v34, %v12245_v42  ;;  %v12536_v5 = vor.u32 %v17481_v49, %v12533_v50  ;;  %v17405_v8 = vld [vmem:[%s27686_s1 + $0x884] sm:$0xf] }
 0x108   :  { %5191 = vmatpush.bf16.msrb.mxu2 %v12056_v21  ;;  %v12389_v3 = vld [vmem:[%s27686_s1 + $0x9d0] sm:$0xf0]  ;;  %v12664_v6 = vor.u32 %v17513_v52, %v12661_v54  ;;  %v17477_v11 = vld [vmem:[%s27686_s1 + $0xac4] sm:$0xf] }
 0x109   :  { %v12229_v9 = vld [vmem:[%s27686_s1 + $0x890] sm:$0xf0]  ;;  %v17509_v14 = vld [vmem:[%s27686_s1 + $0xbc4] sm:$0xf]  ;;  %v12392_v16 = vor.u32 %v17445_v2, %v12389_v3 }
 0x10a   :  { %5164 = vmatpush.bf16.msrb.mxu0 %v11784_v30  ;;  %v12517_v12 = vld [vmem:[%s27686_s1 + $0xad0] sm:$0xf0]  ;;  %v12232_v20 = vor.u32 %v17405_v8, %v12229_v9  ;;  %v17441_v21 = vld [vmem:[%s27686_s1 + $0x9a4] sm:$0xf] }
 0x10b   :  { %5200 = vmatpush.bf16.msra.mxu3 %v12264_v22  ;;  %v12645_v15 = vld [vmem:[%s27686_s1 + $0xbd0] sm:$0xf0]  ;;  %5178 = vmatpush.bf16.msrb.mxu1 %v11912_v59  ;;  %v12520_v26 = vor.u32 %v17477_v11, %v12517_v12  ;;  %v17401_v34 = vld [vmem:[%s27686_s1 + $0x864] sm:$0xf]  ;;  %v20488_v12 = vpop.f32.mrf.mxu2 }
 0x10c   :  { %5192 = vmatpush.bf16.msrb.mxu2 %v12040_v63  ;;  %v12373_v22 = vld [vmem:[%s27686_s1 + $0x9b0] sm:$0xf0]  ;;  %v12648_v28 = vor.u32 %v17509_v14, %v12645_v15  ;;  %v17473_v49 = vld [vmem:[%s27686_s1 + $0xaa4] sm:$0xf]  ;;  %v20490_v15 = vpop.f32.mrf.mxu3 }
 0x10d   :  { %v12213_v42 = vld [vmem:[%s27686_s1 + $0x870] sm:$0xf0]  ;;  %5165 = vmatmul.bf16.vlgmr.msrb.gmra.mxu0 %v19085_v44  ;;  %v17505_v50 = vld [vmem:[%s27686_s1 + $0xba4] sm:$0xf]  ;;  %v12376_v54 = vor.u32 %v17441_v21, %v12373_v22 }
 0x10e   :  { %5213 = vmatpush.bf16.msra.mxu0 %v12408_v61  ;;  %5179 = vmatmul.bf16.vlgmr.msrb.gmra.mxu1 %v19083_v43  ;;  %v12501_v30 = vld [vmem:[%s27686_s1 + $0xab0] sm:$0xf0]  ;;  %v12216_v59 = vor.u32 %v17401_v34, %v12213_v42  ;;  %v17437_v61 = vld [vmem:[%s27686_s1 + $0x984] sm:$0xf]  ;;  %v4942_v42 = vpop.f32.mrf.mxu1 }
 0x10f   :  { %5201 = vmatpush.bf16.msra.mxu3 %v12248_v24  ;;  %5227 = vmatpush.bf16.msra.mxu1 %v12536_v5  ;;  %v12629_v52 = vld [vmem:[%s27686_s1 + $0xbb0] sm:$0xf0]  ;;  %v12504_v24 = vor.u32 %v17473_v49, %v12501_v30  ;;  %v17397_v3 = vld [vmem:[%s27686_s1 + $0x844] sm:$0xf] }
 0x110   :  { %5241 = vmatpush.bf16.msra.mxu2 %v12664_v6  ;;  %v12357_v63 = vld [vmem:[%s27686_s1 + $0x990] sm:$0xf0]  ;;  %v12632_v2 = vor.u32 %v17505_v50, %v12629_v52  ;;  %v17469_v6 = vld [vmem:[%s27686_s1 + $0xa84] sm:$0xf] }
 0x111   :  { %5193 = vmatmul.bf16.vlgmr.msrb.gmra.mxu2 %v19093_v47  ;;  %v12197_v5 = vld [vmem:[%s27686_s1 + $0x850] sm:$0xf0]  ;;  %v17501_v9 = vld [vmem:[%s27686_s1 + $0xb84] sm:$0xf]  ;;  %v12360_v14 = vor.u32 %v17437_v61, %v12357_v63 }
 0x112   :  { %5214 = vmatpush.bf16.msra.mxu0 %v12392_v16  ;;  %v12485_v8 = vld [vmem:[%s27686_s1 + $0xa90] sm:$0xf0]  ;;  %v4928_v16 = vpop.f32.mrf.mxu0  ;;  %v17433_v21 = vld [vmem:[%s27686_s1 + $0x964] sm:$0xf] }
 0x113   :  { %5202 = vmatpush.bf16.msra.mxu3 %v12232_v20  ;;  %5228 = vmatpush.bf16.msra.mxu1 %v12520_v26  ;;  %v12613_v11 = vld [vmem:[%s27686_s1 + $0xb90] sm:$0xf0]  ;;  %v12200_v20 = vor.u32 %v17397_v3, %v12197_v5  ;;  %v4929_v26 = vadd.f32 %v4928_v16, %v20346_v62  ;;  %v17393_v49 = vld [vmem:[%s27686_s1 + $0x824] sm:$0xf] }
 0x114   :  { %5242 = vmatpush.bf16.msra.mxu2 %v12648_v28  ;;  %v12341_v22 = vld [vmem:[%s27686_s1 + $0x970] sm:$0xf0]  ;;  %v12488_v28 = vor.u32 %v17469_v6, %v12485_v8  ;;  %v12616_v34 = vor.u32 %v17501_v9, %v12613_v11  ;;  %v17465_v50 = vld [vmem:[%s27686_s1 + $0xa64] sm:$0xf] }
 0x115   :  { %v12181_v30 = vld [vmem:[%s27686_s1 + $0x830] sm:$0xf0]  ;;  %v17497_v62 = vld [vmem:[%s27686_s1 + $0xb64] sm:$0xf]  ;;  %v12344_v61 = vor.u32 %v17433_v21, %v12341_v22 }
 0x116   :  { %5215 = vmatpush.bf16.msra.mxu0 %v12376_v54  ;;  %v12469_v52 = vld [vmem:[%s27686_s1 + $0xa70] sm:$0xf0]  ;;  %v12184_v63 = vor.u32 %v17393_v49, %v12181_v30  ;;  %v17389_v6 = vld [vmem:[%s27686_s1 + $0x804] sm:$0xf] }
 0x117   :  { %5203 = vmatpush.bf16.msra.mxu3 %v12216_v59  ;;  %5229 = vmatpush.bf16.msra.mxu1 %v12504_v24  ;;  %v12597_v54 = vld [vmem:[%s27686_s1 + $0xb70] sm:$0xf0]  ;;  %v4943_v59 = vadd.f32 %v4942_v42, %v4929_v26  ;;  %v17429_v24 = vld [vmem:[%s27686_s1 + $0x944] sm:$0xf]  ;;  %v12472_v3 = vor.u32 %v17465_v50, %v12469_v52 }
 0x118   :  { %5243 = vmatpush.bf16.msra.mxu2 %v12632_v2  ;;  %v12325_v2 = vld [vmem:[%s27686_s1 + $0x950] sm:$0xf0]  ;;  %v12600_v5 = vor.u32 %v17497_v62, %v12597_v54  ;;  %v17461_v9 = vld [vmem:[%s27686_s1 + $0xa44] sm:$0xf] }
 0x119   :  { %v12165_v8 = vld [vmem:[%s27686_s1 + $0x810] sm:$0xf0]  ;;  %v12328_v21 = vor.u32 %v17429_v24, %v12325_v2  ;;  %v17545_v22 = vld [vmem:[%s27686_s1 + $0xce4] sm:$0xf] }
 0x11a   :  { %5216 = vmatpush.bf16.msra.mxu0 %v12360_v14  ;;  %v12453_v11 = vld [vmem:[%s27686_s1 + $0xa50] sm:$0xf0]  ;;  %v17493_v14 = vld [vmem:[%s27686_s1 + $0xb44] sm:$0xf]  ;;  %v12168_v42 = vor.u32 %v17389_v6, %v12165_v8 }
 0x11b   :  { %5204 = vmatpush.bf16.msra.mxu3 %v12200_v20  ;;  %5230 = vmatpush.bf16.msra.mxu1 %v12488_v28  ;;  %v12581_v16 = vld [vmem:[%s27686_s1 + $0xb50] sm:$0xf0]  ;;  %v4956_v20 = vpop.f32.mrf.mxu2  ;;  %v17425_v49 = vld [vmem:[%s27686_s1 + $0x924] sm:$0xf]  ;;  %v12456_v50 = vor.u32 %v17461_v9, %v12453_v11 }
 0x11c   :  { %5244 = vmatpush.bf16.msra.mxu2 %v12616_v34  ;;  %v12789_v26 = vld [vmem:[%s27686_s1 + $0xcf0] sm:$0xf0]  ;;  %v4957_v28 = vadd.f32 %v4956_v20, %v4943_v59  ;;  %v4970_v34 = vpop.f32.mrf.mxu3  ;;  %v12584_v52 = vor.u32 %v17493_v14, %v12581_v16  ;;  %v17457_v62 = vld [vmem:[%s27686_s1 + $0xa24] sm:$0xf] }
 0x11d   :  { %v12309_v30 = vld [vmem:[%s27686_s1 + $0x930] sm:$0xf0]  ;;  %v12792_v59 = vor.u32 %v17545_v22, %v12789_v26  ;;  %v17421_v6 = vld [vmem:[%s27686_s1 + $0x904] sm:$0xf] }
 0x11e   :  { %5217 = vmatpush.bf16.msra.mxu0 %v12344_v61  ;;  %v20556_v54 = vadd.f32 %v4970_v34, %v4957_v28  ;;  %v12437_v61 = vld [vmem:[%s27686_s1 + $0xa30] sm:$0xf0]  ;;  %v12312_v2 = vor.u32 %v17425_v49, %v12309_v30  ;;  %v17453_v9 = vld [vmem:[%s27686_s1 + $0xa04] sm:$0xf] }
 0x11f   :  { %5205 = vmatpush.bf16.msra.mxu3 %v12184_v63  ;;  %5231 = vmatpush.bf16.msra.mxu1 %v12472_v3  ;;  %v17489_v63 = vld [vmem:[%s27686_s1 + $0xb24] sm:$0xf]  ;;  %v12565_v24 = vld [vmem:[%s27686_s1 + $0xb30] sm:$0xf0]  ;;  %v12440_v11 = vor.u32 %v17457_v62, %v12437_v61 }
 0x120   :  { %5245 = vmatpush.bf16.msra.mxu2 %v12600_v5  ;;  %v17541_v3 = vld [vmem:[%s27686_s1 + $0xcc4] sm:$0xf]  ;;  %v12773_v5 = vld [vmem:[%s27686_s1 + $0xcd0] sm:$0xf0]  ;;  %v12568_v14 = vor.u32 %v17489_v63, %v12565_v24 }
 0x121   :  { %v12293_v8 = vld [vmem:[%s27686_s1 + $0x910] sm:$0xf0]  ;;  %v17577_v20 = vld [vmem:[%s27686_s1 + $0xde4] sm:$0xf]  ;;  %v12776_v22 = vor.u32 %v17541_v3, %v12773_v5 }
 0x122   :  { %5218 = vmatpush.bf16.msra.mxu0 %v12328_v21  ;;  %v12421_v16 = vld [vmem:[%s27686_s1 + $0xa10] sm:$0xf0]  ;;  %v17485_v26 = vld [vmem:[%s27686_s1 + $0xb04] sm:$0xf] }
 0x123   :  { %5206 = vmatpush.bf16.msra.mxu3 %v12168_v42  ;;  %5232 = vmatpush.bf16.msra.mxu1 %v12456_v50  ;;  %v12917_v21 = vld [vmem:[%s27686_s1 + $0xdf0] sm:$0xf0]  ;;  %v17537_v34 = vld [vmem:[%s27686_s1 + $0xca4] sm:$0xf]  ;;  %v12296_v42 = vor.u32 %v17421_v6, %v12293_v8  ;;  %v12424_v61 = vor.u32 %v17453_v9, %v12421_v16 }
 0x124   :  { %5246 = vmatpush.bf16.msra.mxu2 %v12584_v52  ;;  %v12549_v28 = vld [vmem:[%s27686_s1 + $0xb10] sm:$0xf0]  ;;  %v17609_v30 = vld [vmem:[%s27686_s1 + $0xee4] sm:$0xf]  ;;  %v12920_v52 = vor.u32 %v17577_v20, %v12917_v21 }
 0x125   :  { %v12757_v49 = vld [vmem:[%s27686_s1 + $0xcb0] sm:$0xf0]  ;;  %v17641_v62 = vld [vmem:[%s27686_s1 + $0xfe4] sm:$0xf]  ;;  %v12552_v63 = vor.u32 %v17485_v26, %v12549_v28 }
 0x126   :  { %5207 = vmatmul.bf16.vlgmr.msra.gmra.mxu3 %v19300_v31  ;;  %5219 = vmatpush.bf16.msra.mxu0 %v12312_v2  ;;  %v13045_v50 = vld [vmem:[%s27686_s1 + $0xef0] sm:$0xf0]  ;;  %v12760_v24 = vor.u32 %v17537_v34, %v12757_v49  ;;  %v17533_v3 = vld [vmem:[%s27686_s1 + $0xc84] sm:$0xf] }
 0x127   :  { %5255 = vmatpush.bf16.msrb.mxu3 %v12792_v59  ;;  %v13173_v59 = vld [vmem:[%s27686_s1 + $0xff0] sm:$0xf0]  ;;  %5233 = vmatpush.bf16.msra.mxu1 %v12440_v11  ;;  %v13048_v2 = vor.u32 %v17609_v30, %v13045_v50  ;;  %v17573_v5 = vld [vmem:[%s27686_s1 + $0xdc4] sm:$0xf]  ;;  %v20651_v30 = vpop.f32.mrf.mxu1 }
 0x128   :  { %5247 = vmatpush.bf16.msra.mxu2 %v12568_v14  ;;  %v12901_v6 = vld [vmem:[%s27686_s1 + $0xdd0] sm:$0xf0]  ;;  %v13176_v8 = vor.u32 %v17641_v62, %v13173_v59  ;;  %v17605_v11 = vld [vmem:[%s27686_s1 + $0xec4] sm:$0xf] }
 0x129   :  { %v12741_v9 = vld [vmem:[%s27686_s1 + $0xc90] sm:$0xf0]  ;;  %v17637_v16 = vld [vmem:[%s27686_s1 + $0xfc4] sm:$0xf]  ;;  %v12904_v21 = vor.u32 %v17573_v5, %v12901_v6 }
 0x12a   :  { %5220 = vmatpush.bf16.msra.mxu0 %v12296_v42  ;;  %v13029_v14 = vld [vmem:[%s27686_s1 + $0xed0] sm:$0xf0]  ;;  %v12744_v26 = vor.u32 %v17533_v3, %v12741_v9  ;;  %v17529_v34 = vld [vmem:[%s27686_s1 + $0xc64] sm:$0xf] }
 0x12b   :  { %5256 = vmatpush.bf16.msrb.mxu3 %v12776_v22  ;;  %v13157_v20 = vld [vmem:[%s27686_s1 + $0xfd0] sm:$0xf0]  ;;  %5234 = vmatpush.bf16.msra.mxu1 %v12424_v61  ;;  %v20640_v22 = vpop.f32.mrf.mxu0  ;;  %v13032_v28 = vor.u32 %v17605_v11, %v13029_v14  ;;  %v17569_v42 = vld [vmem:[%s27686_s1 + $0xda4] sm:$0xf] }
 0x12c   :  { %5248 = vmatpush.bf16.msra.mxu2 %v12552_v63  ;;  %v12885_v49 = vld [vmem:[%s27686_s1 + $0xdb0] sm:$0xf0]  ;;  %v13160_v50 = vor.u32 %v17637_v16, %v13157_v20  ;;  %v17601_v62 = vld [vmem:[%s27686_s1 + $0xea4] sm:$0xf] }
 0x12d   :  { %5221 = vmatmul.bf16.vlgmr.msra.gmra.mxu0 %v19313_v36  ;;  %v13013_v59 = vld [vmem:[%s27686_s1 + $0xeb0] sm:$0xf0]  ;;  %v17633_v61 = vld [vmem:[%s27686_s1 + $0xfa4] sm:$0xf] }
 0x12e   :  { %5269 = vmatpush.bf16.msrb.mxu0 %v12920_v52  ;;  %v12725_v52 = vld [vmem:[%s27686_s1 + $0xc70] sm:$0xf0]  ;;  %5235 = vmatmul.bf16.vlgmr.msra.gmra.mxu1 %v19311_v35  ;;  %v13016_v3 = vor.u32 %v17601_v62, %v13013_v59  ;;  %v17525_v5 = vld [vmem:[%s27686_s1 + $0xc44] sm:$0xf] }
 0x12f   :  { %5257 = vmatpush.bf16.msrb.mxu3 %v12760_v24  ;;  %5283 = vmatpush.bf16.msrb.mxu1 %v13048_v2  ;;  %v13141_v63 = vld [vmem:[%s27686_s1 + $0xfb0] sm:$0xf0]  ;;  %v12888_v24 = vor.u32 %v17569_v42, %v12885_v49  ;;  %v12728_v2 = vor.u32 %v17529_v34, %v12725_v52  ;;  %v17565_v6 = vld [vmem:[%s27686_s1 + $0xd84] sm:$0xf]  ;;  %v20697_v34 = vpop.f32.mrf.mxu3 }
 0x130   :  { %5297 = vmatpush.bf16.msrb.mxu2 %v13176_v8  ;;  %v12869_v8 = vld [vmem:[%s27686_s1 + $0xd90] sm:$0xf0]  ;;  %v13144_v9 = vor.u32 %v17633_v61, %v13141_v63  ;;  %v17597_v14 = vld [vmem:[%s27686_s1 + $0xe84] sm:$0xf]  ;;  %27737 = vst [vmem:[#allocation24_spill] sm:$0xff] %v20697_v34 }
 0x131   :  { %5249 = vmatmul.bf16.vlgmr.msra.gmra.mxu2 %v19321_v40  ;;  %v12709_v11 = vld [vmem:[%s27686_s1 + $0xc50] sm:$0xf0]  ;;  %v17629_v20 = vld [vmem:[%s27686_s1 + $0xf84] sm:$0xf] }
 0x132   :  { %5270 = vmatpush.bf16.msrb.mxu0 %v12904_v21  ;;  %v12997_v16 = vld [vmem:[%s27686_s1 + $0xe90] sm:$0xf0]  ;;  %v12712_v49 = vor.u32 %v17525_v5, %v12709_v11  ;;  %v17521_v52 = vld [vmem:[%s27686_s1 + $0xc24] sm:$0xf] }
 0x133   :  { %5258 = vmatpush.bf16.msrb.mxu3 %v12744_v26  ;;  %5284 = vmatpush.bf16.msrb.mxu1 %v13032_v28  ;;  %v13125_v21 = vld [vmem:[%s27686_s1 + $0xf90] sm:$0xf0]  ;;  %v20695_v26 = vpop.f32.mrf.mxu2  ;;  %v12872_v28 = vor.u32 %v17565_v6, %v12869_v8  ;;  %v4984_v42 = vpop.f32.mrf.mxu0  ;;  %v17561_v62 = vld [vmem:[%s27686_s1 + $0xd64] sm:$0xf] }
 0x134   :  { %5298 = vmatpush.bf16.msrb.mxu2 %v13160_v50  ;;  %27736 = vst [vmem:[#allocation23_spill] sm:$0xff] %v20695_v26  ;;  %v13000_v50 = vor.u32 %v17597_v14, %v12997_v16  ;;  %v12853_v59 = vld [vmem:[%s27686_s1 + $0xd70] sm:$0xf0]  ;;  %v4985_v61 = vadd.f32 %v4984_v42, %v20556_v54  ;;  %v13128_v63 = vor.u32 %v17629_v20, %v13125_v21  ;;  %v17625_v6 = vld [vmem:[%s27686_s1 + $0xf64] sm:$0xf] }
 0x135   :  { %v12981_v5 = vld [vmem:[%s27686_s1 + $0xe70] sm:$0xf0]  ;;  %v17517_v11 = vld [vmem:[%s27686_s1 + $0xc04] sm:$0xf] }
 0x136   :  { %5271 = vmatpush.bf16.msrb.mxu0 %v12888_v24  ;;  %v4998_v24 = vpop.f32.mrf.mxu1  ;;  %v13109_v54 = vld [vmem:[%s27686_s1 + $0xf70] sm:$0xf0]  ;;  %v17557_v21 = vld [vmem:[%s27686_s1 + $0xd44] sm:$0xf] }
 0x137   :  { %5259 = vmatpush.bf16.msrb.mxu3 %v12728_v2  ;;  %5285 = vmatpush.bf16.msrb.mxu1 %v13016_v3  ;;  %v12693_v2 = vld [vmem:[%s27686_s1 + $0xc30] sm:$0xf0]  ;;  %v17593_v3 = vld [vmem:[%s27686_s1 + $0xe64] sm:$0xf]  ;;  %v4999_v8 = vadd.f32 %v4998_v24, %v4985_v61  ;;  %v13112_v42 = vor.u32 %v17625_v6, %v13109_v54 }
 0x138   :  { %5299 = vmatpush.bf16.msrb.mxu2 %v13144_v9  ;;  %v12856_v9 = vor.u32 %v17561_v62, %v12853_v59  ;;  %v12696_v14 = vor.u32 %v17521_v52, %v12693_v2  ;;  %v12984_v16 = vor.u32 %v17593_v3, %v12981_v5  ;;  %v12677_v20 = vld [vmem:[%s27686_s1 + $0xc10] sm:$0xf0]  ;;  %v17621_v52 = vld [vmem:[%s27686_s1 + $0xf44] sm:$0xf]  ;;  %v5026_v3 = vpop.f32.mrf.mxu3 }
 0x139   :  { %v13093_v62 = vld [vmem:[%s27686_s1 + $0xf50] sm:$0xf0]  ;;  %v17673_v59 = vld [vmem:[%s27686_s1 + $0x10e4] sm:$0xf]  ;;  %v12680_v5 = vor.u32 %v17517_v11, %v12677_v20 }
 0x13a   :  { %5272 = vmatpush.bf16.msrb.mxu0 %v12872_v28  ;;  %v12837_v28 = vld [vmem:[%s27686_s1 + $0xd50] sm:$0xf0]  ;;  %v17553_v54 = vld [vmem:[%s27686_s1 + $0xd24] sm:$0xf]  ;;  %v13096_v34 = vor.u32 %v17621_v52, %v13093_v62 }
 0x13b   :  { %5260 = vmatpush.bf16.msrb.mxu3 %v12712_v49  ;;  %5286 = vmatpush.bf16.msrb.mxu1 %v13000_v50  ;;  %v17589_v49 = vld [vmem:[%s27686_s1 + $0xe44] sm:$0xf]  ;;  %v12965_v50 = vld [vmem:[%s27686_s1 + $0xe50] sm:$0xf0]  ;;  %v12840_v24 = vor.u32 %v17557_v21, %v12837_v28  ;;  %v12824_v28 = vor.u32 %v17553_v54, %v12821_v13 }
 0x13c   :  { %5300 = vmatpush.bf16.msrb.mxu2 %v13128_v63  ;;  %v13301_v61 = vld [vmem:[%s27686_s1 + $0x10f0] sm:$0xf0]  ;;  %v5012_v63 = vpop.f32.mrf.mxu2  ;;  %v12968_v6 = vor.u32 %v17589_v49, %v12965_v50  ;;  %v17617_v11 = vld [vmem:[%s27686_s1 + $0xf24] sm:$0xf] }
 0x13d   :  { %v5013_v2 = vadd.f32 %v5012_v63, %v4999_v8  ;;  %v13304_v26 = vor.u32 %v17673_v59, %v13301_v61  ;;  %v12949_v8 = vld [vmem:[%s27686_s1 + $0xe30] sm:$0xf0]  ;;  %v17669_v20 = vld [vmem:[%s27686_s1 + $0x10c4] sm:$0xf] }
 0x13e   :  { %5273 = vmatpush.bf16.msrb.mxu0 %v12856_v9  ;;  %v17585_v9 = vld [vmem:[%s27686_s1 + $0xe24] sm:$0xf]  ;;  %v13285_v21 = vld [vmem:[%s27686_s1 + $0x10d0] sm:$0xf0] }
 0x13f   :  { %5261 = vmatpush.bf16.msrb.mxu3 %v12696_v14  ;;  %5287 = vmatpush.bf16.msrb.mxu1 %v12984_v16  ;;  %v20769_v14 = vadd.f32 %v5026_v3, %v5013_v2  ;;  %v13077_v16 = vld [vmem:[%s27686_s1 + $0xf30] sm:$0xf0]  ;;  %v12952_v50 = vor.u32 %v17585_v9, %v12949_v8  ;;  %v17581_v52 = vld [vmem:[%s27686_s1 + $0xe04] sm:$0xf]  ;;  %v13288_v61 = vor.u32 %v17669_v20, %v13285_v21 }
 0x140   :  { %5301 = vmatpush.bf16.msrb.mxu2 %v13112_v42  ;;  %v17549_v42 = vld [vmem:[%s27686_s1 + $0xd04] sm:$0xf]  ;;  %v12805_v49 = vld [vmem:[%s27686_s1 + $0xd10] sm:$0xf0]  ;;  %v13080_v59 = vor.u32 %v17617_v11, %v13077_v16 }
 0x141   :  { %v12933_v62 = vld [vmem:[%s27686_s1 + $0xe10] sm:$0xf0]  ;;  %v17613_v13 = vld [vmem:[%s27686_s1 + $0xf04] sm:$0xf] }
 0x142   :  { %5274 = vmatpush.bf16.msrb.mxu0 %v12840_v24  ;;  %v13061_v63 = vld [vmem:[%s27686_s1 + $0xf10] sm:$0xf0]  ;;  %v17705_v24 = vld [vmem:[%s27686_s1 + $0x11e4] sm:$0xf]  ;;  %v12936_v8 = vor.u32 %v17581_v52, %v12933_v62 }
 0x143   :  { %5262 = vmatpush.bf16.msrb.mxu3 %v12680_v5  ;;  %5288 = vmatpush.bf16.msrb.mxu1 %v12968_v6  ;;  %v13429_v2 = vld [vmem:[%s27686_s1 + $0x11f0] sm:$0xf0]  ;;  %v17665_v3 = vld [vmem:[%s27686_s1 + $0x10a4] sm:$0xf]  ;;  %v12808_v5 = vor.u32 %v17549_v42, %v12805_v49  ;;  %v13064_v16 = vor.u32 %v17613_v13, %v13061_v63 }
 0x144   :  { %5302 = vmatpush.bf16.msrb.mxu2 %v13096_v34  ;;  %v17737_v34 = vld [vmem:[%s27686_s1 + $0x12e4] sm:$0xf]  ;;  %v13557_v6 = vld [vmem:[%s27686_s1 + $0x12f0] sm:$0xf0]  ;;  %v13432_v11 = vor.u32 %v17705_v24, %v13429_v2 }
 0x145   :  { %v17769_v54 = vld [vmem:[%s27686_s1 + $0x13e4] sm:$0xf]  ;;  %v13685_v9 = vld [vmem:[%s27686_s1 + $0x13f0] sm:$0xf0]  ;;  %v13560_v42 = vor.u32 %v17737_v34, %v13557_v6 }
 0x146   :  { %5263 = vmatmul.bf16.vlgmr.msrb.gmra.mxu3 %v19528_v32  ;;  %5275 = vmatpush.bf16.msrb.mxu0 %v12824_v28  ;;  %v17701_v21 = vld [vmem:[%s27686_s1 + $0x11c4] sm:$0xf]  ;;  %v13413_v28 = vld [vmem:[%s27686_s1 + $0x11d0] sm:$0xf0]  ;;  %v13688_v49 = vor.u32 %v17769_v54, %v13685_v9 }
 0x147   :  { %5311 = vmatpush.bf16.msra.mxu3 %v13304_v26  ;;  %v13269_v26 = vld [vmem:[%s27686_s1 + $0x10b0] sm:$0xf0]  ;;  %5289 = vmatpush.bf16.msrb.mxu1 %v12952_v50  ;;  %v17661_v50 = vld [vmem:[%s27686_s1 + $0x1084] sm:$0xf]  ;;  %v13416_v63 = vor.u32 %v17701_v21, %v13413_v28 }
 0x148   :  { %5303 = vmatpush.bf16.msrb.mxu2 %v13080_v59  ;;  %v13272_v20 = vor.u32 %v17665_v3, %v13269_v26  ;;  %v13253_v52 = vld [vmem:[%s27686_s1 + $0x1090] sm:$0xf0]  ;;  %v17733_v62 = vld [vmem:[%s27686_s1 + $0x12c4] sm:$0xf]  ;;  %v20853_v26 = vpop.f32.mrf.mxu0 }
 0x149   :  { %v13541_v13 = vld [vmem:[%s27686_s1 + $0x12d0] sm:$0xf0]  ;;  %v17765_v59 = vld [vmem:[%s27686_s1 + $0x13c4] sm:$0xf]  ;;  %v13256_v24 = vor.u32 %v17661_v50, %v13253_v52 }
 0x14a   :  { %5276 = vmatpush.bf16.msrb.mxu0 %v12808_v5  ;;  %v17697_v2 = vld [vmem:[%s27686_s1 + $0x11a4] sm:$0xf]  ;;  %v13397_v3 = vld [vmem:[%s27686_s1 + $0x11b0] sm:$0xf0]  ;;  %v13544_v34 = vor.u32 %v17733_v62, %v13541_v13 }
 0x14b   :  { %5312 = vmatpush.bf16.msra.mxu3 %v13288_v61  ;;  %v13669_v61 = vld [vmem:[%s27686_s1 + $0x13d0] sm:$0xf0]  ;;  %5290 = vmatpush.bf16.msrb.mxu1 %v12936_v8  ;;  %v17657_v6 = vld [vmem:[%s27686_s1 + $0x1064] sm:$0xf]  ;;  %v20864_v8 = vpop.f32.mrf.mxu1  ;;  %v13400_v21 = vor.u32 %v17697_v2, %v13397_v3  ;;  %v20902_v2 = vpop.f32.mrf.mxu2 }
 0x14c   :  { %5304 = vmatpush.bf16.msrb.mxu2 %v13064_v16  ;;  %v13672_v5 = vor.u32 %v17765_v59, %v13669_v61  ;;  %v13237_v54 = vld [vmem:[%s27686_s1 + $0x1070] sm:$0xf0]  ;;  %v17729_v9 = vld [vmem:[%s27686_s1 + $0x12a4] sm:$0xf]  ;;  %27738 = vst [vmem:[#allocation25_spill] sm:$0xff] %v20902_v2  ;;  %v20904_v3 = vpop.f32.mrf.mxu3 }
 0x14d   :  { %5277 = vmatmul.bf16.vlgmr.msrb.gmra.mxu0 %v19541_v41  ;;  %v17761_v16 = vld [vmem:[%s27686_s1 + $0x13a4] sm:$0xf]  ;;  %v13240_v28 = vor.u32 %v17657_v6, %v13237_v54  ;;  %v13221_v13 = vld [vmem:[%s27686_s1 + $0x1050] sm:$0xf0]  ;;  %27739 = vst [vmem:[#allocation26_spill] sm:$0xff] %v20904_v3 }
 0x14e   :  { %5325 = vmatpush.bf16.msra.mxu0 %v13432_v11  ;;  %5291 = vmatmul.bf16.vlgmr.msrb.gmra.mxu1 %v19539_v38  ;;  %v13525_v11 = vld [vmem:[%s27686_s1 + $0x12b0] sm:$0xf0]  ;;  %v17653_v62 = vld [vmem:[%s27686_s1 + $0x1044] sm:$0xf] }
 0x14f   :  { %5313 = vmatpush.bf16.msra.mxu3 %v13272_v20  ;;  %5339 = vmatpush.bf16.msra.mxu1 %v13560_v42  ;;  %v13653_v20 = vld [vmem:[%s27686_s1 + $0x13b0] sm:$0xf0]  ;;  %v17693_v42 = vld [vmem:[%s27686_s1 + $0x1184] sm:$0xf]  ;;  %v13528_v50 = vor.u32 %v17729_v9, %v13525_v11 }
 0x150   :  { %5353 = vmatpush.bf16.msra.mxu2 %v13688_v49  ;;  %v13381_v49 = vld [vmem:[%s27686_s1 + $0x1190] sm:$0xf0]  ;;  %v13656_v52 = vor.u32 %v17761_v16, %v13653_v20  ;;  %v17725_v59 = vld [vmem:[%s27686_s1 + $0x1284] sm:$0xf]  ;;  %v5040_v9 = vpop.f32.mrf.mxu0 }
 0x151   :  { %5305 = vmatmul.bf16.vlgmr.msrb.gmra.mxu2 %v19549_v46  ;;  %v13509_v61 = vld [vmem:[%s27686_s1 + $0x1290] sm:$0xf0]  ;;  %v17689_v6 = vld [vmem:[%s27686_s1 + $0x1164] sm:$0xf] }
 0x152   :  { %5326 = vmatpush.bf16.msra.mxu0 %v13416_v63  ;;  %v17757_v63 = vld [vmem:[%s27686_s1 + $0x1384] sm:$0xf]  ;;  %v13365_v54 = vld [vmem:[%s27686_s1 + $0x1170] sm:$0xf0]  ;;  %v13512_v11 = vor.u32 %v17725_v59, %v13509_v61 }
 0x153   :  { %5314 = vmatpush.bf16.msra.mxu3 %v13256_v24  ;;  %5340 = vmatpush.bf16.msra.mxu1 %v13544_v34  ;;  %v13637_v24 = vld [vmem:[%s27686_s1 + $0x1390] sm:$0xf0]  ;;  %v13384_v34 = vor.u32 %v17693_v42, %v13381_v49  ;;  %v17649_v20 = vld [vmem:[%s27686_s1 + $0x1024] sm:$0xf]  ;;  %v5041_v42 = vadd.f32 %v5040_v9, %v20769_v14  ;;  %v5054_v49 = vpop.f32.mrf.mxu1 }
 0x154   :  { %5354 = vmatpush.bf16.msra.mxu2 %v13672_v5  ;;  %v13224_v5 = vor.u32 %v17653_v62, %v13221_v13  ;;  %v13640_v16 = vor.u32 %v17757_v63, %v13637_v24  ;;  %v13621_v62 = vld [vmem:[%s27686_s1 + $0x1370] sm:$0xf0]  ;;  %v13368_v13 = vor.u32 %v17689_v6, %v13365_v54  ;;  %v17685_v14 = vld [vmem:[%s27686_s1 + $0x1144] sm:$0xf] }
 0x155   :  { %v5055_v59 = vadd.f32 %v5054_v49, %v5041_v42  ;;  %v13349_v63 = vld [vmem:[%s27686_s1 + $0x1150] sm:$0xf0]  ;;  %v17717_v6 = vld [vmem:[%s27686_s1 + $0x1244] sm:$0xf] }
 0x156   :  { %5327 = vmatpush.bf16.msra.mxu0 %v13400_v21  ;;  %v13205_v21 = vld [vmem:[%s27686_s1 + $0x1030] sm:$0xf0]  ;;  %v17801_v42 = vld [vmem:[%s27686_s1 + $0x14e4] sm:$0xf] }
 0x157   :  { %5315 = vmatpush.bf16.msra.mxu3 %v13240_v28  ;;  %5341 = vmatpush.bf16.msra.mxu1 %v13528_v50  ;;  %v17721_v28 = vld [vmem:[%s27686_s1 + $0x1264] sm:$0xf]  ;;  %v13493_v50 = vld [vmem:[%s27686_s1 + $0x1270] sm:$0xf0]  ;;  %v13208_v61 = vor.u32 %v17649_v20, %v13205_v21  ;;  %v5068_v20 = vpop.f32.mrf.mxu2  ;;  %v5082_v21 = vpop.f32.mrf.mxu3 }
 0x158   :  { %5355 = vmatpush.bf16.msra.mxu2 %v13656_v52  ;;  %v17753_v52 = vld [vmem:[%s27686_s1 + $0x1364] sm:$0xf]  ;;  %v13496_v24 = vor.u32 %v17721_v28, %v13493_v50  ;;  %v13477_v54 = vld [vmem:[%s27686_s1 + $0x1250] sm:$0xf0]  ;;  %v13352_v28 = vor.u32 %v17685_v14, %v13349_v63  ;;  %v5069_v50 = vadd.f32 %v5068_v20, %v5055_v59 }
 0x159   :  { %v13624_v9 = vor.u32 %v17753_v52, %v13621_v62  ;;  %v13813_v49 = vld [vmem:[%s27686_s1 + $0x14f0] sm:$0xf0]  ;;  %v17681_v62 = vld [vmem:[%s27686_s1 + $0x1124] sm:$0xf]  ;;  %v13480_v14 = vor.u32 %v17717_v6, %v13477_v54 }
 0x15a   :  { %5328 = vmatpush.bf16.msra.mxu0 %v13384_v34  ;;  %v17645_v34 = vld [vmem:[%s27686_s1 + $0x1004] sm:$0xf]  ;;  %v20970_v2 = vadd.f32 %v5082_v21, %v5069_v50  ;;  %v13816_v59 = vor.u32 %v17801_v42, %v13813_v49  ;;  %v13797_v6 = vld [vmem:[%s27686_s1 + $0x14d0] sm:$0xf0] }
 0x15b   :  { %5316 = vmatpush.bf16.msra.mxu3 %v13224_v5  ;;  %5342 = vmatpush.bf16.msra.mxu1 %v13512_v11  ;;  %v13189_v5 = vld [vmem:[%s27686_s1 + $0x1010] sm:$0xf0]  ;;  %v17749_v11 = vld [vmem:[%s27686_s1 + $0x1344] sm:$0xf] }
 0x15c   :  { %5356 = vmatpush.bf16.msra.mxu2 %v13640_v16  ;;  %v13605_v16 = vld [vmem:[%s27686_s1 + $0x1350] sm:$0xf0]  ;;  %v13192_v52 = vor.u32 %v17645_v34, %v13189_v5  ;;  %v17713_v3 = vld [vmem:[%s27686_s1 + $0x1224] sm:$0xf] }
 0x15d   :  { %v13608_v63 = vor.u32 %v17749_v11, %v13605_v16  ;;  %v17745_v34 = vld [vmem:[%s27686_s1 + $0x1324] sm:$0xf]  ;;  %v13317_v11 = vld [vmem:[%s27686_s1 + $0x1110] sm:$0xf0] }
 0x15e   :  { %5329 = vmatpush.bf16.msra.mxu0 %v13368_v13  ;;  %v13333_v13 = vld [vmem:[%s27686_s1 + $0x1130] sm:$0xf0]  ;;  %v17797_v5 = vld [vmem:[%s27686_s1 + $0x14c4] sm:$0xf] }
 0x15f   :  { %5317 = vmatpush.bf16.msra.mxu3 %v13208_v61  ;;  %5343 = vmatpush.bf16.msra.mxu1 %v13496_v24  ;;  %v13461_v61 = vld [vmem:[%s27686_s1 + $0x1230] sm:$0xf0]  ;;  %v17677_v54 = vld [vmem:[%s27686_s1 + $0x1104] sm:$0xf]  ;;  %v13800_v50 = vor.u32 %v17797_v5, %v13797_v6 }
 0x160   :  { %5357 = vmatpush.bf16.msra.mxu2 %v13624_v9  ;;  %v13589_v24 = vld [vmem:[%s27686_s1 + $0x1330] sm:$0xf0]  ;;  %v13336_v9 = vor.u32 %v17681_v62, %v13333_v13  ;;  %v17709_v16 = vld [vmem:[%s27686_s1 + $0x1204] sm:$0xf]  ;;  %v13464_v20 = vor.u32 %v17713_v3, %v13461_v61  ;;  %v13320_v13 = vor.u32 %v17677_v54, %v13317_v11 }
 0x161   :  { %v13592_v21 = vor.u32 %v17745_v34, %v13589_v24  ;;  %v17833_v42 = vld [vmem:[%s27686_s1 + $0x15e4] sm:$0xf]  ;;  %v13941_v49 = vld [vmem:[%s27686_s1 + $0x15f0] sm:$0xf0] }
 0x162   :  { %5330 = vmatpush.bf16.msra.mxu0 %v13352_v28  ;;  %v13445_v28 = vld [vmem:[%s27686_s1 + $0x1210] sm:$0xf0]  ;;  %v17793_v62 = vld [vmem:[%s27686_s1 + $0x14a4] sm:$0xf]  ;;  %v13944_v61 = vor.u32 %v17833_v42, %v13941_v49 }
 0x163   :  { %5318 = vmatpush.bf16.msra.mxu3 %v13192_v52  ;;  %5344 = vmatpush.bf16.msra.mxu1 %v13480_v14  ;;  %v17741_v52 = vld [vmem:[%s27686_s1 + $0x1304] sm:$0xf]  ;;  %v13573_v3 = vld [vmem:[%s27686_s1 + $0x1310] sm:$0xf0] }
 0x164   :  { %5358 = vmatpush.bf16.msra.mxu2 %v13608_v63  ;;  %v13781_v14 = vld [vmem:[%s27686_s1 + $0x14b0] sm:$0xf0]  ;;  %v17865_v63 = vld [vmem:[%s27686_s1 + $0x16e4] sm:$0xf]  ;;  %v13576_v5 = vor.u32 %v17741_v52, %v13573_v3 }
 0x165   :  { %v17889_v34 = vld [vmem:[%s27686_s1 + $0x17a4] sm:$0xf]  ;;  %v14165_v24 = vld [vmem:[%s27686_s1 + $0x17b0] sm:$0xf0]  ;;  %v13784_v6 = vor.u32 %v17793_v62, %v13781_v14 }
 0x166   :  { %5319 = vmatmul.bf16.vlgmr.msra.gmra.mxu3 %v19756_v51  ;;  %5331 = vmatpush.bf16.msra.mxu0 %v13336_v9  ;;  %v13448_v9 = vor.u32 %v17709_v16, %v13445_v28  ;;  %v17789_v11 = vld [vmem:[%s27686_s1 + $0x1484] sm:$0xf]  ;;  %v13925_v49 = vld [vmem:[%s27686_s1 + $0x15d0] sm:$0xf0]  ;;  %v12059_v51 = vld [vmem:[%s27686_s1 + $0x728] sm:$0xf] }
 0x167   :  { %5367 = vmatpush.bf16.msrb.mxu3 %v13816_v59  ;;  %v14069_v59 = vld [vmem:[%s27686_s1 + $0x16f0] sm:$0xf0]  ;;  %5345 = vmatpush.bf16.msra.mxu1 %v13464_v20  ;;  %v17829_v42 = vld [vmem:[%s27686_s1 + $0x15c4] sm:$0xf]  ;;  %v14168_v20 = vor.u32 %v17889_v34, %v14165_v24 }
 0x168   :  { %5359 = vmatpush.bf16.msra.mxu2 %v13592_v21  ;;  %v14072_v54 = vor.u32 %v17865_v63, %v14069_v59  ;;  %v13765_v16 = vld [vmem:[%s27686_s1 + $0x1490] sm:$0xf0]  ;;  %v17861_v21 = vld [vmem:[%s27686_s1 + $0x16c4] sm:$0xf]  ;;  %v13928_v3 = vor.u32 %v17829_v42, %v13925_v49 }
 0x169   :  { %v14053_v28 = vld [vmem:[%s27686_s1 + $0x16d0] sm:$0xf0]  ;;  %v13768_v62 = vor.u32 %v17789_v11, %v13765_v16  ;;  %v17785_v14 = vld [vmem:[%s27686_s1 + $0x1464] sm:$0xf] }
 0x16a   :  { %5332 = vmatpush.bf16.msra.mxu0 %v13320_v13  ;;  %v14149_v52 = vld [vmem:[%s27686_s1 + $0x1790] sm:$0xf0]  ;;  %v14056_v13 = vor.u32 %v17861_v21, %v14053_v28  ;;  %v17825_v63 = vld [vmem:[%s27686_s1 + $0x15a4] sm:$0xf] }
 0x16b   :  { %5368 = vmatpush.bf16.msrb.mxu3 %v13800_v50  ;;  %v17885_v50 = vld [vmem:[%s27686_s1 + $0x1784] sm:$0xf]  ;;  %5346 = vmatpush.bf16.msra.mxu1 %v13448_v9  ;;  %v13909_v59 = vld [vmem:[%s27686_s1 + $0x15b0] sm:$0xf0] }
 0x16c   :  { %5360 = vmatpush.bf16.msra.mxu2 %v13576_v5  ;;  %v13749_v34 = vld [vmem:[%s27686_s1 + $0x1470] sm:$0xf0]  ;;  %v17857_v24 = vld [vmem:[%s27686_s1 + $0x16a4] sm:$0xf] }
 0x16d   :  { %5333 = vmatmul.bf16.vlgmr.msra.gmra.mxu0 %v19769_v56  ;;  %v14037_v9 = vld [vmem:[%s27686_s1 + $0x16b0] sm:$0xf0]  ;;  %v17881_v5 = vld [vmem:[%s27686_s1 + $0x1764] sm:$0xf]  ;;  %v13752_v11 = vor.u32 %v17785_v14, %v13749_v34  ;;  %v17476_v56 = vld [vmem:[%s27686_s1 + $0xab4] sm:$0xf0] }
 0x16e   :  { %5381 = vmatpush.bf16.msrb.mxu0 %v13944_v61  ;;  %v14152_v61 = vor.u32 %v17885_v50, %v14149_v52  ;;  %5347 = vmatmul.bf16.vlgmr.msra.gmra.mxu1 %v19767_v55  ;;  %v14040_v42 = vor.u32 %v17857_v24, %v14037_v9  ;;  %v17781_v49 = vld [vmem:[%s27686_s1 + $0x1444] sm:$0xf]  ;;  %v13893_v16 = vld [vmem:[%s27686_s1 + $0x1590] sm:$0xf0] }
 0x16f   :  { %5369 = vmatpush.bf16.msrb.mxu3 %v13784_v6  ;;  %5395 = vmatpush.bf16.msrb.mxu1 %v14072_v54  ;;  %v14133_v6 = vld [vmem:[%s27686_s1 + $0x1770] sm:$0xf0]  ;;  %v13912_v54 = vor.u32 %v17825_v63, %v13909_v59  ;;  %v17853_v50 = vld [vmem:[%s27686_s1 + $0x1684] sm:$0xf] }
 0x170   :  { %5411 = vmatpush.bf16.msrb.mxu2 %v14168_v20  ;;  %v17821_v20 = vld [vmem:[%s27686_s1 + $0x1584] sm:$0xf]  ;;  %v14136_v21 = vor.u32 %v17881_v5, %v14133_v6  ;;  %v13733_v28 = vld [vmem:[%s27686_s1 + $0x1450] sm:$0xf0] }
 0x171   :  { %5361 = vmatmul.bf16.vlgmr.msra.gmra.mxu2 %v19777_v60  ;;  %v14021_v52 = vld [vmem:[%s27686_s1 + $0x1690] sm:$0xf0]  ;;  %v13736_v14 = vor.u32 %v17781_v49, %v13733_v28  ;;  %v17777_v59 = vld [vmem:[%s27686_s1 + $0x1424] sm:$0xf] }
 0x172   :  { %5382 = vmatpush.bf16.msrb.mxu0 %v13928_v3  ;;  %v17877_v3 = vld [vmem:[%s27686_s1 + $0x1744] sm:$0xf]  ;;  %v14024_v63 = vor.u32 %v17853_v50, %v14021_v52  ;;  %v13877_v34 = vld [vmem:[%s27686_s1 + $0x1570] sm:$0xf0] }
 0x173   :  { %5370 = vmatpush.bf16.msrb.mxu3 %v13768_v62  ;;  %5396 = vmatpush.bf16.msrb.mxu1 %v14056_v13  ;;  %v14117_v62 = vld [vmem:[%s27686_s1 + $0x1750] sm:$0xf0]  ;;  %v13896_v13 = vor.u32 %v17821_v20, %v13893_v16  ;;  %v17849_v5 = vld [vmem:[%s27686_s1 + $0x1664] sm:$0xf] }
 0x174   :  { %5412 = vmatpush.bf16.msrb.mxu2 %v14152_v61  ;;  %v17817_v61 = vld [vmem:[%s27686_s1 + $0x1564] sm:$0xf]  ;;  %v14120_v24 = vor.u32 %v17877_v3, %v14117_v62  ;;  %v13717_v9 = vld [vmem:[%s27686_s1 + $0x1430] sm:$0xf0] }
 0x175   :  { %v14005_v6 = vld [vmem:[%s27686_s1 + $0x1670] sm:$0xf0]  ;;  %v17773_v49 = vld [vmem:[%s27686_s1 + $0x1404] sm:$0xf]  ;;  %v13720_v20 = vor.u32 %v17777_v59, %v13717_v9  ;;  %v17196_v59 = vld [vmem:[%s27686_s1 + $0x1f4] sm:$0xf0] }
 0x176   :  { %5383 = vmatpush.bf16.msrb.mxu0 %v13912_v54  ;;  %v17873_v54 = vld [vmem:[%s27686_s1 + $0x1724] sm:$0xf]  ;;  %v14008_v16 = vor.u32 %v17849_v5, %v14005_v6  ;;  %v13861_v50 = vld [vmem:[%s27686_s1 + $0x1550] sm:$0xf0] }
 0x177   :  { %5371 = vmatpush.bf16.msrb.mxu3 %v13752_v11  ;;  %5397 = vmatpush.bf16.msrb.mxu1 %v14040_v42  ;;  %v14101_v11 = vld [vmem:[%s27686_s1 + $0x1730] sm:$0xf0]  ;;  %v13880_v42 = vor.u32 %v17817_v61, %v13877_v34  ;;  %v17813_v28 = vld [vmem:[%s27686_s1 + $0x1544] sm:$0xf]  ;;  %v11259_v34 = vld [vmem:[%s27686_s1 + $0xe8] sm:$0xf] }
 0x178   :  { %5413 = vmatpush.bf16.msrb.mxu2 %v14136_v21  ;;  %v13701_v21 = vld [vmem:[%s27686_s1 + $0x1410] sm:$0xf0]  ;;  %v14104_v52 = vor.u32 %v17873_v54, %v14101_v11  ;;  %v17845_v3 = vld [vmem:[%s27686_s1 + $0x1644] sm:$0xf]  ;;  %v13864_v61 = vor.u32 %v17813_v28, %v13861_v50 }
 0x179   :  { %v13989_v62 = vld [vmem:[%s27686_s1 + $0x1650] sm:$0xf0]  ;;  %v13704_v9 = vor.u32 %v17773_v49, %v13701_v21  ;;  %v17809_v6 = vld [vmem:[%s27686_s1 + $0x1524] sm:$0xf]  ;;  %v17192_v21 = vld [vmem:[%s27686_s1 + $0x1d4] sm:$0xf0] }
 0x17a   :  { %5384 = vmatpush.bf16.msrb.mxu0 %v13896_v13  ;;  %v17869_v13 = vld [vmem:[%s27686_s1 + $0x1704] sm:$0xf]  ;;  %v13992_v5 = vor.u32 %v17845_v3, %v13989_v62  ;;  %v13845_v54 = vld [vmem:[%s27686_s1 + $0x1530] sm:$0xf0]  ;;  %v17160_v3 = vld [vmem:[%s27686_s1 + $0xd4] sm:$0xf0] }
 0x17b   :  { %5372 = vmatpush.bf16.msrb.mxu3 %v13736_v14  ;;  %5398 = vmatpush.bf16.msrb.mxu1 %v14024_v63  ;;  %v14085_v14 = vld [vmem:[%s27686_s1 + $0x1710] sm:$0xf0]  ;;  %v11387_v63 = vld [vmem:[%s27686_s1 + $0x1e8] sm:$0xf]  ;;  %v17841_v28 = vld [vmem:[%s27686_s1 + $0x1624] sm:$0xf]  ;;  %v13848_v50 = vor.u32 %v17809_v6, %v13845_v54 }
 0x17c   :  { %5414 = vmatpush.bf16.msrb.mxu2 %v14120_v24  ;;  %v17164_v24 = vld [vmem:[%s27686_s1 + $0xf4] sm:$0xf0]  ;;  %v14088_v11 = vor.u32 %v17869_v13, %v14085_v14  ;;  %v13973_v49 = vld [vmem:[%s27686_s1 + $0x1630] sm:$0xf0]  ;;  %v17805_v62 = vld [vmem:[%s27686_s1 + $0x1504] sm:$0xf] }
 0x17d   :  { %v13976_v13 = vor.u32 %v17841_v28, %v13973_v49  ;;  %v13829_v14 = vld [vmem:[%s27686_s1 + $0x1510] sm:$0xf0]  ;;  %v17188_v6 = vld [vmem:[%s27686_s1 + $0x1b4] sm:$0xf0]  ;;  %v11643_v54 = vld [vmem:[%s27686_s1 + $0x3e8] sm:$0xf] }
 0x17e   :  { %5385 = vmatpush.bf16.msrb.mxu0 %v13880_v42  ;;  %v11388_v42 = vor.u32 %v17196_v59, %v11387_v63  ;;  %v17837_v63 = vld [vmem:[%s27686_s1 + $0x1604] sm:$0xf]  ;;  %v13957_v59 = vld [vmem:[%s27686_s1 + $0x1610] sm:$0xf0]  ;;  %v11227_v28 = vld [vmem:[%s27686_s1 + $0xa8] sm:$0xf] }
 0x17f   :  { %5373 = vmatpush.bf16.msrb.mxu3 %v13720_v20  ;;  %5399 = vmatpush.bf16.msrb.mxu1 %v14008_v16  ;;  %v11260_v20 = vor.u32 %v17164_v24, %v11259_v34  ;;  %v11371_v16 = vld [vmem:[%s27686_s1 + $0x1c8] sm:$0xf]  ;;  %v17156_v49 = vld [vmem:[%s27686_s1 + $0xb4] sm:$0xf0] }
 0x180   :  { %5415 = vmatpush.bf16.msrb.mxu2 %v14104_v52  ;;  %v11243_v52 = vld [vmem:[%s27686_s1 + $0xc8] sm:$0xf] }
 0x181   :  { %v11355_v34 = vld [vmem:[%s27686_s1 + $0x1a8] sm:$0xf] }
 0x182   :  { %5386 = vmatpush.bf16.msrb.mxu0 %v13864_v61  ;;  %v11372_v61 = vor.u32 %v17192_v21, %v11371_v16  ;;  %v11515_v24 = vld [vmem:[%s27686_s1 + $0x2e8] sm:$0xf]  ;;  %v11356_v21 = vor.u32 %v17188_v6, %v11355_v34  ;;  %v17152_v34 = vld [vmem:[%s27686_s1 + $0x94] sm:$0xf0] }
 0x183   :  { %5374 = vmatpush.bf16.msrb.mxu3 %v13704_v9  ;;  %5400 = vmatpush.bf16.msrb.mxu1 %v13992_v5  ;;  %v17228_v9 = vld [vmem:[%s27686_s1 + $0x2f4] sm:$0xf0]  ;;  %v11244_v5 = vor.u32 %v17160_v3, %v11243_v52  ;;  %v11499_v3 = vld [vmem:[%s27686_s1 + $0x2c8] sm:$0xf] }
 0x184   :  { %5416 = vmatpush.bf16.msrb.mxu2 %v14088_v11  ;;  %v17260_v11 = vld [vmem:[%s27686_s1 + $0x3f4] sm:$0xf0]  ;;  %v11516_v16 = vor.u32 %v17228_v9, %v11515_v24  ;;  %v11323_v6 = vld [vmem:[%s27686_s1 + $0x168] sm:$0xf] }
 0x185   :  { %v11644_v52 = vor.u32 %v17260_v11, %v11643_v54  ;;  %v11483_v54 = vld [vmem:[%s27686_s1 + $0x2a8] sm:$0xf]  ;;  %v17220_v11 = vld [vmem:[%s27686_s1 + $0x2b4] sm:$0xf0] }
 0x186   :  { %5375 = vmatmul.bf16.vlgmr.msrb.gmra.mxu3 %v20006_v29  ;;  %5387 = vmatpush.bf16.msrb.mxu0 %v13848_v50  ;;  %v11339_v50 = vld [vmem:[%s27686_s1 + $0x188] sm:$0xf] }
 0x187   :  { %5437 = vmatpush.bf16.msra.mxu3 %v11388_v42  ;;  %v13832_v42 = vor.u32 %v17805_v62, %v13829_v14  ;;  %5401 = vmatpush.bf16.msrb.mxu1 %v13976_v13  ;;  %v17224_v62 = vld [vmem:[%s27686_s1 + $0x2d4] sm:$0xf0]  ;;  %v11228_v13 = vor.u32 %v17156_v49, %v11227_v28  ;;  %v11611_v49 = vld [vmem:[%s27686_s1 + $0x3a8] sm:$0xf] }
 0x188   :  { %5423 = vmatpush.bf16.msra.mxu2 %v11260_v20  ;;  %v13960_v20 = vor.u32 %v17837_v63, %v13957_v59  ;;  %v17184_v14 = vld [vmem:[%s27686_s1 + $0x194] sm:$0xf0]  ;;  %v11627_v63 = vld [vmem:[%s27686_s1 + $0x3c8] sm:$0xf]  ;;  %v11500_v24 = vor.u32 %v17224_v62, %v11499_v3 }
 0x189   :  { %14178 = vmatmul.msk.bf16.vlgmr.msrb.gmra.mxu2 %vm4747_vm0, %v19958_v0  ;;  %v17256_v59 = vld [vmem:[%s27686_s1 + $0x3d4] sm:$0xf0]  ;;  %v11340_v9 = vor.u32 %v17184_v14, %v11339_v50  ;;  %v11307_v62 = vld [vmem:[%s27686_s1 + $0x148] sm:$0xf] }
 0x18a   :  { %5388 = vmatpush.bf16.msrb.mxu0 %v13832_v42  ;;  %v17180_v28 = vld [vmem:[%s27686_s1 + $0x174] sm:$0xf0] }
 0x18b   :  { %5438 = vmatpush.bf16.msra.mxu3 %v11372_v61  ;;  %v11211_v61 = vld [vmem:[%s27686_s1 + $0x88] sm:$0xf]  ;;  %5402 = vmatpush.bf16.msrb.mxu1 %v13960_v20  ;;  %v17252_v20 = vld [vmem:[%s27686_s1 + $0x3b4] sm:$0xf0]  ;;  %v11324_v50 = vor.u32 %v17180_v28, %v11323_v6 }
 0x18c   :  { %5424 = vmatpush.bf16.msra.mxu2 %v11244_v5  ;;  %v11628_v5 = vor.u32 %v17256_v59, %v11627_v63  ;;  %v11212_v42 = vor.u32 %v17152_v34, %v11211_v61  ;;  %v11612_v3 = vor.u32 %v17252_v20, %v11611_v49  ;;  %v17216_v14 = vld [vmem:[%s27686_s1 + $0x294] sm:$0xf0]  ;;  %v11595_v61 = vld [vmem:[%s27686_s1 + $0x388] sm:$0xf] }
 0x18d   :  { %5389 = vmatmul.bf16.vlgmr.msrb.gmra.mxu0 %v20019_v45  ;;  %v17176_v59 = vld [vmem:[%s27686_s1 + $0x154] sm:$0xf0] }
 0x18e   :  { %5451 = vmatpush.bf16.msra.mxu0 %v11516_v16  ;;  %5403 = vmatmul.bf16.vlgmr.msrb.gmra.mxu1 %v20008_v33  ;;  %v11195_v16 = vld [vmem:[%s27686_s1 + $0x68] sm:$0xf]  ;;  %v17248_v34 = vld [vmem:[%s27686_s1 + $0x394] sm:$0xf0]  ;;  %v11308_v6 = vor.u32 %v17176_v59, %v11307_v62 }
 0x18f   :  { %5439 = vmatpush.bf16.msra.mxu3 %v11356_v21  ;;  %5465 = vmatpush.bf16.msra.mxu1 %v11644_v52  ;;  %v17148_v21 = vld [vmem:[%s27686_s1 + $0x74] sm:$0xf0]  ;;  %v11484_v52 = vor.u32 %v17220_v11, %v11483_v54  ;;  %v11596_v54 = vor.u32 %v17248_v34, %v11595_v61  ;;  %v11291_v11 = vld [vmem:[%s27686_s1 + $0x128] sm:$0xf] }
 0x190   :  { %5425 = vmatpush.bf16.msra.mxu2 %v11228_v13  ;;  %v11467_v13 = vld [vmem:[%s27686_s1 + $0x288] sm:$0xf]  ;;  %v11196_v63 = vor.u32 %v17148_v21, %v11195_v16  ;;  %v17212_v28 = vld [vmem:[%s27686_s1 + $0x274] sm:$0xf0] }
 0x191   :  { %v17172_v20 = vld [vmem:[%s27686_s1 + $0x134] sm:$0xf0]  ;;  %v11579_v16 = vld [vmem:[%s27686_s1 + $0x368] sm:$0xf] }
 0x192   :  { %5452 = vmatpush.bf16.msra.mxu0 %v11500_v24  ;;  %v11179_v24 = vld [vmem:[%s27686_s1 + $0x48] sm:$0xf]  ;;  %v17244_v21 = vld [vmem:[%s27686_s1 + $0x374] sm:$0xf0]  ;;  %v11292_v62 = vor.u32 %v17172_v20, %v11291_v11 }
 0x193   :  { %5440 = vmatpush.bf16.msra.mxu3 %v11340_v9  ;;  %5466 = vmatpush.bf16.msra.mxu1 %v11628_v5  ;;  %v17144_v9 = vld [vmem:[%s27686_s1 + $0x54] sm:$0xf0]  ;;  %v11468_v5 = vor.u32 %v17216_v14, %v11467_v13  ;;  %v11580_v13 = vor.u32 %v17244_v21, %v11579_v16  ;;  %v11147_v14 = vld [vmem:[%s27686_s1 + $0x8] sm:$0xf] }
 0x194   :  { %5426 = vmatpush.bf16.msra.mxu2 %v11212_v42  ;;  %v11451_v42 = vld [vmem:[%s27686_s1 + $0x268] sm:$0xf]  ;;  %v11180_v49 = vor.u32 %v17144_v9, %v11179_v24  ;;  %v17208_v61 = vld [vmem:[%s27686_s1 + $0x254] sm:$0xf0] }
 0x195   :  { %v11435_v59 = vld [vmem:[%s27686_s1 + $0x248] sm:$0xf]  ;;  %v17168_v24 = vld [vmem:[%s27686_s1 + $0x114] sm:$0xf0] }
 0x196   :  { %5453 = vmatpush.bf16.msra.mxu0 %v11484_v52  ;;  %v11163_v52 = vld [vmem:[%s27686_s1 + $0x28] sm:$0xf]  ;;  %v17324_v11 = vld [vmem:[%s27686_s1 + $0x5f4] sm:$0xf0] }
 0x197   :  { %5441 = vmatpush.bf16.msra.mxu3 %v11324_v50  ;;  %5467 = vmatpush.bf16.msra.mxu1 %v11612_v3  ;;  %v17140_v50 = vld [vmem:[%s27686_s1 + $0x34] sm:$0xf0]  ;;  %v11452_v3 = vor.u32 %v17212_v28, %v11451_v42  ;;  %v11563_v9 = vld [vmem:[%s27686_s1 + $0x348] sm:$0xf]  ;;  %v11436_v42 = vor.u32 %v17208_v61, %v11435_v59 }
 0x198   :  { %5427 = vmatpush.bf16.msra.mxu2 %v11196_v63  ;;  %v11275_v63 = vld [vmem:[%s27686_s1 + $0x108] sm:$0xf]  ;;  %v11164_v34 = vor.u32 %v17140_v50, %v11163_v52  ;;  %v17204_v52 = vld [vmem:[%s27686_s1 + $0x234] sm:$0xf0] }
 0x199   :  { %v11771_v28 = vld [vmem:[%s27686_s1 + $0x4e8] sm:$0xf]  ;;  %v11276_v20 = vor.u32 %v17168_v24, %v11275_v63  ;;  %v17320_v61 = vld [vmem:[%s27686_s1 + $0x5d4] sm:$0xf0] }
 0x19a   :  { %5454 = vmatpush.bf16.msra.mxu0 %v11468_v5  ;;  %v17240_v5 = vld [vmem:[%s27686_s1 + $0x354] sm:$0xf0]  ;;  %v11419_v21 = vld [vmem:[%s27686_s1 + $0x228] sm:$0xf] }
 0x19b   :  { %5442 = vmatpush.bf16.msra.mxu3 %v11308_v6  ;;  %5468 = vmatpush.bf16.msra.mxu1 %v11596_v54  ;;  %v17136_v6 = vld [vmem:[%s27686_s1 + $0x14] sm:$0xf0]  ;;  %v11899_v54 = vld [vmem:[%s27686_s1 + $0x5e8] sm:$0xf]  ;;  %v11564_v16 = vor.u32 %v17240_v5, %v11563_v9 }
 0x19c   :  { %5428 = vmatpush.bf16.msra.mxu2 %v11180_v49  ;;  %v17292_v49 = vld [vmem:[%s27686_s1 + $0x4f4] sm:$0xf0]  ;;  %v11148_v50 = vor.u32 %v17136_v6, %v11147_v14  ;;  %v11547_v59 = vld [vmem:[%s27686_s1 + $0x328] sm:$0xf]  ;;  %v11420_v14 = vor.u32 %v17204_v52, %v11419_v21 }
 0x19d   :  { %v11883_v63 = vld [vmem:[%s27686_s1 + $0x5c8] sm:$0xf]  ;;  %v17288_v24 = vld [vmem:[%s27686_s1 + $0x4d4] sm:$0xf0] }
 0x19e   :  { %5455 = vmatpush.bf16.msra.mxu0 %v11452_v3  ;;  %v11900_v3 = vor.u32 %v17324_v11, %v11899_v54  ;;  %v11403_v9 = vld [vmem:[%s27686_s1 + $0x208] sm:$0xf]  ;;  %v17200_v6 = vld [vmem:[%s27686_s1 + $0x214] sm:$0xf0] }
 0x19f   :  { %5443 = vmatpush.bf16.msra.mxu3 %v11292_v62  ;;  %5469 = vmatpush.bf16.msra.mxu1 %v11580_v13  ;;  %v17236_v62 = vld [vmem:[%s27686_s1 + $0x334] sm:$0xf0]  ;;  %v11772_v13 = vor.u32 %v17292_v49, %v11771_v28  ;;  %v11531_v54 = vld [vmem:[%s27686_s1 + $0x308] sm:$0xf] }
 0x1a0   :  { %5429 = vmatpush.bf16.msra.mxu2 %v11164_v34  ;;  %v11755_v34 = vld [vmem:[%s27686_s1 + $0x4c8] sm:$0xf]  ;;  %v11548_v5 = vor.u32 %v17236_v62, %v11547_v59  ;;  %v17232_v11 = vld [vmem:[%s27686_s1 + $0x314] sm:$0xf0] }
 0x1a1   :  { %v11867_v28 = vld [vmem:[%s27686_s1 + $0x5a8] sm:$0xf]  ;;  %v17316_v21 = vld [vmem:[%s27686_s1 + $0x5b4] sm:$0xf0] }
 0x1a2   :  { %5456 = vmatpush.bf16.msra.mxu0 %v11436_v42  ;;  %v11884_v42 = vor.u32 %v17320_v61, %v11883_v63  ;;  %v12027_v49 = vld [vmem:[%s27686_s1 + $0x6e8] sm:$0xf]  ;;  %v17284_v62 = vld [vmem:[%s27686_s1 + $0x4b4] sm:$0xf0]  ;;  %v21424_v61 = vpop.f32.mrf.mxu3 }
 0x1a3   :  { %5444 = vmatpush.bf16.msra.mxu3 %v11276_v20  ;;  %5470 = vmatpush.bf16.msra.mxu1 %v11564_v16  ;;  %v17356_v20 = vld [vmem:[%s27686_s1 + $0x6f4] sm:$0xf0]  ;;  %v11756_v16 = vor.u32 %v17288_v24, %v11755_v34  ;;  %v12155_v52 = vld [vmem:[%s27686_s1 + $0x7e8] sm:$0xf]  ;;  %27740 = vst [vmem:[#allocation27_spill] sm:$0xff] %v21424_v61 }
 0x1a4   :  { %5430 = vmatpush.bf16.msra.mxu2 %v11148_v50  ;;  %v17388_v50 = vld [vmem:[%s27686_s1 + $0x7f4] sm:$0xf0]  ;;  %v11739_v59 = vld [vmem:[%s27686_s1 + $0x4a8] sm:$0xf]  ;;  %v12028_v63 = vor.u32 %v17356_v20, %v12027_v49  ;;  %v21446_v49 = vpop.f32.mrf.mxu1  ;;  %v21448_v20 = vpop.f32.mrf.mxu2 }
 0x1a5   :  { %v12156_v34 = vor.u32 %v17388_v50, %v12155_v52  ;;  %v11851_v24 = vld [vmem:[%s27686_s1 + $0x588] sm:$0xf]  ;;  %27741 = vst [vmem:[#allocation28_spill] sm:$0xff] %v21448_v20 }
 0x1a6   :  { %5457 = vmatpush.bf16.msra.mxu0 %v11420_v14  ;;  %5445 = vmatmul.bf16.vlgmr.msra.gmra.mxu3 %v18886_v10  ;;  %v11868_v14 = vor.u32 %v17316_v21, %v11867_v28  ;;  %v17384_v28 = vld [vmem:[%s27686_s1 + $0x7d4] sm:$0xf0]  ;;  %v12443_v61 = vld [vmem:[%s27686_s1 + $0xa28] sm:$0xf] }
 0x1a7   :  { %5493 = vmatpush.bf16.msrb.mxu3 %v11900_v3  ;;  %v11404_v3 = vor.u32 %v17200_v6, %v11403_v9  ;;  %5471 = vmatpush.bf16.msra.mxu1 %v11548_v5  ;;  %v12011_v9 = vld [vmem:[%s27686_s1 + $0x6c8] sm:$0xf]  ;;  %v17352_v5 = vld [vmem:[%s27686_s1 + $0x6d4] sm:$0xf0]  ;;  %v21435_v6 = vpop.f32.mrf.mxu0 }
 0x1a8   :  { %5479 = vmatpush.bf16.msrb.mxu2 %v11772_v13  ;;  %v11532_v13 = vor.u32 %v17232_v11, %v11531_v54  ;;  %v11740_v54 = vor.u32 %v17284_v62, %v11739_v59  ;;  %v17312_v11 = vld [vmem:[%s27686_s1 + $0x594] sm:$0xf0]  ;;  %v12012_v52 = vor.u32 %v17352_v5, %v12011_v9  ;;  %v11835_v62 = vld [vmem:[%s27686_s1 + $0x568] sm:$0xf] }
 0x1a9   :  { %5431 = vmatmul.bf16.vlgmr.msra.gmra.mxu2 %v18850_v58  ;;  %v17280_v21 = vld [vmem:[%s27686_s1 + $0x494] sm:$0xf0]  ;;  %v11852_v50 = vor.u32 %v17312_v11, %v11851_v24  ;;  %v11707_v24 = vld [vmem:[%s27686_s1 + $0x468] sm:$0xf] }
 0x1aa   :  { %5458 = vmatpush.bf16.msra.mxu0 %v11404_v3  ;;  %v11995_v3 = vld [vmem:[%s27686_s1 + $0x6a8] sm:$0xf]  ;;  %v17348_v58 = vld [vmem:[%s27686_s1 + $0x6b4] sm:$0xf0] }
 0x1ab   :  { %5494 = vmatpush.bf16.msrb.mxu3 %v11884_v42  ;;  %v12139_v42 = vld [vmem:[%s27686_s1 + $0x7c8] sm:$0xf]  ;;  %5472 = vmatpush.bf16.msra.mxu1 %v11532_v13  ;;  %v17276_v9 = vld [vmem:[%s27686_s1 + $0x474] sm:$0xf0]  ;;  %v11996_v5 = vor.u32 %v17348_v58, %v11995_v3 }
 0x1ac   :  { %5480 = vmatpush.bf16.msrb.mxu2 %v11756_v16  ;;  %v11723_v16 = vld [vmem:[%s27686_s1 + $0x488] sm:$0xf]  ;;  %v12140_v59 = vor.u32 %v17384_v28, %v12139_v42  ;;  %v11708_v58 = vor.u32 %v17276_v9, %v11707_v24  ;;  %v21504_v3 = vpop.f32.mrf.mxu1  ;;  %v17340_v10 = vld [vmem:[%s27686_s1 + $0x674] sm:$0xf0] }
 0x1ad   :  { %v11724_v13 = vor.u32 %v17280_v21, %v11723_v16  ;;  %5459 = vmatmul.bf16.vlgmr.msra.gmra.mxu0 %v18864_v1  ;;  %v11819_v28 = vld [vmem:[%s27686_s1 + $0x548] sm:$0xf]  ;;  %v17344_v21 = vld [vmem:[%s27686_s1 + $0x694] sm:$0xf0] }
 0x1ae   :  { %5507 = vmatpush.bf16.msrb.mxu0 %v12028_v63  ;;  %v17308_v63 = vld [vmem:[%s27686_s1 + $0x574] sm:$0xf0]  ;;  %5473 = vmatmul.bf16.vlgmr.msra.gmra.mxu1 %v18900_v17  ;;  %v11979_v16 = vld [vmem:[%s27686_s1 + $0x688] sm:$0xf] }
 0x1af   :  { %5495 = vmatpush.bf16.msrb.mxu3 %v11868_v14  ;;  %5521 = vmatpush.bf16.msrb.mxu1 %v12156_v34  ;;  %v12123_v14 = vld [vmem:[%s27686_s1 + $0x7a8] sm:$0xf]  ;;  %v17380_v34 = vld [vmem:[%s27686_s1 + $0x7b4] sm:$0xf0]  ;;  %v11836_v11 = vor.u32 %v17308_v63, %v11835_v62  ;;  %v21506_v63 = vpop.f32.mrf.mxu2 }
 0x1b0   :  { %5481 = vmatpush.bf16.msrb.mxu2 %v11740_v54  ;;  %v21482_v54 = vpop.f32.mrf.mxu3  ;;  %v12124_v42 = vor.u32 %v17380_v34, %v12123_v14  ;;  %v17376_v62 = vld [vmem:[%s27686_s1 + $0x794] sm:$0xf0]  ;;  %v11980_v34 = vor.u32 %v17344_v21, %v11979_v16  ;;  %v11803_v17 = vld [vmem:[%s27686_s1 + $0x528] sm:$0xf] }
 0x1b1   :  { %v17272_v14 = vld [vmem:[%s27686_s1 + $0x454] sm:$0xf0]  ;;  %v11963_v1 = vld [vmem:[%s27686_s1 + $0x668] sm:$0xf] }
 0x1b2   :  { %5508 = vmatpush.bf16.msrb.mxu0 %v12012_v52  ;;  %v21493_v52 = vpop.f32.mrf.mxu0  ;;  %v17268_v16 = vld [vmem:[%s27686_s1 + $0x434] sm:$0xf0]  ;;  %v11964_v21 = vor.u32 %v17340_v10, %v11963_v1 }
 0x1b3   :  { %5496 = vmatpush.bf16.msrb.mxu3 %v11852_v50  ;;  %5522 = vmatpush.bf16.msrb.mxu1 %v12140_v59  ;;  %v17304_v50 = vld [vmem:[%s27686_s1 + $0x554] sm:$0xf0]  ;;  %v12107_v59 = vld [vmem:[%s27686_s1 + $0x788] sm:$0xf] }
 0x1b4   :  { %5482 = vmatpush.bf16.msrb.mxu2 %v11724_v13  ;;  %v11691_v13 = vld [vmem:[%s27686_s1 + $0x448] sm:$0xf]  ;;  %v11820_v24 = vor.u32 %v17304_v50, %v11819_v28  ;;  %v12108_v9 = vor.u32 %v17376_v62, %v12107_v59  ;;  %v17336_v1 = vld [vmem:[%s27686_s1 + $0x654] sm:$0xf0]  ;;  %v21578_v0 = vpop.f32.mrf.mxu1 }
 0x1b5   :  { %v11692_v33 = vor.u32 %v17272_v14, %v11691_v13  ;;  %v11675_v28 = vld [vmem:[%s27686_s1 + $0x428] sm:$0xf] }
 0x1b6   :  { %5509 = vmatpush.bf16.msrb.mxu0 %v11996_v5  ;;  %v17300_v5 = vld [vmem:[%s27686_s1 + $0x534] sm:$0xf0]  ;;  %v11659_v59 = vld [vmem:[%s27686_s1 + $0x408] sm:$0xf]  ;;  %v11676_v10 = vor.u32 %v17268_v16, %v11675_v28 }
 0x1b7   :  { %5497 = vmatpush.bf16.msrb.mxu3 %v11836_v11  ;;  %5523 = vmatpush.bf16.msrb.mxu1 %v12124_v42  ;;  %v12091_v11 = vld [vmem:[%s27686_s1 + $0x768] sm:$0xf]  ;;  %v17372_v42 = vld [vmem:[%s27686_s1 + $0x774] sm:$0xf0]  ;;  %v21580_v29 = vpop.f32.mrf.mxu2 }
 0x1b8   :  { %5483 = vmatpush.bf16.msrb.mxu2 %v11708_v58  ;;  %v11804_v58 = vor.u32 %v17300_v5, %v11803_v17  ;;  %v12092_v50 = vor.u32 %v17372_v42, %v12091_v11  ;;  %v11787_v62 = vld [vmem:[%s27686_s1 + $0x508] sm:$0xf]  ;;  %v17296_v17 = vld [vmem:[%s27686_s1 + $0x514] sm:$0xf0] }
 0x1b9   :  { %v11947_v13 = vld [vmem:[%s27686_s1 + $0x648] sm:$0xf]  ;;  %v17452_v5 = vld [vmem:[%s27686_s1 + $0x9f4] sm:$0xf0]  ;;  %v11788_v45 = vor.u32 %v17296_v17, %v11787_v62 }
 0x1ba   :  { %5510 = vmatpush.bf16.msrb.mxu0 %v11980_v34  ;;  %v12075_v14 = vld [vmem:[%s27686_s1 + $0x748] sm:$0xf]  ;;  %v17368_v34 = vld [vmem:[%s27686_s1 + $0x754] sm:$0xf0]  ;;  %v21570_v11 = vpop.f32.mrf.mxu0  ;;  %v11948_v42 = vor.u32 %v17336_v1, %v11947_v13 }
 0x1bb   :  { %5498 = vmatpush.bf16.msrb.mxu3 %v11820_v24  ;;  %5524 = vmatpush.bf16.msrb.mxu1 %v12108_v9  ;;  %v21559_v24 = vpop.f32.mrf.mxu3  ;;  %v17264_v9 = vld [vmem:[%s27686_s1 + $0x414] sm:$0xf0]  ;;  %v12283_v28 = vld [vmem:[%s27686_s1 + $0x8e8] sm:$0xf]  ;;  %v12076_v60 = vor.u32 %v17368_v34, %v12075_v14 }
 0x1bc   :  { %5484 = vmatpush.bf16.msrb.mxu2 %v11692_v33  ;;  %v12411_v33 = vld [vmem:[%s27686_s1 + $0x9e8] sm:$0xf]  ;;  %v17420_v16 = vld [vmem:[%s27686_s1 + $0x8f4] sm:$0xf0]  ;;  %v11660_v1 = vor.u32 %v17264_v9, %v11659_v59 }
 0x1bd   :  { %v17332_v13 = vld [vmem:[%s27686_s1 + $0x634] sm:$0xf0]  ;;  %v12412_v55 = vor.u32 %v17452_v5, %v12411_v33  ;;  %v12395_v62 = vld [vmem:[%s27686_s1 + $0x9c8] sm:$0xf] }
 0x1be   :  { %5511 = vmatpush.bf16.msrb.mxu0 %v11964_v21  ;;  %v11931_v21 = vld [vmem:[%s27686_s1 + $0x628] sm:$0xf]  ;;  %v17448_v17 = vld [vmem:[%s27686_s1 + $0x9d4] sm:$0xf0] }
 0x1bf   :  { %5499 = vmatpush.bf16.msrb.mxu3 %v11804_v58  ;;  %5525 = vmatpush.bf16.msrb.mxu1 %v12092_v50  ;;  %v17364_v58 = vld [vmem:[%s27686_s1 + $0x734] sm:$0xf0]  ;;  %v12284_v50 = vor.u32 %v17420_v16, %v12283_v28  ;;  %v11932_v59 = vor.u32 %v17332_v13, %v11931_v21  ;;  %v11915_v34 = vld [vmem:[%s27686_s1 + $0x608] sm:$0xf]  ;;  %v12396_v28 = vor.u32 %v17448_v17, %v12395_v62 }
 0x1c0   :  { %5485 = vmatpush.bf16.msrb.mxu2 %v11676_v10  ;;  %v12267_v10 = vld [vmem:[%s27686_s1 + $0x8c8] sm:$0xf]  ;;  %v17416_v14 = vld [vmem:[%s27686_s1 + $0x8d4] sm:$0xf0]  ;;  %v12060_v9 = vor.u32 %v17364_v58, %v12059_v51 }
 0x1c1   :  { %v17328_v33 = vld [vmem:[%s27686_s1 + $0x614] sm:$0xf0]  ;;  %v12043_v5 = vld [vmem:[%s27686_s1 + $0x708] sm:$0xf]  ;;  %v12268_v16 = vor.u32 %v17416_v14, %v12267_v10 }
 0x1c2   :  { %5512 = vmatpush.bf16.msrb.mxu0 %v11948_v42  ;;  %v17360_v42 = vld [vmem:[%s27686_s1 + $0x714] sm:$0xf0]  ;;  %v12539_v51 = vld [vmem:[%s27686_s1 + $0xae8] sm:$0xf]  ;;  %v21646_v14 = vpop.f32.mrf.mxu0 }
 0x1c3   :  { %5500 = vmatpush.bf16.msrb.mxu3 %v11788_v45  ;;  %5526 = vmatpush.bf16.msrb.mxu1 %v12076_v60  ;;  %v12379_v60 = vld [vmem:[%s27686_s1 + $0x9a8] sm:$0xf]  ;;  %v17484_v45 = vld [vmem:[%s27686_s1 + $0xaf4] sm:$0xf0]  ;;  %v21643_v62 = vpop.f32.mrf.mxu3  ;;  %v12044_v17 = vor.u32 %v17360_v42, %v12043_v5  ;;  %v21659_v5 = vpop.f32.mrf.mxu2 }
 0x1c4   :  { %5486 = vmatpush.bf16.msrb.mxu2 %v11660_v1  ;;  %v17444_v21 = vld [vmem:[%s27686_s1 + $0x9b4] sm:$0xf0]  ;;  %v11916_v1 = vor.u32 %v17328_v33, %v11915_v34  ;;  %v12251_v58 = vld [vmem:[%s27686_s1 + $0x8a8] sm:$0xf]  ;;  %v12540_v10 = vor.u32 %v17484_v45, %v12539_v51  ;;  %v21673_v45 = vld [vmem:[%s27687_s2] sm:$0xf] }
 0x1c5   :  { %v17516_v13 = vld [vmem:[%s27686_s1 + $0xbf4] sm:$0xf0]  ;;  %v12363_v33 = vld [vmem:[%s27686_s1 + $0x988] sm:$0xf] }
 0x1c6   :  { %5513 = vmatpush.bf16.msrb.mxu0 %v11932_v59  ;;  %5501 = vmatmul.bf16.vlgmr.msrb.gmra.mxu3 %v19085_v44  ;;  %v12380_v59 = vor.u32 %v17444_v21, %v12379_v60  ;;  %v12523_v44 = vld [vmem:[%s27686_s1 + $0xac8] sm:$0xf]  ;;  %v17512_v51 = vld [vmem:[%s27686_s1 + $0xbd4] sm:$0xf0] }
 0x1c7   :  { %5549 = vmatpush.bf16.msra.mxu3 %v12412_v55  ;;  %v12667_v55 = vld [vmem:[%s27686_s1 + $0xbe8] sm:$0xf]  ;;  %5487 = vmatmul.bf16.vlgmr.msrb.gmra.mxu2 %v19072_v39  ;;  %v17480_v39 = vld [vmem:[%s27686_s1 + $0xad4] sm:$0xf0] }
 0x1c8   :  { %5535 = vmatpush.bf16.msra.mxu2 %v12284_v50  ;;  %v17412_v50 = vld [vmem:[%s27686_s1 + $0x8b4] sm:$0xf0]  ;;  %5527 = vmatpush.bf16.msrb.mxu1 %v12060_v9  ;;  %v12668_v34 = vor.u32 %v17516_v13, %v12667_v55  ;;  %v21657_v9 = vpop.f32.mrf.mxu1  ;;  %v12651_v60 = vld [vmem:[%s27686_s1 + $0xbc8] sm:$0xf]  ;;  %v12524_v13 = vor.u32 %v17480_v39, %v12523_v44 }
 0x1c9   :  { %v12252_v42 = vor.u32 %v17412_v50, %v12251_v58  ;;  %v12235_v21 = vld [vmem:[%s27686_s1 + $0x888] sm:$0xf]  ;;  %v17408_v55 = vld [vmem:[%s27686_s1 + $0x894] sm:$0xf0]  ;;  %v12652_v50 = vor.u32 %v17512_v51, %v12651_v60 }
 0x1ca   :  { %5514 = vmatpush.bf16.msrb.mxu0 %v11916_v1  ;;  %v12507_v1 = vld [vmem:[%s27686_s1 + $0xaa8] sm:$0xf]  ;;  %v12236_v39 = vor.u32 %v17408_v55, %v12235_v21  ;;  %v17436_v44 = vld [vmem:[%s27686_s1 + $0x974] sm:$0xf0] }
 0x1cb   :  { %5550 = vmatpush.bf16.msra.mxu3 %v12396_v28  ;;  %v17440_v28 = vld [vmem:[%s27686_s1 + $0x994] sm:$0xf0]  ;;  %v12491_v21 = vld [vmem:[%s27686_s1 + $0xa88] sm:$0xf] }
 0x1cc   :  { %5536 = vmatpush.bf16.msra.mxu2 %v12268_v16  ;;  %5528 = vmatpush.bf16.msrb.mxu1 %v12044_v17  ;;  %v12364_v58 = vor.u32 %v17440_v28, %v12363_v33  ;;  %v12347_v16 = vld [vmem:[%s27686_s1 + $0x968] sm:$0xf]  ;;  %v12508_v28 = vor.u32 %v17476_v56, %v12507_v1  ;;  %v17472_v55 = vld [vmem:[%s27686_s1 + $0xa94] sm:$0xf0] }
 0x1cd   :  { %5515 = vmatmul.bf16.vlgmr.msrb.gmra.mxu0 %v19083_v43  ;;  %v12635_v17 = vld [vmem:[%s27686_s1 + $0xba8] sm:$0xf]  ;;  %v12348_v60 = vor.u32 %v17436_v44, %v12347_v16  ;;  %v17504_v1 = vld [vmem:[%s27686_s1 + $0xb94] sm:$0xf0]  ;;  %v21735_v44 = vpop.f32.mrf.mxu0 }
 0x1ce   :  { %5563 = vmatpush.bf16.msra.mxu0 %v12540_v10  ;;  %v17508_v10 = vld [vmem:[%s27686_s1 + $0xbb4] sm:$0xf0]  ;;  %v12219_v33 = vld [vmem:[%s27686_s1 + $0x868] sm:$0xf] }
 0x1cf   :  { %5551 = vmatpush.bf16.msra.mxu3 %v12380_v59  ;;  %v27742_v59 = vperm.slane %v21673_v45, 1  ;;  %5529 = vmatmul.bf16.vlgmr.msrb.gmra.mxu1 %v19093_v47  ;;  %v12636_v51 = vor.u32 %v17508_v10, %v12635_v17  ;;  %v21745_v10 = vpop.f32.mrf.mxu2  ;;  %v17468_v47 = vld [vmem:[%s27686_s1 + $0xa74] sm:$0xf0] }
 0x1d0   :  { %5577 = vmatpush.bf16.msra.mxu1 %v12668_v34  ;;  %5537 = vmatpush.bf16.msra.mxu2 %v12252_v42  ;;  %v17404_v42 = vld [vmem:[%s27686_s1 + $0x874] sm:$0xf0]  ;;  %v21743_v17 = vpop.f32.mrf.mxu1 }
 0x1d1   :  { %v5097_v34 = vadd.f32 %v21482_v54, %v27742_v59  ;;  %v12331_v54 = vld [vmem:[%s27686_s1 + $0x948] sm:$0xf]  ;;  %v27743_v59 = vperm.slane %v19791_v4, 0  ;;  %v12220_v16 = vor.u32 %v17404_v42, %v12219_v33  ;;  %v12492_v33 = vor.u32 %v17472_v55, %v12491_v21  ;;  %v17396_v55 = vld [vmem:[%s27686_s1 + $0x834] sm:$0xf0] }
 0x1d2   :  { %5564 = vmatpush.bf16.msra.mxu0 %v12524_v13  ;;  %v21723_v13 = vpop.f32.mrf.mxu3 }
 0x1d3   :  { %5552 = vmatpush.bf16.msra.mxu3 %v12364_v58  ;;  %v4763_v56 = vadd.f32 %v19995_v25, %v27743_v59  ;;  %v17432_v58 = vld [vmem:[%s27686_s1 + $0x954] sm:$0xf0]  ;;  %v5111_v4 = vadd.f32 %v21493_v52, %v5097_v34  ;;  %v12203_v25 = vld [vmem:[%s27686_s1 + $0x848] sm:$0xf] }
 0x1d4   :  { %5578 = vmatpush.bf16.msra.mxu1 %v12652_v50  ;;  %5538 = vmatpush.bf16.msra.mxu2 %v12236_v39  ;;  %v12619_v50 = vld [vmem:[%s27686_s1 + $0xb88] sm:$0xf]  ;;  %v17400_v39 = vld [vmem:[%s27686_s1 + $0x854] sm:$0xf0]  ;;  %v12332_v42 = vor.u32 %v17432_v58, %v12331_v54 }
 0x1d5   :  { %v12620_v52 = vor.u32 %v17504_v1, %v12619_v50  ;;  %v12315_v34 = vld [vmem:[%s27686_s1 + $0x928] sm:$0xf]  ;;  %v4777_v43 = vadd.f32 %v20021_v48, %v4763_v56  ;;  %v17500_v54 = vld [vmem:[%s27686_s1 + $0xb74] sm:$0xf0]  ;;  %v5125_v21 = vadd.f32 %v21504_v3, %v5111_v4 }
 0x1d6   :  { %5565 = vmatpush.bf16.msra.mxu0 %v12508_v28  ;;  %v12475_v59 = vld [vmem:[%s27686_s1 + $0xa68] sm:$0xf]  ;;  %v12204_v28 = vor.u32 %v17400_v39, %v12203_v25 }
 0x1d7   :  { %5553 = vmatpush.bf16.msra.mxu3 %v12348_v60  ;;  %v17428_v60 = vld [vmem:[%s27686_s1 + $0x934] sm:$0xf0]  ;;  %v12187_v48 = vld [vmem:[%s27686_s1 + $0x828] sm:$0xf]  ;;  %v12476_v56 = vor.u32 %v17468_v47, %v12475_v59  ;;  %v21801_v59 = vpop.f32.mrf.mxu0 }
 0x1d8   :  { %5579 = vmatpush.bf16.msra.mxu1 %v12636_v51  ;;  %5539 = vmatpush.bf16.msra.mxu2 %v12220_v16  ;;  %v12603_v51 = vld [vmem:[%s27686_s1 + $0xb68] sm:$0xf]  ;;  %v27744_v16 = vperm.slane %v21673_v45, 1  ;;  %v12316_v50 = vor.u32 %v17428_v60, %v12315_v34  ;;  %v4791_v45 = vadd.f32 %v20050_v7, %v4777_v43  ;;  %v12188_v39 = vor.u32 %v17396_v55, %v12187_v48  ;;  %v17392_v43 = vld [vmem:[%s27686_s1 + $0x814] sm:$0xf0]  ;;  %v21812_v60 = vpop.f32.mrf.mxu1 }
 0x1d9   :  { %v12604_v1 = vor.u32 %v17500_v54, %v12603_v51  ;;  %v12171_v3 = vld [vmem:[%s27686_s1 + $0x808] sm:$0xf]  ;;  %v5139_v34 = vadd.f32 %v21506_v63, %v5125_v21  ;;  %v21814_v51 = vpop.f32.mrf.mxu2  ;;  %v17548_v21 = vld [vmem:[%s27686_s1 + $0xcf4] sm:$0xf0] }
 0x1da   :  { %5566 = vmatpush.bf16.msra.mxu0 %v12492_v33  ;;  %v5099_v58 = vadd.f32 %v21559_v24, %v27744_v16  ;;  %v12299_v4 = vld [vmem:[%s27686_s1 + $0x908] sm:$0xf]  ;;  %v17464_v24 = vld [vmem:[%s27686_s1 + $0xa54] sm:$0xf0]  ;;  %v21789_v25 = vpop.f32.mrf.mxu3 }
 0x1db   :  { %5554 = vmatpush.bf16.msra.mxu3 %v12332_v42  ;;  %v12459_v47 = vld [vmem:[%s27686_s1 + $0xa48] sm:$0xf]  ;;  %v17424_v33 = vld [vmem:[%s27686_s1 + $0x914] sm:$0xf0] }
 0x1dc   :  { %5580 = vmatpush.bf16.msra.mxu1 %v12620_v52  ;;  %5540 = vmatpush.bf16.msra.mxu2 %v12204_v28  ;;  %v12587_v42 = vld [vmem:[%s27686_s1 + $0xb48] sm:$0xf]  ;;  %v17496_v52 = vld [vmem:[%s27686_s1 + $0xb54] sm:$0xf0]  ;;  %v12460_v63 = vor.u32 %v17464_v24, %v12459_v47  ;;  %v5113_v48 = vadd.f32 %v21570_v11, %v5099_v58  ;;  %v12300_v55 = vor.u32 %v17424_v33, %v12299_v4 }
 0x1dd   :  { %v12923_v7 = vld [vmem:[%s27686_s1 + $0xde8] sm:$0xf]  ;;  %v17580_v28 = vld [vmem:[%s27686_s1 + $0xdf4] sm:$0xf0]  ;;  %v12588_v16 = vor.u32 %v17496_v52, %v12587_v42  ;;  %v4805_v47 = vadd.f32 %v20067_v18, %v4791_v45  ;;  %v12172_v24 = vor.u32 %v17392_v43, %v12171_v3 }
 0x1de   :  { %5567 = vmatpush.bf16.msra.mxu0 %v12476_v56  ;;  %v12795_v54 = vld [vmem:[%s27686_s1 + $0xce8] sm:$0xf]  ;;  %v17460_v56 = vld [vmem:[%s27686_s1 + $0xa34] sm:$0xf0]  ;;  %v12924_v20 = vor.u32 %v17580_v28, %v12923_v7  ;;  %v5127_v33 = vadd.f32 %v21578_v0, %v5113_v48 }
 0x1df   :  { %5555 = vmatpush.bf16.msra.mxu3 %v12316_v50  ;;  %v12571_v11 = vld [vmem:[%s27686_s1 + $0xb28] sm:$0xf]  ;;  %v17492_v58 = vld [vmem:[%s27686_s1 + $0xb34] sm:$0xf0]  ;;  %v5153_v50 = vadd.f32 %v21643_v62, %v5139_v34  ;;  %v12444_v3 = vor.u32 %v17460_v56, %v12443_v61  ;;  %v4819_v43 = vadd.f32 %v20226_v53, %v4805_v47 }
 0x1e0   :  { %5581 = vmatpush.bf16.msra.mxu1 %v12604_v1  ;;  %5541 = vmatpush.bf16.msra.mxu2 %v12188_v39  ;;  %v12796_v1 = vor.u32 %v17548_v21, %v12795_v54  ;;  %v12907_v4 = vld [vmem:[%s27686_s1 + $0xdc8] sm:$0xf]  ;;  %v17576_v18 = vld [vmem:[%s27686_s1 + $0xdd4] sm:$0xf0]  ;;  %v12572_v42 = vor.u32 %v17492_v58, %v12571_v11  ;;  %v5141_v47 = vadd.f32 %v21580_v29, %v5127_v33 }
 0x1e1   :  { %v12779_v45 = vld [vmem:[%s27686_s1 + $0xcc8] sm:$0xf]  ;;  %v17544_v39 = vld [vmem:[%s27686_s1 + $0xcd4] sm:$0xf0]  ;;  %v12908_v0 = vor.u32 %v17576_v18, %v12907_v4  ;;  %v5167_v54 = vadd.f32 %v21646_v14, %v5153_v50  ;;  %v4833_v50 = vadd.f32 %v20228_v57, %v4819_v43  ;;  %v21898_v4 = vpop.f32.mrf.mxu2 }
 0x1e2   :  { %5568 = vmatpush.bf16.msra.mxu0 %v12460_v63  ;;  %v12427_v62 = vld [vmem:[%s27686_s1 + $0xa08] sm:$0xf]  ;;  %v17456_v61 = vld [vmem:[%s27686_s1 + $0xa14] sm:$0xf0]  ;;  %v12780_v21 = vor.u32 %v17544_v39, %v12779_v45  ;;  %v5155_v43 = vadd.f32 %v21723_v13, %v5141_v47 }
 0x1e3   :  { %5556 = vmatpush.bf16.msra.mxu3 %v12300_v55  ;;  %v12555_v52 = vld [vmem:[%s27686_s1 + $0xb08] sm:$0xf]  ;;  %v17488_v34 = vld [vmem:[%s27686_s1 + $0xb14] sm:$0xf0]  ;;  %v21882_v55 = vpop.f32.mrf.mxu3  ;;  %v12428_v14 = vor.u32 %v17456_v61, %v12427_v62  ;;  %v5181_v57 = vadd.f32 %v21657_v9, %v5167_v54 }
 0x1e4   :  { %5582 = vmatpush.bf16.msra.mxu1 %v12588_v16  ;;  %5542 = vmatpush.bf16.msra.mxu2 %v12172_v24  ;;  %v12891_v7 = vld [vmem:[%s27686_s1 + $0xda8] sm:$0xf]  ;;  %v17612_v63 = vld [vmem:[%s27686_s1 + $0xef4] sm:$0xf0]  ;;  %v21892_v24 = vpop.f32.mrf.mxu0  ;;  %v12556_v11 = vor.u32 %v17488_v34, %v12555_v52  ;;  %v4847_v52 = vadd.f32 %v20275_v27, %v4833_v50  ;;  %v5169_v47 = vadd.f32 %v21735_v44, %v5155_v43 }
 0x1e5   :  { %v13051_v28 = vld [vmem:[%s27686_s1 + $0xee8] sm:$0xf]  ;;  %v17572_v53 = vld [vmem:[%s27686_s1 + $0xdb4] sm:$0xf0]  ;;  %v5195_v13 = vadd.f32 %v21659_v5, %v5181_v57 }
 0x1e6   :  { %v17644_v48 = vld [vmem:[%s27686_s1 + $0xff4] sm:$0xf0]  ;;  %5569 = vmatpush.bf16.msra.mxu0 %v12444_v3  ;;  %5557 = vmatmul.bf16.vlgmr.msra.gmra.mxu3 %v19313_v36  ;;  %v12763_v16 = vld [vmem:[%s27686_s1 + $0xca8] sm:$0xf]  ;;  %v13052_v58 = vor.u32 %v17612_v63, %v13051_v28  ;;  %v12892_v18 = vor.u32 %v17572_v53, %v12891_v7 }
 0x1e7   :  { %5605 = vmatpush.bf16.msrb.mxu3 %v12924_v20  ;;  %v13179_v20 = vld [vmem:[%s27686_s1 + $0xfe8] sm:$0xf]  ;;  %v17540_v56 = vld [vmem:[%s27686_s1 + $0xcb4] sm:$0xf0]  ;;  %5543 = vmatmul.bf16.vlgmr.msra.gmra.mxu2 %v19300_v31 }
 0x1e8   :  { %5591 = vmatpush.bf16.msrb.mxu2 %v12796_v1  ;;  %5583 = vmatpush.bf16.msra.mxu1 %v12572_v42  ;;  %v21896_v1 = vpop.f32.mrf.mxu1  ;;  %v13180_v3 = vor.u32 %v17644_v48, %v13179_v20  ;;  %v12875_v29 = vld [vmem:[%s27686_s1 + $0xd88] sm:$0xf]  ;;  %v17608_v39 = vld [vmem:[%s27686_s1 + $0xed4] sm:$0xf0]  ;;  %v12764_v62 = vor.u32 %v17540_v56, %v12763_v16 }
 0x1e9   :  { %v13035_v45 = vld [vmem:[%s27686_s1 + $0xec8] sm:$0xf]  ;;  %v17568_v33 = vld [vmem:[%s27686_s1 + $0xd94] sm:$0xf0] }
 0x1ea   :  { %v13163_v42 = vld [vmem:[%s27686_s1 + $0xfc8] sm:$0xf]  ;;  %v17640_v61 = vld [vmem:[%s27686_s1 + $0xfd4] sm:$0xf0]  ;;  %5570 = vmatpush.bf16.msra.mxu0 %v12428_v14  ;;  %v12876_v7 = vor.u32 %v17568_v33, %v12875_v29  ;;  %v4861_v14 = vadd.f32 %v20283_v37, %v4847_v52  ;;  %v5183_v52 = vadd.f32 %v21743_v17, %v5169_v47 }
 0x1eb   :  { %5606 = vmatpush.bf16.msrb.mxu3 %v12908_v0  ;;  %v12747_v9 = vld [vmem:[%s27686_s1 + $0xc88] sm:$0xf]  ;;  %v17536_v34 = vld [vmem:[%s27686_s1 + $0xc94] sm:$0xf0]  ;;  %v13036_v0 = vor.u32 %v17608_v39, %v13035_v45  ;;  %v13164_v28 = vor.u32 %v17640_v61, %v13163_v42  ;;  %v21948_v16 = vpop.f32.mrf.mxu3 }
 0x1ec   :  { %5592 = vmatpush.bf16.msrb.mxu2 %v12780_v21  ;;  %5584 = vmatpush.bf16.msra.mxu1 %v12556_v11  ;;  %v12859_v27 = vld [vmem:[%s27686_s1 + $0xd68] sm:$0xf]  ;;  %v17604_v54 = vld [vmem:[%s27686_s1 + $0xeb4] sm:$0xf0]  ;;  %v12748_v21 = vor.u32 %v17536_v34, %v12747_v9  ;;  %v5209_v11 = vadd.f32 %v21789_v25, %v5195_v13  ;;  %v4875_v50 = vadd.f32 %v20433_v19, %v4861_v14 }
 0x1ed   :  { %v13019_v63 = vld [vmem:[%s27686_s1 + $0xea8] sm:$0xf]  ;;  %5571 = vmatmul.bf16.vlgmr.msra.gmra.mxu0 %v19311_v35  ;;  %v17564_v53 = vld [vmem:[%s27686_s1 + $0xd74] sm:$0xf0] }
 0x1ee   :  { %5619 = vmatpush.bf16.msrb.mxu0 %v13052_v58  ;;  %v13147_v20 = vld [vmem:[%s27686_s1 + $0xfa8] sm:$0xf]  ;;  %v17636_v48 = vld [vmem:[%s27686_s1 + $0xfb4] sm:$0xf0]  ;;  %v21959_v58 = vpop.f32.mrf.mxu0  ;;  %v13020_v37 = vor.u32 %v17604_v54, %v13019_v63  ;;  %v12860_v29 = vor.u32 %v17564_v53, %v12859_v27  ;;  %v5223_v9 = vadd.f32 %v21801_v59, %v5209_v11  ;;  %v4889_v43 = vadd.f32 %v20441_v23, %v4875_v50 }
 0x1ef   :  { %5607 = vmatpush.bf16.msrb.mxu3 %v12892_v18  ;;  %5585 = vmatmul.bf16.vlgmr.msra.gmra.mxu1 %v19321_v40  ;;  %v12731_v5 = vld [vmem:[%s27686_s1 + $0xc68] sm:$0xf]  ;;  %v17532_v56 = vld [vmem:[%s27686_s1 + $0xc74] sm:$0xf0]  ;;  %v13148_v45 = vor.u32 %v17636_v48, %v13147_v20  ;;  %v5197_v59 = vadd.f32 %v21745_v10, %v5183_v52 }
 0x1f0   :  { %5633 = vmatpush.bf16.msrb.mxu1 %v13180_v3  ;;  %5593 = vmatpush.bf16.msrb.mxu2 %v12764_v62  ;;  %v21962_v18 = vpop.f32.mrf.mxu1  ;;  %v21964_v3 = vpop.f32.mrf.mxu2  ;;  %v12843_v44 = vld [vmem:[%s27686_s1 + $0xd48] sm:$0xf]  ;;  %v17600_v19 = vld [vmem:[%s27686_s1 + $0xe94] sm:$0xf0]  ;;  %v12732_v39 = vor.u32 %v17532_v56, %v12731_v5  ;;  %v5237_v20 = vadd.f32 %v21812_v60, %v5223_v9 }
 0x1f1   :  { %v13003_v25 = vld [vmem:[%s27686_s1 + $0xe88] sm:$0xf]  ;;  %v17560_v57 = vld [vmem:[%s27686_s1 + $0xd54] sm:$0xf0]  ;;  %v5211_v48 = vadd.f32 %v21882_v55, %v5197_v59 }
 0x1f2   :  { %5620 = vmatpush.bf16.msrb.mxu0 %v13036_v0  ;;  %v13131_v62 = vld [vmem:[%s27686_s1 + $0xf88] sm:$0xf]  ;;  %v17632_v33 = vld [vmem:[%s27686_s1 + $0xf94] sm:$0xf0]  ;;  %v13004_v34 = vor.u32 %v17600_v19, %v13003_v25  ;;  %v12844_v0 = vor.u32 %v17560_v57, %v12843_v44 }
 0x1f3   :  { %5608 = vmatpush.bf16.msrb.mxu3 %v12876_v7  ;;  %v12715_v42 = vld [vmem:[%s27686_s1 + $0xc48] sm:$0xf]  ;;  %v17528_v61 = vld [vmem:[%s27686_s1 + $0xc54] sm:$0xf0]  ;;  %v13132_v7 = vor.u32 %v17632_v33, %v13131_v62  ;;  %v22021_v5 = vpop.f32.mrf.mxu3 }
 0x1f4   :  { %5634 = vmatpush.bf16.msrb.mxu1 %v13164_v28  ;;  %5594 = vmatpush.bf16.msrb.mxu2 %v12748_v21  ;;  %v12827_v28 = vld [vmem:[%s27686_s1 + $0xd28] sm:$0xf]  ;;  %v17596_v17 = vld [vmem:[%s27686_s1 + $0xe74] sm:$0xf0]  ;;  %v12716_v23 = vor.u32 %v17528_v61, %v12715_v42  ;;  %v4903_v21 = vadd.f32 %v20488_v12, %v4889_v43  ;;  %v5225_v42 = vadd.f32 %v21892_v24, %v5211_v48 }
 0x1f5   :  { %v12987_v27 = vld [vmem:[%s27686_s1 + $0xe68] sm:$0xf]  ;;  %v17556_v63 = vld [vmem:[%s27686_s1 + $0xd34] sm:$0xf0] }
 0x1f6   :  { %5621 = vmatpush.bf16.msrb.mxu0 %v13020_v37  ;;  %v13115_v54 = vld [vmem:[%s27686_s1 + $0xf68] sm:$0xf]  ;;  %v17628_v13 = vld [vmem:[%s27686_s1 + $0xf74] sm:$0xf0]  ;;  %v12988_v14 = vor.u32 %v17596_v17, %v12987_v27  ;;  %v12828_v56 = vor.u32 %v17556_v63, %v12827_v28  ;;  %v5251_v37 = vadd.f32 %v21814_v51, %v5237_v20  ;;  %v22036_v50 = vpop.f32.mrf.mxu0  ;;  %v4917_v19 = vadd.f32 %v20490_v15, %v4903_v21 }
 0x1f7   :  { %5609 = vmatpush.bf16.msrb.mxu3 %v12860_v29  ;;  %v12699_v10 = vld [vmem:[%s27686_s1 + $0xc28] sm:$0xf]  ;;  %v17524_v53 = vld [vmem:[%s27686_s1 + $0xc34] sm:$0xf0]  ;;  %v13116_v12 = vor.u32 %v17628_v13, %v13115_v54  ;;  %v5239_v63 = vadd.f32 %v21896_v1, %v5225_v42 }
 0x1f8   :  { %5635 = vmatpush.bf16.msrb.mxu1 %v13148_v45  ;;  %5595 = vmatpush.bf16.msrb.mxu2 %v12732_v39  ;;  %v12683_v47 = vld [vmem:[%s27686_s1 + $0xc08] sm:$0xf]  ;;  %v17592_v55 = vld [vmem:[%s27686_s1 + $0xe54] sm:$0xf0]  ;;  %v12700_v29 = vor.u32 %v17524_v53, %v12699_v10  ;;  %v22048_v39 = vpop.f32.mrf.mxu1  ;;  %v22050_v51 = vpop.f32.mrf.mxu2  ;;  %v5265_v15 = vadd.f32 %v21948_v16, %v5251_v37 }
 0x1f9   :  { %v12811_v11 = vld [vmem:[%s27686_s1 + $0xd08] sm:$0xf]  ;;  %v17552_v45 = vld [vmem:[%s27686_s1 + $0xd14] sm:$0xf0] }
 0x1fa   :  { %5622 = vmatpush.bf16.msrb.mxu0 %v13004_v34  ;;  %v12971_v60 = vld [vmem:[%s27686_s1 + $0xe48] sm:$0xf]  ;;  %v17624_v25 = vld [vmem:[%s27686_s1 + $0xf54] sm:$0xf0]  ;;  %v4931_v34 = vadd.f32 %v20640_v22, %v4917_v19  ;;  %v12812_v43 = vor.u32 %v17552_v45, %v12811_v11  ;;  %v5279_v54 = vadd.f32 %v21959_v58, %v5265_v15 }
 0x1fb   :  { %5610 = vmatpush.bf16.msrb.mxu3 %v12844_v0  ;;  %v13099_v44 = vld [vmem:[%s27686_s1 + $0xf48] sm:$0xf]  ;;  %v17520_v57 = vld [vmem:[%s27686_s1 + $0xc14] sm:$0xf0]  ;;  %v12972_v61 = vor.u32 %v17592_v55, %v12971_v60  ;;  %v5320_v48 = vpop.f32.mrf.mxu3 }
 0x1fc   :  { %5636 = vmatpush.bf16.msrb.mxu1 %v13132_v7  ;;  %5596 = vmatpush.bf16.msrb.mxu2 %v12716_v23  ;;  %v13435_v62 = vld [vmem:[%s27686_s1 + $0x11e8] sm:$0xf]  ;;  %v17708_v33 = vld [vmem:[%s27686_s1 + $0x11f4] sm:$0xf0]  ;;  %v13100_v0 = vor.u32 %v17624_v25, %v13099_v44  ;;  %v12684_v7 = vor.u32 %v17520_v57, %v12683_v47  ;;  %v4945_v20 = vadd.f32 %v20651_v30, %v4931_v34 }
 0x1fd   :  { %v13307_v52 = vld [vmem:[%s27686_s1 + $0x10e8] sm:$0xf]  ;;  %v17676_v9 = vld [vmem:[%s27686_s1 + $0x10f4] sm:$0xf0]  ;;  %v13436_v28 = vor.u32 %v17708_v33, %v13435_v62  ;;  %v5293_v62 = vadd.f32 %v21962_v18, %v5279_v54 }
 0x1fe   :  { %5623 = vmatpush.bf16.msrb.mxu0 %v12988_v14  ;;  %v12955_v24 = vld [vmem:[%s27686_s1 + $0xe28] sm:$0xf]  ;;  %v17588_v16 = vld [vmem:[%s27686_s1 + $0xe34] sm:$0xf0]  ;;  %v13308_v17 = vor.u32 %v17676_v9, %v13307_v52  ;;  %v22110_v47 = vpop.f32.mrf.mxu0 }
 0x1ff   :  { %5611 = vmatpush.bf16.msrb.mxu3 %v12828_v56  ;;  %v13083_v27 = vld [vmem:[%s27686_s1 + $0xf28] sm:$0xf]  ;;  %v17620_v22 = vld [vmem:[%s27686_s1 + $0xf34] sm:$0xf0]  ;;  %v12956_v13 = vor.u32 %v17588_v16, %v12955_v24  ;;  %v5307_v18 = vadd.f32 %v21964_v3, %v5293_v62 }
 0x200   :  { %5637 = vmatpush.bf16.msrb.mxu1 %v13116_v12  ;;  %5597 = vmatpush.bf16.msrb.mxu2 %v12700_v29  ;;  %v13419_v59 = vld [vmem:[%s27686_s1 + $0x11c8] sm:$0xf]  ;;  %v17704_v23 = vld [vmem:[%s27686_s1 + $0x11d4] sm:$0xf0]  ;;  %v13084_v1 = vor.u32 %v17620_v22, %v13083_v27  ;;  %v5253_v12 = vadd.f32 %v21898_v4, %v5239_v63  ;;  %v22122_v4 = vpop.f32.mrf.mxu1  ;;  %v22124_v45 = vpop.f32.mrf.mxu2 }
 0x201   :  { %v13291_v21 = vld [vmem:[%s27686_s1 + $0x10c8] sm:$0xf]  ;;  %v17672_v10 = vld [vmem:[%s27686_s1 + $0x10d4] sm:$0xf0]  ;;  %v13420_v30 = vor.u32 %v17704_v23, %v13419_v59  ;;  %v5321_v59 = vadd.f32 %v5320_v48, %v5307_v18 }
 0x202   :  { %5624 = vmatpush.bf16.msrb.mxu0 %v12972_v61  ;;  %v12939_v53 = vld [vmem:[%s27686_s1 + $0xe08] sm:$0xf]  ;;  %v17584_v58 = vld [vmem:[%s27686_s1 + $0xe14] sm:$0xf0]  ;;  %v13292_v44 = vor.u32 %v17672_v10, %v13291_v21  ;;  %v5267_v33 = vadd.f32 %v22021_v5, %v5253_v12 }
 0x203   :  { %5612 = vmatpush.bf16.msrb.mxu3 %v12812_v43  ;;  %v13067_v14 = vld [vmem:[%s27686_s1 + $0xf08] sm:$0xf]  ;;  %v17616_v56 = vld [vmem:[%s27686_s1 + $0xf14] sm:$0xf0]  ;;  %v12940_v42 = vor.u32 %v17584_v58, %v12939_v53  ;;  %v5335_v12 = vadd.f32 %v22110_v47, %v5321_v59 }
 0x204   :  { %5638 = vmatpush.bf16.msrb.mxu1 %v13100_v0  ;;  %5598 = vmatpush.bf16.msrb.mxu2 %v12684_v7  ;;  %v13403_v11 = vld [vmem:[%s27686_s1 + $0x11a8] sm:$0xf]  ;;  %v17740_v55 = vld [vmem:[%s27686_s1 + $0x12f4] sm:$0xf0]  ;;  %v13068_v52 = vor.u32 %v17616_v56, %v13067_v14 }
 0x205   :  { %v13563_v60 = vld [vmem:[%s27686_s1 + $0x12e8] sm:$0xf]  ;;  %v17700_v25 = vld [vmem:[%s27686_s1 + $0x11b4] sm:$0xf0] }
 0x206   :  { %v27745_v37 = vld [vmem:[#allocation23_spill] sm:$0xff]  ;;  %v17772_v57 = vld [vmem:[%s27686_s1 + $0x13f4] sm:$0xf0]  ;;  %5625 = vmatpush.bf16.msrb.mxu0 %v12956_v13  ;;  %5613 = vmatmul.bf16.vlgmr.msrb.gmra.mxu3 %v19541_v41  ;;  %v13564_v9 = vor.u32 %v17740_v55, %v13563_v60  ;;  %v13404_v5 = vor.u32 %v17700_v25, %v13403_v11 }
 0x207   :  { %5661 = vmatpush.bf16.msra.mxu3 %v13436_v28  ;;  %v4959_v29 = vadd.f32 %v27745_v37, %v4945_v20  ;;  %v13691_v19 = vld [vmem:[%s27686_s1 + $0x13e8] sm:$0xf]  ;;  %v17668_v61 = vld [vmem:[%s27686_s1 + $0x10b4] sm:$0xf0]  ;;  %5599 = vmatmul.bf16.vlgmr.msrb.gmra.mxu2 %v19528_v32 }
 0x208   :  { %5647 = vmatpush.bf16.msra.mxu2 %v13308_v17  ;;  %v13275_v15 = vld [vmem:[%s27686_s1 + $0x10a8] sm:$0xf]  ;;  %5639 = vmatpush.bf16.msrb.mxu1 %v13084_v1  ;;  %v13692_v34 = vor.u32 %v17772_v57, %v13691_v19  ;;  %v17736_v24 = vld [vmem:[%s27686_s1 + $0x12d4] sm:$0xf0]  ;;  %v5281_v17 = vadd.f32 %v22036_v50, %v5267_v33  ;;  %v22202_v37 = vpop.f32.mrf.mxu1 }
 0x209   :  { %v13387_v43 = vld [vmem:[%s27686_s1 + $0x1188] sm:$0xf]  ;;  %v27746_v16 = vld [vmem:[#allocation24_spill] sm:$0xff]  ;;  %v13276_v28 = vor.u32 %v17668_v61, %v13275_v15  ;;  %v27747_v62 = vld [vmem:[#allocation25_spill] sm:$0xff] }
 0x20a   :  { %v13547_v0 = vld [vmem:[%s27686_s1 + $0x12c8] sm:$0xf]  ;;  %v4973_v7 = vadd.f32 %v27746_v16, %v4959_v29  ;;  %v17696_v3 = vld [vmem:[%s27686_s1 + $0x1194] sm:$0xf0]  ;;  %5626 = vmatpush.bf16.msrb.mxu0 %v12940_v42  ;;  %v5295_v56 = vadd.f32 %v22048_v39, %v5281_v17  ;;  %v22204_v29 = vpop.f32.mrf.mxu2 }
 0x20b   :  { %5662 = vmatpush.bf16.msra.mxu3 %v13420_v30  ;;  %v13675_v27 = vld [vmem:[%s27686_s1 + $0x13c8] sm:$0xf]  ;;  %v17768_v22 = vld [vmem:[%s27686_s1 + $0x13d4] sm:$0xf0]  ;;  %v13548_v13 = vor.u32 %v17736_v24, %v13547_v0  ;;  %v13388_v21 = vor.u32 %v17696_v3, %v13387_v43  ;;  %v5336_v30 = vpop.f32.mrf.mxu0 }
 0x20c   :  { %5648 = vmatpush.bf16.msra.mxu2 %v13292_v44  ;;  %v13259_v23 = vld [vmem:[%s27686_s1 + $0x1088] sm:$0xf]  ;;  %v17664_v63 = vld [vmem:[%s27686_s1 + $0x1094] sm:$0xf0]  ;;  %v4987_v54 = vadd.f32 %v20853_v26, %v4973_v7  ;;  %5640 = vmatpush.bf16.msrb.mxu1 %v13068_v52  ;;  %v13676_v10 = vor.u32 %v17768_v22, %v13675_v27  ;;  %v5322_v26 = vpop.f32.mrf.mxu3  ;;  %v5309_v47 = vadd.f32 %v22050_v51, %v5295_v56 }
 0x20d   :  { %v13371_v50 = vld [vmem:[%s27686_s1 + $0x1168] sm:$0xf]  ;;  %v17732_v20 = vld [vmem:[%s27686_s1 + $0x12b4] sm:$0xf0]  ;;  %5627 = vmatmul.bf16.vlgmr.msrb.gmra.mxu0 %v19539_v38  ;;  %v13260_v48 = vor.u32 %v17664_v63, %v13259_v23  ;;  %v5349_v52 = vadd.f32 %v22122_v4, %v5335_v12 }
 0x20e   :  { %5675 = vmatpush.bf16.msra.mxu0 %v13564_v9  ;;  %v13531_v53 = vld [vmem:[%s27686_s1 + $0x12a8] sm:$0xf]  ;;  %v17692_v1 = vld [vmem:[%s27686_s1 + $0x1174] sm:$0xf0]  ;;  %v5001_v55 = vadd.f32 %v20864_v8, %v4987_v54  ;;  %v5323_v9 = vadd.f32 %v5322_v26, %v5309_v47 }
 0x20f   :  { %5663 = vmatpush.bf16.msra.mxu3 %v13404_v5  ;;  %v13659_v58 = vld [vmem:[%s27686_s1 + $0x13a8] sm:$0xf]  ;;  %v17764_v14 = vld [vmem:[%s27686_s1 + $0x13b4] sm:$0xf0]  ;;  %5641 = vmatmul.bf16.vlgmr.msrb.gmra.mxu1 %v19549_v46  ;;  %v13532_v39 = vor.u32 %v17732_v20, %v13531_v53  ;;  %v13372_v44 = vor.u32 %v17692_v1, %v13371_v50  ;;  %v5363_v43 = vadd.f32 %v22124_v45, %v5349_v52 }
 0x210   :  { %5689 = vmatpush.bf16.msra.mxu1 %v13692_v34  ;;  %5649 = vmatpush.bf16.msra.mxu2 %v13276_v28  ;;  %v13243_v11 = vld [vmem:[%s27686_s1 + $0x1068] sm:$0xf]  ;;  %v17660_v60 = vld [vmem:[%s27686_s1 + $0x1074] sm:$0xf0]  ;;  %v13660_v25 = vor.u32 %v17764_v14, %v13659_v58  ;;  %v5015_v33 = vadd.f32 %v27747_v62, %v5001_v55  ;;  %v5337_v23 = vadd.f32 %v5336_v30, %v5323_v9  ;;  %v5404_v50 = vpop.f32.mrf.mxu1 }
 0x211   :  { %v13355_v19 = vld [vmem:[%s27686_s1 + $0x1148] sm:$0xf]  ;;  %v17728_v57 = vld [vmem:[%s27686_s1 + $0x1294] sm:$0xf0]  ;;  %v13244_v51 = vor.u32 %v17660_v60, %v13243_v11 }
 0x212   :  { %5676 = vmatpush.bf16.msra.mxu0 %v13548_v13  ;;  %v13515_v8 = vld [vmem:[%s27686_s1 + $0x1288] sm:$0xf]  ;;  %v17688_v42 = vld [vmem:[%s27686_s1 + $0x1154] sm:$0xf0]  ;;  %v5418_v53 = vpop.f32.mrf.mxu2  ;;  %v5351_v55 = vadd.f32 %v22202_v37, %v5337_v23 }
 0x213   :  { %5664 = vmatpush.bf16.msra.mxu3 %v13388_v21  ;;  %v13643_v15 = vld [vmem:[%s27686_s1 + $0x1388] sm:$0xf]  ;;  %v17760_v61 = vld [vmem:[%s27686_s1 + $0x1394] sm:$0xf0]  ;;  %v13516_v34 = vor.u32 %v17728_v57, %v13515_v8  ;;  %v13356_v0 = vor.u32 %v17688_v42, %v13355_v19  ;;  %v5390_v54 = vpop.f32.mrf.mxu0 }
 0x214   :  { %5690 = vmatpush.bf16.msra.mxu1 %v13676_v10  ;;  %5650 = vmatpush.bf16.msra.mxu2 %v13260_v48  ;;  %v13227_v18 = vld [vmem:[%s27686_s1 + $0x1048] sm:$0xf]  ;;  %v17656_v5 = vld [vmem:[%s27686_s1 + $0x1054] sm:$0xf0]  ;;  %v13644_v24 = vor.u32 %v17760_v61, %v13643_v15  ;;  %v5376_v45 = vpop.f32.mrf.mxu3 }
 0x215   :  { %v13339_v4 = vld [vmem:[%s27686_s1 + $0x1128] sm:$0xf]  ;;  %v17724_v7 = vld [vmem:[%s27686_s1 + $0x1274] sm:$0xf0]  ;;  %v13228_v27 = vor.u32 %v17656_v5, %v13227_v18  ;;  %v5377_v63 = vadd.f32 %v5376_v45, %v5363_v43 }
 0x216   :  { %5677 = vmatpush.bf16.msra.mxu0 %v13532_v39  ;;  %v13499_v16 = vld [vmem:[%s27686_s1 + $0x1268] sm:$0xf]  ;;  %v17684_v22 = vld [vmem:[%s27686_s1 + $0x1134] sm:$0xf0] }
 0x217   :  { %5665 = vmatpush.bf16.msra.mxu3 %v13372_v44  ;;  %v27748_v28 = vld [vmem:[#allocation26_spill] sm:$0xff]  ;;  %v17756_v59 = vld [vmem:[%s27686_s1 + $0x1374] sm:$0xf0]  ;;  %v13500_v20 = vor.u32 %v17724_v7, %v13499_v16  ;;  %v5391_v48 = vadd.f32 %v5390_v54, %v5377_v63  ;;  %v13340_v1 = vor.u32 %v17684_v22, %v13339_v4 }
 0x218   :  { %5691 = vmatpush.bf16.msra.mxu1 %v13660_v25  ;;  %v5029_v3 = vadd.f32 %v27748_v28, %v5015_v33  ;;  %5651 = vmatpush.bf16.msra.mxu2 %v13244_v51  ;;  %v13627_v17 = vld [vmem:[%s27686_s1 + $0x1368] sm:$0xf]  ;;  %v17652_v21 = vld [vmem:[%s27686_s1 + $0x1034] sm:$0xf0]  ;;  %v6095_v33 = vmax.f32 %v20970_v2, 0.0  ;;  %v5365_v51 = vadd.f32 %v22204_v29, %v5351_v55 }
 0x219   :  { %v13211_v13 = vld [vmem:[%s27686_s1 + $0x1028] sm:$0xf]  ;;  %v13628_v58 = vor.u32 %v17756_v59, %v13627_v17  ;;  %v17680_v14 = vld [vmem:[%s27686_s1 + $0x1114] sm:$0xf0]  ;;  %v5405_v39 = vadd.f32 %v5404_v50, %v5391_v48 }
 0x21a   :  { %v5043_v10 = vadd.f32 %v21435_v6, %v5029_v3  ;;  %5678 = vmatpush.bf16.msra.mxu0 %v13516_v34  ;;  %v13323_v26 = vld [vmem:[%s27686_s1 + $0x1108] sm:$0xf]  ;;  %v17720_v56 = vld [vmem:[%s27686_s1 + $0x1254] sm:$0xf0]  ;;  %v13212_v12 = vor.u32 %v17652_v21, %v13211_v13  ;;  %v5406_v3 = vpop.f32.mrf.mxu1 }
 0x21b   :  { %5666 = vmatpush.bf16.msra.mxu3 %v13356_v0  ;;  %v13483_v6 = vld [vmem:[%s27686_s1 + $0x1248] sm:$0xf]  ;;  %v17752_v60 = vld [vmem:[%s27686_s1 + $0x1354] sm:$0xf0]  ;;  %v13324_v8 = vor.u32 %v17680_v14, %v13323_v26  ;;  %v5419_v42 = vadd.f32 %v5418_v53, %v5405_v39  ;;  %v5392_v4 = vpop.f32.mrf.mxu0 }
 0x21c   :  { %5692 = vmatpush.bf16.msra.mxu1 %v13644_v24  ;;  %5652 = vmatpush.bf16.msra.mxu2 %v13228_v27  ;;  %v13195_v30 = vld [vmem:[%s27686_s1 + $0x1008] sm:$0xf]  ;;  %v17648_v47 = vld [vmem:[%s27686_s1 + $0x1014] sm:$0xf0]  ;;  %v5057_v19 = vadd.f32 %v21446_v49, %v5043_v10  ;;  %v13484_v57 = vor.u32 %v17720_v56, %v13483_v6  ;;  %v5378_v52 = vpop.f32.mrf.mxu3  ;;  %v5420_v10 = vpop.f32.mrf.mxu2 }
 0x21d   :  { %v13611_v11 = vld [vmem:[%s27686_s1 + $0x1348] sm:$0xf]  ;;  %v17836_v25 = vld [vmem:[%s27686_s1 + $0x15f4] sm:$0xf0]  ;;  %v13196_v9 = vor.u32 %v17648_v47, %v13195_v30  ;;  %v6096_v0 = vmax.f32 %v5419_v42, 0.0  ;;  %v5379_v24 = vadd.f32 %v5378_v52, %v5365_v51 }
 0x21e   :  { %v13947_v44 = vld [vmem:[%s27686_s1 + $0x15e8] sm:$0xf]  ;;  %5679 = vmatpush.bf16.msra.mxu0 %v13500_v20  ;;  %v17804_v62 = vld [vmem:[%s27686_s1 + $0x14f4] sm:$0xf0]  ;;  %v13612_v15 = vor.u32 %v17752_v60, %v13611_v11 }
 0x21f   :  { %v13819_v37 = vld [vmem:[%s27686_s1 + $0x14e8] sm:$0xf]  ;;  %5667 = vmatpush.bf16.msra.mxu3 %v13340_v1  ;;  %v17716_v61 = vld [vmem:[%s27686_s1 + $0x1234] sm:$0xf0]  ;;  %v13948_v18 = vor.u32 %v17836_v25, %v13947_v44  ;;  %v6103_v59 = vpack.c.bf16 %v6096_v0, %v6095_v33  ;;  %v5393_v23 = vadd.f32 %v5392_v4, %v5379_v24 }
 0x220   :  { %5693 = vmatpush.bf16.msra.mxu1 %v13628_v58  ;;  %v13467_v49 = vld [vmem:[%s27686_s1 + $0x1228] sm:$0xf]  ;;  %5653 = vmatpush.bf16.msra.mxu2 %v13212_v12  ;;  %v17748_v29 = vld [vmem:[%s27686_s1 + $0x1334] sm:$0xf0]  ;;  %v13820_v16 = vor.u32 %v17804_v62, %v13819_v37 }
 0x221   :  { %v13595_v2 = vld [vmem:[%s27686_s1 + $0x1328] sm:$0xf]  ;;  %v27749_v34 = vld [vmem:[#allocation28_spill] sm:$0xff]  ;;  %v13468_v45 = vor.u32 %v17716_v61, %v13467_v49  ;;  %6107 = vst [vmem:[#allocation2] sm:$0xff] %v6103_v59  ;;  %v5407_v58 = vadd.f32 %v5406_v3, %v5393_v23  ;;  %v27751_v12 = vld [vmem:[#allocation17_spill] sm:$0xff] }
 0x222   :  { %v13803_v5 = vld [vmem:[%s27686_s1 + $0x14c8] sm:$0xf]  ;;  %v5071_v43 = vadd.f32 %v27749_v34, %v5057_v19  ;;  %v17832_v28 = vld [vmem:[%s27686_s1 + $0x15d4] sm:$0xf0]  ;;  %5680 = vmatpush.bf16.msra.mxu0 %v13484_v57  ;;  %v13596_v63 = vor.u32 %v17748_v29, %v13595_v2 }
 0x223   :  { %v13931_v7 = vld [vmem:[%s27686_s1 + $0x15c8] sm:$0xf]  ;;  %v17800_v27 = vld [vmem:[%s27686_s1 + $0x14d4] sm:$0xf0]  ;;  %5668 = vmatpush.bf16.msra.mxu3 %v13324_v8  ;;  %v5421_v55 = vadd.f32 %v5420_v10, %v5407_v58 }
 0x224   :  { %v13451_v22 = vld [vmem:[%s27686_s1 + $0x1208] sm:$0xf]  ;;  %v17712_v17 = vld [vmem:[%s27686_s1 + $0x1214] sm:$0xf0]  ;;  %5694 = vmatpush.bf16.msra.mxu1 %v13612_v15  ;;  %5654 = vmatpush.bf16.msra.mxu2 %v13196_v9  ;;  %v13932_v50 = vor.u32 %v17832_v28, %v13931_v7  ;;  %v13804_v14 = vor.u32 %v17800_v27, %v13803_v5 }
 0x225   :  { %v13579_v54 = vld [vmem:[%s27686_s1 + $0x1308] sm:$0xf]  ;;  %v17744_v13 = vld [vmem:[%s27686_s1 + $0x1314] sm:$0xf0]  ;;  %v13452_v30 = vor.u32 %v17712_v17, %v13451_v22  ;;  %v6100_v51 = vmax.f32 %v5421_v55, 0.0 }
 0x226   :  { %v13915_v21 = vld [vmem:[%s27686_s1 + $0x15a8] sm:$0xf]  ;;  %v17828_v53 = vld [vmem:[%s27686_s1 + $0x15b4] sm:$0xf0]  ;;  %5681 = vmatpush.bf16.msra.mxu0 %v13468_v45  ;;  %5669 = vmatmul.bf16.vlgmr.msra.gmra.mxu3 %v27751_v12  ;;  %v13580_v47 = vor.u32 %v17744_v13, %v13579_v54 }
 0x227   :  { %5717 = vmatpush.bf16.msrb.mxu3 %v13948_v18  ;;  %v14075_v20 = vld [vmem:[%s27686_s1 + $0x16e8] sm:$0xf]  ;;  %v17868_v26 = vld [vmem:[%s27686_s1 + $0x16f4] sm:$0xf0]  ;;  %v13916_v19 = vor.u32 %v17828_v53, %v13915_v21 }
 0x228   :  { %v27750_v48 = vld [vmem:[#allocation27_spill] sm:$0xff]  ;;  %5703 = vmatpush.bf16.msrb.mxu2 %v13820_v16  ;;  %v17892_v56 = vld [vmem:[%s27686_s1 + $0x17b4] sm:$0xf0]  ;;  %5695 = vmatpush.bf16.msra.mxu1 %v13596_v63  ;;  %v14076_v44 = vor.u32 %v17868_v26, %v14075_v20  ;;  %v27754_v28 = vld [vmem:[#allocation18_spill] sm:$0xff] }
 0x229   :  { %v5085_v1 = vadd.f32 %v27750_v48, %v5071_v43  ;;  %v14171_v6 = vld [vmem:[%s27686_s1 + $0x17a8] sm:$0xf]  ;;  %v17796_v60 = vld [vmem:[%s27686_s1 + $0x14b4] sm:$0xf0]  ;;  %v22441_v26 = vld [vmem:[%s27687_s2] sm:$0xf] }
 0x22a   :  { %v13787_v11 = vld [vmem:[%s27686_s1 + $0x14a8] sm:$0xf]  ;;  %v14172_v8 = vor.u32 %v17892_v56, %v14171_v6  ;;  %v17824_v57 = vld [vmem:[%s27686_s1 + $0x1594] sm:$0xf0]  ;;  %5682 = vmatpush.bf16.msra.mxu0 %v13452_v30  ;;  %v822_v48 = vperm.slane %v22441_v26, 2 }
 0x22b   :  { %v27752_v39 = vld [vmem:[#allocation15_spill] sm:$0xff]  ;;  %5718 = vmatpush.bf16.msrb.mxu3 %v13932_v50  ;;  %v17864_v62 = vld [vmem:[%s27686_s1 + $0x16d4] sm:$0xf0]  ;;  %v6099_v33 = vmax.f32 %v5085_v1, 0.0  ;;  %v13788_v42 = vor.u32 %v17796_v60, %v13787_v11  ;;  %v14551_v26 = vld [vmem:[%s27688_s3 + $0x40] sm:$0xf] }
 0x22c   :  { %5655 = vmatmul.bf16.vlgmr.msra.gmra.mxu2 %v27752_v39  ;;  %v13899_v25 = vld [vmem:[%s27686_s1 + $0x1588] sm:$0xf]  ;;  %v17888_v49 = vld [vmem:[%s27686_s1 + $0x1794] sm:$0xf0]  ;;  %5696 = vmatpush.bf16.msra.mxu1 %v13580_v47 }
 0x22d   :  { %v14059_v37 = vld [vmem:[%s27686_s1 + $0x16c8] sm:$0xf]  ;;  %5704 = vmatpush.bf16.msrb.mxu2 %v13804_v14  ;;  %v17792_v52 = vld [vmem:[%s27686_s1 + $0x1494] sm:$0xf0]  ;;  %v6105_v9 = vpack.c.bf16 %v6100_v51, %v6099_v33  ;;  %v13900_v29 = vor.u32 %v17824_v57, %v13899_v25  ;;  %v5432_v25 = vpop.f32.mrf.mxu2 }
 0x22e   :  { %v14155_v15 = vld [vmem:[%s27686_s1 + $0x1788] sm:$0xf]  ;;  %5731 = vmatpush.bf16.msrb.mxu0 %v14076_v44  ;;  %v14060_v18 = vor.u32 %v17864_v62, %v14059_v37  ;;  %v17820_v34 = vld [vmem:[%s27686_s1 + $0x1574] sm:$0xf0] }
 0x22f   :  { %v13771_v61 = vld [vmem:[%s27686_s1 + $0x1488] sm:$0xf]  ;;  %5719 = vmatpush.bf16.msrb.mxu3 %v13916_v19  ;;  %v14156_v5 = vor.u32 %v17888_v49, %v14155_v15  ;;  %v17860_v0 = vld [vmem:[%s27686_s1 + $0x16b4] sm:$0xf0]  ;;  %6109 = vst [vmem:[#allocation2 + $0x10] sm:$0xff] %v6105_v9  ;;  %5697 = vmatmul.bf16.vlgmr.msra.gmra.mxu1 %v27754_v28  ;;  %v5446_v49 = vpop.f32.mrf.mxu3 }
 0x230   :  { %v13883_v2 = vld [vmem:[%s27686_s1 + $0x1568] sm:$0xf]  ;;  %5747 = vmatpush.bf16.msrb.mxu1 %v14172_v8  ;;  %v27753_v24 = vld [vmem:[#allocation16_spill] sm:$0xff]  ;;  %v13772_v4 = vor.u32 %v17792_v52, %v13771_v61  ;;  %v5433_v8 = vadd.f32 %v5432_v25, %v822_v48  ;;  %v11229_v25 = vld [vmem:[%s27686_s1 + $0xb8] sm:$0xf0] }
 0x231   :  { %v14043_v43 = vld [vmem:[%s27686_s1 + $0x16a8] sm:$0xf]  ;;  %5705 = vmatpush.bf16.msrb.mxu2 %v13788_v42  ;;  %5683 = vmatmul.bf16.vlgmr.msra.gmra.mxu0 %v27753_v24  ;;  %v17884_v7 = vld [vmem:[%s27686_s1 + $0x1774] sm:$0xf0]  ;;  %v13884_v22 = vor.u32 %v17820_v34, %v13883_v2  ;;  %v17194_v34 = vld [vmem:[%s27686_s1 + $0x1ec] sm:$0xf] }
 0x232   :  { %v14139_v16 = vld [vmem:[%s27686_s1 + $0x1768] sm:$0xf]  ;;  %v17788_v45 = vld [vmem:[%s27686_s1 + $0x1474] sm:$0xf0]  ;;  %5732 = vmatpush.bf16.msrb.mxu0 %v14060_v18  ;;  %v14044_v27 = vor.u32 %v17860_v0, %v14043_v43  ;;  %v5447_v2 = vadd.f32 %v5446_v49, %v5433_v8  ;;  %v5460_v43 = vpop.f32.mrf.mxu0 }
 0x233   :  { %v13755_v3 = vld [vmem:[%s27686_s1 + $0x1468] sm:$0xf]  ;;  %5720 = vmatpush.bf16.msrb.mxu3 %v13900_v29  ;;  %v14140_v17 = vor.u32 %v17884_v7, %v14139_v16  ;;  %v17856_v63 = vld [vmem:[%s27686_s1 + $0x1694] sm:$0xf0]  ;;  %v17162_v29 = vld [vmem:[%s27686_s1 + $0xec] sm:$0xf] }
 0x234   :  { %5748 = vmatpush.bf16.msrb.mxu1 %v14156_v5  ;;  %v13867_v59 = vld [vmem:[%s27686_s1 + $0x1548] sm:$0xf]  ;;  %v13756_v54 = vor.u32 %v17788_v45, %v13755_v3  ;;  %v17816_v13 = vld [vmem:[%s27686_s1 + $0x1554] sm:$0xf0]  ;;  %v11261_v5 = vld [vmem:[%s27686_s1 + $0xf8] sm:$0xf0]  ;;  %v5461_v3 = vadd.f32 %v5460_v43, %v5447_v2 }
 0x235   :  { %v14027_v23 = vld [vmem:[%s27686_s1 + $0x1688] sm:$0xf]  ;;  %5706 = vmatpush.bf16.msrb.mxu2 %v13772_v4  ;;  %v17880_v10 = vld [vmem:[%s27686_s1 + $0x1754] sm:$0xf0]  ;;  %v13868_v1 = vor.u32 %v17816_v13, %v13867_v59  ;;  %v11389_v4 = vld [vmem:[%s27686_s1 + $0x1f8] sm:$0xf0]  ;;  %v5474_v59 = vpop.f32.mrf.mxu1 }
 0x236   :  { %v14123_v21 = vld [vmem:[%s27686_s1 + $0x1748] sm:$0xf]  ;;  %v17784_v53 = vld [vmem:[%s27686_s1 + $0x1454] sm:$0xf0]  ;;  %5733 = vmatpush.bf16.msrb.mxu0 %v14044_v27  ;;  %v14028_v20 = vor.u32 %v17856_v63, %v14027_v23  ;;  %v17226_v16 = vld [vmem:[%s27686_s1 + $0x2ec] sm:$0xf]  ;;  %v11264_v63 = vor.u32 %v17162_v29, %v11261_v5  ;;  %v11392_v13 = vor.u32 %v17194_v34, %v11389_v4 }
 0x237   :  { %v13739_v50 = vld [vmem:[%s27686_s1 + $0x1448] sm:$0xf]  ;;  %5721 = vmatpush.bf16.msrb.mxu3 %v13884_v22  ;;  %v14124_v58 = vor.u32 %v17880_v10, %v14123_v21  ;;  %v17852_v56 = vld [vmem:[%s27686_s1 + $0x1674] sm:$0xf0]  ;;  %v11517_v7 = vld [vmem:[%s27686_s1 + $0x2f8] sm:$0xf0] }
 0x238   :  { %5749 = vmatpush.bf16.msrb.mxu1 %v14140_v17  ;;  %v13851_v14 = vld [vmem:[%s27686_s1 + $0x1528] sm:$0xf]  ;;  %v13740_v30 = vor.u32 %v17784_v53, %v13739_v50  ;;  %v17812_v11 = vld [vmem:[%s27686_s1 + $0x1534] sm:$0xf0]  ;;  %v11520_v21 = vor.u32 %v17226_v16, %v11517_v7  ;;  %v17158_v10 = vld [vmem:[%s27686_s1 + $0xcc] sm:$0xf]  ;;  %v22596_v16 = vpop.f32.mrf.mxu2 }
 0x239   :  { %v14011_v6 = vld [vmem:[%s27686_s1 + $0x1668] sm:$0xf]  ;;  %5707 = vmatpush.bf16.msrb.mxu2 %v13756_v54  ;;  %v17876_v55 = vld [vmem:[%s27686_s1 + $0x1734] sm:$0xf0]  ;;  %v13852_v57 = vor.u32 %v17812_v11, %v13851_v14  ;;  %v22518_v54 = vadd.f32 %v5474_v59, %v5461_v3  ;;  %v11245_v50 = vld [vmem:[%s27686_s1 + $0xd8] sm:$0xf0] }
 0x23a   :  { %v14107_v60 = vld [vmem:[%s27686_s1 + $0x1728] sm:$0xf]  ;;  %v17780_v44 = vld [vmem:[%s27686_s1 + $0x1434] sm:$0xf0]  ;;  %5734 = vmatpush.bf16.msrb.mxu0 %v14028_v20  ;;  %v14012_v19 = vor.u32 %v17852_v56, %v14011_v6  ;;  %v17190_v53 = vld [vmem:[%s27686_s1 + $0x1cc] sm:$0xf] }
 0x23b   :  { %v13723_v47 = vld [vmem:[%s27686_s1 + $0x1428] sm:$0xf]  ;;  %5722 = vmatpush.bf16.msrb.mxu3 %v13868_v1  ;;  %v14108_v37 = vor.u32 %v17876_v55, %v14107_v60  ;;  %v17776_v33 = vld [vmem:[%s27686_s1 + $0x1414] sm:$0xf0]  ;;  %v11373_v1 = vld [vmem:[%s27686_s1 + $0x1d8] sm:$0xf0] }
 0x23c   :  { %5750 = vmatpush.bf16.msrb.mxu1 %v14124_v58  ;;  %v13707_v62 = vld [vmem:[%s27686_s1 + $0x1408] sm:$0xf]  ;;  %v17848_v15 = vld [vmem:[%s27686_s1 + $0x1654] sm:$0xf0]  ;;  %v13724_v61 = vor.u32 %v17780_v44, %v13723_v47  ;;  %v17222_v58 = vld [vmem:[%s27686_s1 + $0x2cc] sm:$0xf]  ;;  %v11376_v55 = vor.u32 %v17190_v53, %v11373_v1 }
 0x23d   :  { %v13835_v51 = vld [vmem:[%s27686_s1 + $0x1508] sm:$0xf]  ;;  %5708 = vmatpush.bf16.msrb.mxu2 %v13740_v30  ;;  %v17808_v52 = vld [vmem:[%s27686_s1 + $0x1514] sm:$0xf0]  ;;  %v13708_v23 = vor.u32 %v17776_v33, %v13707_v62  ;;  %v11501_v14 = vld [vmem:[%s27686_s1 + $0x2d8] sm:$0xf0]  ;;  %v11248_v30 = vor.u32 %v17158_v10, %v11245_v50 }
 0x23e   :  { %v13995_v42 = vld [vmem:[%s27686_s1 + $0x1648] sm:$0xf]  ;;  %v17872_v18 = vld [vmem:[%s27686_s1 + $0x1714] sm:$0xf0]  ;;  %5735 = vmatpush.bf16.msrb.mxu0 %v14012_v19  ;;  %v13836_v45 = vor.u32 %v17808_v52, %v13835_v51  ;;  %v17258_v11 = vld [vmem:[%s27686_s1 + $0x3ec] sm:$0xf]  ;;  %v11504_v47 = vor.u32 %v17222_v58, %v11501_v14 }
 0x23f   :  { %v14091_v9 = vld [vmem:[%s27686_s1 + $0x1708] sm:$0xf]  ;;  %v13996_v0 = vor.u32 %v17848_v15, %v13995_v42  ;;  %5723 = vmatpush.bf16.msrb.mxu3 %v13852_v57  ;;  %v17844_v17 = vld [vmem:[%s27686_s1 + $0x1634] sm:$0xf0]  ;;  %v11645_v60 = vld [vmem:[%s27686_s1 + $0x3f8] sm:$0xf0] }
 0x240   :  { %5751 = vmatpush.bf16.msrb.mxu1 %v14108_v37  ;;  %v14092_v27 = vor.u32 %v17872_v18, %v14091_v9  ;;  %v13979_v22 = vld [vmem:[%s27686_s1 + $0x1628] sm:$0xf]  ;;  %v17840_v56 = vld [vmem:[%s27686_s1 + $0x1614] sm:$0xf0]  ;;  %v17154_v44 = vld [vmem:[%s27686_s1 + $0xac] sm:$0xf]  ;;  %v11648_v42 = vor.u32 %v17258_v11, %v11645_v60 }
 0x241   :  { %5709 = vmatpush.bf16.msrb.mxu2 %v13724_v61  ;;  %v13980_v20 = vor.u32 %v17844_v17, %v13979_v22  ;;  %v13963_v6 = vld [vmem:[%s27686_s1 + $0x1608] sm:$0xf]  ;;  %v17186_v19 = vld [vmem:[%s27686_s1 + $0x1ac] sm:$0xf]  ;;  %v11357_v37 = vld [vmem:[%s27686_s1 + $0x1b8] sm:$0xf0]  ;;  %v11232_v49 = vor.u32 %v17154_v44, %v11229_v25 }
 0x242   :  { %5736 = vmatpush.bf16.msrb.mxu0 %v13996_v0  ;;  %v27755_v8 = vld [vmem:[#allocation22_spill] sm:$0xff]  ;;  %v13964_v57 = vor.u32 %v17840_v56, %v13963_v6  ;;  %v17218_v62 = vld [vmem:[%s27686_s1 + $0x2ac] sm:$0xf]  ;;  %v11485_v33 = vld [vmem:[%s27686_s1 + $0x2b8] sm:$0xf0]  ;;  %v11360_v9 = vor.u32 %v17186_v19, %v11357_v37 }
 0x243   :  { %5724 = vmatpush.bf16.msrb.mxu3 %v13836_v45  ;;  %v27756_v51 = vld [vmem:[#allocation20_spill] sm:$0xff]  ;;  %v27757_v15 = vld [vmem:[#allocation19_spill] sm:$0xff]  ;;  %v11629_v52 = vld [vmem:[%s27686_s1 + $0x3d8] sm:$0xf0]  ;;  %v11488_v18 = vor.u32 %v17218_v62, %v11485_v33 }
 0x244   :  { %5752 = vmatpush.bf16.msrb.mxu1 %v14092_v27  ;;  %v17254_v61 = vld [vmem:[%s27686_s1 + $0x3cc] sm:$0xf]  ;;  %v11213_v29 = vld [vmem:[%s27686_s1 + $0x98] sm:$0xf0] }
 0x245   :  { %5710 = vmatpush.bf16.msrb.mxu2 %v13708_v23  ;;  %v17150_v2 = vld [vmem:[%s27686_s1 + $0x8c] sm:$0xf]  ;;  %v11341_v34 = vld [vmem:[%s27686_s1 + $0x198] sm:$0xf0]  ;;  %v11632_v4 = vor.u32 %v17254_v61, %v11629_v52 }
 0x246   :  { %5737 = vmatpush.bf16.msrb.mxu0 %v13980_v20  ;;  %5725 = vmatmul.bf16.vlgmr.msrb.gmra.mxu3 %v27755_v8  ;;  %v17182_v5 = vld [vmem:[%s27686_s1 + $0x18c] sm:$0xf]  ;;  %v11469_v0 = vld [vmem:[%s27686_s1 + $0x298] sm:$0xf0]  ;;  %v11216_v7 = vor.u32 %v17150_v2, %v11213_v29  ;;  %v22625_v20 = vpop.f32.mrf.mxu0 }
 0x247   :  { %5787 = vmatpush.bf16.msra.mxu3 %v11520_v21  ;;  %14179 = vmatmul.msk.bf16.vlgmr.msrb.gmra.mxu1 %vm4747_vm0, %v27757_v15  ;;  %v17214_v43 = vld [vmem:[%s27686_s1 + $0x28c] sm:$0xf]  ;;  %v11613_v45 = vld [vmem:[%s27686_s1 + $0x3b8] sm:$0xf0]  ;;  %v11344_v27 = vor.u32 %v17182_v5, %v11341_v34 }
 0x248   :  { %5759 = vmatpush.bf16.msra.mxu1 %v11264_v63  ;;  %5711 = vmatmul.bf16.vlgmr.msrb.gmra.mxu2 %v27756_v51  ;;  %v17250_v3 = vld [vmem:[%s27686_s1 + $0x3ac] sm:$0xf]  ;;  %v11472_v22 = vor.u32 %v17214_v43, %v11469_v0  ;;  %v11197_v59 = vld [vmem:[%s27686_s1 + $0x78] sm:$0xf0]  ;;  %v22613_v63 = vpop.f32.mrf.mxu3 }
 0x249   :  { %5773 = vmatpush.bf16.msra.mxu2 %v11392_v13  ;;  %v17146_v17 = vld [vmem:[%s27686_s1 + $0x6c] sm:$0xf]  ;;  %v27758_v13 = vld [vmem:[#allocation21_spill] sm:$0xff]  ;;  %v11616_v53 = vor.u32 %v17250_v3, %v11613_v45 }
 0x24a   :  { %5738 = vmatpush.bf16.msrb.mxu0 %v13964_v57  ;;  %v17178_v23 = vld [vmem:[%s27686_s1 + $0x16c] sm:$0xf]  ;;  %v11325_v21 = vld [vmem:[%s27686_s1 + $0x178] sm:$0xf0]  ;;  %v11200_v1 = vor.u32 %v17146_v17, %v11197_v59 }
 0x24b   :  { %5788 = vmatpush.bf16.msra.mxu3 %v11504_v47  ;;  %v17210_v10 = vld [vmem:[%s27686_s1 + $0x26c] sm:$0xf]  ;;  %v11453_v50 = vld [vmem:[%s27686_s1 + $0x278] sm:$0xf0]  ;;  %v11328_v6 = vor.u32 %v17178_v23, %v11325_v21 }
 0x24c   :  { %5760 = vmatpush.bf16.msra.mxu1 %v11248_v30  ;;  %v17246_v58 = vld [vmem:[%s27686_s1 + $0x38c] sm:$0xf]  ;;  %v11597_v14 = vld [vmem:[%s27686_s1 + $0x398] sm:$0xf0]  ;;  %v11456_v56 = vor.u32 %v17210_v10, %v11453_v50 }
 0x24d   :  { %5774 = vmatpush.bf16.msra.mxu2 %v11376_v55  ;;  %5739 = vmatmul.bf16.vlgmr.msrb.gmra.mxu0 %v27758_v13  ;;  %v17142_v30 = vld [vmem:[%s27686_s1 + $0x4c] sm:$0xf]  ;;  %v11181_v11 = vld [vmem:[%s27686_s1 + $0x58] sm:$0xf0]  ;;  %v22642_v55 = vpop.f32.mrf.mxu1  ;;  %v11600_v19 = vor.u32 %v17246_v58, %v11597_v14 }
 0x24e   :  { %5801 = vmatpush.bf16.msra.mxu0 %v11648_v42  ;;  %v17174_v60 = vld [vmem:[%s27686_s1 + $0x14c] sm:$0xf]  ;;  %v11309_v47 = vld [vmem:[%s27686_s1 + $0x158] sm:$0xf0]  ;;  %v11184_v57 = vor.u32 %v17142_v30, %v11181_v11  ;;  %v5516_v21 = vpop.f32.mrf.mxu0 }
 0x24f   :  { %5789 = vmatpush.bf16.msra.mxu3 %v11488_v18  ;;  %v17206_v44 = vld [vmem:[%s27686_s1 + $0x24c] sm:$0xf]  ;;  %v11437_v25 = vld [vmem:[%s27686_s1 + $0x258] sm:$0xf0]  ;;  %v11312_v33 = vor.u32 %v17174_v60, %v11309_v47 }
 0x250   :  { %5761 = vmatpush.bf16.msra.mxu1 %v11232_v49  ;;  %v17242_v37 = vld [vmem:[%s27686_s1 + $0x36c] sm:$0xf]  ;;  %v11581_v62 = vld [vmem:[%s27686_s1 + $0x378] sm:$0xf0]  ;;  %v11440_v42 = vor.u32 %v17206_v44, %v11437_v25  ;;  %v5502_v0 = vpop.f32.mrf.mxu3 }
 0x251   :  { %5775 = vmatpush.bf16.msra.mxu2 %v11360_v9  ;;  %v17138_v49 = vld [vmem:[%s27686_s1 + $0x2c] sm:$0xf]  ;;  %v11165_v61 = vld [vmem:[%s27686_s1 + $0x38] sm:$0xf0]  ;;  %v5488_v9 = vpop.f32.mrf.mxu2  ;;  %v11584_v34 = vor.u32 %v17242_v37, %v11581_v62 }
 0x252   :  { %5802 = vmatpush.bf16.msra.mxu0 %v11632_v4  ;;  %v17170_v52 = vld [vmem:[%s27686_s1 + $0x12c] sm:$0xf]  ;;  %v11293_v18 = vld [vmem:[%s27686_s1 + $0x138] sm:$0xf0]  ;;  %v5489_v5 = vadd.f32 %v5488_v9, %v22518_v54  ;;  %v11168_v4 = vor.u32 %v17138_v49, %v11165_v61 }
 0x253   :  { %5790 = vmatpush.bf16.msra.mxu3 %v11472_v22  ;;  %v17202_v2 = vld [vmem:[%s27686_s1 + $0x22c] sm:$0xf]  ;;  %v11421_v29 = vld [vmem:[%s27686_s1 + $0x238] sm:$0xf0] }
 0x254   :  { %5762 = vmatpush.bf16.msra.mxu1 %v11216_v7  ;;  %v17134_v43 = vld [vmem:[%s27686_s1 + $0xc] sm:$0xf]  ;;  %v11149_v7 = vld [vmem:[%s27686_s1 + $0x18] sm:$0xf0]  ;;  %v5503_v45 = vadd.f32 %v5502_v0, %v5489_v5  ;;  %v11424_v22 = vor.u32 %v17202_v2, %v11421_v29 }
 0x255   :  { %5776 = vmatpush.bf16.msra.mxu2 %v11344_v27  ;;  %v17238_v3 = vld [vmem:[%s27686_s1 + $0x34c] sm:$0xf]  ;;  %v11565_v54 = vld [vmem:[%s27686_s1 + $0x358] sm:$0xf0]  ;;  %v11296_v27 = vor.u32 %v17170_v52, %v11293_v18  ;;  %v5530_v30 = vpop.f32.mrf.mxu1  ;;  %v11152_v11 = vor.u32 %v17134_v43, %v11149_v7 }
 0x256   :  { %5803 = vmatpush.bf16.msra.mxu0 %v11616_v53  ;;  %v17166_v17 = vld [vmem:[%s27686_s1 + $0x10c] sm:$0xf]  ;;  %v11277_v59 = vld [vmem:[%s27686_s1 + $0x118] sm:$0xf0]  ;;  %v11568_v58 = vor.u32 %v17238_v3, %v11565_v54 }
 0x257   :  { %5791 = vmatpush.bf16.msra.mxu3 %v11456_v56  ;;  %v17198_v23 = vld [vmem:[%s27686_s1 + $0x20c] sm:$0xf]  ;;  %v11405_v10 = vld [vmem:[%s27686_s1 + $0x218] sm:$0xf0] }
 0x258   :  { %5763 = vmatpush.bf16.msra.mxu1 %v11200_v1  ;;  %v17290_v50 = vld [vmem:[%s27686_s1 + $0x4ec] sm:$0xf]  ;;  %v11773_v53 = vld [vmem:[%s27686_s1 + $0x4f8] sm:$0xf0]  ;;  %v5517_v1 = vadd.f32 %v5516_v21, %v5503_v45 }
 0x259   :  { %5777 = vmatpush.bf16.msra.mxu2 %v11328_v6  ;;  %v17322_v14 = vld [vmem:[%s27686_s1 + $0x5ec] sm:$0xf]  ;;  %v11901_v6 = vld [vmem:[%s27686_s1 + $0x5f8] sm:$0xf0]  ;;  %v11776_v37 = vor.u32 %v17290_v50, %v11773_v53 }
 0x25a   :  { %5804 = vmatpush.bf16.msra.mxu0 %v11600_v19  ;;  %v17354_v56 = vld [vmem:[%s27686_s1 + $0x6ec] sm:$0xf]  ;;  %v12029_v60 = vld [vmem:[%s27686_s1 + $0x6f8] sm:$0xf0]  ;;  %v22726_v25 = vadd.f32 %v5530_v30, %v5517_v1  ;;  %v11280_v19 = vor.u32 %v17166_v17, %v11277_v59  ;;  %v11904_v62 = vor.u32 %v17322_v14, %v11901_v6  ;;  %v27761_v1 = vld [vmem:[#allocation8_spill] sm:$0xff] }
 0x25b   :  { %5792 = vmatpush.bf16.msra.mxu3 %v11440_v42  ;;  %v17234_v47 = vld [vmem:[%s27686_s1 + $0x32c] sm:$0xf]  ;;  %v11549_v44 = vld [vmem:[%s27686_s1 + $0x338] sm:$0xf0]  ;;  %v12032_v49 = vor.u32 %v17354_v56, %v12029_v60 }
 0x25c   :  { %5764 = vmatpush.bf16.msra.mxu1 %v11184_v57  ;;  %v11408_v57 = vor.u32 %v17198_v23, %v11405_v10  ;;  %v11757_v42 = vld [vmem:[%s27686_s1 + $0x4d8] sm:$0xf0]  ;;  %v11552_v61 = vor.u32 %v17234_v47, %v11549_v44  ;;  %v17318_v52 = vld [vmem:[%s27686_s1 + $0x5cc] sm:$0xf] }
 0x25d   :  { %5778 = vmatpush.bf16.msra.mxu2 %v11312_v33  ;;  %v17286_v33 = vld [vmem:[%s27686_s1 + $0x4cc] sm:$0xf]  ;;  %v11885_v9 = vld [vmem:[%s27686_s1 + $0x5d8] sm:$0xf0] }
 0x25e   :  { %5805 = vmatpush.bf16.msra.mxu0 %v11584_v34  ;;  %v17350_v18 = vld [vmem:[%s27686_s1 + $0x6cc] sm:$0xf]  ;;  %v12013_v2 = vld [vmem:[%s27686_s1 + $0x6d8] sm:$0xf0]  ;;  %v11760_v0 = vor.u32 %v17286_v33, %v11757_v42 }
 0x25f   :  { %5793 = vmatpush.bf16.msra.mxu3 %v11424_v22  ;;  %v17230_v29 = vld [vmem:[%s27686_s1 + $0x30c] sm:$0xf]  ;;  %v11533_v5 = vld [vmem:[%s27686_s1 + $0x318] sm:$0xf0]  ;;  %v12016_v3 = vor.u32 %v17350_v18, %v12013_v2 }
 0x260   :  { %5765 = vmatpush.bf16.msra.mxu1 %v11168_v4  ;;  %v17386_v34 = vld [vmem:[%s27686_s1 + $0x7ec] sm:$0xf]  ;;  %v12157_v43 = vld [vmem:[%s27686_s1 + $0x7f8] sm:$0xf0]  ;;  %v11888_v4 = vor.u32 %v17318_v52, %v11885_v9  ;;  %v11536_v54 = vor.u32 %v17230_v29, %v11533_v5  ;;  %v27762_v29 = vld [vmem:[#allocation10_spill] sm:$0xff] }
 0x261   :  { %5779 = vmatpush.bf16.msra.mxu2 %v11296_v27  ;;  %v17282_v7 = vld [vmem:[%s27686_s1 + $0x4ac] sm:$0xf]  ;;  %v11741_v45 = vld [vmem:[%s27686_s1 + $0x4b8] sm:$0xf0]  ;;  %v12160_v23 = vor.u32 %v17386_v34, %v12157_v43 }
 0x262   :  { %5806 = vmatpush.bf16.msra.mxu0 %v11568_v58  ;;  %v17314_v27 = vld [vmem:[%s27686_s1 + $0x5ac] sm:$0xf]  ;;  %v11869_v22 = vld [vmem:[%s27686_s1 + $0x5b8] sm:$0xf0]  ;;  %v11744_v58 = vor.u32 %v17282_v7, %v11741_v45 }
 0x263   :  { %5794 = vmatpush.bf16.msra.mxu3 %v11408_v57  ;;  %v17346_v17 = vld [vmem:[%s27686_s1 + $0x6ac] sm:$0xf]  ;;  %v11997_v59 = vld [vmem:[%s27686_s1 + $0x6b8] sm:$0xf0]  ;;  %v11872_v14 = vor.u32 %v17314_v27, %v11869_v22  ;;  %v22843_v27 = vpop.f32.mrf.mxu1 }
 0x264   :  { %5766 = vmatpush.bf16.msra.mxu1 %v11152_v11  ;;  %v27759_v21 = vld [vmem:[#allocation9_spill] sm:$0xff]  ;;  %v27760_v10 = vld [vmem:[#allocation7_spill] sm:$0xff]  ;;  %v12000_v56 = vor.u32 %v17346_v17, %v11997_v59 }
 0x265   :  { %5780 = vmatpush.bf16.msra.mxu2 %v11280_v19  ;;  %v17382_v50 = vld [vmem:[%s27686_s1 + $0x7cc] sm:$0xf]  ;;  %v12141_v53 = vld [vmem:[%s27686_s1 + $0x7d8] sm:$0xf0] }
 0x266   :  { %5807 = vmatpush.bf16.msra.mxu0 %v11552_v61  ;;  %5795 = vmatmul.bf16.vlgmr.msra.gmra.mxu3 %v27761_v1  ;;  %v17278_v6 = vld [vmem:[%s27686_s1 + $0x48c] sm:$0xf]  ;;  %v11725_v30 = vld [vmem:[%s27686_s1 + $0x498] sm:$0xf0]  ;;  %v12144_v19 = vor.u32 %v17382_v50, %v12141_v53  ;;  %v22814_v61 = vpop.f32.mrf.mxu3 }
 0x267   :  { %5843 = vmatpush.bf16.msrb.mxu3 %v12032_v49  ;;  %5767 = vmatmul.bf16.vlgmr.msra.gmra.mxu1 %v27760_v10  ;;  %v17310_v11 = vld [vmem:[%s27686_s1 + $0x58c] sm:$0xf]  ;;  %v11853_v60 = vld [vmem:[%s27686_s1 + $0x598] sm:$0xf0]  ;;  %v22812_v49 = vpop.f32.mrf.mxu2 }
 0x268   :  { %5815 = vmatpush.bf16.msrb.mxu1 %v11776_v37  ;;  %5781 = vmatmul.bf16.vlgmr.msra.gmra.mxu2 %v27759_v21  ;;  %v17342_v47 = vld [vmem:[%s27686_s1 + $0x68c] sm:$0xf]  ;;  %v11981_v44 = vld [vmem:[%s27686_s1 + $0x698] sm:$0xf0]  ;;  %v11856_v33 = vor.u32 %v17310_v11, %v11853_v60 }
 0x269   :  { %5829 = vmatpush.bf16.msrb.mxu2 %v11904_v62  ;;  %v17378_v57 = vld [vmem:[%s27686_s1 + $0x7ac] sm:$0xf]  ;;  %v12125_v37 = vld [vmem:[%s27686_s1 + $0x7b8] sm:$0xf0]  ;;  %v11728_v62 = vor.u32 %v17278_v6, %v11725_v30  ;;  %v11984_v52 = vor.u32 %v17342_v47, %v11981_v44 }
 0x26a   :  { %5808 = vmatpush.bf16.msra.mxu0 %v11536_v54  ;;  %v17274_v42 = vld [vmem:[%s27686_s1 + $0x46c] sm:$0xf]  ;;  %v11709_v9 = vld [vmem:[%s27686_s1 + $0x478] sm:$0xf0]  ;;  %v12128_v43 = vor.u32 %v17378_v57, %v12125_v37 }
 0x26b   :  { %5844 = vmatpush.bf16.msrb.mxu3 %v12016_v3  ;;  %v17306_v18 = vld [vmem:[%s27686_s1 + $0x56c] sm:$0xf]  ;;  %v11837_v2 = vld [vmem:[%s27686_s1 + $0x578] sm:$0xf0]  ;;  %v11712_v3 = vor.u32 %v17274_v42, %v11709_v9 }
 0x26c   :  { %5816 = vmatpush.bf16.msrb.mxu1 %v11760_v0  ;;  %v17338_v5 = vld [vmem:[%s27686_s1 + $0x66c] sm:$0xf]  ;;  %v11965_v34 = vld [vmem:[%s27686_s1 + $0x678] sm:$0xf0]  ;;  %v22832_v0 = vpop.f32.mrf.mxu0  ;;  %v11840_v54 = vor.u32 %v17306_v18, %v11837_v2 }
 0x26d   :  { %5830 = vmatpush.bf16.msrb.mxu2 %v11888_v4  ;;  %5809 = vmatmul.bf16.vlgmr.msra.gmra.mxu0 %v27762_v29  ;;  %v17374_v4 = vld [vmem:[%s27686_s1 + $0x78c] sm:$0xf]  ;;  %v12109_v7 = vld [vmem:[%s27686_s1 + $0x798] sm:$0xf0]  ;;  %v11968_v22 = vor.u32 %v17338_v5, %v11965_v34  ;;  %v5586_v34 = vpop.f32.mrf.mxu1 }
 0x26e   :  { %5857 = vmatpush.bf16.msrb.mxu0 %v12160_v23  ;;  %v17270_v45 = vld [vmem:[%s27686_s1 + $0x44c] sm:$0xf]  ;;  %v11693_v17 = vld [vmem:[%s27686_s1 + $0x458] sm:$0xf0]  ;;  %v12112_v50 = vor.u32 %v17374_v4, %v12109_v7  ;;  %v5558_v30 = vpop.f32.mrf.mxu3 }
 0x26f   :  { %5845 = vmatpush.bf16.msrb.mxu3 %v12000_v56  ;;  %v17302_v59 = vld [vmem:[%s27686_s1 + $0x54c] sm:$0xf]  ;;  %v11821_v23 = vld [vmem:[%s27686_s1 + $0x558] sm:$0xf0]  ;;  %v5544_v56 = vpop.f32.mrf.mxu2 }
 0x270   :  { %5817 = vmatpush.bf16.msrb.mxu1 %v11744_v58  ;;  %v17334_v21 = vld [vmem:[%s27686_s1 + $0x64c] sm:$0xf]  ;;  %v11949_v10 = vld [vmem:[%s27686_s1 + $0x658] sm:$0xf0]  ;;  %v11696_v58 = vor.u32 %v17270_v45, %v11693_v17 }
 0x271   :  { %5831 = vmatpush.bf16.msrb.mxu2 %v11872_v14  ;;  %v17370_v53 = vld [vmem:[%s27686_s1 + $0x76c] sm:$0xf]  ;;  %v12093_v1 = vld [vmem:[%s27686_s1 + $0x778] sm:$0xf0]  ;;  %v11824_v14 = vor.u32 %v17302_v59, %v11821_v23  ;;  %v11952_v11 = vor.u32 %v17334_v21, %v11949_v10 }
 0x272   :  { %5858 = vmatpush.bf16.msrb.mxu0 %v12144_v19  ;;  %v17266_v6 = vld [vmem:[%s27686_s1 + $0x42c] sm:$0xf]  ;;  %v11677_v60 = vld [vmem:[%s27686_s1 + $0x438] sm:$0xf0]  ;;  %v5545_v19 = vadd.f32 %v5544_v56, %v22726_v25 }
 0x273   :  { %5846 = vmatpush.bf16.msrb.mxu3 %v11984_v52  ;;  %v17298_v47 = vld [vmem:[%s27686_s1 + $0x52c] sm:$0xf]  ;;  %v11805_v44 = vld [vmem:[%s27686_s1 + $0x538] sm:$0xf0]  ;;  %v11680_v9 = vor.u32 %v17266_v6, %v11677_v60 }
 0x274   :  { %5818 = vmatpush.bf16.msrb.mxu1 %v11728_v62  ;;  %v17330_v57 = vld [vmem:[%s27686_s1 + $0x62c] sm:$0xf]  ;;  %v11933_v37 = vld [vmem:[%s27686_s1 + $0x638] sm:$0xf0]  ;;  %v12096_v62 = vor.u32 %v17370_v53, %v12093_v1  ;;  %v5559_v25 = vadd.f32 %v5558_v30, %v5545_v19  ;;  %v11808_v18 = vor.u32 %v17298_v47, %v11805_v44 }
 0x275   :  { %5832 = vmatpush.bf16.msrb.mxu2 %v11856_v33  ;;  %v5572_v33 = vpop.f32.mrf.mxu0  ;;  %v17366_v42 = vld [vmem:[%s27686_s1 + $0x74c] sm:$0xf]  ;;  %v12077_v52 = vld [vmem:[%s27686_s1 + $0x758] sm:$0xf0] }
 0x276   :  { %5859 = vmatpush.bf16.msrb.mxu0 %v12128_v43  ;;  %v17262_v2 = vld [vmem:[%s27686_s1 + $0x40c] sm:$0xf]  ;;  %v11661_v29 = vld [vmem:[%s27686_s1 + $0x418] sm:$0xf0]  ;;  %v11936_v43 = vor.u32 %v17330_v57, %v11933_v37  ;;  %v12080_v45 = vor.u32 %v17366_v42, %v12077_v52 }
 0x277   :  { %5847 = vmatpush.bf16.msrb.mxu3 %v11968_v22  ;;  %v17294_v5 = vld [vmem:[%s27686_s1 + $0x50c] sm:$0xf]  ;;  %v11789_v4 = vld [vmem:[%s27686_s1 + $0x518] sm:$0xf0]  ;;  %v11664_v53 = vor.u32 %v17262_v2, %v11661_v29 }
 0x278   :  { %5819 = vmatpush.bf16.msrb.mxu1 %v11712_v3  ;;  %v17326_v7 = vld [vmem:[%s27686_s1 + $0x60c] sm:$0xf]  ;;  %v11917_v3 = vld [vmem:[%s27686_s1 + $0x618] sm:$0xf0]  ;;  %v11792_v1 = vor.u32 %v17294_v5, %v11789_v4 }
 0x279   :  { %5833 = vmatpush.bf16.msrb.mxu2 %v11840_v54  ;;  %v5573_v54 = vadd.f32 %v5572_v33, %v5559_v25  ;;  %v17418_v22 = vld [vmem:[%s27686_s1 + $0x8ec] sm:$0xf]  ;;  %v12285_v17 = vld [vmem:[%s27686_s1 + $0x8f8] sm:$0xf0]  ;;  %v11920_v6 = vor.u32 %v17326_v7, %v11917_v3 }
 0x27a   :  { %5860 = vmatpush.bf16.msrb.mxu0 %v12112_v50  ;;  %v17450_v59 = vld [vmem:[%s27686_s1 + $0x9ec] sm:$0xf]  ;;  %v12413_v23 = vld [vmem:[%s27686_s1 + $0x9f8] sm:$0xf0]  ;;  %v12288_v56 = vor.u32 %v17418_v22, %v12285_v17  ;;  %v27765_v22 = vld [vmem:[#allocation12_spill] sm:$0xff] }
 0x27b   :  { %5848 = vmatpush.bf16.msrb.mxu3 %v11952_v11  ;;  %v17482_v21 = vld [vmem:[%s27686_s1 + $0xaec] sm:$0xf]  ;;  %v12541_v10 = vld [vmem:[%s27686_s1 + $0xaf8] sm:$0xf0]  ;;  %v22927_v50 = vadd.f32 %v5586_v34, %v5573_v54  ;;  %v12416_v30 = vor.u32 %v17450_v59, %v12413_v23 }
 0x27c   :  { %5820 = vmatpush.bf16.msrb.mxu1 %v11696_v58  ;;  %v17362_v58 = vld [vmem:[%s27686_s1 + $0x72c] sm:$0xf]  ;;  %v12544_v11 = vor.u32 %v17482_v21, %v12541_v10  ;;  %v12269_v47 = vld [vmem:[%s27686_s1 + $0x8d8] sm:$0xf0] }
 0x27d   :  { %5834 = vmatpush.bf16.msrb.mxu2 %v11824_v14  ;;  %v12061_v14 = vld [vmem:[%s27686_s1 + $0x738] sm:$0xf0]  ;;  %v17414_v60 = vld [vmem:[%s27686_s1 + $0x8cc] sm:$0xf] }
 0x27e   :  { %5861 = vmatpush.bf16.msrb.mxu0 %v12096_v62  ;;  %v17446_v44 = vld [vmem:[%s27686_s1 + $0x9cc] sm:$0xf]  ;;  %v12064_v19 = vor.u32 %v17362_v58, %v12061_v14  ;;  %v12397_v57 = vld [vmem:[%s27686_s1 + $0x9d8] sm:$0xf0]  ;;  %v12272_v52 = vor.u32 %v17414_v60, %v12269_v47 }
 0x27f   :  { %5849 = vmatpush.bf16.msrb.mxu3 %v11936_v43  ;;  %v17478_v37 = vld [vmem:[%s27686_s1 + $0xacc] sm:$0xf]  ;;  %v12525_v62 = vld [vmem:[%s27686_s1 + $0xad8] sm:$0xf0] }
 0x280   :  { %5821 = vmatpush.bf16.msrb.mxu1 %v11680_v9  ;;  %v17358_v33 = vld [vmem:[%s27686_s1 + $0x70c] sm:$0xf]  ;;  %v12045_v42 = vld [vmem:[%s27686_s1 + $0x718] sm:$0xf0]  ;;  %v12528_v2 = vor.u32 %v17478_v37, %v12525_v62 }
 0x281   :  { %5835 = vmatpush.bf16.msrb.mxu2 %v11808_v18  ;;  %v17514_v25 = vld [vmem:[%s27686_s1 + $0xbec] sm:$0xf]  ;;  %v12669_v9 = vld [vmem:[%s27686_s1 + $0xbf8] sm:$0xf0]  ;;  %v12400_v18 = vor.u32 %v17446_v44, %v12397_v57  ;;  %v12048_v4 = vor.u32 %v17358_v33, %v12045_v42  ;;  %v23018_v57 = vpop.f32.mrf.mxu3 }
 0x282   :  { %5862 = vmatpush.bf16.msrb.mxu0 %v12080_v45  ;;  %v17410_v29 = vld [vmem:[%s27686_s1 + $0x8ac] sm:$0xf]  ;;  %v12253_v5 = vld [vmem:[%s27686_s1 + $0x8b8] sm:$0xf0]  ;;  %v12672_v17 = vor.u32 %v17514_v25, %v12669_v9  ;;  %v27766_v25 = vld [vmem:[#allocation14_spill] sm:$0xff] }
 0x283   :  { %5850 = vmatpush.bf16.msrb.mxu3 %v11920_v6  ;;  %v17442_v34 = vld [vmem:[%s27686_s1 + $0x9ac] sm:$0xf]  ;;  %v27763_v43 = vld [vmem:[#allocation13_spill] sm:$0xff]  ;;  %v12256_v59 = vor.u32 %v17410_v29, %v12253_v5  ;;  %v23039_v29 = vpop.f32.mrf.mxu0 }
 0x284   :  { %5822 = vmatpush.bf16.msrb.mxu1 %v11664_v53  ;;  %v12381_v7 = vld [vmem:[%s27686_s1 + $0x9b8] sm:$0xf0]  ;;  %v17474_v3 = vld [vmem:[%s27686_s1 + $0xaac] sm:$0xf] }
 0x285   :  { %5836 = vmatpush.bf16.msrb.mxu2 %v11792_v1  ;;  %v12509_v54 = vld [vmem:[%s27686_s1 + $0xab8] sm:$0xf0]  ;;  %v27764_v45 = vld [vmem:[#allocation11_spill] sm:$0xff]  ;;  %v12384_v10 = vor.u32 %v17442_v34, %v12381_v7  ;;  %v23047_v7 = vpop.f32.mrf.mxu1 }
 0x286   :  { %5863 = vmatpush.bf16.msrb.mxu0 %v12064_v19  ;;  %5851 = vmatmul.bf16.vlgmr.msrb.gmra.mxu3 %v27765_v22  ;;  %v17510_v23 = vld [vmem:[%s27686_s1 + $0xbcc] sm:$0xf]  ;;  %v12653_v21 = vld [vmem:[%s27686_s1 + $0xbd8] sm:$0xf0]  ;;  %v12512_v53 = vor.u32 %v17474_v3, %v12509_v54  ;;  %v23016_v19 = vpop.f32.mrf.mxu2 }
 0x287   :  { %5899 = vmatpush.bf16.msra.mxu3 %v12544_v11  ;;  %5823 = vmatmul.bf16.vlgmr.msrb.gmra.mxu1 %v27764_v45  ;;  %v17406_v1 = vld [vmem:[%s27686_s1 + $0x88c] sm:$0xf]  ;;  %v12237_v58 = vld [vmem:[%s27686_s1 + $0x898] sm:$0xf0]  ;;  %v12656_v11 = vor.u32 %v17510_v23, %v12653_v21 }
 0x288   :  { %5871 = vmatpush.bf16.msra.mxu1 %v12288_v56  ;;  %5837 = vmatmul.bf16.vlgmr.msrb.gmra.mxu2 %v27763_v43  ;;  %v17438_v14 = vld [vmem:[%s27686_s1 + $0x98c] sm:$0xf]  ;;  %v12365_v6 = vld [vmem:[%s27686_s1 + $0x998] sm:$0xf0]  ;;  %v12240_v60 = vor.u32 %v17406_v1, %v12237_v58 }
 0x289   :  { %5885 = vmatpush.bf16.msra.mxu2 %v12416_v30  ;;  %v17470_v56 = vld [vmem:[%s27686_s1 + $0xa8c] sm:$0xf]  ;;  %v12493_v30 = vld [vmem:[%s27686_s1 + $0xa98] sm:$0xf0]  ;;  %v12368_v37 = vor.u32 %v17438_v14, %v12365_v6  ;;  %v5614_v6 = vpop.f32.mrf.mxu3 }
 0x28a   :  { %5864 = vmatpush.bf16.msrb.mxu0 %v12048_v4  ;;  %v17506_v47 = vld [vmem:[%s27686_s1 + $0xbac] sm:$0xf]  ;;  %v12637_v44 = vld [vmem:[%s27686_s1 + $0xbb8] sm:$0xf0]  ;;  %v12496_v62 = vor.u32 %v17470_v56, %v12493_v30 }
 0x28b   :  { %5900 = vmatpush.bf16.msra.mxu3 %v12528_v2  ;;  %v17402_v33 = vld [vmem:[%s27686_s1 + $0x86c] sm:$0xf]  ;;  %v12221_v42 = vld [vmem:[%s27686_s1 + $0x878] sm:$0xf0]  ;;  %v12640_v5 = vor.u32 %v17506_v47, %v12637_v44 }
 0x28c   :  { %5872 = vmatpush.bf16.msra.mxu1 %v12272_v52  ;;  %v17434_v52 = vld [vmem:[%s27686_s1 + $0x96c] sm:$0xf]  ;;  %v12349_v9 = vld [vmem:[%s27686_s1 + $0x978] sm:$0xf0]  ;;  %v12224_v34 = vor.u32 %v17402_v33, %v12221_v42  ;;  %v5628_v42 = vpop.f32.mrf.mxu0 }
 0x28d   :  { %5886 = vmatpush.bf16.msra.mxu2 %v12400_v18  ;;  %5865 = vmatmul.bf16.vlgmr.msrb.gmra.mxu0 %v27766_v25  ;;  %v17466_v18 = vld [vmem:[%s27686_s1 + $0xa6c] sm:$0xf]  ;;  %v12477_v2 = vld [vmem:[%s27686_s1 + $0xa78] sm:$0xf0]  ;;  %v12352_v3 = vor.u32 %v17434_v52, %v12349_v9 }
 0x28e   :  { %5913 = vmatpush.bf16.msra.mxu0 %v12672_v17  ;;  %v17502_v43 = vld [vmem:[%s27686_s1 + $0xb8c] sm:$0xf]  ;;  %v12621_v4 = vld [vmem:[%s27686_s1 + $0xb98] sm:$0xf0]  ;;  %v12480_v54 = vor.u32 %v17466_v18, %v12477_v2  ;;  %v5600_v14 = vpop.f32.mrf.mxu2 }
 0x28f   :  { %5901 = vmatpush.bf16.msra.mxu3 %v12512_v53  ;;  %v17398_v45 = vld [vmem:[%s27686_s1 + $0x84c] sm:$0xf]  ;;  %v12205_v22 = vld [vmem:[%s27686_s1 + $0x858] sm:$0xf0]  ;;  %v5601_v44 = vadd.f32 %v5600_v14, %v22927_v50 }
 0x290   :  { %5873 = vmatpush.bf16.msra.mxu1 %v12256_v59  ;;  %v17430_v17 = vld [vmem:[%s27686_s1 + $0x94c] sm:$0xf]  ;;  %v12333_v59 = vld [vmem:[%s27686_s1 + $0x958] sm:$0xf0]  ;;  %v12208_v53 = vor.u32 %v17398_v45, %v12205_v22 }
 0x291   :  { %5887 = vmatpush.bf16.msra.mxu2 %v12384_v10  ;;  %v17462_v23 = vld [vmem:[%s27686_s1 + $0xa4c] sm:$0xf]  ;;  %v12461_v21 = vld [vmem:[%s27686_s1 + $0xa58] sm:$0xf0]  ;;  %v12624_v10 = vor.u32 %v17502_v43, %v12621_v4  ;;  %v12336_v56 = vor.u32 %v17430_v17, %v12333_v59  ;;  %v5615_v25 = vadd.f32 %v5614_v6, %v5601_v44 }
 0x292   :  { %5914 = vmatpush.bf16.msra.mxu0 %v12656_v11  ;;  %v17498_v1 = vld [vmem:[%s27686_s1 + $0xb6c] sm:$0xf]  ;;  %v12605_v58 = vld [vmem:[%s27686_s1 + $0xb78] sm:$0xf0]  ;;  %v12464_v30 = vor.u32 %v17462_v23, %v12461_v21 }
 0x293   :  { %5902 = vmatpush.bf16.msra.mxu3 %v12496_v62  ;;  %v17394_v11 = vld [vmem:[%s27686_s1 + $0x82c] sm:$0xf]  ;;  %v12445_v33 = vld [vmem:[%s27686_s1 + $0xa38] sm:$0xf0]  ;;  %v12608_v52 = vor.u32 %v17498_v1, %v12605_v58  ;;  %v5629_v45 = vadd.f32 %v5628_v42, %v5615_v25 }
 0x294   :  { %5874 = vmatpush.bf16.msra.mxu1 %v12240_v60  ;;  %v12189_v60 = vld [vmem:[%s27686_s1 + $0x838] sm:$0xf0]  ;;  %v17426_v47 = vld [vmem:[%s27686_s1 + $0x92c] sm:$0xf] }
 0x295   :  { %5888 = vmatpush.bf16.msra.mxu2 %v12368_v37  ;;  %v12317_v37 = vld [vmem:[%s27686_s1 + $0x938] sm:$0xf0]  ;;  %v17458_v62 = vld [vmem:[%s27686_s1 + $0xa2c] sm:$0xf]  ;;  %v12192_v9 = vor.u32 %v17394_v11, %v12189_v60 }
 0x296   :  { %5915 = vmatpush.bf16.msra.mxu0 %v12640_v5  ;;  %v17390_v50 = vld [vmem:[%s27686_s1 + $0x80c] sm:$0xf]  ;;  %v12589_v2 = vld [vmem:[%s27686_s1 + $0xb58] sm:$0xf0]  ;;  %v5642_v5 = vpop.f32.mrf.mxu1  ;;  %v12448_v43 = vor.u32 %v17458_v62, %v12445_v33 }
 0x297   :  { %5903 = vmatpush.bf16.msra.mxu3 %v12480_v54  ;;  %v17494_v18 = vld [vmem:[%s27686_s1 + $0xb4c] sm:$0xf]  ;;  %v12173_v4 = vld [vmem:[%s27686_s1 + $0x818] sm:$0xf0]  ;;  %v23128_v1 = vadd.f32 %v5642_v5, %v5629_v45 }
 0x298   :  { %5875 = vmatpush.bf16.msra.mxu1 %v12224_v34  ;;  %v12320_v34 = vor.u32 %v17426_v47, %v12317_v37  ;;  %v12301_v54 = vld [vmem:[%s27686_s1 + $0x918] sm:$0xf0]  ;;  %v17454_v22 = vld [vmem:[%s27686_s1 + $0xa0c] sm:$0xf]  ;;  %v12592_v23 = vor.u32 %v17494_v18, %v12589_v2  ;;  %v12176_v58 = vor.u32 %v17390_v50, %v12173_v4 }
 0x299   :  { %5889 = vmatpush.bf16.msra.mxu2 %v12352_v3  ;;  %v17422_v3 = vld [vmem:[%s27686_s1 + $0x90c] sm:$0xf]  ;;  %v12429_v17 = vld [vmem:[%s27686_s1 + $0xa18] sm:$0xf0] }
 0x29a   :  { %5916 = vmatpush.bf16.msra.mxu0 %v12624_v10  ;;  %v17546_v59 = vld [vmem:[%s27686_s1 + $0xcec] sm:$0xf]  ;;  %v12797_v21 = vld [vmem:[%s27686_s1 + $0xcf8] sm:$0xf0] }
 0x29b   :  { %5904 = vmatpush.bf16.msra.mxu3 %v12464_v30  ;;  %v17578_v10 = vld [vmem:[%s27686_s1 + $0xdec] sm:$0xf]  ;;  %v13053_v6 = vld [vmem:[%s27686_s1 + $0xef8] sm:$0xf0]  ;;  %v12432_v30 = vor.u32 %v17454_v22, %v12429_v17  ;;  %v12800_v47 = vor.u32 %v17546_v59, %v12797_v21 }
 0x29c   :  { %5876 = vmatpush.bf16.msra.mxu1 %v12208_v53  ;;  %v12925_v53 = vld [vmem:[%s27686_s1 + $0xdf8] sm:$0xf0]  ;;  %v17610_v14 = vld [vmem:[%s27686_s1 + $0xeec] sm:$0xf] }
 0x29d   :  { %5890 = vmatpush.bf16.msra.mxu2 %v12336_v56  ;;  %v12304_v56 = vor.u32 %v17422_v3, %v12301_v54  ;;  %v17490_v11 = vld [vmem:[%s27686_s1 + $0xb2c] sm:$0xf]  ;;  %v12573_v60 = vld [vmem:[%s27686_s1 + $0xb38] sm:$0xf0]  ;;  %v12928_v44 = vor.u32 %v17578_v10, %v12925_v53  ;;  %v13056_v62 = vor.u32 %v17610_v14, %v13053_v6 }
 0x29e   :  { %5917 = vmatpush.bf16.msra.mxu0 %v12608_v52  ;;  %v17542_v37 = vld [vmem:[%s27686_s1 + $0xccc] sm:$0xf]  ;;  %v12781_v33 = vld [vmem:[%s27686_s1 + $0xcd8] sm:$0xf0]  ;;  %v12576_v25 = vor.u32 %v17490_v11, %v12573_v60 }
 0x29f   :  { %5905 = vmatpush.bf16.msra.mxu3 %v12448_v43  ;;  %v17574_v42 = vld [vmem:[%s27686_s1 + $0xdcc] sm:$0xf]  ;;  %v12909_v52 = vld [vmem:[%s27686_s1 + $0xdd8] sm:$0xf0]  ;;  %v12784_v5 = vor.u32 %v17542_v37, %v12781_v33  ;;  %v23219_v37 = vpop.f32.mrf.mxu3 }
 0x2a0   :  { %5877 = vmatpush.bf16.msra.mxu1 %v12192_v9  ;;  %v17606_v9 = vld [vmem:[%s27686_s1 + $0xecc] sm:$0xf]  ;;  %v13037_v50 = vld [vmem:[%s27686_s1 + $0xed8] sm:$0xf0] }
 0x2a1   :  { %5891 = vmatpush.bf16.msra.mxu2 %v12320_v34  ;;  %v17486_v18 = vld [vmem:[%s27686_s1 + $0xb0c] sm:$0xf]  ;;  %v12557_v2 = vld [vmem:[%s27686_s1 + $0xb18] sm:$0xf0]  ;;  %v12912_v34 = vor.u32 %v17574_v42, %v12909_v52  ;;  %v13040_v54 = vor.u32 %v17606_v9, %v13037_v50 }
 0x2a2   :  { %5918 = vmatpush.bf16.msra.mxu0 %v12592_v23  ;;  %v17538_v43 = vld [vmem:[%s27686_s1 + $0xcac] sm:$0xf]  ;;  %v13181_v3 = vld [vmem:[%s27686_s1 + $0xff8] sm:$0xf0]  ;;  %v12560_v59 = vor.u32 %v17486_v18, %v12557_v2 }
 0x2a3   :  { %5906 = vmatpush.bf16.msra.mxu3 %v12432_v30  ;;  %v17642_v4 = vld [vmem:[%s27686_s1 + $0xfec] sm:$0xf]  ;;  %v12765_v45 = vld [vmem:[%s27686_s1 + $0xcb8] sm:$0xf0] }
 0x2a4   :  { %5878 = vmatpush.bf16.msra.mxu1 %v12176_v58  ;;  %v17570_v22 = vld [vmem:[%s27686_s1 + $0xdac] sm:$0xf]  ;;  %v12893_v17 = vld [vmem:[%s27686_s1 + $0xdb8] sm:$0xf0]  ;;  %v13184_v21 = vor.u32 %v17642_v4, %v13181_v3  ;;  %v12768_v10 = vor.u32 %v17538_v43, %v12765_v45  ;;  %v23248_v4 = vpop.f32.mrf.mxu1 }
 0x2a5   :  { %5892 = vmatpush.bf16.msra.mxu2 %v12304_v56  ;;  %v13021_v23 = vld [vmem:[%s27686_s1 + $0xeb8] sm:$0xf0]  ;;  %v12896_v53 = vor.u32 %v17570_v22, %v12893_v17  ;;  %v17638_v58 = vld [vmem:[%s27686_s1 + $0xfcc] sm:$0xf] }
 0x2a6   :  { %5919 = vmatpush.bf16.msra.mxu0 %v12576_v25  ;;  %5907 = vmatmul.bf16.vlgmr.msra.gmra.mxu3 %v19311_v35  ;;  %v13165_v14 = vld [vmem:[%s27686_s1 + $0xfd8] sm:$0xf0]  ;;  %v17566_v56 = vld [vmem:[%s27686_s1 + $0xd8c] sm:$0xf] }
 0x2a7   :  { %5955 = vmatpush.bf16.msrb.mxu3 %v13056_v62  ;;  %5879 = vmatmul.bf16.vlgmr.msra.gmra.mxu1 %v19300_v31  ;;  %v17602_v31 = vld [vmem:[%s27686_s1 + $0xeac] sm:$0xf]  ;;  %v12749_v35 = vld [vmem:[%s27686_s1 + $0xc98] sm:$0xf0] }
 0x2a8   :  { %5927 = vmatpush.bf16.msrb.mxu1 %v12800_v47  ;;  %5893 = vmatmul.bf16.vlgmr.msra.gmra.mxu2 %v19313_v36  ;;  %v17534_v36 = vld [vmem:[%s27686_s1 + $0xc8c] sm:$0xf]  ;;  %v13024_v6 = vor.u32 %v17602_v31, %v13021_v23  ;;  %v12877_v30 = vld [vmem:[%s27686_s1 + $0xd98] sm:$0xf0]  ;;  %v13168_v47 = vor.u32 %v17638_v58, %v13165_v14 }
 0x2a9   :  { %5941 = vmatpush.bf16.msrb.mxu2 %v12928_v44  ;;  %v17598_v11 = vld [vmem:[%s27686_s1 + $0xe8c] sm:$0xf]  ;;  %v13005_v60 = vld [vmem:[%s27686_s1 + $0xe98] sm:$0xf0]  ;;  %v23217_v44 = vpop.f32.mrf.mxu2  ;;  %v12752_v62 = vor.u32 %v17534_v36, %v12749_v35  ;;  %v12880_v33 = vor.u32 %v17566_v56, %v12877_v30  ;;  %v5670_v14 = vpop.f32.mrf.mxu3 }
 0x2aa   :  { %5920 = vmatpush.bf16.msra.mxu0 %v12560_v59  ;;  %v17530_v42 = vld [vmem:[%s27686_s1 + $0xc6c] sm:$0xf]  ;;  %v13149_v25 = vld [vmem:[%s27686_s1 + $0xfb8] sm:$0xf0]  ;;  %v13008_v9 = vor.u32 %v17598_v11, %v13005_v60 }
 0x2ab   :  { %5956 = vmatpush.bf16.msrb.mxu3 %v13040_v54  ;;  %v17634_v52 = vld [vmem:[%s27686_s1 + $0xfac] sm:$0xf]  ;;  %v12733_v50 = vld [vmem:[%s27686_s1 + $0xc78] sm:$0xf0] }
 0x2ac   :  { %5928 = vmatpush.bf16.msrb.mxu1 %v12784_v5  ;;  %v17562_v18 = vld [vmem:[%s27686_s1 + $0xd6c] sm:$0xf]  ;;  %v12861_v2 = vld [vmem:[%s27686_s1 + $0xd78] sm:$0xf0]  ;;  %v23240_v5 = vpop.f32.mrf.mxu0  ;;  %v13152_v43 = vor.u32 %v17634_v52, %v13149_v25  ;;  %v12736_v3 = vor.u32 %v17530_v42, %v12733_v50 }
 0x2ad   :  { %5942 = vmatpush.bf16.msrb.mxu2 %v12912_v34  ;;  %5921 = vmatmul.bf16.vlgmr.msra.gmra.mxu0 %v19321_v40  ;;  %v17594_v34 = vld [vmem:[%s27686_s1 + $0xe6c] sm:$0xf]  ;;  %v12989_v40 = vld [vmem:[%s27686_s1 + $0xe78] sm:$0xf0]  ;;  %v12864_v54 = vor.u32 %v17562_v18, %v12861_v2 }
 0x2ae   :  { %5969 = vmatpush.bf16.msrb.mxu0 %v13184_v21  ;;  %v17526_v45 = vld [vmem:[%s27686_s1 + $0xc4c] sm:$0xf]  ;;  %v13133_v17 = vld [vmem:[%s27686_s1 + $0xf98] sm:$0xf0]  ;;  %v12992_v59 = vor.u32 %v17594_v34, %v12989_v40  ;;  %v5698_v34 = vpop.f32.mrf.mxu1 }
 0x2af   :  { %5957 = vmatpush.bf16.msrb.mxu3 %v13024_v6  ;;  %v17630_v22 = vld [vmem:[%s27686_s1 + $0xf8c] sm:$0xf]  ;;  %v12717_v31 = vld [vmem:[%s27686_s1 + $0xc58] sm:$0xf0] }
 0x2b0   :  { %5929 = vmatpush.bf16.msrb.mxu1 %v12768_v10  ;;  %v17558_v23 = vld [vmem:[%s27686_s1 + $0xd4c] sm:$0xf]  ;;  %v12845_v21 = vld [vmem:[%s27686_s1 + $0xd58] sm:$0xf0]  ;;  %v13136_v36 = vor.u32 %v17630_v22, %v13133_v17  ;;  %v12720_v6 = vor.u32 %v17526_v45, %v12717_v31 }
 0x2b1   :  { %5943 = vmatpush.bf16.msrb.mxu2 %v12896_v53  ;;  %v17590_v10 = vld [vmem:[%s27686_s1 + $0xe4c] sm:$0xf]  ;;  %v12973_v53 = vld [vmem:[%s27686_s1 + $0xe58] sm:$0xf0]  ;;  %v5656_v58 = vpop.f32.mrf.mxu2  ;;  %v12848_v35 = vor.u32 %v17558_v23, %v12845_v21 }
 0x2b2   :  { %5970 = vmatpush.bf16.msrb.mxu0 %v13168_v47  ;;  %v17522_v56 = vld [vmem:[%s27686_s1 + $0xc2c] sm:$0xf]  ;;  %v13117_v11 = vld [vmem:[%s27686_s1 + $0xf78] sm:$0xf0]  ;;  %v5657_v60 = vadd.f32 %v5656_v58, %v23128_v1  ;;  %v12976_v47 = vor.u32 %v17590_v10, %v12973_v53 }
 0x2b3   :  { %5958 = vmatpush.bf16.msrb.mxu3 %v13008_v9  ;;  %v17626_v30 = vld [vmem:[%s27686_s1 + $0xf6c] sm:$0xf]  ;;  %v12829_v42 = vld [vmem:[%s27686_s1 + $0xd38] sm:$0xf0] }
 0x2b4   :  { %5930 = vmatpush.bf16.msrb.mxu1 %v12752_v62  ;;  %v12701_v62 = vld [vmem:[%s27686_s1 + $0xc38] sm:$0xf0]  ;;  %v5684_v52 = vpop.f32.mrf.mxu0  ;;  %v17586_v25 = vld [vmem:[%s27686_s1 + $0xe2c] sm:$0xf]  ;;  %v5671_v9 = vadd.f32 %v5670_v14, %v5657_v60  ;;  %v13120_v50 = vor.u32 %v17626_v30, %v13117_v11 }
 0x2b5   :  { %5944 = vmatpush.bf16.msrb.mxu2 %v12880_v33  ;;  %v17554_v33 = vld [vmem:[%s27686_s1 + $0xd2c] sm:$0xf]  ;;  %v12957_v1 = vld [vmem:[%s27686_s1 + $0xe38] sm:$0xf0]  ;;  %v12704_v40 = vor.u32 %v17522_v56, %v12701_v62 }
 0x2b6   :  { %5971 = vmatpush.bf16.msrb.mxu0 %v13152_v43  ;;  %v17518_v18 = vld [vmem:[%s27686_s1 + $0xc0c] sm:$0xf]  ;;  %v12685_v2 = vld [vmem:[%s27686_s1 + $0xc18] sm:$0xf0]  ;;  %v12832_v43 = vor.u32 %v17554_v33, %v12829_v42  ;;  %v5685_v22 = vadd.f32 %v5684_v52, %v5671_v9  ;;  %v12960_v17 = vor.u32 %v17586_v25, %v12957_v1 }
 0x2b7   :  { %5959 = vmatpush.bf16.msrb.mxu3 %v12992_v59  ;;  %v13101_v45 = vld [vmem:[%s27686_s1 + $0xf58] sm:$0xf0]  ;;  %v17582_v31 = vld [vmem:[%s27686_s1 + $0xe0c] sm:$0xf]  ;;  %v12688_v56 = vor.u32 %v17518_v18, %v12685_v2 }
 0x2b8   :  { %5931 = vmatpush.bf16.msrb.mxu1 %v12736_v3  ;;  %v17550_v3 = vld [vmem:[%s27686_s1 + $0xd0c] sm:$0xf]  ;;  %v12813_v59 = vld [vmem:[%s27686_s1 + $0xd18] sm:$0xf0] }
 0x2b9   :  { %5945 = vmatpush.bf16.msrb.mxu2 %v12864_v54  ;;  %v17622_v54 = vld [vmem:[%s27686_s1 + $0xf4c] sm:$0xf]  ;;  %v12941_v23 = vld [vmem:[%s27686_s1 + $0xe18] sm:$0xf0]  ;;  %v12816_v30 = vor.u32 %v17550_v3, %v12813_v59 }
 0x2ba   :  { %5972 = vmatpush.bf16.msrb.mxu0 %v13136_v36  ;;  %v17674_v21 = vld [vmem:[%s27686_s1 + $0x10ec] sm:$0xf]  ;;  %v13309_v10 = vld [vmem:[%s27686_s1 + $0x10f8] sm:$0xf0]  ;;  %v23332_v36 = vadd.f32 %v5698_v34, %v5685_v22  ;;  %v13104_v58 = vor.u32 %v17622_v54, %v13101_v45  ;;  %v12944_v11 = vor.u32 %v17582_v31, %v12941_v23 }
 0x2bb   :  { %5960 = vmatpush.bf16.msrb.mxu3 %v12976_v47  ;;  %v17706_v53 = vld [vmem:[%s27686_s1 + $0x11ec] sm:$0xf]  ;;  %v13437_v14 = vld [vmem:[%s27686_s1 + $0x11f8] sm:$0xf0]  ;;  %v13312_v60 = vor.u32 %v17674_v21, %v13309_v10 }
 0x2bc   :  { %5932 = vmatpush.bf16.msrb.mxu1 %v12720_v6  ;;  %v17738_v6 = vld [vmem:[%s27686_s1 + $0x12ec] sm:$0xf]  ;;  %v13085_v62 = vld [vmem:[%s27686_s1 + $0xf38] sm:$0xf0]  ;;  %v13440_v33 = vor.u32 %v17706_v53, %v13437_v14 }
 0x2bd   :  { %5946 = vmatpush.bf16.msrb.mxu2 %v12848_v35  ;;  %v13565_v35 = vld [vmem:[%s27686_s1 + $0x12f8] sm:$0xf0]  ;;  %v17618_v47 = vld [vmem:[%s27686_s1 + $0xf2c] sm:$0xf] }
 0x2be   :  { %5973 = vmatpush.bf16.msrb.mxu0 %v13120_v50  ;;  %v13568_v42 = vor.u32 %v17738_v6, %v13565_v35  ;;  %v17670_v52 = vld [vmem:[%s27686_s1 + $0x10cc] sm:$0xf]  ;;  %v13293_v25 = vld [vmem:[%s27686_s1 + $0x10d8] sm:$0xf0]  ;;  %v13088_v2 = vor.u32 %v17618_v47, %v13085_v62  ;;  %v23424_v62 = vpop.f32.mrf.mxu2 }
 0x2bf   :  { %5961 = vmatpush.bf16.msrb.mxu3 %v12960_v17  ;;  %v17702_v1 = vld [vmem:[%s27686_s1 + $0x11cc] sm:$0xf]  ;;  %v13421_v9 = vld [vmem:[%s27686_s1 + $0x11d8] sm:$0xf0] }
 0x2c0   :  { %5933 = vmatpush.bf16.msrb.mxu1 %v12704_v40  ;;  %v17734_v50 = vld [vmem:[%s27686_s1 + $0x12cc] sm:$0xf]  ;;  %v13549_v18 = vld [vmem:[%s27686_s1 + $0x12d8] sm:$0xf0]  ;;  %v13296_v40 = vor.u32 %v17670_v52, %v13293_v25  ;;  %v13424_v45 = vor.u32 %v17702_v1, %v13421_v9 }
 0x2c1   :  { %5947 = vmatpush.bf16.msrb.mxu2 %v12832_v43  ;;  %v17614_v34 = vld [vmem:[%s27686_s1 + $0xf0c] sm:$0xf]  ;;  %v13069_v43 = vld [vmem:[%s27686_s1 + $0xf18] sm:$0xf0]  ;;  %v13552_v22 = vor.u32 %v17734_v50, %v13549_v18 }
 0x2c2   :  { %5974 = vmatpush.bf16.msrb.mxu0 %v13104_v58  ;;  %v17666_v3 = vld [vmem:[%s27686_s1 + $0x10ac] sm:$0xf]  ;;  %v13277_v54 = vld [vmem:[%s27686_s1 + $0x10b8] sm:$0xf0]  ;;  %v13072_v53 = vor.u32 %v17614_v34, %v13069_v43 }
 0x2c3   :  { %5962 = vmatpush.bf16.msrb.mxu3 %v12944_v11  ;;  %v17698_v17 = vld [vmem:[%s27686_s1 + $0x11ac] sm:$0xf]  ;;  %v13693_v31 = vld [vmem:[%s27686_s1 + $0x13f8] sm:$0xf0] }
 0x2c4   :  { %5934 = vmatpush.bf16.msrb.mxu1 %v12688_v56  ;;  %v17770_v59 = vld [vmem:[%s27686_s1 + $0x13ec] sm:$0xf]  ;;  %v13405_v23 = vld [vmem:[%s27686_s1 + $0x11b8] sm:$0xf0] }
 0x2c5   :  { %5948 = vmatpush.bf16.msrb.mxu2 %v12816_v30  ;;  %v17730_v21 = vld [vmem:[%s27686_s1 + $0x12ac] sm:$0xf]  ;;  %v13533_v10 = vld [vmem:[%s27686_s1 + $0x12b8] sm:$0xf0]  ;;  %v13696_v58 = vor.u32 %v17770_v59, %v13693_v31  ;;  %v13408_v6 = vor.u32 %v17698_v17, %v13405_v23 }
 0x2c6   :  { %5975 = vmatpush.bf16.msrb.mxu0 %v13088_v2  ;;  %5963 = vmatmul.bf16.vlgmr.msrb.gmra.mxu3 %v19539_v38  ;;  %v13261_v14 = vld [vmem:[%s27686_s1 + $0x1098] sm:$0xf0]  ;;  %v13536_v35 = vor.u32 %v17730_v21, %v13533_v10  ;;  %v17694_v38 = vld [vmem:[%s27686_s1 + $0x118c] sm:$0xf] }
 0x2c7   :  { %6011 = vmatpush.bf16.msra.mxu3 %v13568_v42  ;;  %5935 = vmatmul.bf16.vlgmr.msrb.gmra.mxu1 %v19528_v32  ;;  %v13280_v32 = vor.u32 %v17666_v3, %v13277_v54  ;;  %v17766_v56 = vld [vmem:[%s27686_s1 + $0x13cc] sm:$0xf]  ;;  %v13677_v30 = vld [vmem:[%s27686_s1 + $0x13d8] sm:$0xf0] }
 0x2c8   :  { %5983 = vmatpush.bf16.msra.mxu1 %v13312_v60  ;;  %5949 = vmatmul.bf16.vlgmr.msrb.gmra.mxu2 %v19541_v41  ;;  %v17662_v41 = vld [vmem:[%s27686_s1 + $0x108c] sm:$0xf]  ;;  %v13389_v11 = vld [vmem:[%s27686_s1 + $0x1198] sm:$0xf0]  ;;  %v13680_v52 = vor.u32 %v17766_v56, %v13677_v30 }
 0x2c9   :  { %5997 = vmatpush.bf16.msra.mxu2 %v13440_v33  ;;  %v17726_v60 = vld [vmem:[%s27686_s1 + $0x128c] sm:$0xf]  ;;  %v13517_v47 = vld [vmem:[%s27686_s1 + $0x1298] sm:$0xf0]  ;;  %v23426_v33 = vpop.f32.mrf.mxu3  ;;  %v13264_v42 = vor.u32 %v17662_v41, %v13261_v14  ;;  %v13392_v9 = vor.u32 %v17694_v38, %v13389_v11 }
 0x2ca   :  { %5976 = vmatpush.bf16.msrb.mxu0 %v13072_v53  ;;  %v17658_v25 = vld [vmem:[%s27686_s1 + $0x106c] sm:$0xf]  ;;  %v13245_v1 = vld [vmem:[%s27686_s1 + $0x1078] sm:$0xf0]  ;;  %v13520_v50 = vor.u32 %v17726_v60, %v13517_v47 }
 0x2cb   :  { %6012 = vmatpush.bf16.msra.mxu3 %v13552_v22  ;;  %v17690_v18 = vld [vmem:[%s27686_s1 + $0x116c] sm:$0xf]  ;;  %v13661_v34 = vld [vmem:[%s27686_s1 + $0x13b8] sm:$0xf0]  ;;  %v13248_v22 = vor.u32 %v17658_v25, %v13245_v1  ;;  %v5712_v14 = vpop.f32.mrf.mxu2 }
 0x2cc   :  { %5984 = vmatpush.bf16.msra.mxu1 %v13296_v40  ;;  %v17762_v2 = vld [vmem:[%s27686_s1 + $0x13ac] sm:$0xf]  ;;  %v23443_v40 = vpop.f32.mrf.mxu0  ;;  %v13373_v43 = vld [vmem:[%s27686_s1 + $0x1178] sm:$0xf0]  ;;  %v5713_v11 = vadd.f32 %v5712_v14, %v23332_v36 }
 0x2cd   :  { %5998 = vmatpush.bf16.msra.mxu2 %v13424_v45  ;;  %5977 = vmatmul.bf16.vlgmr.msrb.gmra.mxu0 %v19549_v46  ;;  %v17722_v3 = vld [vmem:[%s27686_s1 + $0x126c] sm:$0xf]  ;;  %v13501_v54 = vld [vmem:[%s27686_s1 + $0x1278] sm:$0xf0]  ;;  %v23455_v45 = vpop.f32.mrf.mxu1  ;;  %v13664_v17 = vor.u32 %v17762_v2, %v13661_v34  ;;  %v13376_v31 = vor.u32 %v17690_v18, %v13373_v43 }
 0x2ce   :  { %6025 = vmatpush.bf16.msra.mxu0 %v13696_v58  ;;  %v17654_v46 = vld [vmem:[%s27686_s1 + $0x104c] sm:$0xf]  ;;  %v13229_v59 = vld [vmem:[%s27686_s1 + $0x1058] sm:$0xf0]  ;;  %v13504_v23 = vor.u32 %v17722_v3, %v13501_v54 }
 0x2cf   :  { %6013 = vmatpush.bf16.msra.mxu3 %v13536_v35  ;;  %v17686_v21 = vld [vmem:[%s27686_s1 + $0x114c] sm:$0xf]  ;;  %v13645_v53 = vld [vmem:[%s27686_s1 + $0x1398] sm:$0xf0]  ;;  %v13232_v35 = vor.u32 %v17654_v46, %v13229_v59 }
 0x2d0   :  { %5985 = vmatpush.bf16.msra.mxu1 %v13280_v32  ;;  %v17758_v10 = vld [vmem:[%s27686_s1 + $0x138c] sm:$0xf]  ;;  %v13357_v32 = vld [vmem:[%s27686_s1 + $0x1158] sm:$0xf0] }
 0x2d1   :  { %5999 = vmatpush.bf16.msra.mxu2 %v13408_v6  ;;  %v17718_v58 = vld [vmem:[%s27686_s1 + $0x124c] sm:$0xf]  ;;  %v13485_v41 = vld [vmem:[%s27686_s1 + $0x1258] sm:$0xf0]  ;;  %v5726_v6 = vpop.f32.mrf.mxu3  ;;  %v13648_v38 = vor.u32 %v17758_v10, %v13645_v53  ;;  %v13360_v60 = vor.u32 %v17686_v21, %v13357_v32 }
 0x2d2   :  { %6026 = vmatpush.bf16.msra.mxu0 %v13680_v52  ;;  %v17650_v56 = vld [vmem:[%s27686_s1 + $0x102c] sm:$0xf]  ;;  %v13213_v30 = vld [vmem:[%s27686_s1 + $0x1038] sm:$0xf0]  ;;  %v13488_v47 = vor.u32 %v17718_v58, %v13485_v41  ;;  %v5727_v18 = vadd.f32 %v5726_v6, %v5713_v11 }
 0x2d3   :  { %6014 = vmatpush.bf16.msra.mxu3 %v13520_v50  ;;  %v17754_v52 = vld [vmem:[%s27686_s1 + $0x136c] sm:$0xf]  ;;  %v13629_v25 = vld [vmem:[%s27686_s1 + $0x1378] sm:$0xf0]  ;;  %v13216_v34 = vor.u32 %v17650_v56, %v13213_v30 }
 0x2d4   :  { %5986 = vmatpush.bf16.msra.mxu1 %v13264_v42  ;;  %v17682_v42 = vld [vmem:[%s27686_s1 + $0x112c] sm:$0xf]  ;;  %v5740_v1 = vpop.f32.mrf.mxu0  ;;  %v13469_v50 = vld [vmem:[%s27686_s1 + $0x1238] sm:$0xf0]  ;;  %v13632_v43 = vor.u32 %v17754_v52, %v13629_v25 }
 0x2d5   :  { %6000 = vmatpush.bf16.msra.mxu2 %v13392_v9  ;;  %v13341_v9 = vld [vmem:[%s27686_s1 + $0x1138] sm:$0xf0]  ;;  %v17714_v36 = vld [vmem:[%s27686_s1 + $0x122c] sm:$0xf]  ;;  %v5754_v2 = vpop.f32.mrf.mxu1 }
 0x2d6   :  { %6027 = vmatpush.bf16.msra.mxu0 %v13664_v17  ;;  %v17646_v3 = vld [vmem:[%s27686_s1 + $0x100c] sm:$0xf]  ;;  %v13197_v54 = vld [vmem:[%s27686_s1 + $0x1018] sm:$0xf0]  ;;  %v5741_v17 = vadd.f32 %v5740_v1, %v5727_v18  ;;  %v13344_v46 = vor.u32 %v17682_v42, %v13341_v9  ;;  %v13472_v59 = vor.u32 %v17714_v36, %v13469_v50 }
 0x2d7   :  { %6015 = vmatpush.bf16.msra.mxu3 %v13504_v23  ;;  %v17750_v23 = vld [vmem:[%s27686_s1 + $0x134c] sm:$0xf]  ;;  %v13613_v21 = vld [vmem:[%s27686_s1 + $0x1358] sm:$0xf0] }
 0x2d8   :  { %5987 = vmatpush.bf16.msra.mxu1 %v13248_v22  ;;  %v17678_v22 = vld [vmem:[%s27686_s1 + $0x110c] sm:$0xf]  ;;  %v13453_v53 = vld [vmem:[%s27686_s1 + $0x1218] sm:$0xf0]  ;;  %v23533_v58 = vadd.f32 %v5754_v2, %v5741_v17 }
 0x2d9   :  { %6001 = vmatpush.bf16.msra.mxu2 %v13376_v31  ;;  %v13325_v31 = vld [vmem:[%s27686_s1 + $0x1118] sm:$0xf0]  ;;  %v17710_v10 = vld [vmem:[%s27686_s1 + $0x120c] sm:$0xf] }
 0x2da   :  { %6028 = vmatpush.bf16.msra.mxu0 %v13648_v38  ;;  %v17802_v32 = vld [vmem:[%s27686_s1 + $0x14ec] sm:$0xf]  ;;  %v13821_v41 = vld [vmem:[%s27686_s1 + $0x14f8] sm:$0xf0]  ;;  %v13616_v38 = vor.u32 %v17750_v23, %v13613_v21  ;;  %v13328_v11 = vor.u32 %v17678_v22, %v13325_v31 }
 0x2db   :  { %6016 = vmatpush.bf16.msra.mxu3 %v13488_v47  ;;  %v17834_v14 = vld [vmem:[%s27686_s1 + $0x15ec] sm:$0xf]  ;;  %v13949_v6 = vld [vmem:[%s27686_s1 + $0x15f8] sm:$0xf0]  ;;  %v13824_v52 = vor.u32 %v17802_v32, %v13821_v41 }
 0x2dc   :  { %5988 = vmatpush.bf16.msra.mxu1 %v13232_v35  ;;  %v13200_v35 = vor.u32 %v17646_v3, %v13197_v54  ;;  %v17866_v56 = vld [vmem:[%s27686_s1 + $0x16ec] sm:$0xf]  ;;  %v14077_v30 = vld [vmem:[%s27686_s1 + $0x16f8] sm:$0xf0]  ;;  %v13952_v25 = vor.u32 %v17834_v14, %v13949_v6 }
 0x2dd   :  { %6002 = vmatpush.bf16.msra.mxu2 %v13360_v60  ;;  %v13456_v60 = vor.u32 %v17710_v10, %v13453_v53  ;;  %v17746_v47 = vld [vmem:[%s27686_s1 + $0x132c] sm:$0xf]  ;;  %v13597_v42 = vld [vmem:[%s27686_s1 + $0x1338] sm:$0xf0]  ;;  %v14080_v9 = vor.u32 %v17866_v56, %v14077_v30 }
 0x2de   :  { %6029 = vmatpush.bf16.msra.mxu0 %v13632_v43  ;;  %v17798_v1 = vld [vmem:[%s27686_s1 + $0x14cc] sm:$0xf]  ;;  %v13805_v36 = vld [vmem:[%s27686_s1 + $0x14d8] sm:$0xf0]  ;;  %v13600_v2 = vor.u32 %v17746_v47, %v13597_v42 }
 0x2df   :  { %6017 = vmatpush.bf16.msra.mxu3 %v13472_v59  ;;  %v17830_v50 = vld [vmem:[%s27686_s1 + $0x15cc] sm:$0xf]  ;;  %v13933_v18 = vld [vmem:[%s27686_s1 + $0x15d8] sm:$0xf0]  ;;  %v13808_v22 = vor.u32 %v17798_v1, %v13805_v36 }
 0x2e0   :  { %5989 = vmatpush.bf16.msra.mxu1 %v13216_v34  ;;  %v17862_v34 = vld [vmem:[%s27686_s1 + $0x16cc] sm:$0xf]  ;;  %v14061_v43 = vld [vmem:[%s27686_s1 + $0x16d8] sm:$0xf0]  ;;  %v13936_v17 = vor.u32 %v17830_v50, %v13933_v18 }
 0x2e1   :  { %6003 = vmatpush.bf16.msra.mxu2 %v13344_v46  ;;  %v17742_v3 = vld [vmem:[%s27686_s1 + $0x130c] sm:$0xf]  ;;  %v13581_v54 = vld [vmem:[%s27686_s1 + $0x1318] sm:$0xf0]  ;;  %v14064_v23 = vor.u32 %v17862_v34, %v14061_v43 }
 0x2e2   :  { %6030 = vmatpush.bf16.msra.mxu0 %v13616_v38  ;;  %v17794_v46 = vld [vmem:[%s27686_s1 + $0x14ac] sm:$0xf]  ;;  %v14173_v31 = vld [vmem:[%s27686_s1 + $0x17b8] sm:$0xf0]  ;;  %v13584_v32 = vor.u32 %v17742_v3, %v13581_v54 }
 0x2e3   :  { %6018 = vmatpush.bf16.msra.mxu3 %v13456_v60  ;;  %v17890_v59 = vld [vmem:[%s27686_s1 + $0x17ac] sm:$0xf]  ;;  %v13789_v21 = vld [vmem:[%s27686_s1 + $0x14b8] sm:$0xf0] }
 0x2e4   :  { %5990 = vmatpush.bf16.msra.mxu1 %v13200_v35  ;;  %v17826_v10 = vld [vmem:[%s27686_s1 + $0x15ac] sm:$0xf]  ;;  %v13917_v53 = vld [vmem:[%s27686_s1 + $0x15b8] sm:$0xf0]  ;;  %v14176_v14 = vor.u32 %v17890_v59, %v14173_v31  ;;  %v13792_v6 = vor.u32 %v17794_v46, %v13789_v21 }
 0x2e5   :  { %6004 = vmatpush.bf16.msra.mxu2 %v13328_v11  ;;  %v14045_v41 = vld [vmem:[%s27686_s1 + $0x16b8] sm:$0xf0]  ;;  %v13920_v35 = vor.u32 %v17826_v10, %v13917_v53  ;;  %v17886_v38 = vld [vmem:[%s27686_s1 + $0x178c] sm:$0xf] }
 0x2e6   :  { %6031 = vmatpush.bf16.msra.mxu0 %v13600_v2  ;;  %6019 = vmatmul.bf16.vlgmr.msra.gmra.mxu3 %v27753_v24  ;;  %v14157_v56 = vld [vmem:[%s27686_s1 + $0x1798] sm:$0xf0]  ;;  %v17822_v11 = vld [vmem:[%s27686_s1 + $0x158c] sm:$0xf] }
 0x2e7   :  { %6067 = vmatpush.bf16.msrb.mxu3 %v14080_v9  ;;  %5991 = vmatmul.bf16.vlgmr.msra.gmra.mxu1 %v27752_v39  ;;  %v17858_v39 = vld [vmem:[%s27686_s1 + $0x16ac] sm:$0xf]  ;;  %v13773_v24 = vld [vmem:[%s27686_s1 + $0x1498] sm:$0xf0] }
 0x2e8   :  { %6039 = vmatpush.bf16.msrb.mxu1 %v13824_v52  ;;  %6005 = vmatmul.bf16.vlgmr.msra.gmra.mxu2 %v27751_v12  ;;  %v17790_v12 = vld [vmem:[%s27686_s1 + $0x148c] sm:$0xf]  ;;  %v14048_v30 = vor.u32 %v17858_v39, %v14045_v41  ;;  %v13901_v60 = vld [vmem:[%s27686_s1 + $0x1598] sm:$0xf0]  ;;  %v14160_v52 = vor.u32 %v17886_v38, %v14157_v56 }
 0x2e9   :  { %6053 = vmatpush.bf16.msrb.mxu2 %v13952_v25  ;;  %v17854_v47 = vld [vmem:[%s27686_s1 + $0x168c] sm:$0xf]  ;;  %v14029_v42 = vld [vmem:[%s27686_s1 + $0x1698] sm:$0xf0]  ;;  %v13776_v25 = vor.u32 %v17790_v12, %v13773_v24  ;;  %v13904_v1 = vor.u32 %v17822_v11, %v13901_v60 }
 0x2ea   :  { %6032 = vmatpush.bf16.msra.mxu0 %v13584_v32  ;;  %v17786_v9 = vld [vmem:[%s27686_s1 + $0x146c] sm:$0xf]  ;;  %v14141_v50 = vld [vmem:[%s27686_s1 + $0x1778] sm:$0xf0]  ;;  %v14032_v18 = vor.u32 %v17854_v47, %v14029_v42 }
 0x2eb   :  { %6068 = vmatpush.bf16.msrb.mxu3 %v14064_v23  ;;  %v17882_v36 = vld [vmem:[%s27686_s1 + $0x176c] sm:$0xf]  ;;  %v13757_v2 = vld [vmem:[%s27686_s1 + $0x1478] sm:$0xf0] }
 0x2ec   :  { %6040 = vmatpush.bf16.msrb.mxu1 %v13808_v22  ;;  %v17818_v34 = vld [vmem:[%s27686_s1 + $0x156c] sm:$0xf]  ;;  %v13885_v43 = vld [vmem:[%s27686_s1 + $0x1578] sm:$0xf0]  ;;  %v14144_v54 = vor.u32 %v17882_v36, %v14141_v50  ;;  %v13760_v22 = vor.u32 %v17786_v9, %v13757_v2 }
 0x2ed   :  { %6054 = vmatpush.bf16.msrb.mxu2 %v13936_v17  ;;  %6033 = vmatmul.bf16.vlgmr.msra.gmra.mxu0 %v27754_v28  ;;  %v17850_v3 = vld [vmem:[%s27686_s1 + $0x166c] sm:$0xf]  ;;  %v14013_v28 = vld [vmem:[%s27686_s1 + $0x1678] sm:$0xf0]  ;;  %v13888_v17 = vor.u32 %v17818_v34, %v13885_v43 }
 0x2ee   :  { %6083 = vmatpush.bf16.msrb.mxu0 %v14176_v14  ;;  %v17782_v46 = vld [vmem:[%s27686_s1 + $0x144c] sm:$0xf]  ;;  %v14125_v31 = vld [vmem:[%s27686_s1 + $0x1758] sm:$0xf0]  ;;  %v14016_v23 = vor.u32 %v17850_v3, %v14013_v28  ;;  %v14319_v28 = vld [vmem:[%s27688_s3 + $0x270] sm:$0xf] }
 0x2ef   :  { %6069 = vmatpush.bf16.msrb.mxu3 %v14048_v30  ;;  %v17878_v59 = vld [vmem:[%s27686_s1 + $0x174c] sm:$0xf]  ;;  %v13741_v21 = vld [vmem:[%s27686_s1 + $0x1458] sm:$0xf0] }
 0x2f0   :  { %6041 = vmatpush.bf16.msrb.mxu1 %v13792_v6  ;;  %v17814_v10 = vld [vmem:[%s27686_s1 + $0x154c] sm:$0xf]  ;;  %v13869_v53 = vld [vmem:[%s27686_s1 + $0x1558] sm:$0xf0]  ;;  %v14128_v41 = vor.u32 %v17878_v59, %v14125_v31  ;;  %v13744_v14 = vor.u32 %v17782_v46, %v13741_v21  ;;  %v17992_v46 = vld [vmem:[%s27688_s3 + $0x2f4] sm:$0xf0] }
 0x2f1   :  { %6055 = vmatpush.bf16.msrb.mxu2 %v13920_v35  ;;  %v17846_v32 = vld [vmem:[%s27686_s1 + $0x164c] sm:$0xf]  ;;  %v13997_v39 = vld [vmem:[%s27686_s1 + $0x1658] sm:$0xf0]  ;;  %v13872_v6 = vor.u32 %v17814_v10, %v13869_v53  ;;  %v14311_v53 = vld [vmem:[%s27688_s3 + $0x260] sm:$0xf] }
 0x2f2   :  { %6084 = vmatpush.bf16.msrb.mxu0 %v14160_v52  ;;  %v17778_v35 = vld [vmem:[%s27686_s1 + $0x142c] sm:$0xf]  ;;  %v14109_v38 = vld [vmem:[%s27686_s1 + $0x1738] sm:$0xf0]  ;;  %v14000_v56 = vor.u32 %v17846_v32, %v13997_v39  ;;  %v17974_v32 = vld [vmem:[%s27688_s3 + $0x264] sm:$0xf0] }
 0x2f3   :  { %6070 = vmatpush.bf16.msrb.mxu3 %v14032_v18  ;;  %v17874_v12 = vld [vmem:[%s27686_s1 + $0x172c] sm:$0xf]  ;;  %v13725_v30 = vld [vmem:[%s27686_s1 + $0x1438] sm:$0xf0]  ;;  %v14375_v39 = vld [vmem:[%s27688_s3 + $0x2e0] sm:$0xf] }
 0x2f4   :  { %6042 = vmatpush.bf16.msrb.mxu1 %v13776_v25  ;;  %v17810_v24 = vld [vmem:[%s27686_s1 + $0x152c] sm:$0xf]  ;;  %v13853_v11 = vld [vmem:[%s27686_s1 + $0x1538] sm:$0xf0]  ;;  %v14112_v42 = vor.u32 %v17874_v12, %v14109_v38  ;;  %v13728_v25 = vor.u32 %v17778_v35, %v13725_v30  ;;  %v14303_v35 = vld [vmem:[%s27688_s3 + $0x250] sm:$0xf] }
 0x2f5   :  { %6056 = vmatpush.bf16.msrb.mxu2 %v13904_v1  ;;  %v17842_v60 = vld [vmem:[%s27686_s1 + $0x162c] sm:$0xf]  ;;  %v13981_v47 = vld [vmem:[%s27686_s1 + $0x1638] sm:$0xf0]  ;;  %v13856_v1 = vor.u32 %v17810_v24, %v13853_v11  ;;  %v17972_v12 = vld [vmem:[%s27688_s3 + $0x254] sm:$0xf0] }
 0x2f6   :  { %6085 = vmatpush.bf16.msrb.mxu0 %v14144_v54  ;;  %v17774_v52 = vld [vmem:[%s27686_s1 + $0x140c] sm:$0xf]  ;;  %v13709_v9 = vld [vmem:[%s27686_s1 + $0x1418] sm:$0xf0]  ;;  %v13984_v18 = vor.u32 %v17842_v60, %v13981_v47  ;;  %v17976_v54 = vld [vmem:[%s27688_s3 + $0x274] sm:$0xf0] }
 0x2f7   :  { %6071 = vmatpush.bf16.msrb.mxu3 %v14016_v23  ;;  %v17870_v36 = vld [vmem:[%s27686_s1 + $0x170c] sm:$0xf]  ;;  %v14093_v50 = vld [vmem:[%s27686_s1 + $0x1718] sm:$0xf0]  ;;  %v13712_v59 = vor.u32 %v17774_v52, %v13709_v9  ;;  %v14320_v21 = vor.u32 %v17976_v54, %v14319_v28  ;;  %v14367_v38 = vld [vmem:[%s27688_s3 + $0x2d0] sm:$0xf] }
 0x2f8   :  { %6043 = vmatpush.bf16.msrb.mxu1 %v13760_v22  ;;  %v17806_v2 = vld [vmem:[%s27686_s1 + $0x150c] sm:$0xf]  ;;  %v13837_v34 = vld [vmem:[%s27686_s1 + $0x1518] sm:$0xf0]  ;;  %v14096_v22 = vor.u32 %v17870_v36, %v14093_v50  ;;  %v14359_v24 = vld [vmem:[%s27688_s3 + $0x2c0] sm:$0xf] }
 0x2f9   :  { %6057 = vmatpush.bf16.msrb.mxu2 %v13888_v17  ;;  %v17838_v43 = vld [vmem:[%s27686_s1 + $0x160c] sm:$0xf]  ;;  %v13965_v3 = vld [vmem:[%s27686_s1 + $0x1618] sm:$0xf0]  ;;  %v14383_v17 = vld [vmem:[%s27688_s3 + $0x2f0] sm:$0xf]  ;;  %v13840_v31 = vor.u32 %v17806_v2, %v13837_v34 }
 0x2fa   :  { %6086 = vmatpush.bf16.msrb.mxu0 %v14128_v41  ;;  %v13968_v23 = vor.u32 %v17838_v43, %v13965_v3  ;;  %v14384_v10 = vor.u32 %v17992_v46, %v14383_v17  ;;  %v17990_v41 = vld [vmem:[%s27688_s3 + $0x2e4] sm:$0xf0]  ;;  %v14287_v47 = vld [vmem:[%s27688_s3 + $0x230] sm:$0xf]  ;;  %v14279_v36 = vld [vmem:[%s27688_s3 + $0x220] sm:$0xf] }
 0x2fb   :  { %6072 = vmatpush.bf16.msrb.mxu3 %v14000_v56  ;;  %v14304_v56 = vor.u32 %v17972_v12, %v14303_v35  ;;  %v14351_v52 = vld [vmem:[%s27688_s3 + $0x2b0] sm:$0xf]  ;;  %v17966_v50 = vld [vmem:[%s27688_s3 + $0x224] sm:$0xf0]  ;;  %v17964_v28 = vld [vmem:[%s27688_s3 + $0x214] sm:$0xf0] }
 0x2fc   :  { %6044 = vmatpush.bf16.msrb.mxu1 %v13744_v14  ;;  %v14312_v14 = vor.u32 %v17974_v32, %v14311_v53  ;;  %v17982_v2 = vld [vmem:[%s27688_s3 + $0x2a4] sm:$0xf0]  ;;  %v14280_v34 = vor.u32 %v17966_v50, %v14279_v36  ;;  %v14271_v3 = vld [vmem:[%s27688_s3 + $0x210] sm:$0xf]  ;;  %v17975_v53 = vld [vmem:[%s27688_s3 + $0x274] sm:$0xf] }
 0x2fd   :  { %6058 = vmatpush.bf16.msrb.mxu2 %v13872_v6  ;;  %v14376_v6 = vor.u32 %v17990_v41, %v14375_v39  ;;  %v14335_v54 = vld [vmem:[%s27688_s3 + $0x290] sm:$0xf]  ;;  %v14272_v17 = vor.u32 %v17964_v28, %v14271_v3  ;;  %v14321_v32 = vld [vmem:[%s27688_s3 + $0x278] sm:$0xf0]  ;;  %v17991_v39 = vld [vmem:[%s27688_s3 + $0x2f4] sm:$0xf] }
 0x2fe   :  { %6087 = vmatpush.bf16.msrb.mxu0 %v14112_v42  ;;  %v17968_v42 = vld [vmem:[%s27688_s3 + $0x234] sm:$0xf0]  ;;  %v17959_v46 = vld [vmem:[#allocation2 + $0xc] sm:$0x10]  ;;  %v14385_v41 = vld [vmem:[%s27688_s3 + $0x2f8] sm:$0xf0] }
 0x2ff   :  { %6073 = vmatpush.bf16.msrb.mxu3 %v13984_v18  ;;  %v14343_v18 = vld [vmem:[%s27688_s3 + $0x2a0] sm:$0xf]  ;;  %v17987_v36 = vld [vmem:[%s27688_s3 + $0x2d4] sm:$0xf]  ;;  %v14369_v50 = vld [vmem:[%s27688_s3 + $0x2d8] sm:$0xf0] }
 0x300   :  { %6045 = vmatpush.bf16.msrb.mxu1 %v13728_v25  ;;  %v17984_v25 = vld [vmem:[%s27688_s3 + $0x2b4] sm:$0xf0]  ;;  %v14344_v43 = vor.u32 %v17982_v2, %v14343_v18  ;;  %v14247_v35 = vld [vmem:[#allocation2] sm:$0xe]  ;;  %v23873_v18 = vpop.f32.mrf.mxu2  ;;  %v17969_v3 = vld [vmem:[%s27688_s3 + $0x244] sm:$0xf] }
 0x301   :  { %6059 = vmatpush.bf16.msrb.mxu2 %v13856_v1  ;;  %v14288_v1 = vor.u32 %v17968_v42, %v14287_v47  ;;  %v14352_v9 = vor.u32 %v17984_v25, %v14351_v52  ;;  %v14297_v28 = vld [vmem:[%s27688_s3 + $0x248] sm:$0xf0] }
 0x302   :  { %6088 = vmatpush.bf16.msrb.mxu0 %v14096_v22  ;;  %v17980_v22 = vld [vmem:[%s27688_s3 + $0x294] sm:$0xf0] }
 0x303   :  { %6074 = vmatpush.bf16.msrb.mxu3 %v13968_v23  ;;  %v17962_v23 = vld [vmem:[%s27688_s3 + $0x204] sm:$0xf0] }
 0x304   :  { %6046 = vmatpush.bf16.msrb.mxu1 %v13712_v59  ;;  %v14336_v59 = vor.u32 %v17980_v22, %v14335_v54  ;;  %v23883_v54 = vpop.f32.mrf.mxu0 }
 0x305   :  { %6060 = vmatpush.bf16.msrb.mxu2 %v13840_v31  ;;  %14180 = vmatmul.msk.bf16.vlgmr.msrb.gmra.mxu0 %vm4747_vm0, %v27757_v15  ;;  %v17988_v15 = vld [vmem:[%s27688_s3 + $0x2d4] sm:$0xf0]  ;;  %v14263_v31 = vld [vmem:[%s27688_s3 + $0x200] sm:$0xf] }
 0x306   :  { %6590 = vmatpush.bf16.msra.mxu0 %v14320_v21  ;;  %6075 = vmatmul.bf16.vlgmr.msrb.gmra.mxu3 %v27758_v13  ;;  %v14368_v30 = vor.u32 %v17988_v15, %v14367_v38  ;;  %v17986_v13 = vld [vmem:[%s27688_s3 + $0x2c4] sm:$0xf0]  ;;  %v14327_v21 = vld [vmem:[%s27688_s3 + $0x280] sm:$0xf]  ;;  %v14324_v38 = vor.u32 %v17975_v53, %v14321_v32  ;;  %v14248_v15 = vor.u32 %v17959_v46, %v14247_v35  ;;  %v14361_v46 = vld [vmem:[%s27688_s3 + $0x2c8] sm:$0xf0] }
 0x307   :  { %6047 = vmatmul.bf16.vlgmr.msrb.gmra.mxu1 %v27756_v51  ;;  %v14295_v51 = vld [vmem:[%s27688_s3 + $0x240] sm:$0xf]  ;;  %v14360_v60 = vor.u32 %v17986_v13, %v14359_v24  ;;  %v14313_v24 = vld [vmem:[%s27688_s3 + $0x268] sm:$0xf0]  ;;  %v23847_v13 = vpop.f32.mrf.mxu1  ;;  %v14353_v53 = vld [vmem:[%s27688_s3 + $0x2b8] sm:$0xf0] }
 0x308   :  { %6603 = vmatpush.bf16.msra.mxu1 %v14384_v10  ;;  %6061 = vmatmul.bf16.vlgmr.msrb.gmra.mxu2 %v27755_v8  ;;  %v17970_v8 = vld [vmem:[%s27688_s3 + $0x244] sm:$0xf0]  ;;  %v23855_v47 = vrot.slane %v14248_v15, 1  ;;  %v23905_v32 = vpop.f32.mrf.mxu2  ;;  %v14281_v35 = vld [vmem:[%s27688_s3 + $0x228] sm:$0xf0] }
 0x309   :  { %v14296_v11 = vor.u32 %v17970_v8, %v14295_v51  ;;  %v17978_v10 = vld [vmem:[%s27688_s3 + $0x284] sm:$0xf0]  ;;  %v17973_v8 = vld [vmem:[%s27688_s3 + $0x264] sm:$0xf]  ;;  %v14345_v15 = vld [vmem:[%s27688_s3 + $0x2a8] sm:$0xf0] }
 0x30a   :  { %6591 = vmatpush.bf16.msra.mxu0 %v14312_v14  ;;  %v14249_v14 = vld [vmem:[#allocation2 + $0x10] sm:$0x10]  ;;  %v14328_v12 = vor.u32 %v17978_v10, %v14327_v21  ;;  %v14316_v42 = vor.u32 %v17973_v8, %v14313_v24  ;;  %v14289_v21 = vld [vmem:[%s27688_s3 + $0x238] sm:$0xf0] }
 0x30b   :  { %v17983_v10 = vld [vmem:[%s27688_s3 + $0x2b4] sm:$0xf]  ;;  %v14273_v24 = vld [vmem:[%s27688_s3 + $0x218] sm:$0xf0] }
 0x30c   :  { %6604 = vmatpush.bf16.msra.mxu1 %v14376_v6  ;;  %v14264_v6 = vor.u32 %v17962_v23, %v14263_v31  ;;  %v17967_v23 = vld [vmem:[%s27688_s3 + $0x234] sm:$0xf] }
 0x30d   :  { %v17963_v8 = vld [vmem:[%s27688_s3 + $0x214] sm:$0xf] }
 0x30e   :  { %6592 = vmatpush.bf16.msra.mxu0 %v14304_v56  ;;  %v17957_v56 = vld [vmem:[#allocation2 + $0x4] sm:$0xe] }
 0x30f   :  { %v14252_v51 = vor.u32 %v17957_v56, %v14249_v14  ;;  %v23885_v22 = vpop.f32.mrf.mxu1  ;;  %v14356_v14 = vor.u32 %v17983_v10, %v14353_v53 }
 0x310   :  { %6605 = vmatpush.bf16.msra.mxu1 %v14368_v30  ;;  %v14388_v30 = vor.u32 %v17991_v39, %v14385_v41  ;;  %v14292_v39 = vor.u32 %v17967_v23, %v14289_v21 }
 0x311   :  { %v23857_v52 = vrot.slane %v14252_v51, 1 }
 0x312   :  { %6593 = vmatpush.bf16.msra.mxu0 %v14296_v11  ;;  %v17989_v11 = vld [vmem:[%s27688_s3 + $0x2e4] sm:$0xf] }
 0x314   :  { %6606 = vmatpush.bf16.msra.mxu1 %v14360_v60  ;;  %v14377_v60 = vld [vmem:[%s27688_s3 + $0x2e8] sm:$0xf0] }
 0x315   :  { %v14380_v25 = vor.u32 %v17989_v11, %v14377_v60  ;;  %v17979_v11 = vld [vmem:[%s27688_s3 + $0x294] sm:$0xf]  ;;  %v14337_v60 = vld [vmem:[%s27688_s3 + $0x298] sm:$0xf0] }
 0x316   :  { %6594 = vmatpush.bf16.msra.mxu0 %v14288_v1  ;;  %v17971_v1 = vld [vmem:[%s27688_s3 + $0x254] sm:$0xf] }
 0x317   :  { %v23923_v56 = vpop.f32.mrf.mxu1 }
 0x318   :  { %6607 = vmatpush.bf16.msra.mxu1 %v14352_v9  ;;  %v14305_v9 = vld [vmem:[%s27688_s3 + $0x258] sm:$0xf0] }
 0x319   :  { %v14308_v2 = vor.u32 %v17971_v1, %v14305_v9  ;;  %v17961_v1 = vld [vmem:[%s27688_s3 + $0x204] sm:$0xf]  ;;  %v14265_v9 = vld [vmem:[%s27688_s3 + $0x208] sm:$0xf0] }
 0x31a   :  { %6595 = vmatpush.bf16.msra.mxu0 %v14280_v34  ;;  %v23875_v34 = vpop.f32.mrf.mxu3 }
 0x31c   :  { %6608 = vmatpush.bf16.msra.mxu1 %v14344_v43  ;;  %v14372_v43 = vor.u32 %v17987_v36, %v14369_v50  ;;  %v17977_v36 = vld [vmem:[%s27688_s3 + $0x284] sm:$0xf]  ;;  %v23946_v50 = vpop.f32.mrf.mxu2 }
 0x31e   :  { %6596 = vmatpush.bf16.msra.mxu0 %v14272_v17  ;;  %v17985_v17 = vld [vmem:[%s27688_s3 + $0x2c4] sm:$0xf] }
 0x31f   :  { %v14364_v31 = vor.u32 %v17985_v17, %v14361_v46  ;;  %v14639_v17 = vld [vmem:[%s27688_s3 + $0xf0] sm:$0xf]  ;;  %v17924_v46 = vld [vmem:[%s27688_s3 + $0xf4] sm:$0xf0]  ;;  %v23967_v10 = vpop.f32.mrf.mxu1 }
 0x320   :  { %6609 = vmatpush.bf16.msra.mxu1 %v14336_v59  ;;  %v14300_v59 = vor.u32 %v17969_v3, %v14297_v28  ;;  %v17908_v3 = vld [vmem:[%s27688_s3 + $0x74] sm:$0xf0]  ;;  %v14640_v53 = vor.u32 %v17924_v46, %v14639_v17 }
 0x322   :  { %6597 = vmatpush.bf16.msra.mxu0 %v14264_v6  ;;  %v23907_v41 = vpop.f32.mrf.mxu3  ;;  %v17965_v6 = vld [vmem:[%s27688_s3 + $0x224] sm:$0xf] }
 0x324   :  { %6610 = vmatpush.bf16.msra.mxu1 %v14328_v12  ;;  %v23915_v12 = vpop.f32.mrf.mxu0 }
 0x325   :  { %6598 = vmatmul.bf16.vlgmr.msra.gmra.mxu0 %v23855_v47 }
 0x326   :  { %6642 = vmatpush.bf16.msrb.mxu0 %v14324_v38  ;;  %v17981_v38 = vld [vmem:[%s27688_s3 + $0x2a4] sm:$0xf] }
 0x327   :  { %6611 = vmatmul.bf16.vlgmr.msra.gmra.mxu1 %v23857_v52  ;;  %v14348_v51 = vor.u32 %v17981_v38, %v14345_v15 }
 0x328   :  { %6655 = vmatpush.bf16.msrb.mxu1 %v14388_v30  ;;  %v14284_v30 = vor.u32 %v17965_v6, %v14281_v35  ;;  %v14631_v6 = vld [vmem:[%s27688_s3 + $0xe0] sm:$0xf]  ;;  %v17922_v35 = vld [vmem:[%s27688_s3 + $0xe4] sm:$0xf0] }
 0x329   :  { %v14632_v15 = vor.u32 %v17922_v35, %v14631_v6  ;;  %v14535_v35 = vld [vmem:[%s27688_s3 + $0x20] sm:$0xf] }
 0x32a   :  { %6643 = vmatpush.bf16.msrb.mxu0 %v14316_v42  ;;  %v14276_v42 = vor.u32 %v17963_v8, %v14273_v24  ;;  %v23957_v28 = vpop.f32.mrf.mxu3  ;;  %v14623_v8 = vld [vmem:[%s27688_s3 + $0xd0] sm:$0xf]  ;;  %v17920_v24 = vld [vmem:[%s27688_s3 + $0xd4] sm:$0xf0] }
 0x32c   :  { %6656 = vmatpush.bf16.msrb.mxu1 %v14380_v25  ;;  %v14340_v25 = vor.u32 %v17979_v11, %v14337_v60  ;;  %v5435_v11 = vadd.f32 %v22596_v16, %v822_v48  ;;  %v23997_v60 = vpop.f32.mrf.mxu2  ;;  %v17902_v48 = vld [vmem:[%s27688_s3 + $0x44] sm:$0xf0]  ;;  %v14615_v16 = vld [vmem:[%s27688_s3 + $0xc0] sm:$0xf] }
 0x32d   :  { %v14552_v17 = vor.u32 %v17902_v48, %v14551_v26  ;;  %v18024_v26 = vld [vmem:[%s27688_s3 + $0x3f4] sm:$0xf0] }
 0x32e   :  { %6644 = vmatpush.bf16.msrb.mxu0 %v14308_v2  ;;  %v14329_v2 = vld [vmem:[%s27688_s3 + $0x288] sm:$0xf0] }
 0x32f   :  { %v14332_v23 = vor.u32 %v17977_v36, %v14329_v2  ;;  %v14624_v36 = vor.u32 %v17920_v24, %v14623_v8  ;;  %v5449_v2 = vadd.f32 %v22613_v63, %v5435_v11  ;;  %v14607_v63 = vld [vmem:[%s27688_s3 + $0xb0] sm:$0xf]  ;;  %v18008_v11 = vld [vmem:[%s27688_s3 + $0x374] sm:$0xf0] }
 0x330   :  { %6657 = vmatpush.bf16.msrb.mxu1 %v14372_v43  ;;  %v14575_v43 = vld [vmem:[%s27688_s3 + $0x70] sm:$0xf] }
 0x331   :  { %v14576_v21 = vor.u32 %v17908_v3, %v14575_v43  ;;  %v24020_v43 = vpop.f32.mrf.mxu1  ;;  %v14447_v24 = vld [vmem:[%s27688_s3 + $0x370] sm:$0xf] }
 0x332   :  { %6645 = vmatpush.bf16.msrb.mxu0 %v14300_v59  ;;  %v23965_v59 = vpop.f32.mrf.mxu0 }
 0x334   :  { %6658 = vmatpush.bf16.msrb.mxu1 %v14364_v31  ;;  %v14268_v31 = vor.u32 %v17961_v1, %v14265_v9 }
 0x336   :  { %6646 = vmatpush.bf16.msrb.mxu0 %v14292_v39  ;;  %v14567_v39 = vld [vmem:[%s27688_s3 + $0x60] sm:$0xf] }
 0x338   :  { %6659 = vmatpush.bf16.msrb.mxu1 %v14356_v14  ;;  %v17906_v14 = vld [vmem:[%s27688_s3 + $0x64] sm:$0xf0] }
 0x339   :  { %v14568_v38 = vor.u32 %v17906_v14, %v14567_v39  ;;  %v24037_v14 = vpop.f32.mrf.mxu2  ;;  %v24056_v8 = vpop.f32.mrf.mxu1 }
 0x33a   :  { %6647 = vmatpush.bf16.msrb.mxu0 %v14284_v30  ;;  %v14559_v30 = vld [vmem:[%s27688_s3 + $0x50] sm:$0xf]  ;;  %v24005_v9 = vpop.f32.mrf.mxu0 }
 0x33c   :  { %6660 = vmatpush.bf16.msrb.mxu1 %v14348_v51  ;;  %v17904_v51 = vld [vmem:[%s27688_s3 + $0x54] sm:$0xf0] }
 0x33d   :  { %v14560_v1 = vor.u32 %v17904_v51, %v14559_v30 }
 0x33e   :  { %6648 = vmatpush.bf16.msrb.mxu0 %v14276_v42 }
 0x340   :  { %6661 = vmatpush.bf16.msrb.mxu1 %v14340_v25  ;;  %v24003_v25 = vpop.f32.mrf.mxu3 }
 0x342   :  { %6649 = vmatpush.bf16.msrb.mxu0 %v14268_v31  ;;  %v14543_v31 = vld [vmem:[%s27688_s3 + $0x30] sm:$0xf]  ;;  %v24054_v51 = vpop.f32.mrf.mxu0 }
 0x344   :  { %6662 = vmatpush.bf16.msrb.mxu1 %v14332_v23  ;;  %v17900_v23 = vld [vmem:[%s27688_s3 + $0x34] sm:$0xf0] }
 0x345   :  { %6650 = vmatmul.bf16.vlgmr.msrb.gmra.mxu0 %v23855_v47  ;;  %v18517_v47 = vld [vmem:[%s27687_s2] sm:$0xf]  ;;  %v14544_v39 = vor.u32 %v17900_v23, %v14543_v31 }
 0x346   :  { %7028 = vmatpush.bf16.msra.mxu0 %v14576_v21  ;;  %v823_v42 = vperm.slane %v18517_v47, 3  ;;  %v5463_v21 = vadd.f32 %v22625_v20, %v5449_v2  ;;  %v14599_v20 = vld [vmem:[%s27688_s3 + $0xa0] sm:$0xf]  ;;  %v14511_v47 = vld [vmem:[%s27688_s3 + $0x3f0] sm:$0xf] }
 0x347   :  { %6663 = vmatmul.bf16.vlgmr.msrb.gmra.mxu1 %v23857_v52  ;;  %v17918_v52 = vld [vmem:[%s27688_s3 + $0xc4] sm:$0xf0]  ;;  %v17896_v2 = vld [vmem:[%s27688_s3 + $0x14] sm:$0xf0]  ;;  %v14439_v31 = vld [vmem:[%s27688_s3 + $0x360] sm:$0xf] }
 0x348   :  { %7041 = vmatpush.bf16.msra.mxu1 %v14640_v53  ;;  %v5769_v3 = vadd.f32 %v23885_v22, %v823_v42  ;;  %v14616_v46 = vor.u32 %v17918_v52, %v14615_v16  ;;  %v17916_v22 = vld [vmem:[%s27688_s3 + $0xb4] sm:$0xf0]  ;;  %v5477_v30 = vadd.f32 %v22642_v55, %v5463_v21  ;;  %v14527_v52 = vld [vmem:[%s27688_s3 + $0x10] sm:$0xf]  ;;  %v17894_v21 = vld [vmem:[%s27688_s3 + $0x4] sm:$0xf0] }
 0x349   :  { %v14608_v6 = vor.u32 %v17916_v22, %v14607_v63  ;;  %v14528_v63 = vor.u32 %v17896_v2, %v14527_v52  ;;  %v14519_v22 = vld [vmem:[%s27688_s3] sm:$0xf] }
 0x34a   :  { %7029 = vmatpush.bf16.msra.mxu0 %v14568_v38  ;;  %v5783_v53 = vadd.f32 %v23905_v32, %v5769_v3  ;;  %v17898_v38 = vld [vmem:[%s27688_s3 + $0x24] sm:$0xf0]  ;;  %v5491_v48 = vadd.f32 %v22812_v49, %v5477_v30  ;;  %v5771_v3 = vadd.f32 %v23923_v56, %v823_v42  ;;  %v17912_v49 = vld [vmem:[%s27688_s3 + $0x94] sm:$0xf0]  ;;  %v14503_v42 = vld [vmem:[%s27688_s3 + $0x3e0] sm:$0xf] }
 0x34b   :  { %v17914_v32 = vld [vmem:[%s27688_s3 + $0xa4] sm:$0xf0]  ;;  %v14536_v55 = vor.u32 %v17898_v38, %v14535_v35  ;;  %v24107_v35 = vpop.f32.mrf.mxu2  ;;  %v14583_v38 = vld [vmem:[%s27688_s3 + $0x80] sm:$0xf] }
 0x34c   :  { %7042 = vmatpush.bf16.msra.mxu1 %v14632_v15  ;;  %v24045_v15 = vpop.f32.mrf.mxu3  ;;  %v14600_v16 = vor.u32 %v17914_v32, %v14599_v20  ;;  %v18006_v56 = vld [vmem:[%s27688_s3 + $0x364] sm:$0xf0]  ;;  %v17907_v32 = vld [vmem:[%s27688_s3 + $0x74] sm:$0xf] }
 0x34d   :  { %v17910_v20 = vld [vmem:[%s27688_s3 + $0x84] sm:$0xf0] }
 0x34e   :  { %7030 = vmatpush.bf16.msra.mxu0 %v14560_v1  ;;  %v5797_v1 = vadd.f32 %v23907_v41, %v5783_v53  ;;  %v14512_v41 = vor.u32 %v18024_v26, %v14511_v47  ;;  %v14440_v53 = vor.u32 %v18006_v56, %v14439_v31  ;;  %v17923_v47 = vld [vmem:[%s27688_s3 + $0xf4] sm:$0xf]  ;;  %v14495_v26 = vld [vmem:[%s27688_s3 + $0x3d0] sm:$0xf] }
 0x350   :  { %7043 = vmatpush.bf16.msra.mxu1 %v14624_v36  ;;  %v14448_v36 = vor.u32 %v18008_v11, %v14447_v24  ;;  %6629 = vmatpush.bf16.msra.mxu3 %v14512_v41  ;;  %v5811_v23 = vadd.f32 %v23915_v12, %v5797_v1  ;;  %v5785_v24 = vadd.f32 %v23946_v50, %v5771_v3  ;;  %v14577_v11 = vld [vmem:[%s27688_s3 + $0x78] sm:$0xf0]  ;;  %v14431_v50 = vld [vmem:[%s27688_s3 + $0x350] sm:$0xf]  ;;  %v18020_v41 = vld [vmem:[%s27688_s3 + $0x3d4] sm:$0xf0] }
 0x351   :  { %v14641_v1 = vld [vmem:[%s27688_s3 + $0xf8] sm:$0xf0]  ;;  %v14580_v31 = vor.u32 %v17907_v32, %v14577_v11  ;;  %v14496_v56 = vor.u32 %v18020_v41, %v14495_v26  ;;  %v14415_v26 = vld [vmem:[%s27688_s3 + $0x330] sm:$0xf]  ;;  %v18016_v41 = vld [vmem:[%s27688_s3 + $0x3b4] sm:$0xf0] }
 0x352   :  { %7031 = vmatpush.bf16.msra.mxu0 %v14552_v17  ;;  %v14591_v17 = vld [vmem:[%s27688_s3 + $0x90] sm:$0xf]  ;;  %6616 = vmatpush.bf16.msra.mxu2 %v14448_v36  ;;  %v18004_v36 = vld [vmem:[%s27688_s3 + $0x354] sm:$0xf0] }
 0x353   :  { %v14592_v12 = vor.u32 %v17912_v49, %v14591_v17  ;;  %v14432_v2 = vor.u32 %v18004_v36, %v14431_v50  ;;  %v24147_v17 = vpop.f32.mrf.mxu1  ;;  %v14584_v49 = vor.u32 %v17910_v20, %v14583_v38  ;;  %v18018_v38 = vld [vmem:[%s27688_s3 + $0x3c4] sm:$0xf0]  ;;  %v14625_v50 = vld [vmem:[%s27688_s3 + $0xd8] sm:$0xf0] }
 0x354   :  { %7044 = vmatpush.bf16.msra.mxu1 %v14616_v46  ;;  %v24085_v46 = vld [vmem:[#allocation2] sm:$0xff] }
 0x355   :  { %v6696_v52 = vunpack.c.l.b16 %v24085_v46 }
 0x356   :  { %7032 = vmatpush.bf16.msra.mxu0 %v14544_v39  ;;  %v18022_v39 = vld [vmem:[%s27688_s3 + $0x3e4] sm:$0xf0]  ;;  %6617 = vmatpush.bf16.msra.mxu2 %v14440_v53  ;;  %v14487_v53 = vld [vmem:[%s27688_s3 + $0x3c0] sm:$0xf] }
 0x357   :  { %v14504_v30 = vor.u32 %v18022_v39, %v14503_v42  ;;  %v5799_v42 = vadd.f32 %v23957_v28, %v5785_v24  ;;  %v14423_v28 = vld [vmem:[%s27688_s3 + $0x340] sm:$0xf]  ;;  %v14488_v24 = vor.u32 %v18018_v38, %v14487_v53  ;;  %v17899_v38 = vld [vmem:[%s27688_s3 + $0x34] sm:$0xf] }
 0x358   :  { %7045 = vmatpush.bf16.msra.mxu1 %v14608_v6  ;;  %v5505_v6 = vadd.f32 %v22814_v61, %v5491_v48  ;;  %v24119_v61 = vpop.f32.mrf.mxu3  ;;  %v5825_v48 = vadd.f32 %v23967_v10, %v5811_v23  ;;  %v17905_v10 = vld [vmem:[%s27688_s3 + $0x64] sm:$0xf]  ;;  %v14644_v23 = vor.u32 %v17923_v47, %v14641_v1  ;;  %v14561_v1 = vld [vmem:[%s27688_s3 + $0x58] sm:$0xf0] }
 0x359   :  { %6630 = vmatpush.bf16.msra.mxu3 %v14504_v30  ;;  %v17903_v30 = vld [vmem:[%s27688_s3 + $0x54] sm:$0xf] }
 0x35a   :  { %7033 = vmatpush.bf16.msra.mxu0 %v14536_v55  ;;  %v24130_v55 = vpop.f32.mrf.mxu0  ;;  %v5519_v3 = vadd.f32 %v22832_v0, %v5505_v6  ;;  %v17921_v0 = vld [vmem:[%s27688_s3 + $0xe4] sm:$0xf]  ;;  %6618 = vmatpush.bf16.msra.mxu2 %v14432_v2  ;;  %v5839_v39 = vadd.f32 %v23997_v60, %v5825_v48  ;;  %v24173_v6 = vpack.c.b16 %v6696_v52, %v6696_v52  ;;  %v18000_v48 = vld [vmem:[%s27688_s3 + $0x334] sm:$0xf0] }
 0x35b   :  { %v5813_v60 = vadd.f32 %v23965_v59, %v5799_v42  ;;  %v24195_v59 = vpop.f32.mrf.mxu2  ;;  %v14416_v2 = vor.u32 %v18000_v48, %v14415_v26  ;;  %v18012_v48 = vld [vmem:[%s27688_s3 + $0x394] sm:$0xf0] }
 0x35c   :  { %7046 = vmatpush.bf16.msra.mxu1 %v14600_v16  ;;  %v14520_v16 = vor.u32 %v17894_v21, %v14519_v22  ;;  %v14569_v22 = vld [vmem:[%s27688_s3 + $0x68] sm:$0xf0]  ;;  %v5533_v20 = vadd.f32 %v22843_v27, %v5519_v3  ;;  %v17919_v27 = vld [vmem:[%s27688_s3 + $0xd4] sm:$0xf]  ;;  %v5853_v52 = vadd.f32 %v24003_v25, %v5839_v39 }
 0x35d   :  { %v14633_v21 = vld [vmem:[%s27688_s3 + $0xe8] sm:$0xf0]  ;;  %6631 = vmatpush.bf16.msra.mxu3 %v14496_v56  ;;  %v14572_v32 = vor.u32 %v17905_v10, %v14569_v22  ;;  %v17901_v10 = vld [vmem:[%s27688_s3 + $0x44] sm:$0xf]  ;;  %v5827_v56 = vadd.f32 %v24020_v43, %v5813_v60  ;;  %v14628_v42 = vor.u32 %v17919_v27, %v14625_v50  ;;  %v14407_v43 = vld [vmem:[%s27688_s3 + $0x320] sm:$0xf] }
 0x35e   :  { %7034 = vmatpush.bf16.msra.mxu0 %v14528_v63  ;;  %v6697_v63 = vunpack.c.h.b16 %v24085_v46  ;;  %v18002_v46 = vld [vmem:[%s27688_s3 + $0x344] sm:$0xf0]  ;;  %v14636_v47 = vor.u32 %v17921_v0, %v14633_v21  ;;  %v5547_v36 = vadd.f32 %v23016_v19, %v5533_v20  ;;  %v14617_v22 = vld [vmem:[%s27688_s3 + $0xc8] sm:$0xf0]  ;;  %v14463_v27 = vld [vmem:[%s27688_s3 + $0x390] sm:$0xf] }
 0x35f   :  { %v17998_v21 = vld [vmem:[%s27688_s3 + $0x324] sm:$0xf0]  ;;  %v5841_v53 = vadd.f32 %v24037_v14, %v5827_v56  ;;  %v17915_v14 = vld [vmem:[%s27688_s3 + $0xb4] sm:$0xf] }
 0x360   :  { %7047 = vmatpush.bf16.msra.mxu1 %v14592_v12  ;;  %v14424_v12 = vor.u32 %v18002_v46, %v14423_v28  ;;  %v24183_v11 = vpack.c.b16 %v6697_v63, %v6697_v63  ;;  %v24208_v19 = vpop.f32.mrf.mxu3  ;;  %v17917_v63 = vld [vmem:[%s27688_s3 + $0xc4] sm:$0xf]  ;;  %v5561_v0 = vadd.f32 %v23018_v57, %v5547_v36  ;;  %v14471_v28 = vld [vmem:[%s27688_s3 + $0x3a0] sm:$0xf]  ;;  %v5867_v46 = vadd.f32 %v24005_v9, %v5853_v52  ;;  %v18014_v57 = vld [vmem:[%s27688_s3 + $0x3a4] sm:$0xf0] }
 0x361   :  { %6632 = vmatpush.bf16.msra.mxu3 %v14488_v24  ;;  %v14408_v39 = vor.u32 %v17998_v21, %v14407_v43  ;;  %v14472_v20 = vor.u32 %v18014_v57, %v14471_v28  ;;  %v14545_v9 = vld [vmem:[%s27688_s3 + $0x38] sm:$0xf0]  ;;  %v5855_v50 = vadd.f32 %v24045_v15, %v5841_v53  ;;  %v18010_v43 = vld [vmem:[%s27688_s3 + $0x384] sm:$0xf0]  ;;  %v18007_v21 = vld [vmem:[%s27688_s3 + $0x374] sm:$0xf] }
 0x362   :  { %7035 = vmatpush.bf16.msra.mxu0 %v14520_v16  ;;  %6619 = vmatpush.bf16.msra.mxu2 %v14424_v12  ;;  %v14479_v16 = vld [vmem:[%s27688_s3 + $0x3b0] sm:$0xf]  ;;  %v24214_v3 = vpop.f32.mrf.mxu0  ;;  %v14609_v24 = vld [vmem:[%s27688_s3 + $0xb8] sm:$0xf0]  ;;  %v5575_v60 = vadd.f32 %v23039_v29, %v5561_v0  ;;  %v14548_v52 = vor.u32 %v17899_v38, %v14545_v9 }
 0x363   :  { %v14480_v25 = vor.u32 %v18016_v41, %v14479_v16  ;;  %v14464_v41 = vor.u32 %v18012_v48, %v14463_v27  ;;  %v14612_v15 = vor.u32 %v17915_v14, %v14609_v24  ;;  %v14449_v28 = vld [vmem:[%s27688_s3 + $0x378] sm:$0xf0]  ;;  %v18005_v24 = vld [vmem:[%s27688_s3 + $0x364] sm:$0xf] }
 0x364   :  { %7048 = vmatpush.bf16.msra.mxu1 %v14584_v49  ;;  %v24216_v49 = vpop.f32.mrf.mxu1  ;;  %v14513_v57 = vld [vmem:[%s27688_s3 + $0x3f8] sm:$0xf0] }
 0x365   :  { %7036 = vmatmul.bf16.vlgmr.msra.gmra.mxu0 %v24173_v6  ;;  %6633 = vmatpush.bf16.msra.mxu3 %v14480_v25  ;;  %v5589_v25 = vadd.f32 %v23047_v7, %v5575_v60  ;;  %v14441_v60 = vld [vmem:[%s27688_s3 + $0x368] sm:$0xf0] }
 0x366   :  { %7080 = vmatpush.bf16.msrb.mxu0 %v14580_v31  ;;  %v14564_v31 = vor.u32 %v17903_v30, %v14561_v1  ;;  %6620 = vmatpush.bf16.msra.mxu2 %v14416_v2  ;;  %v14620_v30 = vor.u32 %v17917_v63, %v14617_v22  ;;  %v17996_v1 = vld [vmem:[%s27688_s3 + $0x314] sm:$0xf0]  ;;  %v17897_v2 = vld [vmem:[%s27688_s3 + $0x24] sm:$0xf]  ;;  %v14455_v63 = vld [vmem:[%s27688_s3 + $0x380] sm:$0xf]  ;;  %v5869_v22 = vadd.f32 %v24054_v51, %v5855_v50 }
 0x367   :  { %7049 = vmatmul.bf16.vlgmr.msra.gmra.mxu1 %v24183_v11  ;;  %v14456_v51 = vor.u32 %v18010_v43, %v14455_v63  ;;  %v14521_v50 = vld [vmem:[%s27688_s3 + $0x8] sm:$0xf0] }
 0x368   :  { %7093 = vmatpush.bf16.msrb.mxu1 %v14644_v23  ;;  %v14553_v23 = vld [vmem:[%s27688_s3 + $0x48] sm:$0xf0]  ;;  %v24273_v29 = vpop.f32.mrf.mxu3 }
 0x369   :  { %v14556_v12 = vor.u32 %v17901_v10, %v14553_v23  ;;  %6634 = vmatpush.bf16.msra.mxu3 %v14472_v20  ;;  %v14601_v10 = vld [vmem:[%s27688_s3 + $0xa8] sm:$0xf0]  ;;  %v17994_v23 = vld [vmem:[%s27688_s3 + $0x304] sm:$0xf0]  ;;  %v14529_v20 = vld [vmem:[%s27688_s3 + $0x18] sm:$0xf0] }
 0x36a   :  { %7081 = vmatpush.bf16.msrb.mxu0 %v14572_v32  ;;  %v5881_v32 = vadd.f32 %v24056_v8, %v5867_v46  ;;  %6621 = vmatpush.bf16.msra.mxu2 %v14408_v39  ;;  %v14399_v8 = vld [vmem:[%s27688_s3 + $0x310] sm:$0xf]  ;;  %v24278_v16 = vpop.f32.mrf.mxu0  ;;  %v5603_v46 = vadd.f32 %v23217_v44, %v5589_v25  ;;  %v14452_v39 = vor.u32 %v18007_v21, %v14449_v28  ;;  %v17895_v44 = vld [vmem:[%s27688_s3 + $0x14] sm:$0xf] }
 0x36b   :  { %v14400_v26 = vor.u32 %v17996_v1, %v14399_v8  ;;  %v18021_v8 = vld [vmem:[%s27688_s3 + $0x3e4] sm:$0xf]  ;;  %v14975_v25 = vld [vmem:[%s27688_s3 + $0x4f0] sm:$0xf] }
 0x36c   :  { %7094 = vmatpush.bf16.msrb.mxu1 %v14636_v47  ;;  %v24260_v47 = vpop.f32.mrf.mxu2  ;;  %v5895_v36 = vadd.f32 %v24107_v35, %v5881_v32  ;;  %v14537_v35 = vld [vmem:[%s27688_s3 + $0x28] sm:$0xf0]  ;;  %v24293_v56 = vpop.f32.mrf.mxu1  ;;  %v5617_v1 = vadd.f32 %v23219_v37, %v5603_v46 }
 0x36d   :  { %6635 = vmatpush.bf16.msra.mxu3 %v14464_v41  ;;  %v14540_v53 = vor.u32 %v17897_v2, %v14537_v35  ;;  %v17909_v2 = vld [vmem:[%s27688_s3 + $0x84] sm:$0xf]  ;;  %v14585_v41 = vld [vmem:[%s27688_s3 + $0x88] sm:$0xf0] }
 0x36e   :  { %7082 = vmatpush.bf16.msrb.mxu0 %v14564_v31  ;;  %v17913_v31 = vld [vmem:[%s27688_s3 + $0xa4] sm:$0xf]  ;;  %6622 = vmatpush.bf16.msra.mxu2 %v14400_v26  ;;  %v5909_v0 = vadd.f32 %v24119_v61, %v5895_v36  ;;  %v18023_v61 = vld [vmem:[%s27688_s3 + $0x3f4] sm:$0xf]  ;;  %v14444_v36 = vor.u32 %v18005_v24, %v14441_v60  ;;  %v14505_v26 = vld [vmem:[%s27688_s3 + $0x3e8] sm:$0xf0]  ;;  %v5631_v43 = vadd.f32 %v23240_v5, %v5617_v1 }
 0x36f   :  { %v14604_v38 = vor.u32 %v17913_v31, %v14601_v10  ;;  %v14516_v32 = vor.u32 %v18023_v61, %v14513_v57  ;;  %v14508_v35 = vor.u32 %v18021_v8, %v14505_v26  ;;  %v18044_v10 = vld [vmem:[%s27688_s3 + $0x474] sm:$0xf0]  ;;  %v14588_v28 = vor.u32 %v17909_v2, %v14585_v41  ;;  %v18042_v5 = vld [vmem:[%s27688_s3 + $0x464] sm:$0xf0]  ;;  %v14967_v61 = vld [vmem:[%s27688_s3 + $0x4e0] sm:$0xf] }
 0x370   :  { %7095 = vmatpush.bf16.msrb.mxu1 %v14628_v42  ;;  %v14391_v42 = vld [vmem:[%s27688_s3 + $0x300] sm:$0xf]  ;;  %v5923_v9 = vadd.f32 %v24130_v55, %v5909_v0  ;;  %v14532_v55 = vor.u32 %v17895_v44, %v14529_v20  ;;  %v24359_v37 = vpop.f32.mrf.mxu3  ;;  %v14433_v0 = vld [vmem:[%s27688_s3 + $0x358] sm:$0xf0]  ;;  %v18058_v57 = vld [vmem:[%s27688_s3 + $0x4e4] sm:$0xf0] }
 0x371   :  { %v14392_v7 = vor.u32 %v17994_v23, %v14391_v42  ;;  %6636 = vmatpush.bf16.msra.mxu3 %v14456_v51  ;;  %v18060_v42 = vld [vmem:[%s27688_s3 + $0x4f4] sm:$0xf0]  ;;  %v18001_v44 = vld [vmem:[%s27688_s3 + $0x344] sm:$0xf]  ;;  %v14425_v20 = vld [vmem:[%s27688_s3 + $0x348] sm:$0xf0] }
 0x372   :  { %7083 = vmatpush.bf16.msrb.mxu0 %v14556_v12  ;;  %v5883_v12 = vadd.f32 %v24147_v17, %v5869_v22  ;;  %v14593_v17 = vld [vmem:[%s27688_s3 + $0x98] sm:$0xf0]  ;;  %v5937_v48 = vadd.f32 %v24216_v49, %v5923_v9  ;;  %v24370_v31 = vpop.f32.mrf.mxu0  ;;  %v18003_v22 = vld [vmem:[%s27688_s3 + $0x354] sm:$0xf]  ;;  %v14895_v60 = vld [vmem:[%s27688_s3 + $0x450] sm:$0xf] }
 0x373   :  { %6623 = vmatpush.bf16.msra.mxu2 %v14392_v7  ;;  %v18019_v7 = vld [vmem:[%s27688_s3 + $0x3d4] sm:$0xf] }
 0x374   :  { %7096 = vmatpush.bf16.msrb.mxu1 %v14620_v30  ;;  %v17911_v30 = vld [vmem:[%s27688_s3 + $0x94] sm:$0xf]  ;;  %v5897_v14 = vadd.f32 %v24195_v59, %v5883_v12  ;;  %v24347_v27 = vpop.f32.mrf.mxu2  ;;  %v17893_v59 = vld [vmem:[%s27688_s3 + $0x4] sm:$0xf]  ;;  %v24372_v49 = vpop.f32.mrf.mxu1  ;;  %v5951_v63 = vadd.f32 %v24260_v47, %v5937_v48  ;;  %v14497_v47 = vld [vmem:[%s27688_s3 + $0x3d8] sm:$0xf0] }
 0x375   :  { %6681 = vmatpush.bf16.msrb.mxu3 %v14516_v32  ;;  %v14524_v21 = vor.u32 %v17893_v59, %v14521_v50  ;;  %v14500_v51 = vor.u32 %v18019_v7, %v14497_v47  ;;  %v18017_v32 = vld [vmem:[%s27688_s3 + $0x3c4] sm:$0xf]  ;;  %v18056_v59 = vld [vmem:[%s27688_s3 + $0x4d4] sm:$0xf0]  ;;  %v17999_v48 = vld [vmem:[%s27688_s3 + $0x334] sm:$0xf] }
 0x376   :  { %7084 = vmatpush.bf16.msrb.mxu0 %v14548_v52  ;;  %v14596_v52 = vor.u32 %v17911_v30, %v14593_v17  ;;  %v5911_v23 = vadd.f32 %v24208_v19, %v5897_v14  ;;  %v14436_v19 = vor.u32 %v18003_v22, %v14433_v0  ;;  %v5645_v30 = vadd.f32 %v23248_v4, %v5631_v43  ;;  %v18015_v2 = vld [vmem:[%s27688_s3 + $0x3b4] sm:$0xf]  ;;  %v17997_v22 = vld [vmem:[%s27688_s3 + $0x324] sm:$0xf]  ;;  %v14409_v0 = vld [vmem:[%s27688_s3 + $0x328] sm:$0xf0] }
 0x377   :  { %6668 = vmatpush.bf16.msrb.mxu2 %v14452_v39  ;;  %v14976_v39 = vor.u32 %v18060_v42, %v14975_v25  ;;  %v14968_v4 = vor.u32 %v18058_v57, %v14967_v61  ;;  %v14951_v25 = vld [vmem:[%s27688_s3 + $0x4c0] sm:$0xf]  ;;  %v18013_v7 = vld [vmem:[%s27688_s3 + $0x3a4] sm:$0xf]  ;;  %v14412_v43 = vor.u32 %v17997_v22, %v14409_v0  ;;  %v18030_v0 = vld [vmem:[%s27688_s3 + $0x404] sm:$0xf0] }
 0x378   :  { %7097 = vmatpush.bf16.msrb.mxu1 %v14612_v15  ;;  %v14911_v15 = vld [vmem:[%s27688_s3 + $0x470] sm:$0xf]  ;;  %v5925_v12 = vadd.f32 %v24214_v3, %v5911_v23  ;;  %v14428_v3 = vor.u32 %v18001_v44, %v14425_v20  ;;  %v6020_v14 = vpop.f32.mrf.mxu3  ;;  %v5659_v50 = vadd.f32 %v23424_v62, %v5645_v30  ;;  %v18011_v44 = vld [vmem:[%s27688_s3 + $0x394] sm:$0xf]  ;;  %v14855_v22 = vld [vmem:[%s27688_s3 + $0x400] sm:$0xf] }
 0x379   :  { %6682 = vmatpush.bf16.msrb.mxu3 %v14508_v35  ;;  %v14912_v46 = vor.u32 %v18044_v10, %v14911_v15  ;;  %v14887_v15 = vld [vmem:[%s27688_s3 + $0x440] sm:$0xf] }
 0x37a   :  { %7085 = vmatpush.bf16.msrb.mxu0 %v14540_v53  ;;  %v14903_v53 = vld [vmem:[%s27688_s3 + $0x460] sm:$0xf]  ;;  %v5939_v9 = vadd.f32 %v24293_v56, %v5925_v12  ;;  %v24429_v1 = vpop.f32.mrf.mxu0  ;;  %v14959_v56 = vld [vmem:[%s27688_s3 + $0x4d0] sm:$0xf]  ;;  %v5673_v42 = vadd.f32 %v23426_v33, %v5659_v50  ;;  %v14473_v33 = vld [vmem:[%s27688_s3 + $0x3a8] sm:$0xf0] }
 0x37b   :  { %6669 = vmatpush.bf16.msrb.mxu2 %v14444_v36  ;;  %v14904_v24 = vor.u32 %v18042_v5, %v14903_v53  ;;  %v14960_v10 = vor.u32 %v18056_v59, %v14959_v56  ;;  %v14943_v53 = vld [vmem:[%s27688_s3 + $0x4b0] sm:$0xf]  ;;  %v17995_v12 = vld [vmem:[%s27688_s3 + $0x314] sm:$0xf]  ;;  %v17993_v56 = vld [vmem:[%s27688_s3 + $0x304] sm:$0xf] }
 0x37c   :  { %7098 = vmatpush.bf16.msrb.mxu1 %v14604_v38  ;;  %v5965_v38 = vadd.f32 %v24273_v29, %v5951_v63  ;;  %v6006_v17 = vpop.f32.mrf.mxu2  ;;  %v14489_v29 = vld [vmem:[%s27688_s3 + $0x3c8] sm:$0xf0]  ;;  %v5953_v26 = vadd.f32 %v24347_v27, %v5939_v9  ;;  %v5994_v62 = vpop.f32.mrf.mxu1  ;;  %v18009_v50 = vld [vmem:[%s27688_s3 + $0x384] sm:$0xf] }
 0x37d   :  { %6683 = vmatpush.bf16.msrb.mxu3 %v14500_v51  ;;  %v14492_v8 = vor.u32 %v18017_v32, %v14489_v29  ;;  %v18052_v51 = vld [vmem:[%s27688_s3 + $0x4b4] sm:$0xf0]  ;;  %v14393_v59 = vld [vmem:[%s27688_s3 + $0x308] sm:$0xf0] }
 0x37e   :  { %7086 = vmatpush.bf16.msrb.mxu0 %v14532_v55  ;;  %v18040_v55 = vld [vmem:[%s27688_s3 + $0x454] sm:$0xf0]  ;;  %v5979_v36 = vadd.f32 %v24278_v16, %v5965_v38  ;;  %v5967_v23 = vadd.f32 %v24359_v37, %v5953_v26  ;;  %v14401_v38 = vld [vmem:[%s27688_s3 + $0x318] sm:$0xf0]  ;;  %v14944_v9 = vor.u32 %v18052_v51, %v14943_v53 }
 0x37f   :  { %6670 = vmatpush.bf16.msrb.mxu2 %v14436_v19  ;;  %v14896_v41 = vor.u32 %v18040_v55, %v14895_v60  ;;  %v14476_v19 = vor.u32 %v18013_v7, %v14473_v33  ;;  %v18050_v60 = vld [vmem:[%s27688_s3 + $0x4a4] sm:$0xf0]  ;;  %v14919_v7 = vld [vmem:[%s27688_s3 + $0x480] sm:$0xf] }
 0x380   :  { %7099 = vmatpush.bf16.msrb.mxu1 %v14596_v52  ;;  %v14417_v52 = vld [vmem:[%s27688_s3 + $0x338] sm:$0xf0]  ;;  %v5993_v27 = vadd.f32 %v24372_v49, %v5979_v36  ;;  %v18054_v49 = vld [vmem:[%s27688_s3 + $0x4c4] sm:$0xf0]  ;;  %v5981_v5 = vadd.f32 %v24370_v31, %v5967_v23  ;;  %v6022_v57 = vpop.f32.mrf.mxu3  ;;  %v14396_v36 = vor.u32 %v17993_v56, %v14393_v59  ;;  %v18039_v59 = vld [vmem:[%s27688_s3 + $0x454] sm:$0xf] }
 0x381   :  { %6684 = vmatpush.bf16.msrb.mxu3 %v14492_v8  ;;  %v14420_v16 = vor.u32 %v17999_v48, %v14417_v52  ;;  %v14465_v31 = vld [vmem:[%s27688_s3 + $0x398] sm:$0xf0] }
 0x382   :  { %7087 = vmatpush.bf16.msrb.mxu0 %v14524_v21  ;;  %v6007_v63 = vadd.f32 %v6006_v17, %v5993_v27  ;;  %v14879_v21 = vld [vmem:[%s27688_s3 + $0x430] sm:$0xf]  ;;  %v6036_v20 = vpop.f32.mrf.mxu0  ;;  %v5995_v30 = vadd.f32 %v5994_v62, %v5981_v5  ;;  %v14468_v29 = vor.u32 %v18011_v44, %v14465_v31  ;;  %v14856_v5 = vor.u32 %v18030_v0, %v14855_v22  ;;  %v18025_v44 = vld [vmem:[#allocation2 + $0x4] sm:$0xc]  ;;  %v17956_v22 = vld [vmem:[%s27688_s3 + $0x1f4] sm:$0xf0] }
 0x383   :  { %6671 = vmatpush.bf16.msrb.mxu2 %v14428_v3  ;;  %v14871_v3 = vld [vmem:[%s27688_s3 + $0x420] sm:$0xf]  ;;  %v18033_v0 = vld [vmem:[%s27688_s3 + $0x424] sm:$0xf] }
 0x384   :  { %7100 = vmatpush.bf16.msrb.mxu1 %v14588_v28  ;;  %v6008_v47 = vpop.f32.mrf.mxu2  ;;  %v14952_v28 = vor.u32 %v18054_v49, %v14951_v25  ;;  %v6021_v61 = vadd.f32 %v6020_v14, %v6007_v63  ;;  %v6048_v32 = vpop.f32.mrf.mxu1  ;;  %v18034_v14 = vld [vmem:[%s27688_s3 + $0x424] sm:$0xf0] }
 0x385   :  { %7088 = vmatmul.bf16.vlgmr.msrb.gmra.mxu0 %v24173_v6  ;;  %v14481_v6 = vld [vmem:[%s27688_s3 + $0x3b8] sm:$0xf0]  ;;  %v6009_v55 = vadd.f32 %v6008_v47, %v5995_v30  ;;  %v14872_v48 = vor.u32 %v18034_v14, %v14871_v3  ;;  %v6097_v47 = vmax.f32 %v23533_v58, 0.0  ;;  %v14905_v30 = vld [vmem:[%s27688_s3 + $0x468] sm:$0xf0] }
 0x386   :  { %7545 = vmatpush.bf16.msra.mxu0 %v14912_v46  ;;  %v14484_v35 = vor.u32 %v18015_v2, %v14481_v6  ;;  %v18036_v46 = vld [vmem:[%s27688_s3 + $0x434] sm:$0xf0]  ;;  %v18057_v3 = vld [vmem:[%s27688_s3 + $0x4e4] sm:$0xf] }
 0x387   :  { %7101 = vmatmul.bf16.vlgmr.msrb.gmra.mxu1 %v24183_v11  ;;  %v18038_v11 = vld [vmem:[%s27688_s3 + $0x444] sm:$0xf0]  ;;  %6672 = vmatpush.bf16.msrb.mxu2 %v14420_v16  ;;  %v14880_v17 = vor.u32 %v18036_v46, %v14879_v21  ;;  %v14863_v16 = vld [vmem:[%s27688_s3 + $0x410] sm:$0xf]  ;;  %v18032_v6 = vld [vmem:[%s27688_s3 + $0x414] sm:$0xf0]  ;;  %v6023_v27 = vadd.f32 %v6022_v57, %v6009_v55 }
 0x388   :  { %7558 = vmatpush.bf16.msra.mxu1 %v14976_v39  ;;  %6685 = vmatpush.bf16.msrb.mxu3 %v14484_v35  ;;  %v14888_v37 = vor.u32 %v18038_v11, %v14887_v15  ;;  %v5687_v39 = vadd.f32 %v23443_v40, %v5673_v42  ;;  %v14404_v40 = vor.u32 %v17995_v12, %v14401_v38  ;;  %v18048_v35 = vld [vmem:[%s27688_s3 + $0x494] sm:$0xf0]  ;;  %v18027_v42 = vld [vmem:[#allocation2 + $0xc] sm:$0x30]  ;;  %v18043_v21 = vld [vmem:[%s27688_s3 + $0x474] sm:$0xf] }
 0x389   :  { %v6076_v15 = vpop.f32.mrf.mxu3  ;;  %v14864_v49 = vor.u32 %v18032_v6, %v14863_v16  ;;  %v14977_v46 = vld [vmem:[%s27688_s3 + $0x4f8] sm:$0xf0]  ;;  %v18053_v16 = vld [vmem:[%s27688_s3 + $0x4c4] sm:$0xf]  ;;  %v14953_v6 = vld [vmem:[%s27688_s3 + $0x4c8] sm:$0xf0] }
 0x38a   :  { %7546 = vmatpush.bf16.msra.mxu0 %v14904_v24  ;;  %v14935_v24 = vld [vmem:[%s27688_s3 + $0x4a0] sm:$0xf]  ;;  %v5701_v8 = vadd.f32 %v23455_v45, %v5687_v39  ;;  %v14457_v45 = vld [vmem:[%s27688_s3 + $0x388] sm:$0xf0] }
 0x38b   :  { %6673 = vmatpush.bf16.msrb.mxu2 %v14412_v43  ;;  %v14460_v52 = vor.u32 %v18009_v50, %v14457_v45  ;;  %v14936_v62 = vor.u32 %v18050_v60, %v14935_v24  ;;  %v6037_v43 = vadd.f32 %v6036_v20, %v6023_v27  ;;  %v18055_v50 = vld [vmem:[%s27688_s3 + $0x4d4] sm:$0xf] }
 0x38c   :  { %7559 = vmatpush.bf16.msra.mxu1 %v14968_v4  ;;  %6686 = vmatpush.bf16.msrb.mxu3 %v14476_v19  ;;  %v6035_v4 = vadd.f32 %v24429_v1, %v6021_v61  ;;  %v5715_v1 = vadd.f32 %v23873_v18, %v5701_v8  ;;  %v6062_v2 = vpop.f32.mrf.mxu2  ;;  %v14927_v18 = vld [vmem:[%s27688_s3 + $0x490] sm:$0xf]  ;;  %v6050_v23 = vpop.f32.mrf.mxu1  ;;  %v14913_v19 = vld [vmem:[%s27688_s3 + $0x478] sm:$0xf0]  ;;  %v14839_v61 = vld [vmem:[#allocation2] sm:$0xc] }
 0x38d   :  { %v14928_v63 = vor.u32 %v18048_v35, %v14927_v18  ;;  %v6051_v39 = vadd.f32 %v6050_v23, %v6037_v43  ;;  %v14916_v38 = vor.u32 %v18043_v21, %v14913_v19  ;;  %v14840_v58 = vor.u32 %v18027_v42, %v14839_v61  ;;  %v14881_v18 = vld [vmem:[%s27688_s3 + $0x438] sm:$0xf0]  ;;  %v18051_v35 = vld [vmem:[%s27688_s3 + $0x4b4] sm:$0xf]  ;;  %v14767_v42 = vld [vmem:[%s27688_s3 + $0x1f0] sm:$0xf] }
 0x38e   :  { %7547 = vmatpush.bf16.msra.mxu0 %v14896_v41  ;;  %v6049_v26 = vadd.f32 %v6048_v32, %v6035_v4  ;;  %v5729_v11 = vadd.f32 %v23875_v34, %v5715_v1  ;;  %v14841_v34 = vld [vmem:[#allocation2 + $0x10] sm:$0x30]  ;;  %v14937_v21 = vld [vmem:[%s27688_s3 + $0x4a8] sm:$0xf0]  ;;  %v17938_v61 = vld [vmem:[%s27688_s3 + $0x164] sm:$0xf0] }
 0x38f   :  { %6674 = vmatpush.bf16.msrb.mxu2 %v14404_v40  ;;  %v14844_v31 = vor.u32 %v18025_v44, %v14841_v34  ;;  %v24592_v60 = vrot.slane %v14840_v58, 2 }
 0x390   :  { %7560 = vmatpush.bf16.msra.mxu1 %v14960_v10  ;;  %6687 = vmatpush.bf16.msrb.mxu3 %v14468_v29  ;;  %v6063_v41 = vadd.f32 %v6062_v2, %v6049_v26  ;;  %v6090_v10 = vpop.f32.mrf.mxu0  ;;  %v5743_v53 = vadd.f32 %v23883_v54, %v5729_v11  ;;  %v18041_v54 = vld [vmem:[%s27688_s3 + $0x464] sm:$0xf]  ;;  %v14969_v29 = vld [vmem:[%s27688_s3 + $0x4e8] sm:$0xf0] }
 0x391   :  { %v14908_v8 = vor.u32 %v18041_v54, %v14905_v30  ;;  %v24594_v55 = vrot.slane %v14844_v31, 2  ;;  %v14972_v56 = vor.u32 %v18057_v3, %v14969_v29  ;;  %v18037_v2 = vld [vmem:[%s27688_s3 + $0x444] sm:$0xf]  ;;  %v14865_v31 = vld [vmem:[%s27688_s3 + $0x418] sm:$0xf0] }
 0x392   :  { %7548 = vmatpush.bf16.msra.mxu0 %v14888_v37  ;;  %v6077_v25 = vadd.f32 %v6076_v15, %v6063_v41  ;;  %v18046_v37 = vld [vmem:[%s27688_s3 + $0x484] sm:$0xf0]  ;;  %v14956_v41 = vor.u32 %v18053_v16, %v14953_v6  ;;  %v18035_v15 = vld [vmem:[%s27688_s3 + $0x434] sm:$0xf]  ;;  %v14929_v30 = vld [vmem:[%s27688_s3 + $0x498] sm:$0xf0] }
 0x393   :  { %6675 = vmatpush.bf16.msrb.mxu2 %v14396_v36  ;;  %v14920_v12 = vor.u32 %v18046_v37, %v14919_v7  ;;  %v14961_v36 = vld [vmem:[%s27688_s3 + $0x4d8] sm:$0xf0]  ;;  %v14873_v7 = vld [vmem:[%s27688_s3 + $0x428] sm:$0xf0]  ;;  %v18049_v37 = vld [vmem:[%s27688_s3 + $0x4a4] sm:$0xf] }
 0x394   :  { %7561 = vmatpush.bf16.msra.mxu1 %v14952_v28  ;;  %6688 = vmatpush.bf16.msrb.mxu3 %v14460_v52  ;;  %v6091_v33 = vadd.f32 %v6090_v10, %v6077_v25  ;;  %v18059_v28 = vld [vmem:[%s27688_s3 + $0x4f4] sm:$0xf]  ;;  %v6064_v57 = vpop.f32.mrf.mxu2  ;;  %v14964_v52 = vor.u32 %v18055_v50, %v14961_v36  ;;  %v14945_v10 = vld [vmem:[%s27688_s3 + $0x4b8] sm:$0xf0]  ;;  %v14703_v25 = vld [vmem:[%s27688_s3 + $0x170] sm:$0xf]  ;;  %v14876_v58 = vor.u32 %v18033_v0, %v14873_v7 }
 0x395   :  { %v6065_v32 = vadd.f32 %v6064_v57, %v6051_v39  ;;  %v14980_v40 = vor.u32 %v18059_v28, %v14977_v46  ;;  %v14948_v43 = vor.u32 %v18051_v35, %v14945_v10  ;;  %v14768_v39 = vor.u32 %v17956_v22, %v14767_v42  ;;  %v14759_v57 = vld [vmem:[%s27688_s3 + $0x1e0] sm:$0xf]  ;;  %v18047_v54 = vld [vmem:[%s27688_s3 + $0x494] sm:$0xf]  ;;  %v14857_v50 = vld [vmem:[%s27688_s3 + $0x408] sm:$0xf0] }
 0x396   :  { %7549 = vmatpush.bf16.msra.mxu0 %v14880_v17  ;;  %v6098_v51 = vmax.f32 %v6091_v33, 0.0  ;;  %v6078_v17 = vpop.f32.mrf.mxu3  ;;  %v14940_v44 = vor.u32 %v18049_v37, %v14937_v21  ;;  %v18045_v36 = vld [vmem:[%s27688_s3 + $0x484] sm:$0xf]  ;;  %v14679_v16 = vld [vmem:[%s27688_s3 + $0x140] sm:$0xf] }
 0x397   :  { %v6079_v14 = vadd.f32 %v6078_v17, %v6065_v32  ;;  %v17954_v32 = vld [vmem:[%s27688_s3 + $0x1e4] sm:$0xf0]  ;;  %v14671_v22 = vld [vmem:[%s27688_s3 + $0x130] sm:$0xf]  ;;  %v17932_v0 = vld [vmem:[%s27688_s3 + $0x134] sm:$0xf0] }
 0x398   :  { %7562 = vmatpush.bf16.msra.mxu1 %v14944_v9  ;;  %v24576_v20 = vpack.c.bf16 %v6098_v51, %v6097_v47  ;;  %v5757_v9 = vadd.f32 %v23847_v13, %v5743_v53  ;;  %v6092_v24 = vpop.f32.mrf.mxu0  ;;  %v14897_v13 = vld [vmem:[%s27688_s3 + $0x458] sm:$0xf0]  ;;  %v18126_v42 = vld [vmem:[%s27688_s3 + $0x6e4] sm:$0xf0]  ;;  %v14735_v7 = vld [vmem:[%s27688_s3 + $0x1b0] sm:$0xf] }
 0x399   :  { %v6093_v4 = vadd.f32 %v6092_v24, %v6079_v14  ;;  %v14900_v26 = vor.u32 %v18039_v59, %v14897_v13  ;;  %v14687_v14 = vld [vmem:[%s27688_s3 + $0x150] sm:$0xf]  ;;  %v17936_v24 = vld [vmem:[%s27688_s3 + $0x154] sm:$0xf0]  ;;  %v18029_v13 = vld [vmem:[%s27688_s3 + $0x404] sm:$0xf] }
 0x39a   :  { %7550 = vmatpush.bf16.msra.mxu0 %v14872_v48  ;;  %6108 = vst [vmem:[#allocation2 + $0x8] sm:$0xff] %v24576_v20  ;;  %v6101_v45 = vmax.f32 %v5757_v9, 0.0  ;;  %v14760_v9 = vor.u32 %v17954_v32, %v14759_v57  ;;  %v17952_v59 = vld [vmem:[%s27688_s3 + $0x1d4] sm:$0xf0]  ;;  %v14860_v6 = vor.u32 %v18029_v13, %v14857_v50  ;;  %v15231_v21 = vld [vmem:[%s27688_s3 + $0x650] sm:$0xf] }
 0x39b   :  { %v6102_v1 = vmax.f32 %v6093_v4, 0.0  ;;  %v18122_v32 = vld [vmem:[%s27688_s3 + $0x6c4] sm:$0xf0]  ;;  %v14711_v50 = vld [vmem:[%s27688_s3 + $0x180] sm:$0xf] }
 0x39c   :  { %7563 = vmatpush.bf16.msra.mxu1 %v14936_v62  ;;  %v14889_v62 = vld [vmem:[%s27688_s3 + $0x448] sm:$0xf0]  ;;  %v17926_v13 = vld [vmem:[%s27688_s3 + $0x104] sm:$0xf0] }
 0x39d   :  { %v6106_v48 = vpack.c.bf16 %v6102_v1, %v6101_v45  ;;  %v14892_v27 = vor.u32 %v18037_v2, %v14889_v62  ;;  %v14921_v45 = vld [vmem:[%s27688_s3 + $0x488] sm:$0xf0]  ;;  %v15247_v1 = vld [vmem:[%s27688_s3 + $0x670] sm:$0xf]  ;;  %v14688_v2 = vor.u32 %v17936_v24, %v14687_v14  ;;  %v18120_v24 = vld [vmem:[%s27688_s3 + $0x6b4] sm:$0xf0] }
 0x39e   :  { %7551 = vmatpush.bf16.msra.mxu0 %v14864_v49  ;;  %v17940_v49 = vld [vmem:[%s27688_s3 + $0x174] sm:$0xf0]  ;;  %v15279_v14 = vld [vmem:[%s27688_s3 + $0x6b0] sm:$0xf] }
 0x39f   :  { %6110 = vst [vmem:[#allocation2 + $0x18] sm:$0xff] %v6106_v48  ;;  %v14704_v51 = vor.u32 %v17940_v49, %v14703_v25  ;;  %v15311_v48 = vld [vmem:[%s27688_s3 + $0x6f0] sm:$0xf]  ;;  %v18110_v25 = vld [vmem:[%s27688_s3 + $0x664] sm:$0xf0] }
 0x3a0   :  { %7564 = vmatpush.bf16.msra.mxu1 %v14928_v63  ;;  %v14884_v63 = vor.u32 %v18035_v15, %v14881_v18  ;;  %v14743_v15 = vld [vmem:[%s27688_s3 + $0x1c0] sm:$0xf]  ;;  %v17950_v18 = vld [vmem:[%s27688_s3 + $0x1c4] sm:$0xf0] }
 0x3a1   :  { %v14255_v33 = vld [vmem:[#allocation2 + $0x8] sm:$0xe]  ;;  %v17958_v47 = vld [vmem:[#allocation2 + $0xc] sm:$0xe]  ;;  %v15303_v49 = vld [vmem:[%s27688_s3 + $0x6e0] sm:$0xf] }
 0x3a2   :  { %7552 = vmatpush.bf16.msra.mxu0 %v14856_v5  ;;  %v6599_v11 = vpop.f32.mrf.mxu0  ;;  %v14695_v5 = vld [vmem:[%s27688_s3 + $0x160] sm:$0xf]  ;;  %v15304_v37 = vor.u32 %v18126_v42, %v15303_v49  ;;  %v6699_v49 = vunpack.c.h.b16 %v24576_v20  ;;  %v17937_v42 = vld [vmem:[%s27688_s3 + $0x164] sm:$0xf] }
 0x3a3   :  { %v14696_v29 = vor.u32 %v17938_v61, %v14695_v5  ;;  %v14727_v5 = vld [vmem:[%s27688_s3 + $0x1a0] sm:$0xf]  ;;  %v17946_v61 = vld [vmem:[%s27688_s3 + $0x1a4] sm:$0xf0] }
 0x3a4   :  { %7565 = vmatpush.bf16.msra.mxu1 %v14920_v12  ;;  %v6612_v23 = vpop.f32.mrf.mxu1 }
 0x3a5   :  { %7553 = vmatmul.bf16.vlgmr.msra.gmra.mxu0 %v24592_v60  ;;  %v24652_v34 = vadd.f32 %v6612_v23, %v6599_v11  ;;  %v15239_v11 = vld [vmem:[%s27688_s3 + $0x660] sm:$0xf] }
 0x3a6   :  { %7597 = vmatpush.bf16.msrb.mxu0 %v14916_v38  ;;  %v17960_v19 = vld [vmem:[#allocation2 + $0x14] sm:$0x10]  ;;  %v14257_v28 = vld [vmem:[#allocation2 + $0x18] sm:$0x10] }
 0x3a7   :  { %7566 = vmatmul.bf16.vlgmr.msra.gmra.mxu1 %v24594_v55  ;;  %v14256_v46 = vor.u32 %v17960_v19, %v14255_v33  ;;  %v14260_v53 = vor.u32 %v17958_v47, %v14257_v28  ;;  %v15240_v33 = vor.u32 %v18110_v25, %v15239_v11  ;;  %v18108_v19 = vld [vmem:[%s27688_s3 + $0x654] sm:$0xf0]  ;;  %v15295_v47 = vld [vmem:[%s27688_s3 + $0x6d0] sm:$0xf] }
 0x3a8   :  { %7610 = vmatpush.bf16.msrb.mxu1 %v14980_v40  ;;  %v18031_v40 = vld [vmem:[%s27688_s3 + $0x414] sm:$0xf]  ;;  %v18124_v28 = vld [vmem:[%s27688_s3 + $0x6d4] sm:$0xf0]  ;;  %v15232_v57 = vor.u32 %v18108_v19, %v15231_v21 }
 0x3a9   :  { %v24669_v12 = vrot.slane %v14256_v46, 1  ;;  %v24671_v38 = vrot.slane %v14260_v53, 1  ;;  %v14868_v4 = vor.u32 %v18031_v40, %v14865_v31  ;;  %v14672_v46 = vor.u32 %v17932_v0, %v14671_v22  ;;  %v17953_v0 = vld [vmem:[%s27688_s3 + $0x1e4] sm:$0xf] }
 0x3aa   :  { %7598 = vmatpush.bf16.msrb.mxu0 %v14908_v8  ;;  %v6601_v17 = vpop.f32.mrf.mxu0  ;;  %v14751_v8 = vld [vmem:[%s27688_s3 + $0x1d0] sm:$0xf]  ;;  %v14728_v31 = vor.u32 %v17946_v61, %v14727_v5  ;;  %v17951_v5 = vld [vmem:[%s27688_s3 + $0x1d4] sm:$0xf] }
 0x3ab   :  { %6624 = vmatmul.bf16.vlgmr.msra.gmra.mxu2 %v24669_v12  ;;  %6637 = vmatmul.bf16.vlgmr.msra.gmra.mxu3 %v24671_v38  ;;  %v14752_v62 = vor.u32 %v17952_v59, %v14751_v8  ;;  %v14647_v59 = vld [vmem:[%s27688_s3 + $0x100] sm:$0xf] }
 0x3ac   :  { %7611 = vmatpush.bf16.msrb.mxu1 %v14972_v56  ;;  %v6614_v3 = vpop.f32.mrf.mxu1  ;;  %7054 = vmatpush.bf16.msra.mxu2 %v14704_v51  ;;  %v14932_v56 = vor.u32 %v18047_v54, %v14929_v30  ;;  %v14663_v51 = vld [vmem:[%s27688_s3 + $0x120] sm:$0xf]  ;;  %v14719_v54 = vld [vmem:[%s27688_s3 + $0x190] sm:$0xf]  ;;  %v17944_v30 = vld [vmem:[%s27688_s3 + $0x194] sm:$0xf0] }
 0x3ad   :  { %7067 = vmatpush.bf16.msra.mxu3 %v14768_v39  ;;  %v17930_v39 = vld [vmem:[%s27688_s3 + $0x124] sm:$0xf0] }
 0x3ae   :  { %7599 = vmatpush.bf16.msrb.mxu0 %v14900_v26  ;;  %v18112_v26 = vld [vmem:[%s27688_s3 + $0x674] sm:$0xf0]  ;;  %v14664_v40 = vor.u32 %v17930_v39, %v14663_v51  ;;  %v17935_v51 = vld [vmem:[%s27688_s3 + $0x154] sm:$0xf]  ;;  %v14689_v39 = vld [vmem:[%s27688_s3 + $0x158] sm:$0xf0] }
 0x3af   :  { %v15248_v35 = vor.u32 %v18112_v26, %v15247_v1  ;;  %v17939_v1 = vld [vmem:[%s27688_s3 + $0x174] sm:$0xf]  ;;  %v14705_v26 = vld [vmem:[%s27688_s3 + $0x178] sm:$0xf0] }
 0x3b0   :  { %7612 = vmatpush.bf16.msrb.mxu1 %v14964_v52  ;;  %v18128_v52 = vld [vmem:[%s27688_s3 + $0x6f4] sm:$0xf0]  ;;  %7055 = vmatpush.bf16.msra.mxu2 %v14696_v29  ;;  %v15215_v29 = vld [vmem:[%s27688_s3 + $0x630] sm:$0xf]  ;;  %v14708_v11 = vor.u32 %v17939_v1, %v14705_v26  ;;  %v18109_v1 = vld [vmem:[%s27688_s3 + $0x664] sm:$0xf] }
 0x3b1   :  { %7068 = vmatpush.bf16.msra.mxu3 %v14760_v9  ;;  %v15312_v10 = vor.u32 %v18128_v52, %v15311_v48  ;;  %v18104_v9 = vld [vmem:[%s27688_s3 + $0x634] sm:$0xf0]  ;;  %v15241_v26 = vld [vmem:[%s27688_s3 + $0x668] sm:$0xf0] }
 0x3b2   :  { %7600 = vmatpush.bf16.msrb.mxu0 %v14892_v27  ;;  %v14924_v27 = vor.u32 %v18045_v36, %v14921_v45  ;;  %v17942_v45 = vld [vmem:[%s27688_s3 + $0x184] sm:$0xf0]  ;;  %v15216_v52 = vor.u32 %v18104_v9, %v15215_v29  ;;  %v17933_v29 = vld [vmem:[%s27688_s3 + $0x144] sm:$0xf]  ;;  %v15175_v9 = vld [vmem:[#allocation2] sm:$0x8] }
 0x3b4   :  { %7613 = vmatpush.bf16.msrb.mxu1 %v14956_v41  ;;  %v17934_v41 = vld [vmem:[%s27688_s3 + $0x144] sm:$0xf0]  ;;  %7056 = vmatpush.bf16.msra.mxu2 %v14688_v2  ;;  %v15280_v2 = vor.u32 %v18120_v24, %v15279_v14  ;;  %v18093_v14 = vld [vmem:[#allocation2 + $0x4] sm:$0x8] }
 0x3b5   :  { %7069 = vmatpush.bf16.msra.mxu3 %v14752_v62  ;;  %v14680_v23 = vor.u32 %v17934_v41, %v14679_v16  ;;  %v17955_v62 = vld [vmem:[%s27688_s3 + $0x1f4] sm:$0xf]  ;;  %v14769_v16 = vld [vmem:[%s27688_s3 + $0x1f8] sm:$0xf0]  ;;  %v15271_v41 = vld [vmem:[%s27688_s3 + $0x6a0] sm:$0xf] }
 0x3b6   :  { %7601 = vmatpush.bf16.msrb.mxu0 %v14884_v63  ;;  %v14744_v63 = vor.u32 %v17950_v18, %v14743_v15  ;;  %v18118_v15 = vld [vmem:[%s27688_s3 + $0x6a4] sm:$0xf0]  ;;  %v14648_v18 = vor.u32 %v17926_v13, %v14647_v59  ;;  %v14772_v25 = vor.u32 %v17955_v62, %v14769_v16  ;;  %v14745_v59 = vld [vmem:[%s27688_s3 + $0x1c8] sm:$0xf0] }
 0x3b7   :  { %v15272_v22 = vor.u32 %v18118_v15, %v15271_v41  ;;  %v17947_v41 = vld [vmem:[%s27688_s3 + $0x1b4] sm:$0xf]  ;;  %v14737_v15 = vld [vmem:[%s27688_s3 + $0x1b8] sm:$0xf0] }
 0x3b8   :  { %7614 = vmatpush.bf16.msrb.mxu1 %v14948_v43  ;;  %v17948_v43 = vld [vmem:[%s27688_s3 + $0x1b4] sm:$0xf0]  ;;  %7057 = vmatpush.bf16.msra.mxu2 %v14680_v23  ;;  %v14697_v23 = vld [vmem:[%s27688_s3 + $0x168] sm:$0xf0] }
 0x3b9   :  { %7070 = vmatpush.bf16.msra.mxu3 %v14744_v63  ;;  %v14736_v53 = vor.u32 %v17948_v43, %v14735_v7  ;;  %v15199_v7 = vld [vmem:[%s27688_s3 + $0x610] sm:$0xf]  ;;  %v18100_v43 = vld [vmem:[%s27688_s3 + $0x614] sm:$0xf0] }
 0x3ba   :  { %7602 = vmatpush.bf16.msrb.mxu0 %v14876_v58  ;;  %v15296_v58 = vor.u32 %v18124_v28, %v15295_v47  ;;  %v24892_v28 = vpack.c.b16 %v6699_v49, %v6699_v49  ;;  %v15200_v61 = vor.u32 %v18100_v43, %v15199_v7  ;;  %v15233_v49 = vld [vmem:[%s27688_s3 + $0x658] sm:$0xf0]  ;;  %v17945_v7 = vld [vmem:[%s27688_s3 + $0x1a4] sm:$0xf]  ;;  %v14729_v43 = vld [vmem:[%s27688_s3 + $0x1a8] sm:$0xf0] }
 0x3bb   :  { %6676 = vmatmul.bf16.vlgmr.msrb.gmra.mxu2 %v24669_v12  ;;  %6689 = vmatmul.bf16.vlgmr.msrb.gmra.mxu3 %v24671_v38  ;;  %v14655_v12 = vld [vmem:[%s27688_s3 + $0x110] sm:$0xf]  ;;  %v17928_v38 = vld [vmem:[%s27688_s3 + $0x114] sm:$0xf0] }
 0x3bc   :  { %7615 = vmatpush.bf16.msrb.mxu1 %v14940_v44  ;;  %v15287_v44 = vld [vmem:[%s27688_s3 + $0x6c0] sm:$0xf]  ;;  %7058 = vmatpush.bf16.msra.mxu2 %v14672_v46  ;;  %v14700_v46 = vor.u32 %v17937_v42, %v14697_v23  ;;  %v18123_v42 = vld [vmem:[%s27688_s3 + $0x6d4] sm:$0xf]  ;;  %v15297_v23 = vld [vmem:[%s27688_s3 + $0x6d8] sm:$0xf0] }
 0x3bd   :  { %7071 = vmatpush.bf16.msra.mxu3 %v14736_v53  ;;  %v15288_v3 = vor.u32 %v18122_v32, %v15287_v44  ;;  %v18095_v44 = vld [vmem:[#allocation2 + $0xc] sm:$0x70]  ;;  %v15177_v32 = vld [vmem:[#allocation2 + $0x10] sm:$0x70] }
 0x3be   :  { %7603 = vmatpush.bf16.msrb.mxu0 %v14868_v4  ;;  %v14656_v4 = vor.u32 %v17928_v38, %v14655_v12  ;;  %v18111_v12 = vld [vmem:[%s27688_s3 + $0x674] sm:$0xf]  ;;  %v15249_v38 = vld [vmem:[%s27688_s3 + $0x678] sm:$0xf0] }
 0x3bf   :  { %v15252_v13 = vor.u32 %v18111_v12, %v15249_v38 }
 0x3c0   :  { %7616 = vmatpush.bf16.msrb.mxu1 %v14932_v56  ;;  %7059 = vmatpush.bf16.msra.mxu2 %v14664_v40  ;;  %v14720_v56 = vor.u32 %v17944_v30, %v14719_v54  ;;  %v15255_v40 = vld [vmem:[%s27688_s3 + $0x680] sm:$0xf]  ;;  %v18127_v54 = vld [vmem:[%s27688_s3 + $0x6f4] sm:$0xf]  ;;  %v15313_v30 = vld [vmem:[%s27688_s3 + $0x6f8] sm:$0xf0] }
 0x3c1   :  { %7072 = vmatpush.bf16.msra.mxu3 %v14728_v31  ;;  %v18114_v31 = vld [vmem:[%s27688_s3 + $0x684] sm:$0xf0] }
 0x3c2   :  { %7604 = vmatpush.bf16.msrb.mxu0 %v14860_v6  ;;  %v6651_v8 = vpop.f32.mrf.mxu0  ;;  %v15207_v6 = vld [vmem:[%s27688_s3 + $0x620] sm:$0xf] }
 0x3c4   :  { %7617 = vmatpush.bf16.msrb.mxu1 %v14924_v27  ;;  %v6664_v36 = vpop.f32.mrf.mxu1  ;;  %v18102_v27 = vld [vmem:[%s27688_s3 + $0x624] sm:$0xf0]  ;;  %7060 = vmatpush.bf16.msra.mxu2 %v14656_v4  ;;  %v14681_v4 = vld [vmem:[%s27688_s3 + $0x148] sm:$0xf0] }
 0x3c5   :  { %7605 = vmatmul.bf16.vlgmr.msrb.gmra.mxu0 %v24592_v60  ;;  %v15223_v60 = vld [vmem:[%s27688_s3 + $0x640] sm:$0xf]  ;;  %v24844_v48 = vadd.f32 %v6664_v36, %v6651_v8  ;;  %7073 = vmatpush.bf16.msra.mxu3 %v14720_v56  ;;  %v15208_v63 = vor.u32 %v18102_v27, %v15207_v6  ;;  %v15256_v8 = vor.u32 %v18114_v31, %v15255_v40  ;;  %v17949_v56 = vld [vmem:[%s27688_s3 + $0x1c4] sm:$0xf]  ;;  %v17931_v6 = vld [vmem:[%s27688_s3 + $0x134] sm:$0xf] }
 0x3c6   :  { %8064 = vmatpush.bf16.msra.mxu0 %v15248_v35  ;;  %v14712_v35 = vor.u32 %v17942_v45, %v14711_v50  ;;  %v15316_v50 = vor.u32 %v18127_v54, %v15313_v30  ;;  %v15176_v36 = vor.u32 %v18095_v44, %v15175_v9  ;;  %v15180_v45 = vor.u32 %v18093_v14, %v15177_v32  ;;  %v14673_v27 = vld [vmem:[%s27688_s3 + $0x138] sm:$0xf0]  ;;  %v18103_v44 = vld [vmem:[%s27688_s3 + $0x634] sm:$0xf]  ;;  %v17925_v30 = vld [vmem:[%s27688_s3 + $0x104] sm:$0xf] }
 0x3c7   :  { %7618 = vmatmul.bf16.vlgmr.msrb.gmra.mxu1 %v24594_v55  ;;  %v18106_v55 = vld [vmem:[%s27688_s3 + $0x644] sm:$0xf0]  ;;  %v14684_v62 = vor.u32 %v17933_v29, %v14681_v4  ;;  %v14748_v16 = vor.u32 %v17949_v56, %v14745_v59  ;;  %v15217_v32 = vld [vmem:[%s27688_s3 + $0x638] sm:$0xf0]  ;;  %v18119_v40 = vld [vmem:[%s27688_s3 + $0x6b4] sm:$0xf] }
 0x3c8   :  { %8077 = vmatpush.bf16.msra.mxu1 %v15312_v10  ;;  %v15224_v17 = vor.u32 %v18106_v55, %v15223_v60  ;;  %v6698_v10 = vunpack.c.l.b16 %v24576_v20  ;;  %v14761_v20 = vld [vmem:[%s27688_s3 + $0x1e8] sm:$0xf0]  ;;  %7061 = vmatpush.bf16.msra.mxu2 %v14648_v18  ;;  %v15191_v60 = vld [vmem:[%s27688_s3 + $0x600] sm:$0xf]  ;;  %v18098_v55 = vld [vmem:[%s27688_s3 + $0x604] sm:$0xf0] }
 0x3c9   :  { %7074 = vmatpush.bf16.msra.mxu3 %v14712_v35  ;;  %v14764_v53 = vor.u32 %v17953_v0, %v14761_v20  ;;  %v15192_v24 = vor.u32 %v18098_v55, %v15191_v60  ;;  %v24968_v18 = vrot.slane %v15176_v36, 3  ;;  %v24970_v35 = vrot.slane %v15180_v45, 3  ;;  %v17929_v0 = vld [vmem:[%s27688_s3 + $0x124] sm:$0xf]  ;;  %v14665_v20 = vld [vmem:[%s27688_s3 + $0x128] sm:$0xf0] }
 0x3ca   :  { %8065 = vmatpush.bf16.msra.mxu0 %v15240_v33  ;;  %v15263_v33 = vld [vmem:[%s27688_s3 + $0x690] sm:$0xf]  ;;  %v6653_v21 = vpop.f32.mrf.mxu0  ;;  %v24890_v19 = vpack.c.b16 %v6698_v10, %v6698_v10  ;;  %v15244_v10 = vor.u32 %v18109_v1, %v15241_v26  ;;  %v15281_v31 = vld [vmem:[%s27688_s3 + $0x6b8] sm:$0xf0]  ;;  %v14713_v9 = vld [vmem:[%s27688_s3 + $0x188] sm:$0xf0] }
 0x3cb   :  { %v18105_v21 = vld [vmem:[%s27688_s3 + $0x644] sm:$0xf]  ;;  %v15039_v14 = vld [vmem:[%s27688_s3 + $0x570] sm:$0xf]  ;;  %v15284_v4 = vor.u32 %v18119_v40, %v15281_v31  ;;  %v18092_v59 = vld [vmem:[%s27688_s3 + $0x5f4] sm:$0xf0] }
 0x3cc   :  { %8078 = vmatpush.bf16.msra.mxu1 %v15304_v37  ;;  %v18116_v37 = vld [vmem:[%s27688_s3 + $0x694] sm:$0xf0]  ;;  %v6666_v47 = vpop.f32.mrf.mxu1  ;;  %7106 = vmatpush.bf16.msrb.mxu2 %v14708_v11  ;;  %v15103_v56 = vld [vmem:[%s27688_s3 + $0x5f0] sm:$0xf]  ;;  %v18117_v36 = vld [vmem:[%s27688_s3 + $0x6a4] sm:$0xf] }
 0x3cd   :  { %7119 = vmatpush.bf16.msrb.mxu3 %v14772_v25  ;;  %7062 = vmatmul.bf16.vlgmr.msra.gmra.mxu2 %v24890_v19  ;;  %v18107_v25 = vld [vmem:[%s27688_s3 + $0x654] sm:$0xf]  ;;  %v15225_v47 = vld [vmem:[%s27688_s3 + $0x648] sm:$0xf0] }
 0x3ce   :  { %8066 = vmatpush.bf16.msra.mxu0 %v15232_v57  ;;  %v15264_v57 = vor.u32 %v18116_v37, %v15263_v33  ;;  %7075 = vmatmul.bf16.vlgmr.msra.gmra.mxu3 %v24892_v28  ;;  %v15236_v33 = vor.u32 %v18107_v25, %v15233_v49  ;;  %v15300_v37 = vor.u32 %v18123_v42, %v15297_v23  ;;  %v15273_v45 = vld [vmem:[%s27688_s3 + $0x6a8] sm:$0xf0]  ;;  %v18115_v25 = vld [vmem:[%s27688_s3 + $0x694] sm:$0xf]  ;;  %v15265_v49 = vld [vmem:[%s27688_s3 + $0x698] sm:$0xf0] }
 0x3cf   :  { %v15228_v60 = vor.u32 %v18105_v21, %v15225_v47  ;;  %v18097_v21 = vld [vmem:[%s27688_s3 + $0x604] sm:$0xf]  ;;  %v15193_v47 = vld [vmem:[%s27688_s3 + $0x608] sm:$0xf0] }
 0x3d0   :  { %8079 = vmatpush.bf16.msra.mxu1 %v15296_v58  ;;  %v14753_v58 = vld [vmem:[%s27688_s3 + $0x1d8] sm:$0xf0]  ;;  %7107 = vmatpush.bf16.msrb.mxu2 %v14700_v46  ;;  %v18121_v46 = vld [vmem:[%s27688_s3 + $0x6c4] sm:$0xf] }
 0x3d1   :  { %7120 = vmatpush.bf16.msrb.mxu3 %v14764_v53  ;;  %v15289_v53 = vld [vmem:[%s27688_s3 + $0x6c8] sm:$0xf0] }
 0x3d2   :  { %8067 = vmatpush.bf16.msra.mxu0 %v15224_v17  ;;  %v14692_v17 = vor.u32 %v17935_v51, %v14689_v39  ;;  %v14668_v51 = vor.u32 %v17929_v0, %v14665_v20  ;;  %v14732_v39 = vor.u32 %v17945_v7, %v14729_v43  ;;  %v15292_v55 = vor.u32 %v18121_v46, %v15289_v53  ;;  %v15023_v0 = vld [vmem:[%s27688_s3 + $0x550] sm:$0xf]  ;;  %v18072_v20 = vld [vmem:[%s27688_s3 + $0x554] sm:$0xf0]  ;;  %v18113_v46 = vld [vmem:[%s27688_s3 + $0x684] sm:$0xf] }
 0x3d3   :  { %v15087_v7 = vld [vmem:[%s27688_s3 + $0x5d0] sm:$0xf]  ;;  %v15257_v53 = vld [vmem:[%s27688_s3 + $0x688] sm:$0xf0] }
 0x3d4   :  { %8080 = vmatpush.bf16.msra.mxu1 %v15288_v3  ;;  %v14756_v3 = vor.u32 %v17951_v5, %v14753_v58  ;;  %7108 = vmatpush.bf16.msrb.mxu2 %v14692_v17  ;;  %v17927_v5 = vld [vmem:[%s27688_s3 + $0x114] sm:$0xf]  ;;  %v14721_v58 = vld [vmem:[%s27688_s3 + $0x198] sm:$0xf0]  ;;  %v14649_v17 = vld [vmem:[%s27688_s3 + $0x108] sm:$0xf0] }
 0x3d5   :  { %v14652_v1 = vor.u32 %v17925_v30, %v14649_v17  ;;  %v15623_v30 = vld [vmem:[%s27688_s3 + $0x8e0] sm:$0xf]  ;;  %v18190_v17 = vld [vmem:[%s27688_s3 + $0x8e4] sm:$0xf0] }
 0x3d6   :  { %8068 = vmatpush.bf16.msra.mxu0 %v15216_v52  ;;  %v18125_v52 = vld [vmem:[%s27688_s3 + $0x6e4] sm:$0xf]  ;;  %7121 = vmatpush.bf16.msrb.mxu3 %v14756_v3 }
 0x3d7   :  { %v17941_v3 = vld [vmem:[%s27688_s3 + $0x184] sm:$0xf] }
 0x3d8   :  { %8081 = vmatpush.bf16.msra.mxu1 %v15280_v2  ;;  %v15305_v2 = vld [vmem:[%s27688_s3 + $0x6e8] sm:$0xf0]  ;;  %7109 = vmatpush.bf16.msrb.mxu2 %v14684_v62  ;;  %v14716_v26 = vor.u32 %v17941_v3, %v14713_v9  ;;  %v15031_v62 = vld [vmem:[%s27688_s3 + $0x560] sm:$0xf] }
 0x3d9   :  { %v15308_v11 = vor.u32 %v18125_v52, %v15305_v2  ;;  %v15104_v2 = vor.u32 %v18092_v59, %v15103_v56  ;;  %v15624_v59 = vor.u32 %v18190_v17, %v15623_v30 }
 0x3da   :  { %8069 = vmatpush.bf16.msra.mxu0 %v15208_v63  ;;  %7122 = vmatpush.bf16.msrb.mxu3 %v14748_v16  ;;  %v14676_v63 = vor.u32 %v17931_v6, %v14673_v27  ;;  %v18074_v16 = vld [vmem:[%s27688_s3 + $0x564] sm:$0xf0]  ;;  %v15276_v27 = vor.u32 %v18117_v36, %v15273_v45  ;;  %v15615_v36 = vld [vmem:[%s27688_s3 + $0x8d0] sm:$0xf]  ;;  %v18188_v45 = vld [vmem:[%s27688_s3 + $0x8d4] sm:$0xf0] }
 0x3dc   :  { %8082 = vmatpush.bf16.msra.mxu1 %v15272_v22  ;;  %v14740_v22 = vor.u32 %v17947_v41, %v14737_v15  ;;  %7110 = vmatpush.bf16.msrb.mxu2 %v14676_v63  ;;  %v15095_v41 = vld [vmem:[%s27688_s3 + $0x5e0] sm:$0xf]  ;;  %v18090_v15 = vld [vmem:[%s27688_s3 + $0x5e4] sm:$0xf0]  ;;  %v15032_v63 = vor.u32 %v18074_v16, %v15031_v62 }
 0x3dd   :  { %v15063_v62 = vld [vmem:[%s27688_s3 + $0x5a0] sm:$0xf]  ;;  %v18082_v16 = vld [vmem:[%s27688_s3 + $0x5a4] sm:$0xf0] }
 0x3de   :  { %8070 = vmatpush.bf16.msra.mxu0 %v15200_v61  ;;  %7123 = vmatpush.bf16.msrb.mxu3 %v14740_v22  ;;  %v14657_v61 = vld [vmem:[%s27688_s3 + $0x118] sm:$0xf0]  ;;  %v15096_v22 = vor.u32 %v18090_v15, %v15095_v41  ;;  %v15607_v41 = vld [vmem:[%s27688_s3 + $0x8c0] sm:$0xf]  ;;  %v18186_v15 = vld [vmem:[%s27688_s3 + $0x8c4] sm:$0xf0] }
 0x3df   :  { %v14660_v38 = vor.u32 %v17927_v5, %v14657_v61  ;;  %v15024_v5 = vor.u32 %v18072_v20, %v15023_v0  ;;  %v15535_v0 = vld [vmem:[%s27688_s3 + $0x830] sm:$0xf]  ;;  %v18028_v20 = vld [vmem:[#allocation2 + $0x14] sm:$0x30] }
 0x3e0   :  { %8083 = vmatpush.bf16.msra.mxu1 %v15264_v57  ;;  %v17943_v57 = vld [vmem:[%s27688_s3 + $0x194] sm:$0xf]  ;;  %7111 = vmatpush.bf16.msrb.mxu2 %v14668_v51  ;;  %v15567_v51 = vld [vmem:[%s27688_s3 + $0x870] sm:$0xf] }
 0x3e1   :  { %v14724_v54 = vor.u32 %v17943_v57, %v14721_v58  ;;  %v15015_v57 = vld [vmem:[%s27688_s3 + $0x540] sm:$0xf]  ;;  %v15196_v58 = vor.u32 %v18097_v21, %v15193_v47 }
 0x3e2   :  { %8071 = vmatpush.bf16.msra.mxu0 %v15192_v24  ;;  %7124 = vmatpush.bf16.msrb.mxu3 %v14732_v39  ;;  %v25034_v12 = vpop.f32.mrf.mxu0  ;;  %v18076_v24 = vld [vmem:[%s27688_s3 + $0x574] sm:$0xf0] }
 0x3e3   :  { %v15040_v52 = vor.u32 %v18076_v24, %v15039_v14  ;;  %v18176_v39 = vld [vmem:[%s27688_s3 + $0x874] sm:$0xf0]  ;;  %v15007_v14 = vld [vmem:[%s27688_s3 + $0x530] sm:$0xf] }
 0x3e4   :  { %8084 = vmatpush.bf16.msra.mxu1 %v15256_v8  ;;  %v25045_v29 = vpop.f32.mrf.mxu1  ;;  %v15220_v8 = vor.u32 %v18103_v44, %v15217_v32  ;;  %7112 = vmatpush.bf16.msrb.mxu2 %v14660_v38  ;;  %v15079_v44 = vld [vmem:[%s27688_s3 + $0x5c0] sm:$0xf]  ;;  %v18086_v32 = vld [vmem:[%s27688_s3 + $0x5c4] sm:$0xf0]  ;;  %v15568_v40 = vor.u32 %v18176_v39, %v15567_v51  ;;  %v18068_v24 = vld [vmem:[%s27688_s3 + $0x534] sm:$0xf0] }
 0x3e5   :  { %8072 = vmatmul.bf16.vlgmr.msra.gmra.mxu0 %v24968_v18  ;;  %v15559_v38 = vld [vmem:[%s27688_s3 + $0x860] sm:$0xf]  ;;  %v15080_v9 = vor.u32 %v18086_v32, %v15079_v44  ;;  %v18062_v51 = vld [vmem:[%s27688_s3 + $0x504] sm:$0xf0]  ;;  %v18091_v44 = vld [vmem:[%s27688_s3 + $0x5f4] sm:$0xf] }
 0x3e6   :  { %8116 = vmatpush.bf16.msrb.mxu0 %v15252_v13  ;;  %v18101_v13 = vld [vmem:[%s27688_s3 + $0x624] sm:$0xf]  ;;  %7125 = vmatpush.bf16.msrb.mxu3 %v14724_v54  ;;  %v18174_v54 = vld [vmem:[%s27688_s3 + $0x864] sm:$0xf0]  ;;  %v15047_v39 = vld [vmem:[%s27688_s3 + $0x580] sm:$0xf] }
 0x3e7   :  { %8085 = vmatmul.bf16.vlgmr.msra.gmra.mxu1 %v24970_v35  ;;  %v15560_v56 = vor.u32 %v18174_v54, %v15559_v38  ;;  %v15105_v32 = vld [vmem:[%s27688_s3 + $0x5f8] sm:$0xf0]  ;;  %v15591_v38 = vld [vmem:[%s27688_s3 + $0x8a0] sm:$0xf]  ;;  %v18182_v54 = vld [vmem:[%s27688_s3 + $0x8a4] sm:$0xf0] }
 0x3e8   :  { %8129 = vmatpush.bf16.msrb.mxu1 %v15316_v50  ;;  %v15209_v50 = vld [vmem:[%s27688_s3 + $0x628] sm:$0xf0]  ;;  %7113 = vmatpush.bf16.msrb.mxu2 %v14652_v1  ;;  %v15008_v1 = vor.u32 %v18068_v24, %v15007_v14  ;;  %v15108_v24 = vor.u32 %v18091_v44, %v15105_v32 }
 0x3e9   :  { %v15212_v6 = vor.u32 %v18101_v13, %v15209_v50  ;;  %v15551_v13 = vld [vmem:[%s27688_s3 + $0x850] sm:$0xf]  ;;  %v18172_v50 = vld [vmem:[%s27688_s3 + $0x854] sm:$0xf0]  ;;  %v15625_v44 = vld [vmem:[%s27688_s3 + $0x8e8] sm:$0xf0] }
 0x3ea   :  { %8117 = vmatpush.bf16.msrb.mxu0 %v15244_v10  ;;  %v18099_v10 = vld [vmem:[%s27688_s3 + $0x614] sm:$0xf]  ;;  %7126 = vmatpush.bf16.msrb.mxu3 %v14716_v26  ;;  %v7039_v42 = vpop.f32.mrf.mxu0 }
 0x3eb   :  { %7114 = vmatmul.bf16.vlgmr.msrb.gmra.mxu2 %v24890_v19  ;;  %v15631_v19 = vld [vmem:[%s27688_s3 + $0x8f0] sm:$0xf] }
 0x3ec   :  { %8130 = vmatpush.bf16.msrb.mxu1 %v15308_v11  ;;  %v15201_v11 = vld [vmem:[%s27688_s3 + $0x618] sm:$0xf0]  ;;  %v7052_v23 = vpop.f32.mrf.mxu1  ;;  %7571 = vmatpush.bf16.msra.mxu2 %v15040_v52  ;;  %v14999_v52 = vld [vmem:[%s27688_s3 + $0x520] sm:$0xf]  ;;  %v15055_v42 = vld [vmem:[%s27688_s3 + $0x590] sm:$0xf] }
 0x3ed   :  { %v15204_v43 = vor.u32 %v18099_v10, %v15201_v11  ;;  %7127 = vmatmul.bf16.vlgmr.msrb.gmra.mxu3 %v24892_v28  ;;  %v18192_v28 = vld [vmem:[%s27688_s3 + $0x8f4] sm:$0xf0]  ;;  %v15064_v11 = vor.u32 %v18082_v16, %v15063_v62 }
 0x3ee   :  { %8118 = vmatpush.bf16.msrb.mxu0 %v15236_v33  ;;  %7584 = vmatpush.bf16.msra.mxu3 %v15104_v2  ;;  %v15268_v33 = vor.u32 %v18115_v25, %v15265_v49  ;;  %v15632_v31 = vor.u32 %v18192_v28, %v15631_v19  ;;  %v18066_v2 = vld [vmem:[%s27688_s3 + $0x524] sm:$0xf0]  ;;  %v14991_v25 = vld [vmem:[%s27688_s3 + $0x510] sm:$0xf]  ;;  %v18064_v49 = vld [vmem:[%s27688_s3 + $0x514] sm:$0xf0] }
 0x3ef   :  { %v15000_v10 = vor.u32 %v18066_v2, %v14999_v52  ;;  %v18080_v23 = vld [vmem:[%s27688_s3 + $0x594] sm:$0xf0]  ;;  %v14992_v47 = vor.u32 %v18064_v49, %v14991_v25  ;;  %v14847_v19 = vld [vmem:[#allocation2 + $0x8] sm:$0xc]  ;;  %v15511_v25 = vld [vmem:[%s27688_s3 + $0x800] sm:$0xf] }
 0x3f0   :  { %8131 = vmatpush.bf16.msrb.mxu1 %v15300_v37  ;;  %v18088_v37 = vld [vmem:[%s27688_s3 + $0x5d4] sm:$0xf0]  ;;  %7572 = vmatpush.bf16.msra.mxu2 %v15032_v63  ;;  %v14848_v30 = vor.u32 %v18028_v20, %v14847_v19  ;;  %v18162_v49 = vld [vmem:[%s27688_s3 + $0x804] sm:$0xf0]  ;;  %v15633_v20 = vld [vmem:[%s27688_s3 + $0x8f8] sm:$0xf0] }
 0x3f1   :  { %v15088_v61 = vor.u32 %v18088_v37, %v15087_v7  ;;  %v18168_v7 = vld [vmem:[%s27688_s3 + $0x834] sm:$0xf0]  ;;  %v14849_v37 = vld [vmem:[#allocation2 + $0x18] sm:$0x30] }
 0x3f2   :  { %8119 = vmatpush.bf16.msrb.mxu0 %v15228_v60  ;;  %7585 = vmatpush.bf16.msra.mxu3 %v15096_v22  ;;  %v15260_v60 = vor.u32 %v18113_v46, %v15257_v53  ;;  %v15608_v22 = vor.u32 %v18186_v15, %v15607_v41  ;;  %v15056_v46 = vor.u32 %v18080_v23, %v15055_v42  ;;  %v14983_v53 = vld [vmem:[%s27688_s3 + $0x500] sm:$0xf]  ;;  %v25298_v2 = vrot.slane %v14848_v30, 2  ;;  %v18087_v41 = vld [vmem:[%s27688_s3 + $0x5d4] sm:$0xf] }
 0x3f3   :  { %v14984_v17 = vor.u32 %v18062_v51, %v14983_v53  ;;  %v15575_v42 = vld [vmem:[%s27688_s3 + $0x880] sm:$0xf]  ;;  %v18178_v23 = vld [vmem:[%s27688_s3 + $0x884] sm:$0xf0]  ;;  %v15017_v53 = vld [vmem:[%s27688_s3 + $0x548] sm:$0xf0] }
 0x3f4   :  { %8132 = vmatpush.bf16.msrb.mxu1 %v15292_v55  ;;  %v18070_v55 = vld [vmem:[%s27688_s3 + $0x544] sm:$0xf0]  ;;  %7573 = vmatpush.bf16.msra.mxu2 %v15024_v5  ;;  %v18085_v51 = vld [vmem:[%s27688_s3 + $0x5c4] sm:$0xf]  ;;  %v15073_v30 = vld [vmem:[%s27688_s3 + $0x5b8] sm:$0xf0] }
 0x3f5   :  { %v15016_v3 = vor.u32 %v18070_v55, %v15015_v57  ;;  %v18078_v5 = vld [vmem:[%s27688_s3 + $0x584] sm:$0xf0]  ;;  %v15041_v57 = vld [vmem:[%s27688_s3 + $0x578] sm:$0xf0] }
 0x3f6   :  { %8120 = vmatpush.bf16.msrb.mxu0 %v15220_v8  ;;  %7586 = vmatpush.bf16.msra.mxu3 %v15088_v61  ;;  %v15071_v8 = vld [vmem:[%s27688_s3 + $0x5b0] sm:$0xf]  ;;  %v18075_v61 = vld [vmem:[%s27688_s3 + $0x574] sm:$0xf] }
 0x3f7   :  { %v15044_v14 = vor.u32 %v18075_v61, %v15041_v57  ;;  %v18173_v61 = vld [vmem:[%s27688_s3 + $0x864] sm:$0xf] }
 0x3f8   :  { %8133 = vmatpush.bf16.msrb.mxu1 %v15284_v4  ;;  %v18084_v4 = vld [vmem:[%s27688_s3 + $0x5b4] sm:$0xf0]  ;;  %7574 = vmatpush.bf16.msra.mxu2 %v15016_v3  ;;  %v15048_v3 = vor.u32 %v18078_v5, %v15047_v39  ;;  %v15081_v39 = vld [vmem:[%s27688_s3 + $0x5c8] sm:$0xf0] }
 0x3f9   :  { %v15072_v26 = vor.u32 %v18084_v4, %v15071_v8  ;;  %v18073_v8 = vld [vmem:[%s27688_s3 + $0x564] sm:$0xf]  ;;  %v15033_v4 = vld [vmem:[%s27688_s3 + $0x568] sm:$0xf0] }
 0x3fa   :  { %8121 = vmatpush.bf16.msrb.mxu0 %v15212_v6  ;;  %7587 = vmatpush.bf16.msra.mxu3 %v15080_v9  ;;  %v15552_v6 = vor.u32 %v18172_v50, %v15551_v13  ;;  %v18089_v13 = vld [vmem:[%s27688_s3 + $0x5e4] sm:$0xf]  ;;  %v15097_v50 = vld [vmem:[%s27688_s3 + $0x5e8] sm:$0xf0] }
 0x3fc   :  { %8134 = vmatpush.bf16.msrb.mxu1 %v15276_v27  ;;  %v15616_v27 = vor.u32 %v18188_v45, %v15615_v36  ;;  %7575 = vmatpush.bf16.msra.mxu2 %v15008_v1  ;;  %v15519_v36 = vld [vmem:[%s27688_s3 + $0x810] sm:$0xf]  ;;  %v18164_v45 = vld [vmem:[%s27688_s3 + $0x814] sm:$0xf0] }
 0x3fd   :  { %v15583_v1 = vld [vmem:[%s27688_s3 + $0x890] sm:$0xf]  ;;  %v15520_v15 = vor.u32 %v18164_v45, %v15519_v36  ;;  %v15001_v36 = vld [vmem:[%s27688_s3 + $0x528] sm:$0xf0]  ;;  %v18081_v45 = vld [vmem:[%s27688_s3 + $0x5a4] sm:$0xf] }
 0x3fe   :  { %8122 = vmatpush.bf16.msrb.mxu0 %v15204_v43  ;;  %7588 = vmatpush.bf16.msra.mxu3 %v15072_v26  ;;  %v15599_v43 = vld [vmem:[%s27688_s3 + $0x8b0] sm:$0xf]  ;;  %v18180_v26 = vld [vmem:[%s27688_s3 + $0x894] sm:$0xf0] }
 0x400   :  { %8135 = vmatpush.bf16.msrb.mxu1 %v15268_v33  ;;  %v18184_v33 = vld [vmem:[%s27688_s3 + $0x8b4] sm:$0xf0]  ;;  %7576 = vmatpush.bf16.msra.mxu2 %v15000_v10  ;;  %v15584_v10 = vor.u32 %v18180_v26, %v15583_v1  ;;  %v15065_v1 = vld [vmem:[%s27688_s3 + $0x5a8] sm:$0xf0] }
 0x401   :  { %v15600_v55 = vor.u32 %v18184_v33, %v15599_v43  ;;  %v18069_v33 = vld [vmem:[%s27688_s3 + $0x544] sm:$0xf] }
 0x402   :  { %8123 = vmatpush.bf16.msrb.mxu0 %v15196_v58  ;;  %7589 = vmatpush.bf16.msra.mxu3 %v15064_v11  ;;  %v25234_v21 = vpop.f32.mrf.mxu0  ;;  %v18026_v58 = vld [vmem:[#allocation2 + $0xc] sm:$0xc]  ;;  %v15089_v11 = vld [vmem:[%s27688_s3 + $0x5d8] sm:$0xf0]  ;;  %v15020_v32 = vor.u32 %v18069_v33, %v15017_v53  ;;  %v18061_v33 = vld [vmem:[%s27688_s3 + $0x504] sm:$0xf] }
 0x403   :  { %v14852_v9 = vor.u32 %v18026_v58, %v14849_v37  ;;  %v15092_v43 = vor.u32 %v18087_v41, %v15089_v11  ;;  %v8170_v37 = vld [vmem:[#allocation2 + $0x10] sm:$0xff]  ;;  %v15068_v41 = vor.u32 %v18081_v45, %v15065_v1  ;;  %v15049_v53 = vld [vmem:[%s27688_s3 + $0x588] sm:$0xf0] }
 0x404   :  { %8136 = vmatpush.bf16.msrb.mxu1 %v15260_v60  ;;  %v25245_v28 = vpop.f32.mrf.mxu1  ;;  %v15536_v60 = vor.u32 %v18168_v7, %v15535_v0  ;;  %7577 = vmatpush.bf16.msra.mxu2 %v14992_v47  ;;  %v18191_v0 = vld [vmem:[%s27688_s3 + $0x8f4] sm:$0xf]  ;;  %v15512_v47 = vor.u32 %v18162_v49, %v15511_v25  ;;  %v8239_v57 = vunpack.c.l.b16 %v8170_v37  ;;  %v8240_v58 = vunpack.c.h.b16 %v8170_v37  ;;  %v15057_v25 = vld [vmem:[%s27688_s3 + $0x598] sm:$0xf0]  ;;  %v14985_v37 = vld [vmem:[%s27688_s3 + $0x508] sm:$0xf0] }
 0x405   :  { %8124 = vmatmul.bf16.vlgmr.msrb.gmra.mxu0 %v24968_v18  ;;  %v15543_v18 = vld [vmem:[%s27688_s3 + $0x840] sm:$0xf]  ;;  %v25300_v62 = vrot.slane %v14852_v9, 2  ;;  %v15636_v5 = vor.u32 %v18191_v0, %v15633_v20  ;;  %v18171_v9 = vld [vmem:[%s27688_s3 + $0x854] sm:$0xf] }
 0x406   :  { %8571 = vmatpush.bf16.msra.mxu0 %v15568_v40  ;;  %v15527_v40 = vld [vmem:[%s27688_s3 + $0x820] sm:$0xf]  ;;  %7590 = vmatpush.bf16.msra.mxu3 %v15056_v46  ;;  %v15576_v46 = vor.u32 %v18178_v23, %v15575_v42  ;;  %v18079_v11 = vld [vmem:[%s27688_s3 + $0x594] sm:$0xf]  ;;  %v15601_v0 = vld [vmem:[%s27688_s3 + $0x8b8] sm:$0xf0] }
 0x407   :  { %8137 = vmatmul.bf16.vlgmr.msrb.gmra.mxu1 %v24970_v35  ;;  %v18170_v35 = vld [vmem:[%s27688_s3 + $0x844] sm:$0xf0]  ;;  %v18167_v23 = vld [vmem:[%s27688_s3 + $0x834] sm:$0xf] }
 0x408   :  { %8584 = vmatpush.bf16.msra.mxu1 %v15632_v31  ;;  %v15544_v63 = vor.u32 %v18170_v35, %v15543_v18  ;;  %v18166_v31 = vld [vmem:[%s27688_s3 + $0x824] sm:$0xf0]  ;;  %7578 = vmatpush.bf16.msra.mxu2 %v14984_v17  ;;  %v18071_v18 = vld [vmem:[%s27688_s3 + $0x554] sm:$0xf]  ;;  %v15025_v35 = vld [vmem:[%s27688_s3 + $0x558] sm:$0xf0] }
 0x409   :  { %v15028_v7 = vor.u32 %v18071_v18, %v15025_v35  ;;  %v15609_v18 = vld [vmem:[%s27688_s3 + $0x8c8] sm:$0xf0] }
 0x40a   :  { %8572 = vmatpush.bf16.msra.mxu0 %v15560_v56  ;;  %v15528_v56 = vor.u32 %v18166_v31, %v15527_v40  ;;  %7591 = vmatpush.bf16.msra.mxu3 %v15048_v3  ;;  %v7091_v52 = vpop.f32.mrf.mxu0  ;;  %v15084_v40 = vor.u32 %v18085_v51, %v15081_v39  ;;  %v18067_v31 = vld [vmem:[%s27688_s3 + $0x534] sm:$0xf]  ;;  %v15375_v51 = vld [vmem:[%s27688_s3 + $0x770] sm:$0xf]  ;;  %v18144_v39 = vld [vmem:[%s27688_s3 + $0x774] sm:$0xf0] }
 0x40b   :  { %7579 = vmatmul.bf16.vlgmr.msra.gmra.mxu2 %v25298_v2 }
 0x40c   :  { %8585 = vmatpush.bf16.msra.mxu1 %v15624_v59  ;;  %v15592_v59 = vor.u32 %v18182_v54, %v15591_v38  ;;  %v7104_v16 = vpop.f32.mrf.mxu1  ;;  %7623 = vmatpush.bf16.msrb.mxu2 %v15044_v14  ;;  %v15009_v38 = vld [vmem:[%s27688_s3 + $0x538] sm:$0xf0]  ;;  %v18083_v54 = vld [vmem:[%s27688_s3 + $0x5b4] sm:$0xf]  ;;  %v25379_v14 = vpack.c.b16 %v8239_v57, %v8239_v57  ;;  %v15439_v57 = vld [vmem:[%s27688_s3 + $0x7f0] sm:$0xf] }
 0x40d   :  { %7592 = vmatmul.bf16.vlgmr.msra.gmra.mxu3 %v25300_v62  ;;  %v18169_v16 = vld [vmem:[%s27688_s3 + $0x844] sm:$0xf] }
 0x40e   :  { %8573 = vmatpush.bf16.msra.mxu0 %v15552_v6  ;;  %7636 = vmatpush.bf16.msrb.mxu3 %v15108_v24  ;;  %v15036_v6 = vor.u32 %v18073_v8, %v15033_v4  ;;  %v25381_v24 = vpack.c.b16 %v8240_v58, %v8240_v58  ;;  %v15553_v8 = vld [vmem:[%s27688_s3 + $0x858] sm:$0xf0]  ;;  %v18187_v4 = vld [vmem:[%s27688_s3 + $0x8d4] sm:$0xf]  ;;  %v18160_v58 = vld [vmem:[%s27688_s3 + $0x7f4] sm:$0xf0] }
 0x40f   :  { %v15556_v26 = vor.u32 %v18171_v9, %v15553_v8  ;;  %v15431_v8 = vld [vmem:[%s27688_s3 + $0x7e0] sm:$0xf] }
 0x410   :  { %8586 = vmatpush.bf16.msra.mxu1 %v15616_v27  ;;  %v15100_v27 = vor.u32 %v18089_v13, %v15097_v50  ;;  %7624 = vmatpush.bf16.msrb.mxu2 %v15036_v6  ;;  %v15076_v13 = vor.u32 %v18083_v54, %v15073_v30  ;;  %v18065_v50 = vld [vmem:[%s27688_s3 + $0x524] sm:$0xf]  ;;  %v15545_v6 = vld [vmem:[%s27688_s3 + $0x848] sm:$0xf0]  ;;  %v15440_v54 = vor.u32 %v18160_v58, %v15439_v57  ;;  %v15367_v30 = vld [vmem:[%s27688_s3 + $0x760] sm:$0xf] }
 0x411   :  { %v15004_v35 = vor.u32 %v18065_v50, %v15001_v36  ;;  %v15548_v49 = vor.u32 %v18169_v16, %v15545_v6  ;;  %v15585_v50 = vld [vmem:[%s27688_s3 + $0x898] sm:$0xf0]  ;;  %v18140_v16 = vld [vmem:[%s27688_s3 + $0x754] sm:$0xf0] }
 0x412   :  { %8574 = vmatpush.bf16.msra.mxu0 %v15544_v63  ;;  %v18175_v63 = vld [vmem:[%s27688_s3 + $0x874] sm:$0xf]  ;;  %7637 = vmatpush.bf16.msrb.mxu3 %v15100_v27  ;;  %v18185_v27 = vld [vmem:[%s27688_s3 + $0x8c4] sm:$0xf] }
 0x413   :  { %v15612_v42 = vor.u32 %v18185_v27, %v15609_v18  ;;  %v15423_v18 = vld [vmem:[%s27688_s3 + $0x7d0] sm:$0xf] }
 0x414   :  { %8587 = vmatpush.bf16.msra.mxu1 %v15608_v22  ;;  %v15569_v22 = vld [vmem:[%s27688_s3 + $0x878] sm:$0xf0]  ;;  %7625 = vmatpush.bf16.msrb.mxu2 %v15028_v7 }
 0x415   :  { %v15572_v19 = vor.u32 %v18175_v63, %v15569_v22  ;;  %v15537_v63 = vld [vmem:[%s27688_s3 + $0x838] sm:$0xf0]  ;;  %v18183_v22 = vld [vmem:[%s27688_s3 + $0x8b4] sm:$0xf] }
 0x416   :  { %8575 = vmatpush.bf16.msra.mxu0 %v15536_v60  ;;  %v15561_v60 = vld [vmem:[%s27688_s3 + $0x868] sm:$0xf0]  ;;  %7638 = vmatpush.bf16.msrb.mxu3 %v15092_v43  ;;  %v15060_v43 = vor.u32 %v18079_v11, %v15057_v25 }
 0x417   :  { %v15564_v17 = vor.u32 %v18173_v61, %v15561_v60  ;;  %v15604_v61 = vor.u32 %v18183_v22, %v15601_v0  ;;  %v18165_v60 = vld [vmem:[%s27688_s3 + $0x824] sm:$0xf]  ;;  %v15577_v11 = vld [vmem:[%s27688_s3 + $0x888] sm:$0xf0]  ;;  %v18154_v22 = vld [vmem:[%s27688_s3 + $0x7c4] sm:$0xf0] }
 0x418   :  { %8588 = vmatpush.bf16.msra.mxu1 %v15600_v55  ;;  %v18189_v55 = vld [vmem:[%s27688_s3 + $0x8e4] sm:$0xf]  ;;  %7626 = vmatpush.bf16.msrb.mxu2 %v15020_v32  ;;  %v15593_v32 = vld [vmem:[%s27688_s3 + $0x8a8] sm:$0xf0] }
 0x419   :  { %v15628_v3 = vor.u32 %v18189_v55, %v15625_v44  ;;  %v15529_v55 = vld [vmem:[%s27688_s3 + $0x828] sm:$0xf0]  ;;  %v18181_v44 = vld [vmem:[%s27688_s3 + $0x8a4] sm:$0xf] }
 0x41a   :  { %8576 = vmatpush.bf16.msra.mxu0 %v15528_v56  ;;  %v15617_v56 = vld [vmem:[%s27688_s3 + $0x8d8] sm:$0xf0]  ;;  %7639 = vmatpush.bf16.msrb.mxu3 %v15084_v40  ;;  %v14988_v40 = vor.u32 %v18061_v33, %v14985_v37  ;;  %v15596_v9 = vor.u32 %v18181_v44, %v15593_v32  ;;  %v15407_v33 = vld [vmem:[%s27688_s3 + $0x7b0] sm:$0xf]  ;;  %v18152_v37 = vld [vmem:[%s27688_s3 + $0x7b4] sm:$0xf0] }
 0x41b   :  { %v15620_v52 = vor.u32 %v18187_v4, %v15617_v56  ;;  %v18158_v4 = vld [vmem:[%s27688_s3 + $0x7e4] sm:$0xf0]  ;;  %v18163_v56 = vld [vmem:[%s27688_s3 + $0x814] sm:$0xf]  ;;  %v18132_v44 = vld [vmem:[%s27688_s3 + $0x714] sm:$0xf0] }
 0x41c   :  { %8589 = vmatpush.bf16.msra.mxu1 %v15592_v59  ;;  %v15012_v59 = vor.u32 %v18067_v31, %v15009_v38  ;;  %v15376_v38 = vor.u32 %v18144_v39, %v15375_v51  ;;  %v18134_v51 = vld [vmem:[%s27688_s3 + $0x724] sm:$0xf0]  ;;  %v15399_v39 = vld [vmem:[%s27688_s3 + $0x7a0] sm:$0xf]  ;;  %v15391_v32 = vld [vmem:[%s27688_s3 + $0x790] sm:$0xf] }
 0x41e   :  { %8577 = vmatpush.bf16.msra.mxu0 %v15520_v15  ;;  %7627 = vmatpush.bf16.msrb.mxu2 %v15012_v59  ;;  %v18063_v15 = vld [vmem:[%s27688_s3 + $0x514] sm:$0xf]  ;;  %v15521_v59 = vld [vmem:[%s27688_s3 + $0x818] sm:$0xf0] }
 0x41f   :  { %7640 = vmatpush.bf16.msrb.mxu3 %v15076_v13  ;;  %v18179_v13 = vld [vmem:[%s27688_s3 + $0x894] sm:$0xf]  ;;  %v15524_v6 = vor.u32 %v18163_v56, %v15521_v59  ;;  %v15377_v59 = vld [vmem:[%s27688_s3 + $0x778] sm:$0xf0] }
 0x420   :  { %8590 = vmatpush.bf16.msra.mxu1 %v15584_v10  ;;  %v14993_v10 = vld [vmem:[%s27688_s3 + $0x518] sm:$0xf0]  ;;  %v15588_v27 = vor.u32 %v18179_v13, %v15585_v50  ;;  %v18159_v13 = vld [vmem:[%s27688_s3 + $0x7f4] sm:$0xf] }
 0x421   :  { %v14996_v7 = vor.u32 %v18063_v15, %v14993_v10  ;;  %v15513_v15 = vld [vmem:[%s27688_s3 + $0x808] sm:$0xf0]  ;;  %v18177_v10 = vld [vmem:[%s27688_s3 + $0x884] sm:$0xf]  ;;  %v15441_v50 = vld [vmem:[%s27688_s3 + $0x7f8] sm:$0xf0] }
 0x422   :  { %8578 = vmatpush.bf16.msra.mxu0 %v15512_v47  ;;  %7628 = vmatpush.bf16.msrb.mxu2 %v15004_v35  ;;  %v7554_v20 = vpop.f32.mrf.mxu0  ;;  %v18077_v47 = vld [vmem:[%s27688_s3 + $0x584] sm:$0xf]  ;;  %v18156_v35 = vld [vmem:[%s27688_s3 + $0x7d4] sm:$0xf0] }
 0x423   :  { %7641 = vmatpush.bf16.msrb.mxu3 %v15068_v41  ;;  %v15052_v31 = vor.u32 %v18077_v47, %v15049_v53  ;;  %v18161_v41 = vld [vmem:[%s27688_s3 + $0x804] sm:$0xf]  ;;  %v15335_v53 = vld [vmem:[%s27688_s3 + $0x720] sm:$0xf] }
 0x424   :  { %8591 = vmatpush.bf16.msra.mxu1 %v15576_v46  ;;  %v7567_v46 = vpop.f32.mrf.mxu1 }
 0x425   :  { %8579 = vmatmul.bf16.vlgmr.msra.gmra.mxu0 %v25379_v14 }
 0x426   :  { %8623 = vmatpush.bf16.msrb.mxu0 %v15572_v19  ;;  %v25460_v19 = vadd.f32 %v7567_v46, %v7554_v20  ;;  %7629 = vmatpush.bf16.msrb.mxu2 %v14996_v7  ;;  %v15343_v7 = vld [vmem:[%s27688_s3 + $0x730] sm:$0xf]  ;;  %v15408_v46 = vor.u32 %v18152_v37, %v15407_v33 }
 0x427   :  { %8592 = vmatmul.bf16.vlgmr.msra.gmra.mxu1 %v25381_v24  ;;  %7642 = vmatpush.bf16.msrb.mxu3 %v15060_v43  ;;  %v18136_v43 = vld [vmem:[%s27688_s3 + $0x734] sm:$0xf0] }
 0x428   :  { %8636 = vmatpush.bf16.msrb.mxu1 %v15636_v5  ;;  %v15540_v5 = vor.u32 %v18167_v23, %v15537_v63  ;;  %v18138_v23 = vld [vmem:[%s27688_s3 + $0x744] sm:$0xf0]  ;;  %v15415_v63 = vld [vmem:[%s27688_s3 + $0x7c0] sm:$0xf]  ;;  %v15344_v47 = vor.u32 %v18136_v43, %v15343_v7  ;;  %v15425_v7 = vld [vmem:[%s27688_s3 + $0x7d8] sm:$0xf0] }
 0x429   :  { %v15416_v20 = vor.u32 %v18154_v22, %v15415_v63 }
 0x42a   :  { %8624 = vmatpush.bf16.msrb.mxu0 %v15564_v17  ;;  %v18142_v17 = vld [vmem:[%s27688_s3 + $0x764] sm:$0xf0]  ;;  %7630 = vmatpush.bf16.msrb.mxu2 %v14988_v40  ;;  %v7556_v36 = vpop.f32.mrf.mxu0 }
 0x42b   :  { %7643 = vmatpush.bf16.msrb.mxu3 %v15052_v31  ;;  %v15368_v1 = vor.u32 %v18142_v17, %v15367_v30  ;;  %v18096_v30 = vld [vmem:[#allocation2 + $0x14] sm:$0x70]  ;;  %v15185_v17 = vld [vmem:[#allocation2 + $0x18] sm:$0x70] }
 0x42c   :  { %8637 = vmatpush.bf16.msrb.mxu1 %v15628_v3  ;;  %v15532_v3 = vor.u32 %v18165_v60, %v15529_v55  ;;  %v7569_v45 = vpop.f32.mrf.mxu1  ;;  %v15327_v60 = vld [vmem:[%s27688_s3 + $0x710] sm:$0xf] }
 0x42d   :  { %7631 = vmatmul.bf16.vlgmr.msrb.gmra.mxu2 %v25298_v2  ;;  %v15351_v2 = vld [vmem:[%s27688_s3 + $0x740] sm:$0xf]  ;;  %v15328_v40 = vor.u32 %v18132_v44, %v15327_v60  ;;  %v15409_v60 = vld [vmem:[%s27688_s3 + $0x7b8] sm:$0xf0] }
 0x42e   :  { %8625 = vmatpush.bf16.msrb.mxu0 %v15556_v26  ;;  %8090 = vmatpush.bf16.msra.mxu2 %v15376_v38  ;;  %v15432_v26 = vor.u32 %v18158_v4, %v15431_v8  ;;  %v15352_v0 = vor.u32 %v18138_v23, %v15351_v2  ;;  %v6638_v57 = vpop.f32.mrf.mxu3  ;;  %v15319_v38 = vld [vmem:[%s27688_s3 + $0x700] sm:$0xf]  ;;  %v18143_v8 = vld [vmem:[%s27688_s3 + $0x774] sm:$0xf] }
 0x42f   :  { %8103 = vmatpush.bf16.msra.mxu3 %v15440_v54  ;;  %v18130_v54 = vld [vmem:[%s27688_s3 + $0x704] sm:$0xf0]  ;;  %v18139_v23 = vld [vmem:[%s27688_s3 + $0x754] sm:$0xf] }
 0x430   :  { %8638 = vmatpush.bf16.msrb.mxu1 %v15620_v52  ;;  %v15359_v52 = vld [vmem:[%s27688_s3 + $0x750] sm:$0xf]  ;;  %7644 = vmatmul.bf16.vlgmr.msrb.gmra.mxu3 %v25300_v62  ;;  %v15516_v62 = vor.u32 %v18161_v41, %v15513_v15  ;;  %v18141_v15 = vld [vmem:[%s27688_s3 + $0x764] sm:$0xf] }
 0x431   :  { %v15360_v25 = vor.u32 %v18140_v16, %v15359_v52  ;;  %v15183_v16 = vld [vmem:[#allocation2 + $0x8] sm:$0x8] }
 0x432   :  { %8626 = vmatpush.bf16.msrb.mxu0 %v15548_v49  ;;  %8091 = vmatpush.bf16.msra.mxu2 %v15368_v1  ;;  %v15424_v49 = vor.u32 %v18156_v35, %v15423_v18  ;;  %v15444_v18 = vor.u32 %v18159_v13, %v15441_v50  ;;  %v15184_v35 = vor.u32 %v18096_v30, %v15183_v16  ;;  %v18149_v30 = vld [vmem:[%s27688_s3 + $0x7a4] sm:$0xf] }
 0x433   :  { %8104 = vmatpush.bf16.msra.mxu3 %v15432_v26  ;;  %v15320_v26 = vor.u32 %v18130_v54, %v15319_v38  ;;  %v15337_v54 = vld [vmem:[%s27688_s3 + $0x728] sm:$0xf0]  ;;  %v18145_v16 = vld [vmem:[%s27688_s3 + $0x784] sm:$0xf] }
 0x434   :  { %8639 = vmatpush.bf16.msrb.mxu1 %v15612_v42  ;;  %v15580_v42 = vor.u32 %v18177_v10, %v15577_v11  ;;  %v15369_v10 = vld [vmem:[%s27688_s3 + $0x768] sm:$0xf0]  ;;  %v18157_v11 = vld [vmem:[%s27688_s3 + $0x7e4] sm:$0xf] }
 0x436   :  { %8627 = vmatpush.bf16.msrb.mxu0 %v15540_v5  ;;  %8092 = vmatpush.bf16.msra.mxu2 %v15360_v25  ;;  %v18150_v5 = vld [vmem:[%s27688_s3 + $0x7a4] sm:$0xf0]  ;;  %v6640_v1 = vpop.f32.mrf.mxu3  ;;  %v15433_v25 = vld [vmem:[%s27688_s3 + $0x7e8] sm:$0xf0] }
 0x437   :  { %8105 = vmatpush.bf16.msra.mxu3 %v15424_v49  ;;  %v25621_v49 = vrot.slane %v15184_v35, 3 }
 0x438   :  { %8640 = vmatpush.bf16.msrb.mxu1 %v15604_v61  ;;  %v6625_v61 = vpop.f32.mrf.mxu2 }
 0x439   :  { %v6626_v58 = vadd.f32 %v6625_v61, %v24652_v34  ;;  %v18148_v34 = vld [vmem:[%s27688_s3 + $0x794] sm:$0xf0] }
 0x43a   :  { %8628 = vmatpush.bf16.msrb.mxu0 %v15532_v3  ;;  %8093 = vmatpush.bf16.msra.mxu2 %v15352_v0  ;;  %v15392_v31 = vor.u32 %v18148_v34, %v15391_v32  ;;  %v15383_v3 = vld [vmem:[%s27688_s3 + $0x780] sm:$0xf]  ;;  %v15361_v0 = vld [vmem:[%s27688_s3 + $0x758] sm:$0xf0] }
 0x43b   :  { %8106 = vmatpush.bf16.msra.mxu3 %v15416_v20  ;;  %v25572_v55 = vadd.f32 %v6638_v57, %v6626_v58  ;;  %v18155_v20 = vld [vmem:[%s27688_s3 + $0x7d4] sm:$0xf] }
 0x43c   :  { %8641 = vmatpush.bf16.msrb.mxu1 %v15596_v9  ;;  %v18146_v9 = vld [vmem:[%s27688_s3 + $0x784] sm:$0xf0]  ;;  %v18135_v58 = vld [vmem:[%s27688_s3 + $0x734] sm:$0xf] }
 0x43d   :  { %v15384_v52 = vor.u32 %v18146_v9, %v15383_v3  ;;  %v7038_v38 = vadd.f32 %v25034_v12, %v25572_v55  ;;  %v18131_v12 = vld [vmem:[%s27688_s3 + $0x714] sm:$0xf] }
 0x43e   :  { %8629 = vmatpush.bf16.msrb.mxu0 %v15524_v6  ;;  %8094 = vmatpush.bf16.msra.mxu2 %v15344_v47  ;;  %v18094_v6 = vld [vmem:[#allocation2 + $0xc] sm:$0x8]  ;;  %v6690_v33 = vpop.f32.mrf.mxu3  ;;  %v15364_v47 = vor.u32 %v18139_v23, %v15361_v0 }
 0x43f   :  { %8107 = vmatpush.bf16.msra.mxu3 %v15408_v46  ;;  %v15188_v41 = vor.u32 %v18094_v6, %v15185_v17  ;;  %v15428_v46 = vor.u32 %v18155_v20, %v15425_v7  ;;  %v15401_v17 = vld [vmem:[%s27688_s3 + $0x7a8] sm:$0xf0]  ;;  %v7051_v55 = vadd.f32 %v25045_v29, %v7038_v38  ;;  %v18129_v29 = vld [vmem:[%s27688_s3 + $0x704] sm:$0xf]  ;;  %v18206_v20 = vld [vmem:[%s27688_s3 + $0x964] sm:$0xf0] }
 0x440   :  { %8642 = vmatpush.bf16.msrb.mxu1 %v15588_v27  ;;  %v6627_v45 = vpop.f32.mrf.mxu2  ;;  %v15380_v27 = vor.u32 %v18143_v8, %v15377_v59  ;;  %v15404_v9 = vor.u32 %v18149_v30, %v15401_v17  ;;  %v15329_v8 = vld [vmem:[%s27688_s3 + $0x718] sm:$0xf0]  ;;  %v15385_v6 = vld [vmem:[%s27688_s3 + $0x788] sm:$0xf0]  ;;  %v15751_v7 = vld [vmem:[%s27688_s3 + $0x9e0] sm:$0xf] }
 0x441   :  { %v25623_v2 = vrot.slane %v15188_v41, 3  ;;  %v15332_v45 = vor.u32 %v18131_v12, %v15329_v8  ;;  %v18208_v41 = vld [vmem:[%s27688_s3 + $0x974] sm:$0xf0]  ;;  %v15655_v30 = vld [vmem:[%s27688_s3 + $0x920] sm:$0xf] }
 0x442   :  { %8630 = vmatpush.bf16.msrb.mxu0 %v15516_v62  ;;  %v7606_v4 = vpop.f32.mrf.mxu0  ;;  %v15372_v62 = vor.u32 %v18141_v15, %v15369_v10  ;;  %v15759_v15 = vld [vmem:[%s27688_s3 + $0x9f0] sm:$0xf]  ;;  %v18224_v10 = vld [vmem:[%s27688_s3 + $0x9f4] sm:$0xf0]  ;;  %v18198_v17 = vld [vmem:[%s27688_s3 + $0x924] sm:$0xf0] }
 0x443   :  { %v15760_v23 = vor.u32 %v18224_v10, %v15759_v15  ;;  %v15697_v15 = vld [vmem:[%s27688_s3 + $0x978] sm:$0xf0]  ;;  %v18223_v10 = vld [vmem:[%s27688_s3 + $0x9f4] sm:$0xf] }
 0x444   :  { %8643 = vmatpush.bf16.msrb.mxu1 %v15580_v42  ;;  %v7619_v56 = vpop.f32.mrf.mxu1  ;;  %v15436_v42 = vor.u32 %v18157_v11, %v15433_v25 }
 0x445   :  { %8631 = vmatmul.bf16.vlgmr.msrb.gmra.mxu0 %v25379_v14  ;;  %v15336_v14 = vor.u32 %v18134_v51, %v15335_v53  ;;  %v25607_v36 = vadd.f32 %v7619_v56, %v7606_v4  ;;  %v18137_v53 = vld [vmem:[%s27688_s3 + $0x744] sm:$0xf]  ;;  %v18147_v4 = vld [vmem:[%s27688_s3 + $0x794] sm:$0xf]  ;;  %v15393_v56 = vld [vmem:[%s27688_s3 + $0x798] sm:$0xf0] }
 0x446   :  { %v6692_v32 = vpop.f32.mrf.mxu3  ;;  %v15396_v1 = vor.u32 %v18147_v4, %v15393_v56  ;;  %v18196_v56 = vld [vmem:[%s27688_s3 + $0x914] sm:$0xf0] }
 0x447   :  { %8644 = vmatmul.bf16.vlgmr.msrb.gmra.mxu1 %v25381_v24  ;;  %v15400_v24 = vor.u32 %v18150_v5, %v15399_v39  ;;  %8095 = vmatpush.bf16.msra.mxu2 %v15336_v14  ;;  %v15353_v39 = vld [vmem:[%s27688_s3 + $0x748] sm:$0xf0]  ;;  %v18153_v5 = vld [vmem:[%s27688_s3 + $0x7c4] sm:$0xf]  ;;  %v15345_v14 = vld [vmem:[%s27688_s3 + $0x738] sm:$0xf0] }
 0x448   :  { %v6677_v43 = vpop.f32.mrf.mxu2  ;;  %v15356_v61 = vor.u32 %v18137_v53, %v15353_v39  ;;  %v15348_v34 = vor.u32 %v18135_v58, %v15345_v14  ;;  %v18204_v39 = vld [vmem:[%s27688_s3 + $0x954] sm:$0xf0]  ;;  %v15671_v58 = vld [vmem:[%s27688_s3 + $0x940] sm:$0xf]  ;;  %v18202_v14 = vld [vmem:[%s27688_s3 + $0x944] sm:$0xf0] }
 0x449   :  { %8108 = vmatpush.bf16.msra.mxu3 %v15400_v24  ;;  %v6678_v37 = vadd.f32 %v6677_v43, %v24844_v48  ;;  %v15417_v48 = vld [vmem:[%s27688_s3 + $0x7c8] sm:$0xf0]  ;;  %v18151_v24 = vld [vmem:[%s27688_s3 + $0x7b4] sm:$0xf]  ;;  %v18222_v43 = vld [vmem:[%s27688_s3 + $0x9e4] sm:$0xf0] }
 0x44a   :  { %v7608_v63 = vpop.f32.mrf.mxu0  ;;  %v15420_v57 = vor.u32 %v18153_v5, %v15417_v48  ;;  %v15743_v5 = vld [vmem:[%s27688_s3 + $0x9d0] sm:$0xf]  ;;  %v18220_v48 = vld [vmem:[%s27688_s3 + $0x9d4] sm:$0xf0] }
 0x44b   :  { %8096 = vmatpush.bf16.msra.mxu2 %v15328_v40  ;;  %v25643_v51 = vadd.f32 %v6690_v33, %v6678_v37  ;;  %v15412_v40 = vor.u32 %v18151_v24, %v15409_v60  ;;  %v15687_v63 = vld [vmem:[%s27688_s3 + $0x960] sm:$0xf]  ;;  %v15752_v37 = vor.u32 %v18222_v43, %v15751_v7  ;;  %v18200_v32 = vld [vmem:[%s27688_s3 + $0x934] sm:$0xf0] }
 0x44c   :  { %v7621_v22 = vpop.f32.mrf.mxu1  ;;  %v15688_v33 = vor.u32 %v18206_v20, %v15687_v63  ;;  %v15735_v24 = vld [vmem:[%s27688_s3 + $0x9c0] sm:$0xf] }
 0x44d   :  { %8109 = vmatpush.bf16.msra.mxu3 %v15392_v31  ;;  %v18133_v31 = vld [vmem:[%s27688_s3 + $0x724] sm:$0xf] }
 0x44e   :  { %v15340_v3 = vor.u32 %v18133_v31, %v15337_v54  ;;  %v7090_v31 = vadd.f32 %v25234_v21, %v25643_v51  ;;  %v18214_v21 = vld [vmem:[%s27688_s3 + $0x9a4] sm:$0xf0] }
 0x44f   :  { %8097 = vmatpush.bf16.msra.mxu2 %v15320_v26  ;;  %v15321_v26 = vld [vmem:[%s27688_s3 + $0x708] sm:$0xf0] }
 0x450   :  { %v6679_v44 = vpop.f32.mrf.mxu2  ;;  %v15324_v25 = vor.u32 %v18129_v29, %v15321_v26  ;;  %v7103_v51 = vadd.f32 %v25245_v28, %v7090_v31  ;;  %v18212_v28 = vld [vmem:[%s27688_s3 + $0x994] sm:$0xf0]  ;;  %v15639_v29 = vld [vmem:[%s27688_s3 + $0x900] sm:$0xf]  ;;  %v18194_v26 = vld [vmem:[%s27688_s3 + $0x904] sm:$0xf0] }
 0x451   :  { %8110 = vmatpush.bf16.msra.mxu3 %v15384_v52  ;;  %v7076_v13 = vpop.f32.mrf.mxu3  ;;  %v15663_v44 = vld [vmem:[%s27688_s3 + $0x930] sm:$0xf] }
 0x452   :  { %8098 = vmatmul.bf16.vlgmr.msra.gmra.mxu2 %v25621_v49  ;;  %v15664_v38 = vor.u32 %v18200_v32, %v15663_v44  ;;  %v18201_v44 = vld [vmem:[%s27688_s3 + $0x944] sm:$0xf]  ;;  %v15673_v32 = vld [vmem:[%s27688_s3 + $0x948] sm:$0xf0] }
 0x453   :  { %8142 = vmatpush.bf16.msrb.mxu2 %v15380_v27  ;;  %v15695_v27 = vld [vmem:[%s27688_s3 + $0x970] sm:$0xf]  ;;  %v15676_v31 = vor.u32 %v18201_v44, %v15673_v32  ;;  %v18317_v32 = vld [vmem:[%s27690_s5 + $0x2e4] sm:$0xf] }
 0x454   :  { %8111 = vmatmul.bf16.vlgmr.msra.gmra.mxu3 %v25623_v2 }
 0x455   :  { %8155 = vmatpush.bf16.msrb.mxu3 %v15444_v18 }
 0x457   :  { %8143 = vmatpush.bf16.msrb.mxu2 %v15372_v62  ;;  %v15388_v62 = vor.u32 %v18145_v16, %v15385_v6  ;;  %v8171_v16 = vld [vmem:[#allocation2 + $0x18] sm:$0xff]  ;;  %v15703_v6 = vld [vmem:[%s27688_s3 + $0x980] sm:$0xf] }
 0x458   :  { %v7063_v59 = vpop.f32.mrf.mxu2  ;;  %v8241_v63 = vunpack.c.l.b16 %v8171_v16  ;;  %v8242_v43 = vunpack.c.h.b16 %v8171_v16 }
 0x459   :  { %8156 = vmatpush.bf16.msrb.mxu3 %v15436_v42  ;;  %v7064_v50 = vadd.f32 %v7063_v59, %v7051_v55  ;;  %v15696_v42 = vor.u32 %v18208_v41, %v15695_v27  ;;  %v7078_v0 = vpop.f32.mrf.mxu3  ;;  %v15647_v55 = vld [vmem:[%s27688_s3 + $0x910] sm:$0xf]  ;;  %v18210_v27 = vld [vmem:[%s27688_s3 + $0x984] sm:$0xf0] }
 0x45a   :  { %v15711_v59 = vld [vmem:[%s27688_s3 + $0x990] sm:$0xf] }
 0x45b   :  { %8144 = vmatpush.bf16.msrb.mxu2 %v15364_v47  ;;  %v25699_v52 = vadd.f32 %v7076_v13, %v7064_v50  ;;  %v15679_v47 = vld [vmem:[%s27688_s3 + $0x950] sm:$0xf] }
 0x45d   :  { %8157 = vmatpush.bf16.msrb.mxu3 %v15428_v46 }
 0x45f   :  { %8145 = vmatpush.bf16.msrb.mxu2 %v15356_v61  ;;  %v15680_v61 = vor.u32 %v18204_v39, %v15679_v47  ;;  %v18221_v47 = vld [vmem:[%s27688_s3 + $0x9e4] sm:$0xf]  ;;  %v25840_v39 = vpack.c.b16 %v8242_v43, %v8242_v43 }
 0x460   :  { %v7065_v22 = vpop.f32.mrf.mxu2 }
 0x461   :  { %8158 = vmatpush.bf16.msrb.mxu3 %v15420_v57  ;;  %v15744_v57 = vor.u32 %v18220_v48, %v15743_v5 }
 0x462   :  { %v8073_v18 = vpop.f32.mrf.mxu0 }
 0x463   :  { %8146 = vmatpush.bf16.msrb.mxu2 %v15348_v34  ;;  %v15727_v34 = vld [vmem:[%s27688_s3 + $0x9b0] sm:$0xf] }
 0x464   :  { %v8086_v35 = vpop.f32.mrf.mxu1 }
 0x465   :  { %8159 = vmatpush.bf16.msrb.mxu3 %v15412_v40  ;;  %v25719_v11 = vadd.f32 %v8086_v35, %v8073_v18  ;;  %v18216_v40 = vld [vmem:[%s27688_s3 + $0x9b4] sm:$0xf0]  ;;  %v18207_v18 = vld [vmem:[%s27688_s3 + $0x974] sm:$0xf] }
 0x466   :  { %v15728_v54 = vor.u32 %v18216_v40, %v15727_v34  ;;  %v15700_v20 = vor.u32 %v18207_v18, %v15697_v15  ;;  %v18217_v34 = vld [vmem:[%s27688_s3 + $0x9c4] sm:$0xf]  ;;  %v15737_v40 = vld [vmem:[%s27688_s3 + $0x9c8] sm:$0xf0] }
 0x467   :  { %8147 = vmatpush.bf16.msrb.mxu2 %v15340_v3  ;;  %v15719_v3 = vld [vmem:[%s27688_s3 + $0x9a0] sm:$0xf]  ;;  %v18193_v18 = vld [vmem:[%s27688_s3 + $0x904] sm:$0xf] }
 0x468   :  { %v15720_v12 = vor.u32 %v18214_v21, %v15719_v3  ;;  %v15729_v3 = vld [vmem:[%s27688_s3 + $0x9b8] sm:$0xf0] }
 0x469   :  { %8160 = vmatpush.bf16.msrb.mxu3 %v15404_v9  ;;  %v15656_v9 = vor.u32 %v18198_v17, %v15655_v30  ;;  %v15665_v30 = vld [vmem:[%s27688_s3 + $0x938] sm:$0xf0]  ;;  %v18215_v17 = vld [vmem:[%s27688_s3 + $0x9b4] sm:$0xf] }
 0x46a   :  { %v8075_v46 = vpop.f32.mrf.mxu0 }
 0x46b   :  { %8148 = vmatpush.bf16.msrb.mxu2 %v15332_v45  ;;  %v15648_v45 = vor.u32 %v18196_v56, %v15647_v55  ;;  %v15753_v46 = vld [vmem:[%s27688_s3 + $0x9e8] sm:$0xf0]  ;;  %v18213_v55 = vld [vmem:[%s27688_s3 + $0x9a4] sm:$0xf] }
 0x46c   :  { %v8088_v53 = vpop.f32.mrf.mxu1  ;;  %v15756_v48 = vor.u32 %v18221_v47, %v15753_v46 }
 0x46d   :  { %8161 = vmatpush.bf16.msrb.mxu3 %v15396_v1  ;;  %v15712_v1 = vor.u32 %v18212_v28, %v15711_v59  ;;  %v25838_v53 = vpack.c.b16 %v8241_v63, %v8241_v63  ;;  %v18195_v59 = vld [vmem:[%s27688_s3 + $0x914] sm:$0xf] }
 0x46e   :  { %v7115_v8 = vpop.f32.mrf.mxu2 }
 0x46f   :  { %8149 = vmatpush.bf16.msrb.mxu2 %v15324_v25  ;;  %v7116_v13 = vadd.f32 %v7115_v8, %v7103_v51  ;;  %v15761_v25 = vld [vmem:[%s27688_s3 + $0x9f8] sm:$0xf0]  ;;  %v15732_v51 = vor.u32 %v18215_v17, %v15729_v3  ;;  %v15721_v8 = vld [vmem:[%s27688_s3 + $0x9a8] sm:$0xf0] }
 0x470   :  { %v7128_v4 = vpop.f32.mrf.mxu3  ;;  %v15764_v7 = vor.u32 %v18223_v10, %v15761_v25  ;;  %v15724_v56 = vor.u32 %v18213_v55, %v15721_v8  ;;  %v15927_v8 = vld [vmem:[%s27690_s5 + $0x2c0] sm:$0xf] }
 0x471   :  { %8162 = vmatpush.bf16.msrb.mxu3 %v15388_v62  ;;  %v25798_v50 = vadd.f32 %v7128_v4, %v7116_v13 }
 0x472   :  { %8150 = vmatmul.bf16.vlgmr.msrb.gmra.mxu2 %v25621_v49  ;;  %v18218_v49 = vld [vmem:[%s27688_s3 + $0x9c4] sm:$0xf0] }
 0x473   :  { %8597 = vmatpush.bf16.msra.mxu2 %v15696_v42  ;;  %v15736_v60 = vor.u32 %v18218_v49, %v15735_v24  ;;  %v15640_v42 = vor.u32 %v18194_v26, %v15639_v29  ;;  %v18219_v24 = vld [vmem:[%s27688_s3 + $0x9d4] sm:$0xf]  ;;  %v15745_v49 = vld [vmem:[%s27688_s3 + $0x9d8] sm:$0xf0] }
 0x474   :  { %8163 = vmatmul.bf16.vlgmr.msrb.gmra.mxu3 %v25623_v2  ;;  %v15672_v2 = vor.u32 %v18202_v14, %v15671_v58  ;;  %v15681_v14 = vld [vmem:[%s27688_s3 + $0x958] sm:$0xf0] }
 0x475   :  { %8610 = vmatpush.bf16.msra.mxu3 %v15760_v23  ;;  %v15704_v23 = vor.u32 %v18210_v27, %v15703_v6  ;;  %v15713_v29 = vld [vmem:[%s27688_s3 + $0x998] sm:$0xf0] }
 0x476   :  { %v7117_v22 = vpop.f32.mrf.mxu2 }
 0x477   :  { %8598 = vmatpush.bf16.msra.mxu2 %v15688_v33  ;;  %v18205_v33 = vld [vmem:[%s27688_s3 + $0x964] sm:$0xf] }
 0x478   :  { %v7130_v0 = vpop.f32.mrf.mxu3 }
 0x479   :  { %8611 = vmatpush.bf16.msra.mxu3 %v15752_v37  ;;  %v15689_v37 = vld [vmem:[%s27688_s3 + $0x968] sm:$0xf0] }
 0x47a   :  { %v15692_v5 = vor.u32 %v18205_v33, %v15689_v37 }
 0x47b   :  { %8599 = vmatpush.bf16.msra.mxu2 %v15680_v61  ;;  %v18203_v61 = vld [vmem:[%s27688_s3 + $0x954] sm:$0xf] }
 0x47d   :  { %8612 = vmatpush.bf16.msra.mxu3 %v15744_v57 }
 0x47f   :  { %8600 = vmatpush.bf16.msra.mxu2 %v15672_v2  ;;  %v15684_v2 = vor.u32 %v18203_v61, %v15681_v14 }
 0x481   :  { %8613 = vmatpush.bf16.msra.mxu3 %v15736_v60  ;;  %v15748_v60 = vor.u32 %v18219_v24, %v15745_v49 }
 0x482   :  { %v8125_v35 = vpop.f32.mrf.mxu0 }
 0x483   :  { %8601 = vmatpush.bf16.msra.mxu2 %v15664_v38  ;;  %v15740_v38 = vor.u32 %v18217_v34, %v15737_v40  ;;  %v15945_v34 = vld [vmem:[%s27690_s5 + $0x2f0] sm:$0xf0] }
 0x484   :  { %v8138_v41 = vpop.f32.mrf.mxu1 }
 0x485   :  { %8614 = vmatpush.bf16.msra.mxu3 %v15728_v54  ;;  %v25824_v62 = vadd.f32 %v8138_v41, %v8125_v35  ;;  %v18199_v54 = vld [vmem:[%s27688_s3 + $0x934] sm:$0xf]  ;;  %v15641_v35 = vld [vmem:[%s27688_s3 + $0x908] sm:$0xf0]  ;;  %v18209_v41 = vld [vmem:[%s27688_s3 + $0x984] sm:$0xf] }
 0x486   :  { %v15668_v21 = vor.u32 %v18199_v54, %v15665_v30  ;;  %v16073_v54 = vld [vmem:[%s27690_s5 + $0x3f0] sm:$0xf0] }
 0x487   :  { %8602 = vmatpush.bf16.msra.mxu2 %v15656_v9  ;;  %v18197_v9 = vld [vmem:[%s27688_s3 + $0x924] sm:$0xf] }
 0x489   :  { %8615 = vmatpush.bf16.msra.mxu3 %v15720_v12  ;;  %v15657_v12 = vld [vmem:[%s27688_s3 + $0x928] sm:$0xf0] }
 0x48a   :  { %v8127_v57 = vpop.f32.mrf.mxu0  ;;  %v15660_v4 = vor.u32 %v18197_v9, %v15657_v12 }
 0x48b   :  { %8603 = vmatpush.bf16.msra.mxu2 %v15648_v45  ;;  %v15649_v45 = vld [vmem:[%s27688_s3 + $0x918] sm:$0xf0] }
 0x48c   :  { %v8140_v58 = vpop.f32.mrf.mxu1  ;;  %v15652_v6 = vor.u32 %v18195_v59, %v15649_v45 }
 0x48d   :  { %8616 = vmatpush.bf16.msra.mxu3 %v15712_v1  ;;  %v18211_v1 = vld [vmem:[%s27688_s3 + $0x994] sm:$0xf] }
 0x48e   :  { %v7580_v28 = vpop.f32.mrf.mxu2  ;;  %v15716_v27 = vor.u32 %v18211_v1, %v15713_v29 }
 0x48f   :  { %8604 = vmatpush.bf16.msra.mxu2 %v15640_v42  ;;  %v7581_v26 = vadd.f32 %v7580_v28, %v25460_v19  ;;  %v15705_v19 = vld [vmem:[%s27688_s3 + $0x988] sm:$0xf0]  ;;  %v18313_v28 = vld [vmem:[%s27690_s5 + $0x2c4] sm:$0xf] }
 0x490   :  { %v7593_v13 = vpop.f32.mrf.mxu3  ;;  %v15708_v63 = vor.u32 %v18209_v41, %v15705_v19  ;;  %v16039_v41 = vld [vmem:[%s27690_s5 + $0x3a0] sm:$0xf]  ;;  %v18343_v19 = vld [vmem:[%s27690_s5 + $0x3ac] sm:$0xf0] }
 0x491   :  { %8617 = vmatpush.bf16.msra.mxu3 %v15704_v23  ;;  %v7594_v16 = vadd.f32 %v7593_v13, %v7581_v26  ;;  %v15644_v23 = vor.u32 %v18193_v18, %v15641_v35  ;;  %v15929_v13 = vld [vmem:[%s27690_s5 + $0x2d0] sm:$0xf0]  ;;  %v18311_v35 = vld [vmem:[%s27690_s5 + $0x2ac] sm:$0xf0] }
 0x492   :  { %8605 = vmatmul.bf16.vlgmr.msra.gmra.mxu2 %v25838_v53  ;;  %v15932_v26 = vor.u32 %v18313_v28, %v15929_v13  ;;  %v18327_v28 = vld [vmem:[%s27690_s5 + $0x32c] sm:$0xf0]  ;;  %v18293_v13 = vld [vmem:[%s27690_s5 + $0x224] sm:$0xf] }
 0x493   :  { %8649 = vmatpush.bf16.msrb.mxu2 %v15700_v20  ;;  %v7649_v15 = vadd.f32 %v7594_v16, %v25699_v52  ;;  %v18345_v16 = vld [vmem:[%s27690_s5 + $0x3c4] sm:$0xf] }
 0x494   :  { %8618 = vmatmul.bf16.vlgmr.msra.gmra.mxu3 %v25840_v39 }
 0x495   :  { %8662 = vmatpush.bf16.msrb.mxu3 %v15764_v7 }
 0x496   :  { %v7582_v22 = vpop.f32.mrf.mxu2 }
 0x497   :  { %8650 = vmatpush.bf16.msrb.mxu2 %v15692_v5 }
 0x498   :  { %v7595_v0 = vpop.f32.mrf.mxu3 }
 0x499   :  { %8663 = vmatpush.bf16.msrb.mxu3 %v15756_v48  ;;  %v16041_v0 = vld [vmem:[%s27690_s5 + $0x3b0] sm:$0xf0] }
 0x49b   :  { %8651 = vmatpush.bf16.msrb.mxu2 %v15684_v2 }
 0x49d   :  { %8664 = vmatpush.bf16.msrb.mxu3 %v15748_v60  ;;  %v16071_v60 = vld [vmem:[%s27690_s5 + $0x3e0] sm:$0xf] }
 0x49f   :  { %8652 = vmatpush.bf16.msrb.mxu2 %v15676_v31  ;;  %v15948_v31 = vor.u32 %v18317_v32, %v15945_v34 }
 0x4a1   :  { %8665 = vmatpush.bf16.msrb.mxu3 %v15740_v38  ;;  %v18349_v38 = vld [vmem:[%s27690_s5 + $0x3e4] sm:$0xf] }
 0x4a2   :  { %v8580_v10 = vpop.f32.mrf.mxu0  ;;  %v16076_v3 = vor.u32 %v18349_v38, %v16073_v54  ;;  %v15991_v38 = vld [vmem:[%s27690_s5 + $0x340] sm:$0xf] }
 0x4a3   :  { %8653 = vmatpush.bf16.msrb.mxu2 %v15668_v21 }
 0x4a4   :  { %v8593_v25 = vpop.f32.mrf.mxu1 }
 0x4a5   :  { %8666 = vmatpush.bf16.msrb.mxu3 %v15732_v51  ;;  %v25918_v42 = vadd.f32 %v8593_v25, %v8580_v10  ;;  %v16040_v10 = vor.u32 %v18343_v19, %v16039_v41  ;;  %v18309_v25 = vld [vmem:[%s27690_s5 + $0x2a4] sm:$0xf]  ;;  %v18323_v41 = vld [vmem:[%s27690_s5 + $0x30c] sm:$0xf0] }
 0x4a6   :  { %v18289_v19 = vld [vmem:[%s27690_s5 + $0x204] sm:$0xf] }
 0x4a7   :  { %8654 = vmatpush.bf16.msrb.mxu2 %v15660_v4  ;;  %v18315_v4 = vld [vmem:[%s27690_s5 + $0x2cc] sm:$0xf0] }
 0x4a8   :  { %v15928_v59 = vor.u32 %v18315_v4, %v15927_v8  ;;  %v15847_v4 = vld [vmem:[%s27690_s5 + $0x220] sm:$0xf] }
 0x4a9   :  { %8667 = vmatpush.bf16.msrb.mxu3 %v15724_v56  ;;  %v16055_v56 = vld [vmem:[%s27690_s5 + $0x3c0] sm:$0xf] }
 0x4aa   :  { %v8582_v20 = vpop.f32.mrf.mxu0 }
 0x4ab   :  { %8655 = vmatpush.bf16.msrb.mxu2 %v15652_v6  ;;  %v16057_v6 = vld [vmem:[%s27690_s5 + $0x3d0] sm:$0xf0]  ;;  %v15895_v20 = vld [vmem:[%s27690_s5 + $0x280] sm:$0xf] }
 0x4ac   :  { %v8595_v7 = vpop.f32.mrf.mxu1  ;;  %v16060_v18 = vor.u32 %v18345_v16, %v16057_v6  ;;  %v15831_v16 = vld [vmem:[%s27690_s5 + $0x200] sm:$0xf]  ;;  %v18291_v6 = vld [vmem:[%s27690_s5 + $0x20c] sm:$0xf0] }
 0x4ad   :  { %8668 = vmatpush.bf16.msrb.mxu3 %v15716_v27  ;;  %v15911_v27 = vld [vmem:[%s27690_s5 + $0x2a0] sm:$0xf]  ;;  %v18307_v7 = vld [vmem:[%s27690_s5 + $0x28c] sm:$0xf0] }
 0x4af   :  { %8656 = vmatpush.bf16.msrb.mxu2 %v15644_v23  ;;  %v15913_v23 = vld [vmem:[%s27690_s5 + $0x2b0] sm:$0xf0] }
 0x4b0   :  { %v7632_v43 = vpop.f32.mrf.mxu2  ;;  %v15916_v22 = vor.u32 %v18309_v25, %v15913_v23  ;;  %v18321_v25 = vld [vmem:[%s27690_s5 + $0x304] sm:$0xf]  ;;  %v15961_v23 = vld [vmem:[%s27690_s5 + $0x310] sm:$0xf0] }
 0x4b1   :  { %8669 = vmatpush.bf16.msrb.mxu3 %v15708_v63  ;;  %v7633_v33 = vadd.f32 %v7632_v43, %v25607_v36  ;;  %v15943_v36 = vld [vmem:[%s27690_s5 + $0x2e0] sm:$0xf]  ;;  %v18341_v63 = vld [vmem:[%s27690_s5 + $0x3a4] sm:$0xf] }
 0x4b2   :  { %8657 = vmatmul.bf16.vlgmr.msrb.gmra.mxu2 %v25838_v53  ;;  %v16044_v43 = vor.u32 %v18341_v63, %v16041_v0  ;;  %v15951_v63 = vld [vmem:[%s27690_s5 + $0x2e8] sm:$0xf] }
 0x4b3   :  { %v7645_v52 = vpop.f32.mrf.mxu3  ;;  %9175 = vmatpush.bf16.msra.mxu2 %v15948_v31  ;;  %v18299_v31 = vld [vmem:[%s27690_s5 + $0x24c] sm:$0xf0]  ;;  %v16079_v0 = vld [vmem:[%s27690_s5 + $0x3e8] sm:$0xf] }
 0x4b4   :  { %8670 = vmatmul.bf16.vlgmr.msrb.gmra.mxu3 %v25840_v39  ;;  %v7646_v37 = vadd.f32 %v7645_v52, %v7633_v33  ;;  %v16023_v52 = vld [vmem:[%s27690_s5 + $0x380] sm:$0xf]  ;;  %v18339_v33 = vld [vmem:[%s27690_s5 + $0x38c] sm:$0xf0] }
 0x4b5   :  { %9188 = vmatpush.bf16.msra.mxu3 %v16076_v3  ;;  %v15865_v3 = vld [vmem:[%s27690_s5 + $0x250] sm:$0xf0] }
 0x4b6   :  { %v7650_v47 = vadd.f32 %v7646_v37, %v25798_v50  ;;  %v18319_v50 = vld [vmem:[%s27690_s5 + $0x2ec] sm:$0xf0]  ;;  %v18305_v37 = vld [vmem:[%s27690_s5 + $0x284] sm:$0xf] }
 0x4b7   :  { %v15944_v44 = vor.u32 %v18319_v50, %v15943_v36  ;;  %9176 = vmatpush.bf16.msra.mxu2 %v15932_v26  ;;  %v18301_v36 = vld [vmem:[%s27690_s5 + $0x264] sm:$0xf]  ;;  %v15881_v50 = vld [vmem:[%s27690_s5 + $0x270] sm:$0xf0] }
 0x4b8   :  { %v7634_v61 = vpop.f32.mrf.mxu2  ;;  %v15884_v34 = vor.u32 %v18301_v36, %v15881_v50 }
 0x4b9   :  { %9149 = vmatpush.bf16.msra.mxu0 %v15944_v44  ;;  %9189 = vmatpush.bf16.msra.mxu3 %v16060_v18  ;;  %v16025_v61 = vld [vmem:[%s27690_s5 + $0x390] sm:$0xf0] }
 0x4ba   :  { %v16009_v44 = vld [vmem:[%s27690_s5 + $0x370] sm:$0xf0] }
 0x4bb   :  { %v7647_v57 = vpop.f32.mrf.mxu3  ;;  %9177 = vmatpush.bf16.msra.mxu2 %v15916_v22  ;;  %v18320_v22 = vld [vmem:[%s27690_s5 + $0x2f4] sm:$0xf0] }
 0x4bc   :  { %v16024_v57 = vor.u32 %v18339_v33, %v16023_v52  ;;  %v18352_v52 = vld [vmem:[%s27690_s5 + $0x3f4] sm:$0xf0]  ;;  %v18318_v33 = vld [vmem:[%s27690_s5 + $0x2ec] sm:$0xf] }
 0x4bd   :  { %9150 = vmatpush.bf16.msra.mxu0 %v15928_v59  ;;  %9190 = vmatpush.bf16.msra.mxu3 %v16044_v43  ;;  %v15975_v59 = vld [vmem:[%s27690_s5 + $0x320] sm:$0xf]  ;;  %v15832_v43 = vor.u32 %v18291_v6, %v15831_v16  ;;  %v18306_v16 = vld [vmem:[%s27690_s5 + $0x28c] sm:$0xf] }
 0x4c2   :  { %v8632_v46 = vpop.f32.mrf.mxu0 }
 0x4c4   :  { %v8645_v5 = vpop.f32.mrf.mxu1 }
 0x4c5   :  { %v25924_v48 = vadd.f32 %v8645_v5, %v8632_v46  ;;  %v15897_v46 = vld [vmem:[%s27690_s5 + $0x290] sm:$0xf0]  ;;  %v18337_v5 = vld [vmem:[%s27690_s5 + $0x384] sm:$0xf] }
 0x4ca   :  { %v8634_v58 = vpop.f32.mrf.mxu0 }
 0x4cb   :  { %v15900_v58 = vor.u32 %v18305_v37, %v15897_v46  ;;  %v15953_v37 = vld [vmem:[%s27690_s5 + $0x2f8] sm:$0xf0] }
 0x4cc   :  { %v8647_v14 = vpop.f32.mrf.mxu1 }
 0x4cd   :  { %v15879_v14 = vld [vmem:[%s27690_s5 + $0x260] sm:$0xf]  ;;  %9178 = vmatpush.bf16.msra.mxu2 %v15900_v58  ;;  %v15964_v58 = vor.u32 %v18321_v25, %v15961_v23  ;;  %v16015_v25 = vld [vmem:[%s27690_s5 + $0x368] sm:$0xf] }
 0x4d1   :  { %9179 = vmatpush.bf16.msra.mxu2 %v15884_v34  ;;  %v18314_v34 = vld [vmem:[%s27690_s5 + $0x2cc] sm:$0xf] }
 0x4d5   :  { %v8099_v24 = vpop.f32.mrf.mxu2 }
 0x4d6   :  { %v8100_v53 = vadd.f32 %v8099_v24, %v25719_v11  ;;  %v18351_v11 = vld [vmem:[%s27690_s5 + $0x3ec] sm:$0xf0] }
 0x4d7   :  { %v8112_v49 = vpop.f32.mrf.mxu3  ;;  %v16072_v40 = vor.u32 %v18351_v11, %v16071_v60  ;;  %v18303_v24 = vld [vmem:[%s27690_s5 + $0x26c] sm:$0xf0]  ;;  %v18333_v60 = vld [vmem:[%s27690_s5 + $0x364] sm:$0xf] }
 0x4d8   :  { %v8113_v39 = vadd.f32 %v8112_v49, %v8100_v53  ;;  %v16007_v49 = vld [vmem:[%s27690_s5 + $0x360] sm:$0xf]  ;;  %v16028_v53 = vor.u32 %v18337_v5, %v16025_v61  ;;  %v15880_v11 = vor.u32 %v18303_v24, %v15879_v14  ;;  %v16012_v54 = vor.u32 %v18333_v60, %v16009_v44  ;;  %v18350_v61 = vld [vmem:[%s27690_s5 + $0x3ec] sm:$0xf]  ;;  %v15935_v60 = vld [vmem:[%s27690_s5 + $0x2c8] sm:$0xf] }
 0x4d9   :  { %9162 = vmatpush.bf16.msra.mxu1 %v16072_v40  ;;  %v15863_v40 = vld [vmem:[%s27690_s5 + $0x240] sm:$0xf]  ;;  %v15952_v14 = vor.u32 %v18320_v22, %v15951_v63  ;;  %v18316_v44 = vld [vmem:[%s27690_s5 + $0x2d4] sm:$0xf0]  ;;  %v18302_v22 = vld [vmem:[%s27690_s5 + $0x26c] sm:$0xf] }
 0x4da   :  { %v25927_v2 = vadd.f32 %v8113_v39, %v7649_v15  ;;  %v15912_v15 = vor.u32 %v18311_v35, %v15911_v27  ;;  %v18335_v39 = vld [vmem:[%s27690_s5 + $0x36c] sm:$0xf0]  ;;  %9191 = vmatpush.bf16.msra.mxu3 %v16028_v53  ;;  %v15976_v27 = vor.u32 %v18327_v28, %v15975_v59  ;;  %v15959_v35 = vld [vmem:[%s27690_s5 + $0x300] sm:$0xf]  ;;  %v15956_v53 = vor.u32 %v18318_v33, %v15953_v37  ;;  %v18342_v59 = vld [vmem:[%s27690_s5 + $0x3ac] sm:$0xf] }
 0x4db   :  { %v16008_v32 = vor.u32 %v18335_v39, %v16007_v49  ;;  %v15960_v46 = vor.u32 %v18323_v41, %v15959_v35  ;;  %v16080_v49 = vor.u32 %v18352_v52, %v16079_v0  ;;  %v16049_v28 = vld [vmem:[%s27690_s5 + $0x3b8] sm:$0xf0]  ;;  %v18336_v63 = vld [vmem:[%s27690_s5 + $0x374] sm:$0xf0]  ;;  %v15871_v37 = vld [vmem:[%s27690_s5 + $0x248] sm:$0xf] }
 0x4dc   :  { %9151 = vmatpush.bf16.msra.mxu0 %v15912_v15  ;;  %v16033_v35 = vld [vmem:[%s27690_s5 + $0x398] sm:$0xf0]  ;;  %v16016_v52 = vor.u32 %v18336_v63, %v16015_v25  ;;  %v18255_v63 = vld [vmem:[%s27690_s5 + $0xec] sm:$0xf0] }
 0x4dd   :  { %v8101_v30 = vpop.f32.mrf.mxu2  ;;  %v15889_v0 = vld [vmem:[%s27690_s5 + $0x278] sm:$0xf0] }
 0x4de   :  { %v18331_v30 = vld [vmem:[%s27690_s5 + $0x34c] sm:$0xf0]  ;;  %9192 = vmatpush.bf16.msra.mxu3 %v16012_v54  ;;  %v18346_v54 = vld [vmem:[%s27690_s5 + $0x3cc] sm:$0xf]  ;;  %v15892_v33 = vor.u32 %v18302_v22, %v15889_v0  ;;  %v16327_v22 = vld [vmem:[%s27690_s5 + $0x1e0] sm:$0xf] }
 0x4df   :  { %v8114_v17 = vpop.f32.mrf.mxu3  ;;  %v18287_v0 = vld [vmem:[%s27690_s5 + $0x1ec] sm:$0xf0] }
 0x4e0   :  { %v18297_v17 = vld [vmem:[%s27690_s5 + $0x244] sm:$0xf] }
 0x4e1   :  { %v15868_v8 = vor.u32 %v18297_v17, %v15865_v3  ;;  %v15919_v17 = vld [vmem:[%s27690_s5 + $0x2a8] sm:$0xf] }
 0x4e3   :  { %9180 = vmatpush.bf16.msra.mxu2 %v15868_v8 }
 0x4f5   :  { %v8151_v21 = vpop.f32.mrf.mxu2 }
 0x4f6   :  { %v8152_v9 = vadd.f32 %v8151_v21, %v25824_v62  ;;  %v18347_v62 = vld [vmem:[%s27690_s5 + $0x3cc] sm:$0xf0]  ;;  %v18329_v21 = vld [vmem:[%s27690_s5 + $0x344] sm:$0xf] }
 0x4f7   :  { %v8164_v51 = vpop.f32.mrf.mxu3  ;;  %v16056_v29 = vor.u32 %v18347_v62, %v16055_v56  ;;  %v18295_v56 = vld [vmem:[%s27690_s5 + $0x22c] sm:$0xf0] }
 0x4f8   :  { %v8165_v12 = vadd.f32 %v8164_v51, %v8152_v9  ;;  %v15993_v51 = vld [vmem:[%s27690_s5 + $0x350] sm:$0xf0]  ;;  %v15864_v9 = vor.u32 %v18299_v31, %v15863_v40  ;;  %v15848_v26 = vor.u32 %v18295_v56, %v15847_v4  ;;  %v15937_v40 = vld [vmem:[%s27690_s5 + $0x2d8] sm:$0xf0]  ;;  %v18310_v4 = vld [vmem:[%s27690_s5 + $0x2ac] sm:$0xf] }
 0x4f9   :  { %9163 = vmatpush.bf16.msra.mxu1 %v16056_v29  ;;  %v15996_v62 = vor.u32 %v18329_v21, %v15993_v51  ;;  %v15977_v29 = vld [vmem:[%s27690_s5 + $0x330] sm:$0xf0]  ;;  %v18312_v21 = vld [vmem:[%s27690_s5 + $0x2b4] sm:$0xf0]  ;;  %v16047_v51 = vld [vmem:[%s27690_s5 + $0x3a8] sm:$0xf] }
 0x4fa   :  { %v25954_v55 = vadd.f32 %v8165_v12, %v7650_v47  ;;  %v15896_v47 = vor.u32 %v18307_v7, %v15895_v20  ;;  %v15992_v12 = vor.u32 %v18331_v30, %v15991_v38  ;;  %v15940_v38 = vor.u32 %v18314_v34, %v15937_v40  ;;  %v16065_v30 = vld [vmem:[%s27690_s5 + $0x3d8] sm:$0xf0]  ;;  %v18326_v40 = vld [vmem:[%s27690_s5 + $0x32c] sm:$0xf] }
 0x4fb   :  { %9193 = vmatpush.bf16.msra.mxu3 %v15996_v62  ;;  %v16068_v3 = vor.u32 %v18346_v54, %v16065_v30  ;;  %v15921_v56 = vld [vmem:[%s27690_s5 + $0x2b8] sm:$0xf0] }
 0x4fc   :  { %9152 = vmatpush.bf16.msra.mxu0 %v15896_v47  ;;  %v15924_v62 = vor.u32 %v18310_v4, %v15921_v56  ;;  %v15857_v34 = vld [vmem:[%s27690_s5 + $0x238] sm:$0xf0]  ;;  %v18290_v56 = vld [vmem:[%s27690_s5 + $0x20c] sm:$0xf] }
 0x4fd   :  { %v8153_v45 = vpop.f32.mrf.mxu2  ;;  %9164 = vmatpush.bf16.msra.mxu1 %v16040_v10  ;;  %v15833_v10 = vld [vmem:[%s27690_s5 + $0x210] sm:$0xf0] }
 0x4fe   :  { %v15849_v45 = vld [vmem:[%s27690_s5 + $0x230] sm:$0xf0]  ;;  %v15836_v5 = vor.u32 %v18289_v19, %v15833_v10  ;;  %v18304_v10 = vld [vmem:[%s27690_s5 + $0x274] sm:$0xf0] }
 0x4ff   :  { %v8166_v1 = vpop.f32.mrf.mxu3  ;;  %v15852_v18 = vor.u32 %v18293_v13, %v15849_v45  ;;  %v15903_v13 = vld [vmem:[%s27690_s5 + $0x288] sm:$0xf]  ;;  %v18308_v45 = vld [vmem:[%s27690_s5 + $0x294] sm:$0xf0] }
 0x500   :  { %9153 = vmatpush.bf16.msra.mxu0 %v15880_v11  ;;  %v18325_v1 = vld [vmem:[%s27690_s5 + $0x324] sm:$0xf]  ;;  %v15936_v11 = vor.u32 %v18316_v44, %v15935_v60  ;;  %v15904_v6 = vor.u32 %v18308_v45, %v15903_v13  ;;  %v18296_v60 = vld [vmem:[%s27690_s5 + $0x234] sm:$0xf0]  ;;  %v15983_v44 = vld [vmem:[%s27690_s5 + $0x328] sm:$0xf] }
 0x501   :  { %9165 = vmatpush.bf16.msra.mxu1 %v16024_v57  ;;  %v15980_v15 = vor.u32 %v18325_v1, %v15977_v29  ;;  %9181 = vmatpush.bf16.msra.mxu2 %v15852_v18  ;;  %v16081_v57 = vld [vmem:[%s27690_s5 + $0x3f8] sm:$0xf0]  ;;  %v16052_v1 = vor.u32 %v18342_v59, %v16049_v28  ;;  %v16031_v29 = vld [vmem:[%s27690_s5 + $0x388] sm:$0xf]  ;;  %v18338_v18 = vld [vmem:[%s27690_s5 + $0x38c] sm:$0xf] }
 0x502   :  { %v16036_v23 = vor.u32 %v18338_v18, %v16033_v35  ;;  %v15841_v59 = vld [vmem:[%s27690_s5 + $0x218] sm:$0xf0]  ;;  %v18322_v13 = vld [vmem:[%s27690_s5 + $0x30c] sm:$0xf] }
 0x503   :  { %9194 = vmatpush.bf16.msra.mxu3 %v15980_v15  ;;  %v15887_v15 = vld [vmem:[%s27690_s5 + $0x268] sm:$0xf]  ;;  %v15969_v45 = vld [vmem:[%s27690_s5 + $0x318] sm:$0xf0] }
 0x504   :  { %9154 = vmatpush.bf16.msra.mxu0 %v15864_v9  ;;  %v18344_v9 = vld [vmem:[%s27690_s5 + $0x3b4] sm:$0xf0] }
 0x505   :  { %9166 = vmatpush.bf16.msra.mxu1 %v16008_v32  ;;  %9182 = vmatpush.bf16.msra.mxu2 %v15836_v5  ;;  %v18348_v32 = vld [vmem:[%s27690_s5 + $0x3d4] sm:$0xf0]  ;;  %v16048_v8 = vor.u32 %v18344_v9, %v16047_v51  ;;  %v15839_v9 = vld [vmem:[%s27690_s5 + $0x208] sm:$0xf] }
 0x507   :  { %9195 = vmatpush.bf16.msra.mxu3 %v15964_v58  ;;  %v15873_v58 = vld [vmem:[%s27690_s5 + $0x258] sm:$0xf0] }
 0x508   :  { %9155 = vmatpush.bf16.msra.mxu0 %v15848_v26  ;;  %v18340_v26 = vld [vmem:[%s27690_s5 + $0x394] sm:$0xf0] }
 0x509   :  { %9167 = vmatpush.bf16.msra.mxu1 %v15992_v12  ;;  %9227 = vmatpush.bf16.msrb.mxu2 %v15956_v53  ;;  %v15920_v12 = vor.u32 %v18312_v21, %v15919_v17  ;;  %v16032_v41 = vor.u32 %v18340_v26, %v16031_v29 }
 0x50c   :  { %9156 = vmatpush.bf16.msra.mxu0 %v15832_v43  ;;  %v15888_v43 = vor.u32 %v18304_v10, %v15887_v15 }
 0x50d   :  { %9168 = vmatpush.bf16.msra.mxu1 %v15976_v27  ;;  %9228 = vmatpush.bf16.msrb.mxu2 %v15940_v38  ;;  %v15905_v27 = vld [vmem:[%s27690_s5 + $0x298] sm:$0xf0] }
 0x50e   :  { %v15908_v19 = vor.u32 %v18306_v16, %v15905_v27  ;;  %v15972_v27 = vor.u32 %v18322_v13, %v15969_v45  ;;  %v16281_v13 = vld [vmem:[%s27690_s5 + $0x190] sm:$0xf0] }
 0x510   :  { %9201 = vmatpush.bf16.msrb.mxu0 %v15952_v14  ;;  %v18330_v14 = vld [vmem:[%s27690_s5 + $0x34c] sm:$0xf] }
 0x511   :  { %9169 = vmatpush.bf16.msra.mxu1 %v15960_v46  ;;  %9229 = vmatpush.bf16.msrb.mxu2 %v15924_v62  ;;  %v15999_v46 = vld [vmem:[%s27690_s5 + $0x348] sm:$0xf] }
 0x514   :  { %9202 = vmatpush.bf16.msrb.mxu0 %v15936_v11  ;;  %v18328_v11 = vld [vmem:[%s27690_s5 + $0x334] sm:$0xf0] }
 0x515   :  { %v8606_v20 = vpop.f32.mrf.mxu2  ;;  %9214 = vmatpush.bf16.msrb.mxu1 %v16080_v49  ;;  %9230 = vmatpush.bf16.msrb.mxu2 %v15908_v19  ;;  %v8677_v49 = vld [vmem:[%s27689_s4] sm:$0x3]  ;;  %v15984_v21 = vor.u32 %v18328_v11, %v15983_v44  ;;  %s11030_s4 = sshll.u32 %s18544_s22, 4  ;;  %s11031_s4 = int_to_ptr.vmem [resolvable:$true] %s11030_s4 }
 0x516   :  { %v8607_v47 = vadd.f32 %v8606_v20, %v25918_v42  ;;  %v16084_v42 = vor.u32 %v18350_v61, %v16081_v57  ;;  %v18334_v20 = vld [vmem:[%s27690_s5 + $0x36c] sm:$0xf]  ;;  %v18332_v61 = vld [vmem:[%s27690_s5 + $0x354] sm:$0xf0]  ;;  %v8679_v38 = vperm.slane %v8677_v49, 0  ;;  %v8680_v28 = vperm.slane %v8677_v49, 1 }
 0x517   :  { %v8619_v7 = vpop.f32.mrf.mxu3  ;;  %v18298_v57 = vld [vmem:[%s27690_s5 + $0x24c] sm:$0xf]  ;;  %v16311_v49 = vld [vmem:[%s27690_s5 + $0x1c0] sm:$0xf] }
 0x518   :  { %v8620_v24 = vadd.f32 %v8619_v7, %v8607_v47  ;;  %9240 = vmatpush.bf16.msrb.mxu3 %v16084_v42  ;;  %9203 = vmatpush.bf16.msrb.mxu0 %v15920_v12  ;;  %v16017_v7 = vld [vmem:[%s27690_s5 + $0x378] sm:$0xf0]  ;;  %v18300_v47 = vld [vmem:[%s27690_s5 + $0x254] sm:$0xf0]  ;;  %v16000_v42 = vor.u32 %v18332_v61, %v15999_v46  ;;  %v16328_v61 = vor.u32 %v18287_v0, %v16327_v22  ;;  %v16167_v11 = vld [vmem:[%s27690_s5 + $0xa0] sm:$0xf] }
 0x519   :  { %v16020_v5 = vor.u32 %v18334_v20, %v16017_v7  ;;  %v15872_v53 = vor.u32 %v18300_v47, %v15871_v37  ;;  %9231 = vmatpush.bf16.msrb.mxu2 %v15892_v33  ;;  %v18292_v12 = vld [vmem:[%s27690_s5 + $0x214] sm:$0xf0]  ;;  %v18253_v20 = vld [vmem:[%s27690_s5 + $0xe4] sm:$0xf]  ;;  %v16329_v37 = vld [vmem:[%s27690_s5 + $0x1f0] sm:$0xf0] }
 0x51a   :  { %v26150_v39 = vadd.f32 %v8620_v24, %v25927_v2  ;;  %v16063_v2 = vld [vmem:[%s27690_s5 + $0x3c8] sm:$0xf]  ;;  %v16001_v24 = vld [vmem:[%s27690_s5 + $0x358] sm:$0xf0]  ;;  %v15840_v29 = vor.u32 %v18292_v12, %v15839_v9  ;;  %v18285_v33 = vld [vmem:[%s27690_s5 + $0x1e4] sm:$0xf] }
 0x51b   :  { %v16064_v31 = vor.u32 %v18348_v32, %v16063_v2  ;;  %v16004_v2 = vor.u32 %v18330_v14, %v16001_v24  ;;  %v18294_v32 = vld [vmem:[%s27690_s5 + $0x22c] sm:$0xf]  ;;  %v16332_v24 = vor.u32 %v18285_v33, %v16329_v37  ;;  %v16151_v9 = vld [vmem:[%s27690_s5 + $0x80] sm:$0xf]  ;;  %v18243_v12 = vld [vmem:[%s27690_s5 + $0x8c] sm:$0xf0] }
 0x51c   :  { %9241 = vmatpush.bf16.msrb.mxu3 %v16068_v3  ;;  %9204 = vmatpush.bf16.msrb.mxu0 %v15904_v6  ;;  %v15860_v51 = vor.u32 %v18294_v32, %v15857_v34  ;;  %v15844_v6 = vor.u32 %v18290_v56, %v15841_v59  ;;  %v18247_v32 = vld [vmem:[%s27690_s5 + $0xac] sm:$0xf0]  ;;  %v18241_v59 = vld [vmem:[%s27690_s5 + $0x84] sm:$0xf]  ;;  %v16152_v45 = vor.u32 %v18243_v12, %v16151_v9  ;;  %v16247_v22 = vld [vmem:[%s27690_s5 + $0x140] sm:$0xf] }
 0x51d   :  { %v8608_v36 = vpop.f32.mrf.mxu2  ;;  %9215 = vmatpush.bf16.msrb.mxu1 %v16064_v31  ;;  %v15985_v31 = vld [vmem:[%s27690_s5 + $0x338] sm:$0xf0]  ;;  %v18275_v56 = vld [vmem:[%s27690_s5 + $0x18c] sm:$0xf0] }
 0x51e   :  { %v15876_v36 = vor.u32 %v18298_v57, %v15873_v58  ;;  %v15988_v4 = vor.u32 %v18326_v40, %v15985_v31  ;;  %v16183_v57 = vld [vmem:[%s27690_s5 + $0xc0] sm:$0xf]  ;;  %v18251_v58 = vld [vmem:[%s27690_s5 + $0xcc] sm:$0xf0] }
 0x51f   :  { %v8621_v50 = vpop.f32.mrf.mxu3  ;;  %v16184_v44 = vor.u32 %v18251_v58, %v16183_v57  ;;  %v16295_v31 = vld [vmem:[%s27690_s5 + $0x1a0] sm:$0xf]  ;;  %v18267_v0 = vld [vmem:[%s27690_s5 + $0x14c] sm:$0xf0] }
 0x520   :  { %9242 = vmatpush.bf16.msrb.mxu3 %v16052_v1  ;;  %9205 = vmatpush.bf16.msrb.mxu0 %v15888_v43  ;;  %v15855_v50 = vld [vmem:[%s27690_s5 + $0x228] sm:$0xf]  ;;  %v8683_v1 = vadd.f32 %v8679_v38, %v26150_v39  ;;  %v18279_v38 = vld [vmem:[%s27690_s5 + $0x1ac] sm:$0xf0]  ;;  %v16248_v37 = vor.u32 %v18267_v0, %v16247_v22 }
 0x521   :  { %9216 = vmatpush.bf16.msrb.mxu1 %v16048_v8  ;;  %v15856_v17 = vor.u32 %v18296_v60, %v15855_v50  ;;  %9232 = vmatpush.bf16.msrb.mxu2 %v15876_v36  ;;  %v15967_v8 = vld [vmem:[%s27690_s5 + $0x308] sm:$0xf]  ;;  %v16185_v36 = vld [vmem:[%s27690_s5 + $0xd0] sm:$0xf0]  ;;  %v18281_v50 = vld [vmem:[%s27690_s5 + $0x1c4] sm:$0xf] }
 0x522   :  { %v8685_v19 = vmax.f32 %v8683_v1, 0.0  ;;  %v16313_v60 = vld [vmem:[%s27690_s5 + $0x1d0] sm:$0xf0]  ;;  %v16303_v0 = vld [vmem:[%s27690_s5 + $0x1a8] sm:$0xf] }
 0x523   :  { %v16316_v40 = vor.u32 %v18281_v50, %v16313_v60  ;;  %v18227_v60 = vld [vmem:[%s27690_s5 + $0xc] sm:$0xf0] }
 0x524   :  { %9243 = vmatpush.bf16.msrb.mxu3 %v16036_v23  ;;  %9206 = vmatpush.bf16.msrb.mxu0 %v15872_v53  ;;  %v16199_v23 = vld [vmem:[%s27690_s5 + $0xe0] sm:$0xf]  ;;  %v18283_v53 = vld [vmem:[%s27690_s5 + $0x1cc] sm:$0xf0] }
 0x525   :  { %9217 = vmatpush.bf16.msrb.mxu1 %v16032_v41  ;;  %9233 = vmatpush.bf16.msrb.mxu2 %v15860_v51  ;;  %v16296_v51 = vor.u32 %v18279_v38, %v16295_v31  ;;  %v16089_v31 = vld [vmem:[%s27690_s5 + $0x10] sm:$0xf0]  ;;  %v18257_v38 = vld [vmem:[%s27690_s5 + $0x104] sm:$0xf] }
 0x528   :  { %9244 = vmatpush.bf16.msrb.mxu3 %v16020_v5  ;;  %9207 = vmatpush.bf16.msrb.mxu0 %v15856_v17  ;;  %v16200_v5 = vor.u32 %v18255_v63, %v16199_v23  ;;  %v18277_v17 = vld [vmem:[%s27690_s5 + $0x1a4] sm:$0xf] }
 0x529   :  { %9218 = vmatpush.bf16.msrb.mxu1 %v16016_v52  ;;  %9234 = vmatpush.bf16.msrb.mxu2 %v15844_v6  ;;  %v16201_v52 = vld [vmem:[%s27690_s5 + $0xf0] sm:$0xf0] }
 0x52a   :  { %v16204_v14 = vor.u32 %v18253_v20, %v16201_v52  ;;  %v18233_v20 = vld [vmem:[%s27690_s5 + $0x44] sm:$0xf]  ;;  %v16249_v52 = vld [vmem:[%s27690_s5 + $0x150] sm:$0xf0] }
 0x52c   :  { %9245 = vmatpush.bf16.msrb.mxu3 %v16004_v2  ;;  %9208 = vmatpush.bf16.msrb.mxu0 %v15840_v29  ;;  %v16312_v2 = vor.u32 %v18283_v53, %v16311_v49  ;;  %v16135_v29 = vld [vmem:[%s27690_s5 + $0x60] sm:$0xf]  ;;  %v18261_v49 = vld [vmem:[%s27690_s5 + $0x124] sm:$0xf]  ;;  %v16233_v53 = vld [vmem:[%s27690_s5 + $0x130] sm:$0xf0] }
 0x52d   :  { %9219 = vmatpush.bf16.msrb.mxu1 %v16000_v42  ;;  %v18249_v42 = vld [vmem:[%s27690_s5 + $0xc4] sm:$0xf] }
 0x52e   :  { %v16188_v34 = vor.u32 %v18249_v42, %v16185_v36  ;;  %v16087_v42 = vld [vmem:[%s27690_s5] sm:$0xf] }
 0x52f   :  { %v16088_v9 = vor.u32 %v18227_v60, %v16087_v42  ;;  %v16289_v42 = vld [vmem:[%s27690_s5 + $0x198] sm:$0xf0]  ;;  %v16143_v60 = vld [vmem:[%s27690_s5 + $0x68] sm:$0xf] }
 0x530   :  { %9246 = vmatpush.bf16.msrb.mxu3 %v15988_v4 }
 0x531   :  { %9220 = vmatpush.bf16.msrb.mxu1 %v15984_v21  ;;  %v16168_v21 = vor.u32 %v18247_v32, %v16167_v11 }
 0x534   :  { %9247 = vmatpush.bf16.msrb.mxu3 %v15972_v27  ;;  %v16263_v27 = vld [vmem:[%s27690_s5 + $0x160] sm:$0xf] }
 0x535   :  { %v8658_v54 = vpop.f32.mrf.mxu2 }
 0x536   :  { %v8659_v3 = vadd.f32 %v8658_v54, %v25924_v48  ;;  %v18324_v48 = vld [vmem:[%s27690_s5 + $0x314] sm:$0xf0]  ;;  %v18245_v54 = vld [vmem:[%s27690_s5 + $0xa4] sm:$0xf] }
 0x537   :  { %v8671_v30 = vpop.f32.mrf.mxu3  ;;  %v15968_v16 = vor.u32 %v18324_v48, %v15967_v8  ;;  %v16279_v48 = vld [vmem:[%s27690_s5 + $0x180] sm:$0xf] }
 0x538   :  { %v8672_v62 = vadd.f32 %v8671_v30, %v8659_v3  ;;  %v16169_v30 = vld [vmem:[%s27690_s5 + $0xb0] sm:$0xf0]  ;;  %v16280_v1 = vor.u32 %v18275_v56, %v16279_v48  ;;  %v16337_v48 = vld [vmem:[%s27690_s5 + $0x1f8] sm:$0xf0] }
 0x539   :  { %9221 = vmatpush.bf16.msrb.mxu1 %v15968_v16  ;;  %v16297_v3 = vld [vmem:[%s27690_s5 + $0x1b0] sm:$0xf0]  ;;  %v16172_v8 = vor.u32 %v18245_v54, %v16169_v30  ;;  %v16207_v30 = vld [vmem:[%s27690_s5 + $0xe8] sm:$0xf] }
 0x53a   :  { %v8676_v26 = vadd.f32 %v8672_v62, %v25954_v55  ;;  %v16300_v4 = vor.u32 %v18277_v17, %v16297_v3  ;;  %v16153_v62 = vld [vmem:[%s27690_s5 + $0x90] sm:$0xf0]  ;;  %v18256_v17 = vld [vmem:[%s27690_s5 + $0xf4] sm:$0xf0]  ;;  %v16335_v3 = vld [vmem:[%s27690_s5 + $0x1e8] sm:$0xf] }
 0x53b   :  { %v16156_v16 = vor.u32 %v18241_v59, %v16153_v62  ;;  %v16217_v54 = vld [vmem:[%s27690_s5 + $0x110] sm:$0xf0] }
 0x53c   :  { %v8684_v18 = vadd.f32 %v8680_v28, %v8676_v26  ;;  %v18273_v28 = vld [vmem:[%s27690_s5 + $0x184] sm:$0xf]  ;;  %v18239_v26 = vld [vmem:[%s27690_s5 + $0x6c] sm:$0xf0]  ;;  %v16220_v59 = vor.u32 %v18257_v38, %v16217_v54  ;;  %v18270_v38 = vld [vmem:[%s27690_s5 + $0x16c] sm:$0xf] }
 0x53d   :  { %v8660_v35 = vpop.f32.mrf.mxu2  ;;  %v16284_v6 = vor.u32 %v18273_v28, %v16281_v13  ;;  %v16208_v28 = vor.u32 %v18256_v17, %v16207_v30  ;;  %v16273_v54 = vld [vmem:[%s27690_s5 + $0x178] sm:$0xf0] }
 0x53e   :  { %v8686_v15 = vmax.f32 %v8684_v18, 0.0  ;;  %v18271_v18 = vld [vmem:[%s27690_s5 + $0x16c] sm:$0xf0]  ;;  %v18237_v35 = vld [vmem:[%s27690_s5 + $0x64] sm:$0xf] }
 0x53f   :  { %v8673_v41 = vpop.f32.mrf.mxu3 }
 0x540   :  { %v8687_v39 = vpack.c.bf16 %v8686_v15, %v8685_v19  ;;  %v16137_v41 = vld [vmem:[%s27690_s5 + $0x70] sm:$0xf0]  ;;  %v18269_v19 = vld [vmem:[%s27690_s5 + $0x164] sm:$0xf] }
 0x541   :  { %v16265_v15 = vld [vmem:[%s27690_s5 + $0x170] sm:$0xf0]  ;;  %v16140_v23 = vor.u32 %v18237_v35, %v16137_v41  ;;  %v16193_v35 = vld [vmem:[%s27690_s5 + $0xd8] sm:$0xf0]  ;;  %v18282_v41 = vld [vmem:[%s27690_s5 + $0x1cc] sm:$0xf] }
 0x542   :  { %8688 = vst [vmem:[#allocation3] sm:$0xff] %v8687_v39  ;;  %v16136_v39 = vor.u32 %v18239_v26, %v16135_v29  ;;  %v16268_v63 = vor.u32 %v18269_v19, %v16265_v15  ;;  %v18252_v29 = vld [vmem:[%s27690_s5 + $0xd4] sm:$0xf0]  ;;  %v16321_v19 = vld [vmem:[%s27690_s5 + $0x1d8] sm:$0xf0] }
 0x543   :  { %v16324_v22 = vor.u32 %v18282_v41, %v16321_v19  ;;  %v16095_v41 = vld [vmem:[%s27690_s5 + $0x8] sm:$0xf] }
 0x549   :  { %v8754_v10 = vld [vmem:[#allocation3] sm:$0x22]  ;;  %v8689_v11 = vld [vmem:[#allocation3] sm:$0x11] }
 0x54a   :  { %v8821_v25 = vunpack.c.l.b16 %v8754_v10  ;;  %v8822_v55 = vunpack.c.h.b16 %v8754_v10  ;;  %v16264_v10 = vor.u32 %v18271_v18, %v16263_v27  ;;  %v9254_v62 = vunpack.c.l.b16 %v8689_v11  ;;  %v18284_v27 = vld [vmem:[%s27690_s5 + $0x1d4] sm:$0xf0]  ;;  %v18250_v18 = vld [vmem:[%s27690_s5 + $0xcc] sm:$0xf] }
 0x54c   :  { %v8823_v7 = vpack.c.b16 %v8821_v25, %v8821_v25  ;;  %v8824_v43 = vpack.c.b16 %v8822_v55, %v8822_v55  ;;  %v16119_v25 = vld [vmem:[%s27690_s5 + $0x40] sm:$0xf]  ;;  %v18235_v55 = vld [vmem:[%s27690_s5 + $0x4c] sm:$0xf0]  ;;  %v26578_v15 = vpack.c.b16 %v9254_v62, %v9254_v62 }
 0x54d   :  { %v16120_v33 = vor.u32 %v18235_v55, %v16119_v25  ;;  %v16175_v55 = vld [vmem:[%s27690_s5 + $0xa8] sm:$0xf] }
 0x54e   :  { %v26350_v47 = vrot.slane %v8823_v7, 1  ;;  %v26352_v46 = vrot.slane %v8824_v43, 1  ;;  %v16121_v7 = vld [vmem:[%s27690_s5 + $0x50] sm:$0xf0]  ;;  %v18265_v43 = vld [vmem:[%s27690_s5 + $0x144] sm:$0xf] }
 0x54f   :  { %v16124_v57 = vor.u32 %v18233_v20, %v16121_v7  ;;  %v16252_v58 = vor.u32 %v18265_v43, %v16249_v52  ;;  %v18280_v20 = vld [vmem:[%s27690_s5 + $0x1b4] sm:$0xf0]  ;;  %v18246_v7 = vld [vmem:[%s27690_s5 + $0xac] sm:$0xf]  ;;  %v16177_v43 = vld [vmem:[%s27690_s5 + $0xb8] sm:$0xf0] }
 0x550   :  { %9157 = vmatmul.bf16.vlgmr.msra.gmra.mxu0 %v26350_v47  ;;  %9170 = vmatmul.bf16.vlgmr.msra.gmra.mxu1 %v26352_v46  ;;  %v18278_v52 = vld [vmem:[%s27690_s5 + $0x1ac] sm:$0xf] }
 0x551   :  { %9183 = vmatmul.bf16.vlgmr.msra.gmra.mxu2 %v26350_v47  ;;  %9196 = vmatmul.bf16.vlgmr.msra.gmra.mxu3 %v26352_v46 }
 0x552   :  { %9580 = vmatpush.bf16.msra.mxu0 %v16200_v5  ;;  %9593 = vmatpush.bf16.msra.mxu1 %v16328_v61  ;;  %v16103_v5 = vld [vmem:[%s27690_s5 + $0x20] sm:$0xf]  ;;  %v18231_v61 = vld [vmem:[%s27690_s5 + $0x2c] sm:$0xf0] }
 0x553   :  { %9606 = vmatpush.bf16.msra.mxu2 %v16204_v14  ;;  %9619 = vmatpush.bf16.msra.mxu3 %v16332_v24  ;;  %v18229_v14 = vld [vmem:[%s27690_s5 + $0x24] sm:$0xf]  ;;  %v16105_v24 = vld [vmem:[%s27690_s5 + $0x30] sm:$0xf0]  ;;  %v16104_v36 = vor.u32 %v18231_v61, %v16103_v5  ;;  %v16304_v5 = vor.u32 %v18280_v20, %v16303_v0  ;;  %v16159_v61 = vld [vmem:[%s27690_s5 + $0x88] sm:$0xf] }
 0x554   :  { %v16108_v32 = vor.u32 %v18229_v14, %v16105_v24  ;;  %v18276_v14 = vld [vmem:[%s27690_s5 + $0x194] sm:$0xf0]  ;;  %v18242_v24 = vld [vmem:[%s27690_s5 + $0x8c] sm:$0xf]  ;;  %v16097_v20 = vld [vmem:[%s27690_s5 + $0x18] sm:$0xf0] }
 0x555   :  { %v18226_v0 = vld [vmem:[%s27690_s5 + $0xc] sm:$0xf] }
 0x556   :  { %9581 = vmatpush.bf16.msra.mxu0 %v16184_v44  ;;  %9594 = vmatpush.bf16.msra.mxu1 %v16312_v2  ;;  %v16215_v44 = vld [vmem:[%s27690_s5 + $0x100] sm:$0xf]  ;;  %v18259_v2 = vld [vmem:[%s27690_s5 + $0x10c] sm:$0xf0] }
 0x557   :  { %9607 = vmatpush.bf16.msra.mxu2 %v16188_v34  ;;  %9620 = vmatpush.bf16.msra.mxu3 %v16316_v40  ;;  %v16236_v34 = vor.u32 %v18261_v49, %v16233_v53  ;;  %v18225_v40 = vld [vmem:[%s27690_s5 + $0x4] sm:$0xf]  ;;  %v16216_v12 = vor.u32 %v18259_v2, %v16215_v44  ;;  %v16161_v49 = vld [vmem:[%s27690_s5 + $0x98] sm:$0xf0]  ;;  %v18274_v53 = vld [vmem:[%s27690_s5 + $0x18c] sm:$0xf] }
 0x558   :  { %v16092_v56 = vor.u32 %v18225_v40, %v16089_v31  ;;  %v18240_v44 = vld [vmem:[%s27690_s5 + $0x74] sm:$0xf0]  ;;  %v16164_v2 = vor.u32 %v18242_v24, %v16161_v49  ;;  %v18238_v40 = vld [vmem:[%s27690_s5 + $0x6c] sm:$0xf]  ;;  %v16145_v31 = vld [vmem:[%s27690_s5 + $0x78] sm:$0xf0]  ;;  %v16100_v24 = vor.u32 %v18226_v0, %v16097_v20 }
 0x559   :  { %v16144_v30 = vor.u32 %v18240_v44, %v16143_v60 }
 0x55a   :  { %9582 = vmatpush.bf16.msra.mxu0 %v16168_v21  ;;  %9595 = vmatpush.bf16.msra.mxu1 %v16296_v51  ;;  %v18288_v21 = vld [vmem:[%s27690_s5 + $0x1f4] sm:$0xf0]  ;;  %v18254_v51 = vld [vmem:[%s27690_s5 + $0xec] sm:$0xf] }
 0x55b   :  { %9608 = vmatpush.bf16.msra.mxu2 %v16172_v8  ;;  %9621 = vmatpush.bf16.msra.mxu3 %v16300_v4  ;;  %v16209_v8 = vld [vmem:[%s27690_s5 + $0xf8] sm:$0xf0]  ;;  %v18286_v4 = vld [vmem:[%s27690_s5 + $0x1ec] sm:$0xf]  ;;  %v16336_v13 = vor.u32 %v18288_v21, %v16335_v3  ;;  %v16127_v3 = vld [vmem:[%s27690_s5 + $0x48] sm:$0xf] }
 0x55c   :  { %v16212_v26 = vor.u32 %v18254_v51, %v16209_v8  ;;  %v18236_v21 = vld [vmem:[%s27690_s5 + $0x54] sm:$0xf0]  ;;  %v16148_v51 = vor.u32 %v18238_v40, %v16145_v31  ;;  %v18409_v40 = vld [vmem:[%s27690_s5 + $0x5c4] sm:$0xf]  ;;  %v16633_v31 = vld [vmem:[%s27690_s5 + $0x5d0] sm:$0xf0] }
 0x55d   :  { %v18268_v8 = vld [vmem:[%s27690_s5 + $0x154] sm:$0xf0]  ;;  %v16128_v62 = vor.u32 %v18236_v21, %v16127_v3  ;;  %v16636_v21 = vor.u32 %v18409_v40, %v16633_v31 }
 0x55e   :  { %9583 = vmatpush.bf16.msra.mxu0 %v16152_v45  ;;  %9596 = vmatpush.bf16.msra.mxu1 %v16280_v1  ;;  %v9255_v45 = vunpack.c.h.b16 %v8689_v11  ;;  %v16191_v1 = vld [vmem:[%s27690_s5 + $0xc8] sm:$0xf]  ;;  %v16292_v11 = vor.u32 %v18274_v53, %v16289_v42 }
 0x55f   :  { %9609 = vmatpush.bf16.msra.mxu2 %v16156_v16  ;;  %9622 = vmatpush.bf16.msra.mxu3 %v16284_v6  ;;  %v16340_v16 = vor.u32 %v18286_v4, %v16337_v48  ;;  %v16319_v6 = vld [vmem:[%s27690_s5 + $0x1c8] sm:$0xf]  ;;  %v18234_v4 = vld [vmem:[%s27690_s5 + $0x4c] sm:$0xf]  ;;  %v16129_v48 = vld [vmem:[%s27690_s5 + $0x58] sm:$0xf0] }
 0x560   :  { %9209 = vmatmul.bf16.vlgmr.msrb.gmra.mxu0 %v26350_v47  ;;  %9222 = vmatmul.bf16.vlgmr.msrb.gmra.mxu1 %v26352_v46  ;;  %v16320_v25 = vor.u32 %v18284_v27, %v16319_v6  ;;  %v18230_v6 = vld [vmem:[%s27690_s5 + $0x2c] sm:$0xf]  ;;  %v16113_v27 = vld [vmem:[%s27690_s5 + $0x38] sm:$0xf0] }
 0x561   :  { %9235 = vmatmul.bf16.vlgmr.msrb.gmra.mxu2 %v26350_v47  ;;  %9248 = vmatmul.bf16.vlgmr.msrb.gmra.mxu3 %v26352_v46  ;;  %v16231_v47 = vld [vmem:[%s27690_s5 + $0x120] sm:$0xf]  ;;  %v18263_v46 = vld [vmem:[%s27690_s5 + $0x12c] sm:$0xf0] }
 0x562   :  { %9584 = vmatpush.bf16.msra.mxu0 %v16136_v39  ;;  %9597 = vmatpush.bf16.msra.mxu1 %v16264_v10  ;;  %v16232_v50 = vor.u32 %v18263_v46, %v16231_v47  ;;  %v26580_v39 = vpack.c.b16 %v9255_v45, %v9255_v45  ;;  %v16192_v10 = vor.u32 %v18252_v29, %v16191_v1  ;;  %v16287_v46 = vld [vmem:[%s27690_s5 + $0x188] sm:$0xf]  ;;  %v18232_v45 = vld [vmem:[%s27690_s5 + $0x34] sm:$0xf0] }
 0x563   :  { %9610 = vmatpush.bf16.msra.mxu2 %v16140_v23  ;;  %9623 = vmatpush.bf16.msra.mxu3 %v16268_v63  ;;  %v18248_v23 = vld [vmem:[%s27690_s5 + $0xb4] sm:$0xf0]  ;;  %v16196_v63 = vor.u32 %v18250_v18, %v16193_v35  ;;  %v16132_v1 = vor.u32 %v18234_v4, %v16129_v48  ;;  %v18262_v18 = vld [vmem:[%s27690_s5 + $0x12c] sm:$0xf]  ;;  %v16241_v35 = vld [vmem:[%s27690_s5 + $0x138] sm:$0xf0] }
 0x564   :  { %v18405_v4 = vld [vmem:[%s27690_s5 + $0x5a4] sm:$0xf]  ;;  %v16617_v48 = vld [vmem:[%s27690_s5 + $0x5b0] sm:$0xf0] }
 0x566   :  { %9585 = vmatpush.bf16.msra.mxu0 %v16120_v33  ;;  %9598 = vmatpush.bf16.msra.mxu1 %v16248_v37  ;;  %v16305_v33 = vld [vmem:[%s27690_s5 + $0x1b8] sm:$0xf0]  ;;  %v16176_v37 = vor.u32 %v18248_v23, %v16175_v55  ;;  %v16223_v55 = vld [vmem:[%s27690_s5 + $0x108] sm:$0xf]  ;;  %v18260_v23 = vld [vmem:[%s27690_s5 + $0x114] sm:$0xf0] }
 0x567   :  { %9611 = vmatpush.bf16.msra.mxu2 %v16124_v57  ;;  %9624 = vmatpush.bf16.msra.mxu3 %v16252_v58  ;;  %v18244_v57 = vld [vmem:[%s27690_s5 + $0x94] sm:$0xf0]  ;;  %v16180_v58 = vor.u32 %v18246_v7, %v16177_v43  ;;  %v16308_v47 = vor.u32 %v18278_v52, %v16305_v33  ;;  %v18258_v7 = vld [vmem:[%s27690_s5 + $0x10c] sm:$0xf]  ;;  %v16225_v43 = vld [vmem:[%s27690_s5 + $0x118] sm:$0xf0] }
 0x568   :  { %v16519_v52 = vld [vmem:[%s27690_s5 + $0x4e0] sm:$0xf]  ;;  %v18383_v33 = vld [vmem:[%s27690_s5 + $0x4ec] sm:$0xf0]  ;;  %v16228_v49 = vor.u32 %v18258_v7, %v16225_v43 }
 0x569   :  { %v16520_v53 = vor.u32 %v18383_v33, %v16519_v52  ;;  %v16439_v7 = vld [vmem:[%s27690_s5 + $0x440] sm:$0xf]  ;;  %v18363_v43 = vld [vmem:[%s27690_s5 + $0x44c] sm:$0xf0] }
 0x56a   :  { %9586 = vmatpush.bf16.msra.mxu0 %v16104_v36  ;;  %9599 = vmatpush.bf16.msra.mxu1 %v16232_v50  ;;  %v16160_v36 = vor.u32 %v18244_v57, %v16159_v61  ;;  %v16288_v50 = vor.u32 %v18276_v14, %v16287_v46  ;;  %v18381_v61 = vld [vmem:[%s27690_s5 + $0x4e4] sm:$0xf]  ;;  %v16649_v14 = vld [vmem:[%s27690_s5 + $0x5f0] sm:$0xf0] }
 0x56b   :  { %9612 = vmatpush.bf16.msra.mxu2 %v16108_v32  ;;  %9625 = vmatpush.bf16.msra.mxu3 %v16236_v34  ;;  %v16271_v32 = vld [vmem:[%s27690_s5 + $0x168] sm:$0xf]  ;;  %v18272_v34 = vld [vmem:[%s27690_s5 + $0x174] sm:$0xf0]  ;;  %v18413_v46 = vld [vmem:[%s27690_s5 + $0x5e4] sm:$0xf] }
 0x56c   :  { %v16272_v17 = vor.u32 %v18272_v34, %v16271_v32  ;;  %v16652_v44 = vor.u32 %v18413_v46, %v16649_v14  ;;  %v18377_v32 = vld [vmem:[%s27690_s5 + $0x4c4] sm:$0xf]  ;;  %v16505_v34 = vld [vmem:[%s27690_s5 + $0x4d0] sm:$0xf0]  ;;  %v16440_v46 = vor.u32 %v18363_v43, %v16439_v7 }
 0x56d   :  { %v16508_v3 = vor.u32 %v18377_v32, %v16505_v34  ;;  %v16407_v32 = vld [vmem:[%s27690_s5 + $0x400] sm:$0xf] }
 0x56e   :  { %9587 = vmatpush.bf16.msra.mxu0 %v16088_v9  ;;  %9600 = vmatpush.bf16.msra.mxu1 %v16216_v12  ;;  %v16276_v9 = vor.u32 %v18270_v38, %v16273_v54  ;;  %v16255_v12 = vld [vmem:[%s27690_s5 + $0x148] sm:$0xf]  ;;  %v9684_v34 = vld [vmem:[#allocation3] sm:$0x44] }
 0x56f   :  { %9613 = vmatpush.bf16.msra.mxu2 %v16092_v56  ;;  %9626 = vmatpush.bf16.msra.mxu3 %v16220_v59  ;;  %v18266_v56 = vld [vmem:[%s27690_s5 + $0x14c] sm:$0xf]  ;;  %v16257_v59 = vld [vmem:[%s27690_s5 + $0x158] sm:$0xf0] }
 0x570   :  { %v16260_v29 = vor.u32 %v18266_v56, %v16257_v59 }
 0x571   :  { %9588 = vmatmul.bf16.vlgmr.msra.gmra.mxu0 %v26578_v15  ;;  %9601 = vmatmul.bf16.vlgmr.msra.gmra.mxu1 %v26580_v39 }
 0x572   :  { %9632 = vmatpush.bf16.msrb.mxu0 %v16208_v28  ;;  %9645 = vmatpush.bf16.msrb.mxu1 %v16336_v13  ;;  %v16256_v28 = vor.u32 %v18268_v8, %v16255_v12  ;;  %v16111_v13 = vld [vmem:[%s27690_s5 + $0x28] sm:$0xf]  ;;  %v18373_v12 = vld [vmem:[%s27690_s5 + $0x4a4] sm:$0xf]  ;;  %v16489_v8 = vld [vmem:[%s27690_s5 + $0x4b0] sm:$0xf0] }
 0x573   :  { %9658 = vmatpush.bf16.msrb.mxu2 %v16212_v26  ;;  %9671 = vmatpush.bf16.msrb.mxu3 %v16340_v16  ;;  %v16239_v26 = vld [vmem:[%s27690_s5 + $0x128] sm:$0xf]  ;;  %v18264_v16 = vld [vmem:[%s27690_s5 + $0x134] sm:$0xf0]  ;;  %v16112_v19 = vor.u32 %v18232_v45, %v16111_v13  ;;  %v16492_v13 = vor.u32 %v18373_v12, %v16489_v8  ;;  %v16620_v45 = vor.u32 %v18405_v4, %v16617_v48  ;;  %v16537_v12 = vld [vmem:[%s27690_s5 + $0x510] sm:$0xf0]  ;;  %v9751_v48 = vunpack.c.l.b16 %v9684_v34 }
 0x574   :  { %9614 = vmatmul.bf16.vlgmr.msra.gmra.mxu2 %v26578_v15  ;;  %9627 = vmatmul.bf16.vlgmr.msra.gmra.mxu3 %v26580_v39  ;;  %v16527_v8 = vld [vmem:[%s27690_s5 + $0x4e8] sm:$0xf]  ;;  %v18384_v4 = vld [vmem:[%s27690_s5 + $0x4f4] sm:$0xf0] }
 0x576   :  { %9633 = vmatpush.bf16.msrb.mxu0 %v16192_v10  ;;  %9646 = vmatpush.bf16.msrb.mxu1 %v16320_v25  ;;  %v16240_v10 = vor.u32 %v18264_v16, %v16239_v26  ;;  %v18228_v25 = vld [vmem:[%s27690_s5 + $0x14] sm:$0xf0]  ;;  %v18401_v26 = vld [vmem:[%s27690_s5 + $0x584] sm:$0xf]  ;;  %v16601_v16 = vld [vmem:[%s27690_s5 + $0x590] sm:$0xf0] }
 0x577   :  { %9659 = vmatpush.bf16.msrb.mxu2 %v16196_v63  ;;  %9672 = vmatpush.bf16.msrb.mxu3 %v16324_v22  ;;  %v16116_v63 = vor.u32 %v18230_v6, %v16113_v27  ;;  %v16244_v22 = vor.u32 %v18262_v18, %v16241_v35  ;;  %v16096_v57 = vor.u32 %v18228_v25, %v16095_v41  ;;  %v16455_v18 = vld [vmem:[%s27690_s5 + $0x460] sm:$0xf]  ;;  %v18367_v35 = vld [vmem:[%s27690_s5 + $0x46c] sm:$0xf0] }
 0x578   :  { %v18399_v25 = vld [vmem:[%s27690_s5 + $0x56c] sm:$0xf0]  ;;  %v16456_v0 = vor.u32 %v18367_v35, %v16455_v18  ;;  %v16511_v35 = vld [vmem:[%s27690_s5 + $0x4c8] sm:$0xf] }
 0x57a   :  { %9634 = vmatpush.bf16.msrb.mxu0 %v16176_v37  ;;  %9647 = vmatpush.bf16.msrb.mxu1 %v16304_v5  ;;  %v16647_v37 = vld [vmem:[%s27690_s5 + $0x5e0] sm:$0xf]  ;;  %v18415_v5 = vld [vmem:[%s27690_s5 + $0x5ec] sm:$0xf0] }
 0x57b   :  { %9660 = vmatpush.bf16.msrb.mxu2 %v16180_v58  ;;  %9673 = vmatpush.bf16.msrb.mxu3 %v16308_v47  ;;  %v16224_v58 = vor.u32 %v18260_v23, %v16223_v55  ;;  %v16521_v47 = vld [vmem:[%s27690_s5 + $0x4f0] sm:$0xf0]  ;;  %v16648_v42 = vor.u32 %v18415_v5, %v16647_v37  ;;  %v18365_v55 = vld [vmem:[%s27690_s5 + $0x464] sm:$0xf]  ;;  %v16567_v37 = vld [vmem:[%s27690_s5 + $0x540] sm:$0xf] }
 0x57c   :  { %v16524_v60 = vor.u32 %v18381_v61, %v16521_v47  ;;  %v16457_v23 = vld [vmem:[%s27690_s5 + $0x470] sm:$0xf0]  ;;  %v18395_v5 = vld [vmem:[%s27690_s5 + $0x54c] sm:$0xf0]  ;;  %v18361_v61 = vld [vmem:[%s27690_s5 + $0x444] sm:$0xf] }
 0x57d   :  { %v16460_v52 = vor.u32 %v18365_v55, %v16457_v23  ;;  %v16569_v47 = vld [vmem:[%s27690_s5 + $0x550] sm:$0xf0]  ;;  %v16568_v14 = vor.u32 %v18395_v5, %v16567_v37  ;;  %v18412_v55 = vld [vmem:[%s27690_s5 + $0x5d4] sm:$0xf0]  ;;  %v18378_v23 = vld [vmem:[%s27690_s5 + $0x4cc] sm:$0xf] }
 0x57e   :  { %9635 = vmatpush.bf16.msrb.mxu0 %v16160_v36  ;;  %9648 = vmatpush.bf16.msrb.mxu1 %v16288_v50  ;;  %v16503_v36 = vld [vmem:[%s27690_s5 + $0x4c0] sm:$0xf]  ;;  %v18379_v50 = vld [vmem:[%s27690_s5 + $0x4cc] sm:$0xf0]  ;;  %v18376_v37 = vld [vmem:[%s27690_s5 + $0x4b4] sm:$0xf0] }
 0x57f   :  { %9661 = vmatpush.bf16.msrb.mxu2 %v16164_v2  ;;  %9674 = vmatpush.bf16.msrb.mxu3 %v16292_v11  ;;  %v16631_v2 = vld [vmem:[%s27690_s5 + $0x5c0] sm:$0xf]  ;;  %v18411_v11 = vld [vmem:[%s27690_s5 + $0x5cc] sm:$0xf0]  ;;  %v16504_v38 = vor.u32 %v18379_v50, %v16503_v36 }
 0x580   :  { %v16632_v54 = vor.u32 %v18411_v11, %v16631_v2  ;;  %v16551_v36 = vld [vmem:[%s27690_s5 + $0x520] sm:$0xf]  ;;  %v18391_v50 = vld [vmem:[%s27690_s5 + $0x52c] sm:$0xf0]  ;;  %v18389_v2 = vld [vmem:[%s27690_s5 + $0x524] sm:$0xf] }
 0x581   :  { %v16553_v11 = vld [vmem:[%s27690_s5 + $0x530] sm:$0xf0]  ;;  %v16552_v31 = vor.u32 %v18391_v50, %v16551_v36  ;;  %v18372_v36 = vld [vmem:[%s27690_s5 + $0x494] sm:$0xf0] }
 0x582   :  { %9636 = vmatpush.bf16.msrb.mxu0 %v16144_v30  ;;  %9649 = vmatpush.bf16.msrb.mxu1 %v16272_v17  ;;  %v16487_v30 = vld [vmem:[%s27690_s5 + $0x4a0] sm:$0xf]  ;;  %v18375_v17 = vld [vmem:[%s27690_s5 + $0x4ac] sm:$0xf0] }
 0x583   :  { %9662 = vmatpush.bf16.msrb.mxu2 %v16148_v51  ;;  %9675 = vmatpush.bf16.msrb.mxu3 %v16276_v9  ;;  %v16615_v51 = vld [vmem:[%s27690_s5 + $0x5a0] sm:$0xf]  ;;  %v18407_v9 = vld [vmem:[%s27690_s5 + $0x5ac] sm:$0xf0]  ;;  %v16488_v56 = vor.u32 %v18375_v17, %v16487_v30 }
 0x584   :  { %v16616_v59 = vor.u32 %v18407_v9, %v16615_v51  ;;  %v18387_v30 = vld [vmem:[%s27690_s5 + $0x50c] sm:$0xf0]  ;;  %v16409_v51 = vld [vmem:[%s27690_s5 + $0x410] sm:$0xf0]  ;;  %v18385_v9 = vld [vmem:[%s27690_s5 + $0x504] sm:$0xf] }
 0x586   :  { %9637 = vmatpush.bf16.msrb.mxu0 %v16128_v62  ;;  %9650 = vmatpush.bf16.msrb.mxu1 %v16256_v28  ;;  %v16471_v62 = vld [vmem:[%s27690_s5 + $0x480] sm:$0xf]  ;;  %v18371_v28 = vld [vmem:[%s27690_s5 + $0x48c] sm:$0xf0] }
 0x587   :  { %9663 = vmatpush.bf16.msrb.mxu2 %v16132_v1  ;;  %9676 = vmatpush.bf16.msrb.mxu3 %v16260_v29  ;;  %v18369_v1 = vld [vmem:[%s27690_s5 + $0x484] sm:$0xf]  ;;  %v16473_v29 = vld [vmem:[%s27690_s5 + $0x490] sm:$0xf0]  ;;  %v16472_v6 = vor.u32 %v18371_v28, %v16471_v62  ;;  %v18416_v62 = vld [vmem:[%s27690_s5 + $0x5f4] sm:$0xf0] }
 0x588   :  { %v16476_v41 = vor.u32 %v18369_v1, %v16473_v29  ;;  %v18382_v28 = vld [vmem:[%s27690_s5 + $0x4ec] sm:$0xf]  ;;  %v16657_v1 = vld [vmem:[%s27690_s5 + $0x5f8] sm:$0xf0] }
 0x58a   :  { %9638 = vmatpush.bf16.msrb.mxu0 %v16112_v19  ;;  %9651 = vmatpush.bf16.msrb.mxu1 %v16240_v10  ;;  %v16604_v19 = vor.u32 %v18401_v26, %v16601_v16  ;;  %v16583_v10 = vld [vmem:[%s27690_s5 + $0x560] sm:$0xf]  ;;  %v16540_v26 = vor.u32 %v18385_v9, %v16537_v12  ;;  %v16528_v16 = vor.u32 %v18384_v4, %v16527_v8  ;;  %v18366_v9 = vld [vmem:[%s27690_s5 + $0x46c] sm:$0xf]  ;;  %v16465_v12 = vld [vmem:[%s27690_s5 + $0x478] sm:$0xf0] }
 0x58b   :  { %9664 = vmatpush.bf16.msrb.mxu2 %v16116_v63  ;;  %9677 = vmatpush.bf16.msrb.mxu3 %v16244_v22  ;;  %v18397_v63 = vld [vmem:[%s27690_s5 + $0x564] sm:$0xf]  ;;  %v16585_v22 = vld [vmem:[%s27690_s5 + $0x570] sm:$0xf0]  ;;  %v16584_v20 = vor.u32 %v18399_v25, %v16583_v10  ;;  %v16639_v25 = vld [vmem:[%s27690_s5 + $0x5c8] sm:$0xf] }
 0x58c   :  { %v16588_v33 = vor.u32 %v18397_v63, %v16585_v22  ;;  %v16513_v63 = vld [vmem:[%s27690_s5 + $0x4d8] sm:$0xf0]  ;;  %v18410_v22 = vld [vmem:[%s27690_s5 + $0x5cc] sm:$0xf] }
 0x58d   :  { %v16516_v5 = vor.u32 %v18378_v23, %v16513_v63  ;;  %v18398_v8 = vld [vmem:[%s27690_s5 + $0x56c] sm:$0xf]  ;;  %v16593_v4 = vld [vmem:[%s27690_s5 + $0x578] sm:$0xf0] }
 0x58e   :  { %9639 = vmatpush.bf16.msrb.mxu0 %v16096_v57  ;;  %9652 = vmatpush.bf16.msrb.mxu1 %v16224_v58  ;;  %v16441_v57 = vld [vmem:[%s27690_s5 + $0x450] sm:$0xf0]  ;;  %v18393_v58 = vld [vmem:[%s27690_s5 + $0x544] sm:$0xf]  ;;  %v18390_v23 = vld [vmem:[%s27690_s5 + $0x52c] sm:$0xf] }
 0x58f   :  { %9665 = vmatpush.bf16.msrb.mxu2 %v16100_v24  ;;  %9678 = vmatpush.bf16.msrb.mxu3 %v16228_v49  ;;  %v16423_v24 = vld [vmem:[%s27690_s5 + $0x420] sm:$0xf]  ;;  %v18359_v49 = vld [vmem:[%s27690_s5 + $0x42c] sm:$0xf0]  ;;  %v16561_v63 = vld [vmem:[%s27690_s5 + $0x538] sm:$0xf0] }
 0x590   :  { %v16424_v40 = vor.u32 %v18359_v49, %v16423_v24  ;;  %v16625_v24 = vld [vmem:[%s27690_s5 + $0x5b8] sm:$0xf0] }
 0x591   :  { %9640 = vmatmul.bf16.vlgmr.msrb.gmra.mxu0 %v26578_v15  ;;  %9653 = vmatmul.bf16.vlgmr.msrb.gmra.mxu1 %v26580_v39 }
 0x592   :  { %10079 = vmatpush.bf16.msra.mxu0 %v16520_v53  ;;  %10092 = vmatpush.bf16.msra.mxu1 %v16648_v42  ;;  %v16444_v53 = vor.u32 %v18361_v61, %v16441_v57  ;;  %v16572_v42 = vor.u32 %v18393_v58, %v16569_v47  ;;  %v16623_v57 = vld [vmem:[%s27690_s5 + $0x5a8] sm:$0xf]  ;;  %v18408_v58 = vld [vmem:[%s27690_s5 + $0x5b4] sm:$0xf0]  ;;  %v18374_v47 = vld [vmem:[%s27690_s5 + $0x4ac] sm:$0xf] }
 0x593   :  { %10105 = vmatpush.bf16.msra.mxu2 %v16524_v60  ;;  %10118 = vmatpush.bf16.msra.mxu3 %v16652_v44  ;;  %v18357_v60 = vld [vmem:[%s27690_s5 + $0x424] sm:$0xf]  ;;  %v16425_v44 = vld [vmem:[%s27690_s5 + $0x430] sm:$0xf0] }
 0x594   :  { %9666 = vmatmul.bf16.vlgmr.msrb.gmra.mxu2 %v26578_v15  ;;  %9679 = vmatmul.bf16.vlgmr.msrb.gmra.mxu3 %v26580_v39  ;;  %v16599_v15 = vld [vmem:[%s27690_s5 + $0x580] sm:$0xf]  ;;  %v18403_v39 = vld [vmem:[%s27690_s5 + $0x58c] sm:$0xf0]  ;;  %v16428_v17 = vor.u32 %v18357_v60, %v16425_v44  ;;  %v16607_v44 = vld [vmem:[%s27690_s5 + $0x588] sm:$0xf] }
 0x595   :  { %v16600_v27 = vor.u32 %v18403_v39, %v16599_v15  ;;  %v16529_v15 = vld [vmem:[%s27690_s5 + $0x4f8] sm:$0xf0]  ;;  %v18414_v39 = vld [vmem:[%s27690_s5 + $0x5ec] sm:$0xf] }
 0x596   :  { %10080 = vmatpush.bf16.msra.mxu0 %v16504_v38  ;;  %10093 = vmatpush.bf16.msra.mxu1 %v16632_v54  ;;  %v18355_v38 = vld [vmem:[%s27690_s5 + $0x40c] sm:$0xf0]  ;;  %v16535_v54 = vld [vmem:[%s27690_s5 + $0x500] sm:$0xf]  ;;  %v16660_v10 = vor.u32 %v18414_v39, %v16657_v1  ;;  %v18362_v39 = vld [vmem:[%s27690_s5 + $0x44c] sm:$0xf] }
 0x597   :  { %10106 = vmatpush.bf16.msra.mxu2 %v16508_v3  ;;  %10119 = vmatpush.bf16.msra.mxu3 %v16636_v21  ;;  %v16556_v3 = vor.u32 %v18389_v2, %v16553_v11  ;;  %v18353_v21 = vld [vmem:[%s27690_s5 + $0x404] sm:$0xf]  ;;  %v18404_v2 = vld [vmem:[%s27690_s5 + $0x594] sm:$0xf0]  ;;  %v18370_v11 = vld [vmem:[%s27690_s5 + $0x48c] sm:$0xf] }
 0x598   :  { %v16412_v29 = vor.u32 %v18353_v21, %v16409_v51  ;;  %v16591_v21 = vld [vmem:[%s27690_s5 + $0x568] sm:$0xf]  ;;  %v18400_v51 = vld [vmem:[%s27690_s5 + $0x574] sm:$0xf0]  ;;  %v16449_v1 = vld [vmem:[%s27690_s5 + $0x458] sm:$0xf0] }
 0x59a   :  { %10081 = vmatpush.bf16.msra.mxu0 %v16488_v56  ;;  %10094 = vmatpush.bf16.msra.mxu1 %v16616_v59  ;;  %v9752_v56 = vunpack.c.h.b16 %v9684_v34  ;;  %v16655_v59 = vld [vmem:[%s27690_s5 + $0x5e8] sm:$0xf]  ;;  %v18402_v34 = vld [vmem:[%s27690_s5 + $0x58c] sm:$0xf] }
 0x59b   :  { %10107 = vmatpush.bf16.msra.mxu2 %v16492_v13  ;;  %10120 = vmatpush.bf16.msra.mxu3 %v16620_v45  ;;  %v16408_v13 = vor.u32 %v18355_v38, %v16407_v32  ;;  %v16536_v45 = vor.u32 %v18387_v30, %v16535_v54  ;;  %v16481_v32 = vld [vmem:[%s27690_s5 + $0x498] sm:$0xf0]  ;;  %v16608_v38 = vor.u32 %v18404_v2, %v16607_v44  ;;  %v16463_v54 = vld [vmem:[%s27690_s5 + $0x468] sm:$0xf]  ;;  %v18368_v30 = vld [vmem:[%s27690_s5 + $0x474] sm:$0xf0] }
 0x59c   :  { %v9754_v18 = vpack.c.b16 %v9752_v56, %v9752_v56  ;;  %v16592_v56 = vor.u32 %v18400_v51, %v16591_v21  ;;  %v18477_v44 = vld [vmem:[%s27690_s5 + $0x7e4] sm:$0xf]  ;;  %v16969_v2 = vld [vmem:[%s27690_s5 + $0x7f0] sm:$0xf0] }
 0x59d   :  { %v18441_v21 = vld [vmem:[%s27690_s5 + $0x6c4] sm:$0xf]  ;;  %v16825_v51 = vld [vmem:[%s27690_s5 + $0x6d0] sm:$0xf0] }
 0x59e   :  { %10082 = vmatpush.bf16.msra.mxu0 %v16472_v6  ;;  %10095 = vmatpush.bf16.msra.mxu1 %v16600_v27  ;;  %v16656_v6 = vor.u32 %v18416_v62, %v16655_v59  ;;  %v9753_v27 = vpack.c.b16 %v9751_v48, %v9751_v48  ;;  %v26976_v7 = vrot.slane %v9754_v18, 2  ;;  %v16464_v48 = vor.u32 %v18368_v30, %v16463_v54  ;;  %v16447_v59 = vld [vmem:[%s27690_s5 + $0x448] sm:$0xf]  ;;  %v18364_v62 = vld [vmem:[%s27690_s5 + $0x454] sm:$0xf0] }
 0x59f   :  { %10108 = vmatpush.bf16.msra.mxu2 %v16476_v41  ;;  %10121 = vmatpush.bf16.msra.mxu3 %v16604_v19  ;;  %v18380_v41 = vld [vmem:[%s27690_s5 + $0x4d4] sm:$0xf0]  ;;  %v16532_v19 = vor.u32 %v18382_v28, %v16529_v15  ;;  %v16468_v28 = vor.u32 %v18366_v9, %v16465_v12  ;;  %v16972_v30 = vor.u32 %v18477_v44, %v16969_v2  ;;  %v18473_v9 = vld [vmem:[%s27690_s5 + $0x7c4] sm:$0xf]  ;;  %v16953_v12 = vld [vmem:[%s27690_s5 + $0x7d0] sm:$0xf0] }
 0x5a0   :  { %v16512_v43 = vor.u32 %v18380_v41, %v16511_v35  ;;  %v18396_v15 = vld [vmem:[%s27690_s5 + $0x554] sm:$0xf0]  ;;  %v16452_v35 = vor.u32 %v18362_v39, %v16449_v1  ;;  %v18469_v39 = vld [vmem:[%s27690_s5 + $0x7a4] sm:$0xf]  ;;  %v16937_v1 = vld [vmem:[%s27690_s5 + $0x7b0] sm:$0xf0] }
 0x5a1   :  { %v18360_v18 = vld [vmem:[%s27690_s5 + $0x434] sm:$0xf0] }
 0x5a2   :  { %10083 = vmatpush.bf16.msra.mxu0 %v16456_v0  ;;  %10096 = vmatpush.bf16.msra.mxu1 %v16584_v20  ;;  %v16641_v0 = vld [vmem:[%s27690_s5 + $0x5d8] sm:$0xf0]  ;;  %v26974_v20 = vrot.slane %v9753_v27, 2  ;;  %v16431_v27 = vld [vmem:[%s27690_s5 + $0x428] sm:$0xf] }
 0x5a3   :  { %10109 = vmatpush.bf16.msra.mxu2 %v16460_v52  ;;  %10122 = vmatpush.bf16.msra.mxu3 %v16588_v33  ;;  %v16640_v52 = vor.u32 %v18412_v55, %v16639_v25  ;;  %v16495_v33 = vld [vmem:[%s27690_s5 + $0x4a8] sm:$0xf]  ;;  %v16644_v61 = vor.u32 %v18410_v22, %v16641_v0  ;;  %v18358_v25 = vld [vmem:[%s27690_s5 + $0x42c] sm:$0xf]  ;;  %v16433_v55 = vld [vmem:[%s27690_s5 + $0x438] sm:$0xf0]  ;;  %v16432_v0 = vor.u32 %v18360_v18, %v16431_v27 }
 0x5a4   :  { %v16496_v49 = vor.u32 %v18376_v37, %v16495_v33  ;;  %v16415_v22 = vld [vmem:[%s27690_s5 + $0x408] sm:$0xf]  ;;  %v18388_v37 = vld [vmem:[%s27690_s5 + $0x514] sm:$0xf0]  ;;  %v16791_v18 = vld [vmem:[%s27690_s5 + $0x680] sm:$0xf] }
 0x5a5   :  { %v16543_v33 = vld [vmem:[%s27690_s5 + $0x508] sm:$0xf] }
 0x5a6   :  { %10084 = vmatpush.bf16.msra.mxu0 %v16440_v46  ;;  %10097 = vmatpush.bf16.msra.mxu1 %v16568_v14  ;;  %v16497_v46 = vld [vmem:[%s27690_s5 + $0x4b8] sm:$0xf0]  ;;  %v18406_v14 = vld [vmem:[%s27690_s5 + $0x5ac] sm:$0xf] }
 0x5a7   :  { %10110 = vmatpush.bf16.msra.mxu2 %v16444_v53  ;;  %10123 = vmatpush.bf16.msra.mxu3 %v16572_v42  ;;  %v16624_v53 = vor.u32 %v18408_v58, %v16623_v57  ;;  %v16479_v42 = vld [vmem:[%s27690_s5 + $0x488] sm:$0xf]  ;;  %v16500_v50 = vor.u32 %v18374_v47, %v16497_v46  ;;  %v16628_v60 = vor.u32 %v18406_v14, %v16625_v24  ;;  %v18354_v57 = vld [vmem:[%s27690_s5 + $0x40c] sm:$0xf]  ;;  %v16417_v58 = vld [vmem:[%s27690_s5 + $0x418] sm:$0xf0] }
 0x5a8   :  { %v18386_v47 = vld [vmem:[%s27690_s5 + $0x50c] sm:$0xf]  ;;  %v16545_v46 = vld [vmem:[%s27690_s5 + $0x518] sm:$0xf0]  ;;  %v16839_v14 = vld [vmem:[%s27690_s5 + $0x6e0] sm:$0xf] }
 0x5a9   :  { %v18447_v24 = vld [vmem:[%s27690_s5 + $0x6ec] sm:$0xf0] }
 0x5aa   :  { %10085 = vmatpush.bf16.msra.mxu0 %v16424_v40  ;;  %10098 = vmatpush.bf16.msra.mxu1 %v16552_v31  ;;  %v16609_v40 = vld [vmem:[%s27690_s5 + $0x598] sm:$0xf0]  ;;  %v16480_v31 = vor.u32 %v18372_v36, %v16479_v42  ;;  %v18445_v42 = vld [vmem:[%s27690_s5 + $0x6e4] sm:$0xf] }
 0x5ab   :  { %10111 = vmatpush.bf16.msra.mxu2 %v16428_v17  ;;  %10124 = vmatpush.bf16.msra.mxu3 %v16556_v3  ;;  %v16484_v17 = vor.u32 %v18370_v11, %v16481_v32  ;;  %v16612_v3 = vor.u32 %v18402_v34, %v16609_v40  ;;  %v16420_v11 = vor.u32 %v18354_v57, %v16417_v58 }
 0x5ac   :  { %v16548_v32 = vor.u32 %v18386_v47, %v16545_v46  ;;  %v16840_v34 = vor.u32 %v18447_v24, %v16839_v14  ;;  %v16777_v47 = vld [vmem:[%s27690_s5 + $0x670] sm:$0xf0]  ;;  %v18461_v46 = vld [vmem:[%s27690_s5 + $0x764] sm:$0xf] }
 0x5ad   :  { %v16905_v14 = vld [vmem:[%s27690_s5 + $0x770] sm:$0xf0] }
 0x5ae   :  { %10086 = vmatpush.bf16.msra.mxu0 %v16408_v13  ;;  %10099 = vmatpush.bf16.msra.mxu1 %v16536_v45  ;;  %v16596_v13 = vor.u32 %v18398_v8, %v16593_v4  ;;  %v16575_v45 = vld [vmem:[%s27690_s5 + $0x548] sm:$0xf]  ;;  %v16908_v2 = vor.u32 %v18461_v46, %v16905_v14 }
 0x5af   :  { %10112 = vmatpush.bf16.msra.mxu2 %v16412_v29  ;;  %10125 = vmatpush.bf16.msra.mxu3 %v16540_v26  ;;  %v18394_v29 = vld [vmem:[%s27690_s5 + $0x54c] sm:$0xf]  ;;  %v16577_v26 = vld [vmem:[%s27690_s5 + $0x558] sm:$0xf0] }
 0x5b0   :  { %v16580_v41 = vor.u32 %v18394_v29, %v16577_v26 }
 0x5b1   :  { %10087 = vmatmul.bf16.vlgmr.msra.gmra.mxu0 %v26974_v20  ;;  %10100 = vmatmul.bf16.vlgmr.msra.gmra.mxu1 %v26976_v7 }
 0x5b2   :  { %10131 = vmatpush.bf16.msrb.mxu0 %v16528_v16  ;;  %10144 = vmatpush.bf16.msrb.mxu1 %v16656_v6  ;;  %v16448_v16 = vor.u32 %v18364_v62, %v16447_v59  ;;  %v16576_v6 = vor.u32 %v18396_v15, %v16575_v45  ;;  %v16828_v59 = vor.u32 %v18441_v21, %v16825_v51  ;;  %v18437_v45 = vld [vmem:[%s27690_s5 + $0x6a4] sm:$0xf]  ;;  %v16809_v15 = vld [vmem:[%s27690_s5 + $0x6b0] sm:$0xf0] }
 0x5b3   :  { %10157 = vmatpush.bf16.msrb.mxu2 %v16532_v19  ;;  %10170 = vmatpush.bf16.msrb.mxu3 %v16660_v10  ;;  %v16559_v19 = vld [vmem:[%s27690_s5 + $0x528] sm:$0xf]  ;;  %v18392_v10 = vld [vmem:[%s27690_s5 + $0x534] sm:$0xf0]  ;;  %v16956_v62 = vor.u32 %v18473_v9, %v16953_v12  ;;  %v16871_v9 = vld [vmem:[%s27690_s5 + $0x720] sm:$0xf] }
 0x5b4   :  { %10113 = vmatmul.bf16.vlgmr.msra.gmra.mxu2 %v26974_v20  ;;  %10126 = vmatmul.bf16.vlgmr.msra.gmra.mxu3 %v26976_v7  ;;  %v18455_v12 = vld [vmem:[%s27690_s5 + $0x72c] sm:$0xf0] }
 0x5b6   :  { %10132 = vmatpush.bf16.msrb.mxu0 %v16512_v43  ;;  %10145 = vmatpush.bf16.msrb.mxu1 %v16640_v52  ;;  %v16560_v43 = vor.u32 %v18392_v10, %v16559_v19  ;;  %v18356_v52 = vld [vmem:[%s27690_s5 + $0x414] sm:$0xf0]  ;;  %v18467_v19 = vld [vmem:[%s27690_s5 + $0x78c] sm:$0xf0]  ;;  %v18433_v10 = vld [vmem:[%s27690_s5 + $0x684] sm:$0xf] }
 0x5b7   :  { %10158 = vmatpush.bf16.msrb.mxu2 %v16516_v5  ;;  %10171 = vmatpush.bf16.msrb.mxu3 %v16644_v61  ;;  %v16436_v5 = vor.u32 %v18358_v25, %v16433_v55  ;;  %v16564_v61 = vor.u32 %v18390_v23, %v16561_v63  ;;  %v16416_v36 = vor.u32 %v18356_v52, %v16415_v22  ;;  %v16793_v25 = vld [vmem:[%s27690_s5 + $0x690] sm:$0xf0]  ;;  %v18465_v55 = vld [vmem:[%s27690_s5 + $0x784] sm:$0xf] }
 0x5b8   :  { %v16921_v23 = vld [vmem:[%s27690_s5 + $0x790] sm:$0xf0]  ;;  %v16796_v52 = vor.u32 %v18433_v10, %v16793_v25  ;;  %v16847_v10 = vld [vmem:[%s27690_s5 + $0x6e8] sm:$0xf]  ;;  %v18448_v25 = vld [vmem:[%s27690_s5 + $0x6f4] sm:$0xf0] }
 0x5ba   :  { %10133 = vmatpush.bf16.msrb.mxu0 %v16496_v49  ;;  %10146 = vmatpush.bf16.msrb.mxu1 %v16624_v53  ;;  %v16967_v49 = vld [vmem:[%s27690_s5 + $0x7e0] sm:$0xf]  ;;  %v18479_v53 = vld [vmem:[%s27690_s5 + $0x7ec] sm:$0xf0] }
 0x5bb   :  { %10159 = vmatpush.bf16.msrb.mxu2 %v16500_v50  ;;  %10172 = vmatpush.bf16.msrb.mxu3 %v16628_v60  ;;  %v16544_v50 = vor.u32 %v18388_v37, %v16543_v33  ;;  %v16841_v60 = vld [vmem:[%s27690_s5 + $0x6f0] sm:$0xf0]  ;;  %v16968_v40 = vor.u32 %v18479_v53, %v16967_v49  ;;  %v16924_v33 = vor.u32 %v18465_v55, %v16921_v23  ;;  %v16903_v37 = vld [vmem:[%s27690_s5 + $0x760] sm:$0xf] }
 0x5bc   :  { %v16844_v54 = vor.u32 %v18445_v42, %v16841_v60  ;;  %v18427_v60 = vld [vmem:[%s27690_s5 + $0x64c] sm:$0xf0] }
 0x5be   :  { %10134 = vmatpush.bf16.msrb.mxu0 %v16480_v31  ;;  %10147 = vmatpush.bf16.msrb.mxu1 %v16608_v38  ;;  %v16823_v31 = vld [vmem:[%s27690_s5 + $0x6c0] sm:$0xf]  ;;  %v18443_v38 = vld [vmem:[%s27690_s5 + $0x6cc] sm:$0xf0] }
 0x5bf   :  { %10160 = vmatpush.bf16.msrb.mxu2 %v16484_v17  ;;  %10173 = vmatpush.bf16.msrb.mxu3 %v16612_v3  ;;  %v16951_v17 = vld [vmem:[%s27690_s5 + $0x7c0] sm:$0xf]  ;;  %v18475_v3 = vld [vmem:[%s27690_s5 + $0x7cc] sm:$0xf0]  ;;  %v16824_v8 = vor.u32 %v18443_v38, %v16823_v31  ;;  %v18457_v31 = vld [vmem:[%s27690_s5 + $0x744] sm:$0xf] }
 0x5c0   :  { %v16952_v4 = vor.u32 %v18475_v3, %v16951_v17  ;;  %v16889_v38 = vld [vmem:[%s27690_s5 + $0x750] sm:$0xf0]  ;;  %v16743_v17 = vld [vmem:[%s27690_s5 + $0x620] sm:$0xf]  ;;  %v18423_v3 = vld [vmem:[%s27690_s5 + $0x62c] sm:$0xf0] }
 0x5c1   :  { %v16892_v51 = vor.u32 %v18457_v31, %v16889_v38  ;;  %v16833_v31 = vld [vmem:[%s27690_s5 + $0x6d8] sm:$0xf0]  ;;  %v18474_v38 = vld [vmem:[%s27690_s5 + $0x7cc] sm:$0xf] }
 0x5c2   :  { %10135 = vmatpush.bf16.msrb.mxu0 %v16464_v48  ;;  %10148 = vmatpush.bf16.msrb.mxu1 %v16592_v56  ;;  %v16807_v48 = vld [vmem:[%s27690_s5 + $0x6a0] sm:$0xf]  ;;  %v18439_v56 = vld [vmem:[%s27690_s5 + $0x6ac] sm:$0xf0] }
 0x5c3   :  { %10161 = vmatpush.bf16.msrb.mxu2 %v16468_v28  ;;  %10174 = vmatpush.bf16.msrb.mxu3 %v16596_v13  ;;  %v16935_v28 = vld [vmem:[%s27690_s5 + $0x7a0] sm:$0xf]  ;;  %v18471_v13 = vld [vmem:[%s27690_s5 + $0x7ac] sm:$0xf0] }
 0x5c6   :  { %10136 = vmatpush.bf16.msrb.mxu0 %v16448_v16  ;;  %10149 = vmatpush.bf16.msrb.mxu1 %v16576_v6  ;;  %v16808_v16 = vor.u32 %v18439_v56, %v16807_v48  ;;  %v16936_v6 = vor.u32 %v18471_v13, %v16935_v28  ;;  %v16745_v56 = vld [vmem:[%s27690_s5 + $0x630] sm:$0xf0] }
 0x5c7   :  { %10162 = vmatpush.bf16.msrb.mxu2 %v16452_v35  ;;  %10175 = vmatpush.bf16.msrb.mxu3 %v16580_v41  ;;  %v18435_v35 = vld [vmem:[%s27690_s5 + $0x68c] sm:$0xf0]  ;;  %v16919_v41 = vld [vmem:[%s27690_s5 + $0x780] sm:$0xf] }
 0x5c8   :  { %v16792_v63 = vor.u32 %v18435_v35, %v16791_v18  ;;  %v16920_v22 = vor.u32 %v18467_v19, %v16919_v41  ;;  %v18449_v41 = vld [vmem:[%s27690_s5 + $0x704] sm:$0xf]  ;;  %v16857_v19 = vld [vmem:[%s27690_s5 + $0x710] sm:$0xf0] }
 0x5ca   :  { %10137 = vmatpush.bf16.msrb.mxu0 %v16432_v0  ;;  %10150 = vmatpush.bf16.msrb.mxu1 %v16560_v43  ;;  %v16775_v0 = vld [vmem:[%s27690_s5 + $0x660] sm:$0xf]  ;;  %v18431_v43 = vld [vmem:[%s27690_s5 + $0x66c] sm:$0xf0] }
 0x5cb   :  { %10163 = vmatpush.bf16.msrb.mxu2 %v16436_v5  ;;  %10176 = vmatpush.bf16.msrb.mxu3 %v16564_v61  ;;  %v18463_v5 = vld [vmem:[%s27690_s5 + $0x76c] sm:$0xf0]  ;;  %v18429_v61 = vld [vmem:[%s27690_s5 + $0x664] sm:$0xf]  ;;  %v16776_v42 = vor.u32 %v18431_v43, %v16775_v0  ;;  %v18446_v0 = vld [vmem:[%s27690_s5 + $0x6ec] sm:$0xf] }
 0x5cc   :  { %v16780_v44 = vor.u32 %v18429_v61, %v16777_v47 }
 0x5cd   :  { %v9158_v29 = vpop.f32.mrf.mxu0  ;;  %v9171_v26 = vpop.f32.mrf.mxu1 }
 0x5ce   :  { %10138 = vmatpush.bf16.msrb.mxu0 %v16416_v36  ;;  %10151 = vmatpush.bf16.msrb.mxu1 %v16544_v50  ;;  %v27202_v27 = vadd.f32 %v9171_v26, %v9158_v29  ;;  %v16904_v36 = vor.u32 %v18463_v5, %v16903_v37  ;;  %v16759_v50 = vld [vmem:[%s27690_s5 + $0x640] sm:$0xf]  ;;  %v18419_v26 = vld [vmem:[%s27690_s5 + $0x60c] sm:$0xf0]  ;;  %v18478_v37 = vld [vmem:[%s27690_s5 + $0x7ec] sm:$0xf] }
 0x5cf   :  { %10164 = vmatpush.bf16.msrb.mxu2 %v16420_v11  ;;  %10177 = vmatpush.bf16.msrb.mxu3 %v16548_v32  ;;  %v16887_v11 = vld [vmem:[%s27690_s5 + $0x740] sm:$0xf]  ;;  %v18459_v32 = vld [vmem:[%s27690_s5 + $0x74c] sm:$0xf0]  ;;  %v16977_v5 = vld [vmem:[%s27690_s5 + $0x7f8] sm:$0xf0] }
 0x5d1   :  { %10139 = vmatmul.bf16.vlgmr.msrb.gmra.mxu0 %v26974_v20  ;;  %10152 = vmatmul.bf16.vlgmr.msrb.gmra.mxu1 %v26976_v7 }
 0x5d2   :  { %10582 = vmatpush.bf16.msra.mxu0 %v16840_v34  ;;  %10595 = vmatpush.bf16.msra.mxu1 %v16968_v40  ;;  %v18425_v34 = vld [vmem:[%s27690_s5 + $0x644] sm:$0xf]  ;;  %v16761_v40 = vld [vmem:[%s27690_s5 + $0x650] sm:$0xf0] }
 0x5d3   :  { %10608 = vmatpush.bf16.msra.mxu2 %v16844_v54  ;;  %10621 = vmatpush.bf16.msra.mxu3 %v16972_v30  ;;  %v16760_v54 = vor.u32 %v18427_v60, %v16759_v50  ;;  %v16888_v30 = vor.u32 %v18459_v32, %v16887_v11  ;;  %v16764_v21 = vor.u32 %v18425_v34, %v16761_v40  ;;  %v16959_v32 = vld [vmem:[%s27690_s5 + $0x7c8] sm:$0xf]  ;;  %v18476_v34 = vld [vmem:[%s27690_s5 + $0x7d4] sm:$0xf0]  ;;  %v18442_v40 = vld [vmem:[%s27690_s5 + $0x6cc] sm:$0xf] }
 0x5d4   :  { %10165 = vmatmul.bf16.vlgmr.msrb.gmra.mxu2 %v26974_v20  ;;  %10178 = vmatmul.bf16.vlgmr.msrb.gmra.mxu3 %v26976_v7  ;;  %v16812_v20 = vor.u32 %v18437_v45, %v16809_v15  ;;  %v16940_v7 = vor.u32 %v18469_v39, %v16937_v1  ;;  %v9184_v57 = vpop.f32.mrf.mxu2  ;;  %v9197_v58 = vpop.f32.mrf.mxu3  ;;  %v16727_v45 = vld [vmem:[%s27690_s5 + $0x600] sm:$0xf]  ;;  %v16744_v39 = vor.u32 %v18423_v3, %v16743_v17 }
 0x5d5   :  { %v27252_v24 = vadd.f32 %v9197_v58, %v9184_v57  ;;  %v9160_v49 = vpop.f32.mrf.mxu0  ;;  %v9173_v53 = vpop.f32.mrf.mxu1  ;;  %v10187_v15 = vld [vmem:[#allocation3] sm:$0x88]  ;;  %v16872_v1 = vor.u32 %v18455_v12, %v16871_v9  ;;  %v16728_v43 = vor.u32 %v18419_v26, %v16727_v45  ;;  %v16860_v57 = vor.u32 %v18449_v41, %v16857_v19  ;;  %v18440_v9 = vld [vmem:[%s27690_s5 + $0x6b4] sm:$0xf0]  ;;  %v18466_v41 = vld [vmem:[%s27690_s5 + $0x78c] sm:$0xf] }
 0x5d6   :  { %10583 = vmatpush.bf16.msra.mxu0 %v16824_v8  ;;  %10596 = vmatpush.bf16.msra.mxu1 %v16952_v4  ;;  %v18421_v8 = vld [vmem:[%s27690_s5 + $0x624] sm:$0xf]  ;;  %v10254_v55 = vunpack.c.l.b16 %v10187_v15  ;;  %v10255_v23 = vunpack.c.h.b16 %v10187_v15  ;;  %v16848_v58 = vor.u32 %v18448_v25, %v16847_v10  ;;  %v16980_v60 = vor.u32 %v18478_v37, %v16977_v5  ;;  %v18436_v26 = vld [vmem:[%s27690_s5 + $0x694] sm:$0xf0]  ;;  %v16929_v19 = vld [vmem:[%s27690_s5 + $0x798] sm:$0xf0] }
 0x5d7   :  { %10609 = vmatpush.bf16.msra.mxu2 %v16828_v59  ;;  %10622 = vmatpush.bf16.msra.mxu3 %v16956_v62  ;;  %v18453_v59 = vld [vmem:[%s27690_s5 + $0x724] sm:$0xf]  ;;  %v16873_v62 = vld [vmem:[%s27690_s5 + $0x730] sm:$0xf0]  ;;  %v16748_v18 = vor.u32 %v18421_v8, %v16745_v56  ;;  %v16836_v12 = vor.u32 %v18442_v40, %v16833_v31  ;;  %v18438_v56 = vld [vmem:[%s27690_s5 + $0x6ac] sm:$0xf] }
 0x5d8   :  { %v16876_v35 = vor.u32 %v18453_v59, %v16873_v62  ;;  %v10256_v49 = vpack.c.b16 %v10254_v55, %v10254_v55  ;;  %v10257_v53 = vpack.c.b16 %v10255_v23, %v10255_v23  ;;  %v16817_v59 = vld [vmem:[%s27690_s5 + $0x6b8] sm:$0xf0]  ;;  %v18470_v62 = vld [vmem:[%s27690_s5 + $0x7ac] sm:$0xf] }
 0x5d9   :  { %v18430_v37 = vld [vmem:[%s27690_s5 + $0x66c] sm:$0xf]  ;;  %v16897_v40 = vld [vmem:[%s27690_s5 + $0x758] sm:$0xf0] }
 0x5da   :  { %10584 = vmatpush.bf16.msra.mxu0 %v16808_v16  ;;  %10597 = vmatpush.bf16.msra.mxu1 %v16936_v6  ;;  %v16855_v16 = vld [vmem:[%s27690_s5 + $0x700] sm:$0xf]  ;;  %v18451_v6 = vld [vmem:[%s27690_s5 + $0x70c] sm:$0xf0]  ;;  %v27380_v17 = vrot.slane %v10257_v53, 3 }
 0x5db   :  { %10610 = vmatpush.bf16.msra.mxu2 %v16812_v20  ;;  %10623 = vmatpush.bf16.msra.mxu3 %v16940_v7  ;;  %v18417_v20 = vld [vmem:[%s27690_s5 + $0x604] sm:$0xf]  ;;  %v16729_v7 = vld [vmem:[%s27690_s5 + $0x610] sm:$0xf0] }
 0x5dc   :  { %v9186_v4 = vpop.f32.mrf.mxu2  ;;  %v9199_v48 = vpop.f32.mrf.mxu3  ;;  %v16732_v61 = vor.u32 %v18417_v20, %v16729_v7  ;;  %v18434_v20 = vld [vmem:[%s27690_s5 + $0x68c] sm:$0xf]  ;;  %v16801_v7 = vld [vmem:[%s27690_s5 + $0x698] sm:$0xf0] }
 0x5dd   :  { %v9210_v28 = vpop.f32.mrf.mxu0  ;;  %v9223_v13 = vpop.f32.mrf.mxu1  ;;  %v16943_v4 = vld [vmem:[%s27690_s5 + $0x7a8] sm:$0xf]  ;;  %v18472_v48 = vld [vmem:[%s27690_s5 + $0x7b4] sm:$0xf0] }
 0x5de   :  { %10585 = vmatpush.bf16.msra.mxu0 %v16792_v63  ;;  %10598 = vmatpush.bf16.msra.mxu1 %v16920_v22  ;;  %v27305_v29 = vadd.f32 %v9223_v13, %v9210_v28  ;;  %v16975_v63 = vld [vmem:[%s27690_s5 + $0x7e8] sm:$0xf]  ;;  %v18480_v22 = vld [vmem:[%s27690_s5 + $0x7f4] sm:$0xf0]  ;;  %v16945_v28 = vld [vmem:[%s27690_s5 + $0x7b8] sm:$0xf0]  ;;  %v16944_v45 = vor.u32 %v18472_v48, %v16943_v4 }
 0x5df   :  { %10611 = vmatpush.bf16.msra.mxu2 %v16796_v52  ;;  %10624 = vmatpush.bf16.msra.mxu3 %v16924_v33  ;;  %v16856_v52 = vor.u32 %v18451_v6, %v16855_v16  ;;  %v16849_v33 = vld [vmem:[%s27690_s5 + $0x6f8] sm:$0xf0]  ;;  %v16976_v47 = vor.u32 %v18480_v22, %v16975_v63  ;;  %v16820_v16 = vor.u32 %v18438_v56, %v16817_v59  ;;  %v16783_v22 = vld [vmem:[%s27690_s5 + $0x668] sm:$0xf]  ;;  %v18456_v48 = vld [vmem:[%s27690_s5 + $0x734] sm:$0xf0] }
 0x5e0   :  { %v16852_v50 = vor.u32 %v18446_v0, %v16849_v33  ;;  %v16948_v6 = vor.u32 %v18470_v62, %v16945_v28  ;;  %v18432_v0 = vld [vmem:[%s27690_s5 + $0x674] sm:$0xf0]  ;;  %v16911_v33 = vld [vmem:[%s27690_s5 + $0x768] sm:$0xf]  ;;  %v18422_v56 = vld [vmem:[%s27690_s5 + $0x62c] sm:$0xf] }
 0x5e1   :  { %v16879_v4 = vld [vmem:[%s27690_s5 + $0x728] sm:$0xf]  ;;  %v16753_v59 = vld [vmem:[%s27690_s5 + $0x638] sm:$0xf0]  ;;  %v18454_v62 = vld [vmem:[%s27690_s5 + $0x72c] sm:$0xf] }
 0x5e2   :  { %10586 = vmatpush.bf16.msra.mxu0 %v16776_v42  ;;  %10599 = vmatpush.bf16.msra.mxu1 %v16904_v36  ;;  %v16831_v42 = vld [vmem:[%s27690_s5 + $0x6c8] sm:$0xf]  ;;  %v18444_v36 = vld [vmem:[%s27690_s5 + $0x6d4] sm:$0xf0]  ;;  %v16881_v28 = vld [vmem:[%s27690_s5 + $0x738] sm:$0xf0] }
 0x5e3   :  { %10612 = vmatpush.bf16.msra.mxu2 %v16780_v44  ;;  %10625 = vmatpush.bf16.msra.mxu3 %v16908_v2  ;;  %v16832_v3 = vor.u32 %v18444_v36, %v16831_v42  ;;  %v16895_v36 = vld [vmem:[%s27690_s5 + $0x748] sm:$0xf] }
 0x5e4   :  { %v9236_v46 = vpop.f32.mrf.mxu2  ;;  %v9249_v14 = vpop.f32.mrf.mxu3 }
 0x5e5   :  { %v27358_v44 = vadd.f32 %v9249_v14, %v9236_v46  ;;  %v9212_v2 = vpop.f32.mrf.mxu0  ;;  %v9225_v11 = vpop.f32.mrf.mxu1  ;;  %v16767_v14 = vld [vmem:[%s27690_s5 + $0x648] sm:$0xf] }
 0x5e6   :  { %10587 = vmatpush.bf16.msra.mxu0 %v16760_v54  ;;  %10600 = vmatpush.bf16.msra.mxu1 %v16888_v30  ;;  %v16961_v54 = vld [vmem:[%s27690_s5 + $0x7d8] sm:$0xf0]  ;;  %v27378_v30 = vrot.slane %v10256_v49, 3  ;;  %v18428_v49 = vld [vmem:[%s27690_s5 + $0x654] sm:$0xf0] }
 0x5e7   :  { %10613 = vmatpush.bf16.msra.mxu2 %v16764_v21  ;;  %10626 = vmatpush.bf16.msra.mxu3 %v16892_v51  ;;  %v16960_v21 = vor.u32 %v18476_v34, %v16959_v32  ;;  %v16815_v51 = vld [vmem:[%s27690_s5 + $0x6a8] sm:$0xf]  ;;  %v16964_v8 = vor.u32 %v18474_v38, %v16961_v54  ;;  %v16769_v32 = vld [vmem:[%s27690_s5 + $0x658] sm:$0xf0]  ;;  %v18458_v34 = vld [vmem:[%s27690_s5 + $0x74c] sm:$0xf] }
 0x5e8   :  { %v16816_v13 = vor.u32 %v18440_v9, %v16815_v51  ;;  %v16751_v51 = vld [vmem:[%s27690_s5 + $0x628] sm:$0xf]  ;;  %v18424_v9 = vld [vmem:[%s27690_s5 + $0x634] sm:$0xf0] }
 0x5ea   :  { %10588 = vmatpush.bf16.msra.mxu0 %v16744_v39  ;;  %10601 = vmatpush.bf16.msra.mxu1 %v16872_v1  ;;  %v16799_v1 = vld [vmem:[%s27690_s5 + $0x688] sm:$0xf] }
 0x5eb   :  { %10614 = vmatpush.bf16.msra.mxu2 %v16748_v18  ;;  %10627 = vmatpush.bf16.msra.mxu3 %v16876_v35  ;;  %v16927_v18 = vld [vmem:[%s27690_s5 + $0x788] sm:$0xf]  ;;  %v18468_v35 = vld [vmem:[%s27690_s5 + $0x794] sm:$0xf0]  ;;  %v16800_v23 = vor.u32 %v18436_v26, %v16799_v1  ;;  %v16756_v1 = vor.u32 %v18422_v56, %v16753_v59  ;;  %v16884_v26 = vor.u32 %v18454_v62, %v16881_v28  ;;  %v18503_v62 = vld [vmem:[%s27692_s7 + $0xb0] sm:$0xff] }
 0x5ec   :  { %v9238_v15 = vpop.f32.mrf.mxu2  ;;  %v9251_v39 = vpop.f32.mrf.mxu3  ;;  %v16928_v63 = vor.u32 %v18468_v35, %v16927_v18  ;;  %v18418_v18 = vld [vmem:[%s27690_s5 + $0x60c] sm:$0xf]  ;;  %v18504_v56 = vld [vmem:[%s27692_s7 + $0xb8] sm:$0xff] }
 0x5ed   :  { %v16735_v15 = vld [vmem:[%s27690_s5 + $0x608] sm:$0xf]  ;;  %v18420_v39 = vld [vmem:[%s27690_s5 + $0x614] sm:$0xf0] }
 0x5ee   :  { %10589 = vmatpush.bf16.msra.mxu0 %v16728_v43  ;;  %10602 = vmatpush.bf16.msra.mxu1 %v16856_v52  ;;  %v9589_v10 = vpop.f32.mrf.mxu0  ;;  %v9602_v25 = vpop.f32.mrf.mxu1  ;;  %v16804_v43 = vor.u32 %v18434_v20, %v16801_v7  ;;  %v16932_v52 = vor.u32 %v18466_v41, %v16929_v19  ;;  %v16737_v7 = vld [vmem:[%s27690_s5 + $0x618] sm:$0xf0]  ;;  %v18450_v41 = vld [vmem:[%s27690_s5 + $0x70c] sm:$0xf] }
 0x5ef   :  { %10615 = vmatpush.bf16.msra.mxu2 %v16732_v61  ;;  %10628 = vmatpush.bf16.msra.mxu3 %v16860_v57  ;;  %v9590_v55 = vadd.f32 %v9589_v10, %v27202_v27  ;;  %v18464_v27 = vld [vmem:[%s27690_s5 + $0x774] sm:$0xf0]  ;;  %v16785_v61 = vld [vmem:[%s27690_s5 + $0x678] sm:$0xf0]  ;;  %v18462_v57 = vld [vmem:[%s27690_s5 + $0x76c] sm:$0xf]  ;;  %v16736_v10 = vor.u32 %v18420_v39, %v16735_v15 }
 0x5f0   :  { %v16912_v46 = vor.u32 %v18464_v27, %v16911_v33  ;;  %v16788_v53 = vor.u32 %v18430_v37, %v16785_v61  ;;  %v16865_v19 = vld [vmem:[%s27690_s5 + $0x718] sm:$0xf0]  ;;  %v18490_v59 = vld [vmem:[%s27692_s7 + $0x48] sm:$0xff]  ;;  %v18489_v15 = vld [vmem:[%s27692_s7 + $0x40] sm:$0xff] }
 0x5f1   :  { %10590 = vmatmul.bf16.vlgmr.msra.gmra.mxu0 %v27378_v30  ;;  %10603 = vmatmul.bf16.vlgmr.msra.gmra.mxu1 %v27380_v17  ;;  %v27450_v5 = vadd.f32 %v9602_v25, %v9590_v55  ;;  %v16740_v55 = vor.u32 %v18418_v18, %v16737_v7  ;;  %v18512_v28 = vld [vmem:[%s27692_s7 + $0xf8] sm:$0xff]  ;;  %v18511_v39 = vld [vmem:[%s27692_s7 + $0xf0] sm:$0xff] }
 0x5f2   :  { %10634 = vmatpush.bf16.msrb.mxu0 %v16848_v58  ;;  %10647 = vmatpush.bf16.msrb.mxu1 %v16976_v47  ;;  %v16913_v58 = vld [vmem:[%s27690_s5 + $0x778] sm:$0xf0]  ;;  %v16784_v47 = vor.u32 %v18432_v0, %v16783_v22 }
 0x5f3   :  { %10660 = vmatpush.bf16.msrb.mxu2 %v16852_v50  ;;  %10673 = vmatpush.bf16.msrb.mxu3 %v16980_v60  ;;  %v16916_v42 = vor.u32 %v18462_v57, %v16913_v58  ;;  %v18460_v50 = vld [vmem:[%s27690_s5 + $0x754] sm:$0xf0]  ;;  %v18426_v60 = vld [vmem:[%s27690_s5 + $0x64c] sm:$0xf] }
 0x5f4   :  { %10616 = vmatmul.bf16.vlgmr.msra.gmra.mxu2 %v27378_v30  ;;  %10629 = vmatmul.bf16.vlgmr.msra.gmra.mxu3 %v27380_v17  ;;  %v18500_v18 = vld [vmem:[%s27692_s7 + $0x98] sm:$0xff] }
 0x5f6   :  { %10635 = vmatpush.bf16.msrb.mxu0 %v16832_v3  ;;  %10648 = vmatpush.bf16.msrb.mxu1 %v16960_v21  ;;  %v9591_v38 = vpop.f32.mrf.mxu0  ;;  %v9604_v54 = vpop.f32.mrf.mxu1  ;;  %v16768_v3 = vor.u32 %v18428_v49, %v16767_v14  ;;  %v16896_v21 = vor.u32 %v18460_v50, %v16895_v36  ;;  %v18486_v36 = vld [vmem:[%s27692_s7 + $0x28] sm:$0xff] }
 0x5f7   :  { %10661 = vmatpush.bf16.msrb.mxu2 %v16836_v12  ;;  %10674 = vmatpush.bf16.msrb.mxu3 %v16964_v8  ;;  %v9615_v2 = vpop.f32.mrf.mxu2  ;;  %v9628_v11 = vpop.f32.mrf.mxu3  ;;  %v16772_v8 = vor.u32 %v18426_v60, %v16769_v32  ;;  %v18494_v32 = vld [vmem:[%s27692_s7 + $0x68] sm:$0xff]  ;;  %v18483_v54 = vld [vmem:[%s27692_s7 + $0x10] sm:$0xff] }
 0x5f8   :  { %v9616_v31 = vadd.f32 %v9615_v2, %v27252_v24  ;;  %v16900_v24 = vor.u32 %v18458_v34, %v16897_v40  ;;  %v18495_v2 = vld [vmem:[%s27692_s7 + $0x70] sm:$0xff]  ;;  %v18484_v34 = vld [vmem:[%s27692_s7 + $0x18] sm:$0xff]  ;;  %v18493_v40 = vld [vmem:[%s27692_s7 + $0x60] sm:$0xff] }
 0x5fa   :  { %10636 = vmatpush.bf16.msrb.mxu0 %v16816_v13  ;;  %10649 = vmatpush.bf16.msrb.mxu1 %v16944_v45  ;;  %v27492_v12 = vadd.f32 %v9628_v11, %v9616_v31  ;;  %v16752_v13 = vor.u32 %v18424_v9, %v16751_v51  ;;  %v16880_v45 = vor.u32 %v18456_v48, %v16879_v4  ;;  %v18485_v11 = vld [vmem:[%s27692_s7 + $0x20] sm:$0xff]  ;;  %v18482_v9 = vld [vmem:[%s27692_s7 + $0x8] sm:$0xff]  ;;  %v18491_v4 = vld [vmem:[%s27692_s7 + $0x50] sm:$0xff] }
 0x5fb   :  { %10662 = vmatpush.bf16.msrb.mxu2 %v16820_v16  ;;  %10675 = vmatpush.bf16.msrb.mxu3 %v16948_v6  ;;  %v16863_v16 = vld [vmem:[%s27690_s5 + $0x708] sm:$0xf]  ;;  %v18452_v6 = vld [vmem:[%s27690_s5 + $0x714] sm:$0xf0]  ;;  %v18481_v48 = vld [vmem:[%s27692_s7] sm:$0xff] }
 0x5fc   :  { %v16864_v25 = vor.u32 %v18452_v6, %v16863_v16  ;;  %v18501_v16 = vld [vmem:[%s27692_s7 + $0xa0] sm:$0xff] }
 0x5fd   :  { %v18509_v6 = vld [vmem:[%s27692_s7 + $0xe0] sm:$0xff] }
 0x5fe   :  { %10637 = vmatpush.bf16.msrb.mxu0 %v16800_v23  ;;  %10650 = vmatpush.bf16.msrb.mxu1 %v16928_v63  ;;  %v16868_v23 = vor.u32 %v18450_v41, %v16865_v19 }
 0x5ff   :  { %10663 = vmatpush.bf16.msrb.mxu2 %v16804_v43  ;;  %10676 = vmatpush.bf16.msrb.mxu3 %v16932_v52  ;;  %v9617_v35 = vpop.f32.mrf.mxu2  ;;  %v9630_v20 = vpop.f32.mrf.mxu3 }
 0x600   :  { %v27642_v20 = vld [vmem:[%s27691_s6] sm:$0xf] }
 0x602   :  { %10638 = vmatpush.bf16.msrb.mxu0 %v16784_v47  ;;  %10651 = vmatpush.bf16.msrb.mxu1 %v16912_v46 }
 0x603   :  { %10664 = vmatpush.bf16.msrb.mxu2 %v16788_v53  ;;  %10677 = vmatpush.bf16.msrb.mxu3 %v16916_v42  ;;  %v18487_v53 = vld [vmem:[%s27692_s7 + $0x30] sm:$0xff]  ;;  %v18496_v42 = vld [vmem:[%s27692_s7 + $0x78] sm:$0xff] }
 0x606   :  { %10639 = vmatpush.bf16.msrb.mxu0 %v16768_v3  ;;  %10652 = vmatpush.bf16.msrb.mxu1 %v16896_v21  ;;  %v18492_v3 = vld [vmem:[%s27692_s7 + $0x58] sm:$0xff] }
 0x607   :  { %10665 = vmatpush.bf16.msrb.mxu2 %v16772_v8  ;;  %10678 = vmatpush.bf16.msrb.mxu3 %v16900_v24 }
 0x60a   :  { %10640 = vmatpush.bf16.msrb.mxu0 %v16752_v13  ;;  %10653 = vmatpush.bf16.msrb.mxu1 %v16880_v45 }
 0x60b   :  { %10666 = vmatpush.bf16.msrb.mxu2 %v16756_v1  ;;  %10679 = vmatpush.bf16.msrb.mxu3 %v16884_v26  ;;  %v18502_v1 = vld [vmem:[%s27692_s7 + $0xa8] sm:$0xff] }
 0x60c   :  { %v18510_v26 = vld [vmem:[%s27692_s7 + $0xe8] sm:$0xff] }
 0x60e   :  { %10641 = vmatpush.bf16.msrb.mxu0 %v16736_v10  ;;  %10654 = vmatpush.bf16.msrb.mxu1 %v16864_v25  ;;  %v9641_v63 = vpop.f32.mrf.mxu0  ;;  %v9654_v22 = vpop.f32.mrf.mxu1  ;;  %v10692_v25 = vperm.slane %v27642_v20, 0 }
 0x60f   :  { %10667 = vmatpush.bf16.msrb.mxu2 %v16740_v55  ;;  %10680 = vmatpush.bf16.msrb.mxu3 %v16868_v23  ;;  %v9642_v0 = vadd.f32 %v9641_v63, %v27305_v29  ;;  %v18499_v55 = vld [vmem:[%s27692_s7 + $0x90] sm:$0xff] }
 0x611   :  { %10642 = vmatmul.bf16.vlgmr.msrb.gmra.mxu0 %v27378_v30  ;;  %10655 = vmatmul.bf16.vlgmr.msrb.gmra.mxu1 %v27380_v17  ;;  %v27541_v43 = vadd.f32 %v9654_v22, %v9642_v0  ;;  %v18508_v22 = vld [vmem:[%s27692_s7 + $0xd8] sm:$0xff] }
 0x612   :  { %10668 = vmatmul.bf16.vlgmr.msrb.gmra.mxu2 %v27378_v30  ;;  %10681 = vmatmul.bf16.vlgmr.msrb.gmra.mxu3 %v27380_v17 }
 0x613   :  { %10985 = vmatpush.bf16.msra.mxu1 %v18496_v42  ;;  %10998 = vmatpush.bf16.msra.mxu2 %v18504_v56 }
 0x614   :  { %11011 = vmatpush.bf16.msra.mxu3 %v18512_v28 }
 0x616   :  { %v9643_v37 = vpop.f32.mrf.mxu0  ;;  %v9656_v61 = vpop.f32.mrf.mxu1 }
 0x617   :  { %v9667_v52 = vpop.f32.mrf.mxu2  ;;  %v9680_v33 = vpop.f32.mrf.mxu3  ;;  %10986 = vmatpush.bf16.msra.mxu1 %v18495_v2  ;;  %10999 = vmatpush.bf16.msra.mxu2 %v18503_v62 }
 0x618   :  { %v9668_v27 = vadd.f32 %v9667_v52, %v27358_v44  ;;  %v18488_v44 = vld [vmem:[%s27692_s7 + $0x38] sm:$0xff]  ;;  %11012 = vmatpush.bf16.msra.mxu3 %v18511_v39 }
 0x619   :  { %10972 = vmatpush.bf16.msra.mxu0 %v18488_v44 }
 0x61a   :  { %v27544_v57 = vadd.f32 %v9680_v33, %v9668_v27 }
 0x61b   :  { %10987 = vmatpush.bf16.msra.mxu1 %v18494_v32  ;;  %11000 = vmatpush.bf16.msra.mxu2 %v18502_v1 }
 0x61c   :  { %11013 = vmatpush.bf16.msra.mxu3 %v18510_v26 }
 0x61d   :  { %10973 = vmatpush.bf16.msra.mxu0 %v18487_v53  ;;  %v18505_v53 = vld [vmem:[%s27692_s7 + $0xc0] sm:$0xff] }
 0x61f   :  { %v9669_v58 = vpop.f32.mrf.mxu2  ;;  %v9682_v47 = vpop.f32.mrf.mxu3  ;;  %10988 = vmatpush.bf16.msra.mxu1 %v18493_v40  ;;  %11001 = vmatpush.bf16.msra.mxu2 %v18501_v16  ;;  %v10694_v40 = vperm.slane %v27642_v20, 2 }
 0x620   :  { %11014 = vmatpush.bf16.msra.mxu3 %v18509_v6  ;;  %v10693_v58 = vperm.slane %v27642_v20, 1 }
 0x621   :  { %10974 = vmatpush.bf16.msra.mxu0 %v18486_v36 }
 0x623   :  { %10989 = vmatpush.bf16.msra.mxu1 %v18492_v3  ;;  %11002 = vmatpush.bf16.msra.mxu2 %v18500_v18 }
 0x624   :  { %11015 = vmatpush.bf16.msra.mxu3 %v18508_v22 }
 0x625   :  { %10975 = vmatpush.bf16.msra.mxu0 %v18485_v11 }
 0x627   :  { %10990 = vmatpush.bf16.msra.mxu1 %v18491_v4  ;;  %11003 = vmatpush.bf16.msra.mxu2 %v18499_v55 }
 0x629   :  { %10976 = vmatpush.bf16.msra.mxu0 %v18484_v34 }
 0x62b   :  { %10991 = vmatpush.bf16.msra.mxu1 %v18490_v59 }
 0x62d   :  { %10977 = vmatpush.bf16.msra.mxu0 %v18483_v54 }
 0x62e   :  { %v27546_v46 = vpop.f32.mrf.mxu0  ;;  %v27548_v30 = vpop.f32.mrf.mxu1 }
 0x62f   :  { %10992 = vmatpush.bf16.msra.mxu1 %v18489_v15  ;;  %v10102_v35 = vadd.f32 %v27548_v30, %v27546_v46  ;;  %v18507_v30 = vld [vmem:[%s27692_s7 + $0xd0] sm:$0xff] }
 0x630   :  { %11016 = vmatpush.bf16.msra.mxu3 %v18507_v30 }
 0x631   :  { %10978 = vmatpush.bf16.msra.mxu0 %v18482_v9  ;;  %v10183_v19 = vadd.f32 %v10102_v35, %v27450_v5  ;;  %v18498_v5 = vld [vmem:[%s27692_s7 + $0x88] sm:$0xff] }
 0x632   :  { %11004 = vmatpush.bf16.msra.mxu2 %v18498_v5 }
 0x635   :  { %10979 = vmatpush.bf16.msra.mxu0 %v18481_v48 }
 0x636   :  { %v10090_v29 = vpop.f32.mrf.mxu0  ;;  %v10103_v49 = vpop.f32.mrf.mxu1 }
 0x637   :  { %v27550_v17 = vpop.f32.mrf.mxu2  ;;  %v27552_v14 = vpop.f32.mrf.mxu3  ;;  %v18497_v29 = vld [vmem:[%s27692_s7 + $0x80] sm:$0xff] }
 0x638   :  { %v10128_v63 = vadd.f32 %v27552_v14, %v27550_v17  ;;  %11005 = vmatpush.bf16.msra.mxu2 %v18497_v29 }
 0x63a   :  { %v10184_v37 = vadd.f32 %v10128_v63, %v27492_v12  ;;  %v18506_v12 = vld [vmem:[%s27692_s7 + $0xc8] sm:$0xff] }
 0x63b   :  { %11017 = vmatpush.bf16.msra.mxu3 %v18506_v12 }
 0x63f   :  { %v10116_v50 = vpop.f32.mrf.mxu2  ;;  %v10129_v60 = vpop.f32.mrf.mxu3  ;;  %11018 = vmatpush.bf16.msra.mxu3 %v18505_v53 }
 0x64e   :  { %v27581_v31 = vpop.f32.mrf.mxu0  ;;  %v27583_v38 = vpop.f32.mrf.mxu1 }
 0x64f   :  { %v10154_v60 = vadd.f32 %v27583_v38, %v27581_v31  ;;  %v10695_v31 = vperm.slane %v27642_v20, 3 }
 0x651   :  { %v10185_v32 = vadd.f32 %v10154_v60, %v27541_v43 }
 0x656   :  { %v10142_v8 = vpop.f32.mrf.mxu0  ;;  %v10155_v24 = vpop.f32.mrf.mxu1 }
 0x657   :  { %v27591_v21 = vpop.f32.mrf.mxu2  ;;  %v27593_v51 = vpop.f32.mrf.mxu3 }
 0x658   :  { %v10180_v3 = vadd.f32 %v27593_v51, %v27591_v21 }
 0x65a   :  { %v10186_v48 = vadd.f32 %v10180_v3, %v27544_v57  ;;  %v18514_v57 = vld [vmem:[%s27693_s8] ss:$0 sm:$0xff] }
 0x65f   :  { %v10168_v13 = vpop.f32.mrf.mxu2  ;;  %v10181_v45 = vpop.f32.mrf.mxu3 }
 0x66e   :  { %v10591_v7 = vpop.f32.mrf.mxu0  ;;  %v10604_v41 = vpop.f32.mrf.mxu1 }
 0x66f   :  { %v10605_v10 = vadd.f32 %v10604_v41, %v10591_v7 }
 0x671   :  { %v10686_v23 = vadd.f32 %v10605_v10, %v10183_v19 }
 0x673   :  { %v10700_v0 = vadd.f32 %v10692_v25, %v10686_v23 }
 0x675   :  { %v10704_v52 = vmax.f32 %v10700_v0, 0.0 }
 0x676   :  { %v10593_v47 = vpop.f32.mrf.mxu0  ;;  %v10606_v46 = vpop.f32.mrf.mxu1 }
 0x677   :  { %v10617_v33 = vpop.f32.mrf.mxu2  ;;  %v10630_v27 = vpop.f32.mrf.mxu3  ;;  %v10708_v17 = vpack.c.bf16 %v10704_v52, %v10704_v52 }
 0x678   :  { %v10631_v61 = vadd.f32 %v10630_v27, %v10617_v33 }
 0x679   :  { %10980 = vmatmul.bf16.vlgmr.msra.gmra.mxu0 %v10708_v17 }
 0x67a   :  { %v10687_v14 = vadd.f32 %v10631_v61, %v10184_v37 }
 0x67c   :  { %v10701_v49 = vadd.f32 %v10693_v58, %v10687_v14 }
 0x67e   :  { %v10705_v44 = vmax.f32 %v10701_v49, 0.0 }
 0x67f   :  { %v10619_v42 = vpop.f32.mrf.mxu2  ;;  %v10632_v36 = vpop.f32.mrf.mxu3 }
 0x680   :  { %v10709_v50 = vpack.c.bf16 %v10705_v44, %v10705_v44 }
 0x682   :  { %10993 = vmatmul.bf16.vlgmr.msra.gmra.mxu1 %v10709_v50 }
 0x68e   :  { %v10643_v2 = vpop.f32.mrf.mxu0  ;;  %v10656_v11 = vpop.f32.mrf.mxu1 }
 0x68f   :  { %v10657_v34 = vadd.f32 %v10656_v11, %v10643_v2 }
 0x691   :  { %v10688_v54 = vadd.f32 %v10657_v34, %v10185_v32 }
 0x693   :  { %v10702_v9 = vadd.f32 %v10694_v40, %v10688_v54 }
 0x695   :  { %v10706_v8 = vmax.f32 %v10702_v9, 0.0  ;;  %v10669_v24 = vpop.f32.mrf.mxu2  ;;  %v10682_v4 = vpop.f32.mrf.mxu3 }
 0x696   :  { %v10683_v56 = vadd.f32 %v10682_v4, %v10669_v24  ;;  %v10645_v38 = vpop.f32.mrf.mxu0  ;;  %v10658_v59 = vpop.f32.mrf.mxu1 }
 0x697   :  { %v10710_v62 = vpack.c.bf16 %v10706_v8, %v10706_v8 }
 0x698   :  { %v10689_v43 = vadd.f32 %v10683_v56, %v10186_v48 }
 0x699   :  { %11006 = vmatmul.bf16.vlgmr.msra.gmra.mxu2 %v10710_v62 }
 0x69a   :  { %v10703_v28 = vadd.f32 %v10695_v31, %v10689_v43 }
 0x69c   :  { %v10707_v13 = vmax.f32 %v10703_v28, 0.0 }
 0x69d   :  { %v10671_v45 = vpop.f32.mrf.mxu2  ;;  %v10684_v15 = vpop.f32.mrf.mxu3 }
 0x69e   :  { %v10711_v39 = vpack.c.bf16 %v10707_v13, %v10707_v13 }
 0x6a0   :  { %11019 = vmatmul.bf16.vlgmr.msra.gmra.mxu3 %v10711_v39 }
 0x6f6   :  { %v10981_v21 = vpop.f32.mrf.mxu0 }
 0x6f7   :  { %v10982_v6 = vadd.f32 %v18514_v57, %v10981_v21 }
 0x6fe   :  { %v10983_v1 = vpop.f32.mrf.mxu0 }
 0x6ff   :  { %v10994_v51 = vpop.f32.mrf.mxu1 }
 0x700   :  { %v10995_v18 = vadd.f32 %v10994_v51, %v10982_v6 }
 0x707   :  { %v10996_v26 = vpop.f32.mrf.mxu1 }
 0x71c   :  { %v11007_v16 = vpop.f32.mrf.mxu2 }
 0x71d   :  { %v11008_v35 = vadd.f32 %v11007_v16, %v10995_v18 }
 0x723   :  { %v11020_v20 = vpop.f32.mrf.mxu3 }
 0x724   :  { %v11021_v7 = vadd.f32 %v11020_v20, %v11008_v35  ;;  %v11009_v41 = vpop.f32.mrf.mxu2 }
 0x726   :  { %11024 = vst [vmem:[#allocation4] sm:$0x3] %v11021_v7 }
 0x727   :  { %11035 = dma.vmem_to_hbm [thread:$0]  %s11031_s4, 32, %s11033_s24, [#allocation5]  }
 0x72b   :  { %v11022_v19 = vpop.f32.mrf.mxu3 }
 0x72c   :  { %18542 = dma.done.wait [#allocation5], 32  }
 0x72d   :  { %18543 = vsyncadd [#allocation5], 4294967264 }
 0x72e   :  { %11040 = vsyncpa [#allocation5], 1 }

</bundles_post_ra>
